<compile_context>
chip_gen: v7x
topology: tpu7x:2x2x1
jax: 0.10.0
libtpu: 0.0.40
codegen_flags: <defaults>
</compile_context>

<pallas_src>
import functools
import math

import numpy as np
import jax
import jax.numpy as jnp
from jax.experimental import pallas as pl
from jax.experimental.pallas import tpu as pltpu


# ----------------------------------------------------------------------------
# Small helpers
# ----------------------------------------------------------------------------
def _act(x, act):
    if act == "relu":
        return jnp.maximum(x, 0.0)
    if act == "sigmoid":
        return jax.nn.sigmoid(x)
    return x


def _largest_tile(n, target, align=8):
    """Largest divisor of n that is <= target and a multiple of `align`."""
    for t in range(min(target, n), 0, -1):
        if n % t == 0 and (t % align == 0 or t == n):
            return t
    return n


@functools.lru_cache(maxsize=None)
def _vmem_limit_bytes():
    # ~3/4 of physical VMEM: 96 MB on v5e/v6e (128 MiB), 48 MB on v7x (64 MiB).
    try:
        cap = pltpu.get_tpu_info().vmem_capacity_bytes
    except Exception:
        cap = 64 * 1024 * 1024
    return int(min(cap * 3 // 4, 100 * 1024 * 1024))


def _conv1d3(x, w_flat, b):
    """k=3, pad=1 conv over the time (first) axis: (T, Cin) -> (T, Cout) f32.

    w_flat is (3*Cin, Cout) with row index k*Cin + c (tap k=0 uses x[t-1]).
    Uses im2col channel-concat + one K=3*Cin matmul when Cin is lane aligned,
    otherwise three K=Cin matmuls (first layer, small feat_dim).
    """
    T, Cin = x.shape
    zero = jnp.zeros((1, Cin), x.dtype)
    xm = jnp.concatenate([zero, x[:T - 1]], axis=0)      # x[t-1]
    xp = jnp.concatenate([x[1:], zero], axis=0)          # x[t+1]
    if Cin % 128 == 0:
        xc = jnp.concatenate([xm, x, xp], axis=-1)       # (T, 3*Cin)
        acc = jnp.dot(xc, w_flat, preferred_element_type=jnp.float32)
    else:
        acc = jnp.dot(xm, w_flat[:Cin], preferred_element_type=jnp.float32)
        acc += jnp.dot(x, w_flat[Cin:2 * Cin], preferred_element_type=jnp.float32)
        acc += jnp.dot(xp, w_flat[2 * Cin:], preferred_element_type=jnp.float32)
    return acc + b


# ----------------------------------------------------------------------------
# Pallas kernels
# ----------------------------------------------------------------------------
def _head1d_kernel(x_ref, b1w_ref, b1b_ref, b2w_ref, b2b_ref,
                   s1w_ref, s1b_ref, e1w_ref, e1b_ref,
                   p1w_ref, p1b_ref, sew_ref, seb_ref,
                   p_out_ref, se_out_ref):
    """Fused 1D stage for one batch element.

    x_ref:  (1, T, feat_dim) bf16
    conv weights: (3*Cin, Cout) bf16 (im2col layout); biases (1, Cout) f32
    sew_ref: (2, H1, 128) bf16 — start head in column 0, end head in column 1
    p_out_ref:  (1, T, H1)  bf16 — x_1d_p features
    se_out_ref: (1, T, 128) f32  — lane-dense start/end slab (cols 0 and 1 used)
    """
    cdt = jnp.bfloat16
    x = x_ref[0]
    h = _act(_conv1d3(x, b1w_ref[...], b1b_ref[...]), "relu").astype(cdt)
    base = _act(_conv1d3(h, b2w_ref[...], b2b_ref[...]), "relu").astype(cdt)

    s = _act(_conv1d3(base, s1w_ref[...], s1b_ref[...]), "relu").astype(cdt)
    e = _act(_conv1d3(base, e1w_ref[...], e1b_ref[...]), "relu").astype(cdt)
    pf = _act(_conv1d3(base, p1w_ref[...], p1b_ref[...]), "relu")
    p_out_ref[0] = pf.astype(p_out_ref.dtype)

    head = (jnp.dot(s, sew_ref[0], preferred_element_type=jnp.float32)
            + jnp.dot(e, sew_ref[1], preferred_element_type=jnp.float32)
            + seb_ref[...])
    se_out_ref[0] = _act(head, "sigmoid").astype(se_out_ref.dtype)


def _matmul_bias_kernel(x_ref, w_ref, b_ref, o_ref, *, act):
    # x_ref: (mt, Cin) bf16; w_ref: (Cin, nt) bf16; b_ref: (1, nt) f32
    acc = jnp.dot(x_ref[...], w_ref[...], preferred_element_type=jnp.float32)
    acc += b_ref[...]
    o_ref[...] = _act(acc, act).astype(o_ref.dtype)


def _bm_q1_kernel(m_ref, z_ref, b3_ref, q1w_ref, q1b_ref, o_ref):
    """Boundary-matching matmul + Conv3d((N,1,1)) + ReLU, fused with the q1
    1x1 conv (512->128) + ReLU epilogue.

    m_ref:   (tt_tile, N*T) bf16 mask tile — column index t*N + n
    z_ref:   (1, N*T, Co)   bf16, Z[b, t*N+n, co] = pfeat[b,t] @ W3[:, n, co]
    b3_ref:  (1, Co) f32 Conv3d bias
    q1w_ref: (Co, H2) bf16; q1b_ref: (1, H2) f32
    o_ref:   (1, tt_tile, H2) bf16
    """
    acc = jnp.dot(m_ref[...], z_ref[0], preferred_element_type=jnp.float32)
    acc += b3_ref[...]
    h = jnp.maximum(acc, 0.0).astype(jnp.bfloat16)               # Conv3d + ReLU
    acc2 = jnp.dot(h, q1w_ref[...], preferred_element_type=jnp.float32)
    acc2 += q1b_ref[...]
    o_ref[0] = jnp.maximum(acc2, 0.0).astype(o_ref.dtype)        # q1 + ReLU


def _conv2d_k3_kernel(x_ref, w_ref, b_ref, *rest, rt, act, head_act):
    """3x3 pad=1 conv, channels-last, row-tiled with an in-kernel +/-1 row halo.
    Optionally fuses a trailing 1x1 head (matmul + bias + activation).

    x_ref: (1, T, T, Cin) bf16 — full map, resident across the row-tile axis
    w_ref: (3, 3*Cin, Cmid) bf16 — w[di, dj*Cin + c, co]
    b_ref: (1, Cmid) f32
    rest:  [hw_ref (Cmid, Cout) bf16, hb_ref (1, Cout) f32,] o_ref (1, rt, T, Cout)
    """
    if head_act is None:
        (o_ref,) = rest
        hw_ref = hb_ref = None
    else:
        hw_ref, hb_ref, o_ref = rest

    T = x_ref.shape[1]
    Cin = x_ref.shape[-1]
    Cmid = w_ref.shape[-1]
    Cout = o_ref.shape[-1]

    r = pl.program_id(1)
    nr = pl.num_programs(1)
    row0 = r * rt

    center = x_ref[0, pl.ds(row0, rt)]                            # (rt, T, Cin)
    prev = x_ref[0, pl.ds(jnp.maximum(row0 - 1, 0), 1)]           # (1, T, Cin)
    nxt = x_ref[0, pl.ds(jnp.minimum(row0 + rt, T - 1), 1)]       # (1, T, Cin)
    prev = jnp.where(r > 0, prev, jnp.zeros_like(prev))           # zero top halo
    nxt = jnp.where(r < nr - 1, nxt, jnp.zeros_like(nxt))         # zero bottom halo
    rows = jnp.concatenate([prev, center, nxt], axis=0)           # (rt+2, T, Cin)

    zc = jnp.zeros((rt + 2, 1, Cin), rows.dtype)
    xr = jnp.concatenate([zc, rows[:, :T - 1, :]], axis=1)        # x[i, j-1]
    xl = jnp.concatenate([rows[:, 1:, :], zc], axis=1)            # x[i, j+1]
    xc = jnp.concatenate([xr, rows, xl], axis=-1)                 # (rt+2, T, 3*Cin)

    acc = jnp.dot(xc[0:rt].reshape(rt * T, 3 * Cin), w_ref[0],
                  preferred_element_type=jnp.float32)             # row i-1
    acc += jnp.dot(xc[1:rt + 1].reshape(rt * T, 3 * Cin), w_ref[1],
                   preferred_element_type=jnp.float32)            # row i
    acc += jnp.dot(xc[2:rt + 2].reshape(rt * T, 3 * Cin), w_ref[2],
                   preferred_element_type=jnp.float32)            # row i+1
    acc += b_ref[...]
    h = _act(acc, act)                                            # (rt*T, Cmid)

    if head_act is None:
        o_ref[0] = h.reshape(rt, T, Cmid).astype(o_ref.dtype)
    else:
        acc2 = jnp.dot(h.astype(jnp.bfloat16), hw_ref[...],
                       preferred_element_type=jnp.float32)
        acc2 += hb_ref[...]
        o_ref[0] = _act(acc2, head_act).reshape(rt, T, Cout).astype(o_ref.dtype)


# ----------------------------------------------------------------------------
# pallas_call wrappers
# ----------------------------------------------------------------------------
def head1d_stack(x, p):
    # x: (B, T, feat_dim) bf16 -> (pfeat (B,T,H1) bf16, se (B,T,128) f32)
    # TODO(synk): if B grows, fold several batch elements per grid step to
    # amortize the ~0.35us/step pipeline overhead (low priority).
    B, T, Cf = x.shape
    H1 = p["b1_b"].shape[-1]
    w1, wh = 3 * Cf, 3 * H1
    return pl.pallas_call(
        _head1d_kernel,
        out_shape=(jax.ShapeDtypeStruct((B, T, H1), jnp.bfloat16),
                   jax.ShapeDtypeStruct((B, T, 128), jnp.float32)),
        grid=(B,),
        in_specs=[
            pl.BlockSpec((1, T, Cf), lambda b: (b, 0, 0)),
            pl.BlockSpec((w1, H1), lambda b: (0, 0)),
            pl.BlockSpec((1, H1), lambda b: (0, 0)),
            pl.BlockSpec((wh, H1), lambda b: (0, 0)),
            pl.BlockSpec((1, H1), lambda b: (0, 0)),
            pl.BlockSpec((wh, H1), lambda b: (0, 0)),
            pl.BlockSpec((1, H1), lambda b: (0, 0)),
            pl.BlockSpec((wh, H1), lambda b: (0, 0)),
            pl.BlockSpec((1, H1), lambda b: (0, 0)),
            pl.BlockSpec((wh, H1), lambda b: (0, 0)),
            pl.BlockSpec((1, H1), lambda b: (0, 0)),
            pl.BlockSpec((2, H1, 128), lambda b: (0, 0, 0)),
            pl.BlockSpec((1, 128), lambda b: (0, 0)),
        ],
        out_specs=(pl.BlockSpec((1, T, H1), lambda b: (b, 0, 0)),
                   pl.BlockSpec((1, T, 128), lambda b: (b, 0, 0))),
        compiler_params=pltpu.CompilerParams(
            dimension_semantics=("parallel",),
            vmem_limit_bytes=_vmem_limit_bytes()),
    )(x, p["b1_w"], p["b1_b"], p["b2_w"], p["b2_b"],
      p["s1_w"], p["s1_b"], p["e1_w"], p["e1_b"],
      p["p1_w"], p["p1_b"], p["se_w"], p["se_b"])


def pointwise(x2d, w, b, act, out_dtype=jnp.bfloat16,
              m_target=1024, n_target=4096):
    # x2d: (M, Cin) with batch/space folded into rows -> (M, Cout)
    M, Cin = x2d.shape
    Cout = w.shape[-1]
    mt = _largest_tile(M, m_target)
    nt = _largest_tile(Cout, n_target, align=128)
    kernel = functools.partial(_matmul_bias_kernel, act=act)
    return pl.pallas_call(
        kernel,
        out_shape=jax.ShapeDtypeStruct((M, Cout), out_dtype),
        grid=(M // mt, Cout // nt),
        in_specs=[pl.BlockSpec((mt, Cin), lambda i, j: (i, 0)),
                  pl.BlockSpec((Cin, nt), lambda i, j: (0, j)),
                  pl.BlockSpec((1, nt), lambda i, j: (0, j))],
        out_specs=pl.BlockSpec((mt, nt), lambda i, j: (i, j)),
        compiler_params=pltpu.CompilerParams(
            dimension_semantics=("parallel", "parallel"),
            vmem_limit_bytes=_vmem_limit_bytes()),
    )(x2d, w, b)


def bm_conv3d_q1(mask2d, zflat, b3, q1w, q1b):
    """mask2d: (T*T, N*T) bf16 (col index t*N+n); zflat: (B, N*T, Co) bf16;
    b3: (1, Co) f32; q1w: (Co, H2) bf16; q1b: (1, H2) f32 -> (B, T*T, H2) bf16.

    Grid is (TT_tiles, B) with batch innermost: each mask tile is DMA'd once
    and reused across all batch elements (mask streams from HBM once total).
    """
    TT, NT = mask2d.shape
    B, _, Co = zflat.shape
    H2 = q1w.shape[-1]
    tt = _largest_tile(TT, 1024)
    # TODO(synk): ~half of the mask rows (s > e) are all-zero; packing only the
    # valid upper-triangular rows would roughly halve the dominant matmul.
    return pl.pallas_call(
        _bm_q1_kernel,
        out_shape=jax.ShapeDtypeStruct((B, TT, H2), jnp.bfloat16),
        grid=(TT // tt, B),
        in_specs=[
            pl.BlockSpec((tt, NT), lambda t, b: (t, 0)),
            pl.BlockSpec((1, NT, Co), lambda t, b: (b, 0, 0)),
            pl.BlockSpec((1, Co), lambda t, b: (0, 0)),
            pl.BlockSpec((Co, H2), lambda t, b: (0, 0)),
            pl.BlockSpec((1, H2), lambda t, b: (0, 0)),
        ],
        out_specs=pl.BlockSpec((1, tt, H2), lambda t, b: (b, t, 0)),
        compiler_params=pltpu.CompilerParams(
            dimension_semantics=("parallel", "arbitrary"),
            vmem_limit_bytes=_vmem_limit_bytes()),
    )(mask2d, zflat, b3, q1w, q1b)


def conv2d_k3(x, w, b, act="relu", head_w=None, head_b=None, head_act=None,
              out_dtype=jnp.bfloat16):
    # x: (B, T, T, Cin) channels-last -> (B, T, T, Cout); row-tiled over axis 1.
    B, T, _, Cin = x.shape
    Cmid = w.shape[-1]
    Cout = head_w.shape[-1] if head_w is not None else Cmid
    rt = _largest_tile(T, max(1, 2048 // T), align=1)   # ~2k output rows / tile
    kernel = functools.partial(_conv2d_k3_kernel, rt=rt, act=act,
                               head_act=head_act)
    in_specs = [pl.BlockSpec((1, T, T, Cin), lambda bb, r: (bb, 0, 0, 0)),
                pl.BlockSpec((3, 3 * Cin, Cmid), lambda bb, r: (0, 0, 0)),
                pl.BlockSpec((1, Cmid), lambda bb, r: (0, 0))]
    args = [x, w, b]
    if head_w is not None:
        in_specs += [pl.BlockSpec((Cmid, Cout), lambda bb, r: (0, 0)),
                     pl.BlockSpec((1, Cout), lambda bb, r: (0, 0))]
        args += [head_w, head_b]
    return pl.pallas_call(
        kernel,
        out_shape=jax.ShapeDtypeStruct((B, T, T, Cout), out_dtype),
        grid=(B, T // rt),
        in_specs=in_specs,
        out_specs=pl.BlockSpec((1, rt, T, Cout), lambda bb, r: (bb, r, 0, 0)),
        compiler_params=pltpu.CompilerParams(
            dimension_semantics=("parallel", "parallel"),
            vmem_limit_bytes=_vmem_limit_bytes()),
    )(*args)


# ----------------------------------------------------------------------------
# Sample mask construction (straight numpy port of the PyTorch __init__)
# ----------------------------------------------------------------------------
def _get_interp1d_bin_mask(seg_xmin, seg_xmax, tscale, num_sample, num_sample_perbin):
    plen = float(seg_xmax - seg_xmin)
    plen_sample = plen / (num_sample * num_sample_perbin - 1.0)
    total_samples = [seg_xmin + plen_sample * ii
                     for ii in range(num_sample * num_sample_perbin)]
    p_mask = []
    for idx in range(num_sample):
        bin_samples = total_samples[idx * num_sample_perbin:(idx + 1) * num_sample_perbin]
        bin_vector = np.zeros([tscale])
        for sample in bin_samples:
            sample_upper = math.ceil(sample)
            sample_decimal, sample_down = math.modf(sample)
            if 0 <= int(sample_down) <= tscale - 1:
                bin_vector[int(sample_down)] += 1 - sample_decimal
            if 0 <= int(sample_upper) <= tscale - 1:
                bin_vector[int(sample_upper)] += sample_decimal
        bin_vector = 1.0 / num_sample_perbin * bin_vector
        p_mask.append(bin_vector)
    return np.stack(p_mask, axis=1)


def get_interp1d_mask(tscale, prop_boundary_ratio, num_sample, num_sample_perbin):
    mask_mat = []
    for end_index in range(tscale):
        mask_mat_vector = []
        for start_index in range(tscale):
            if start_index <= end_index:
                p_xmin = start_index
                p_xmax = end_index + 1
                center_len = float(p_xmax - p_xmin) + 1
                sample_xmin = p_xmin - center_len * prop_boundary_ratio
                sample_xmax = p_xmax + center_len * prop_boundary_ratio
                p_mask = _get_interp1d_bin_mask(
                    sample_xmin, sample_xmax, tscale, num_sample, num_sample_perbin)
            else:
                p_mask = np.zeros([tscale, num_sample])
            mask_mat_vector.append(p_mask)
        mask_mat_vector = np.stack(mask_mat_vector, axis=2)
        mask_mat.append(mask_mat_vector)
    # (T_t, N, T_start, T_end)
    return np.stack(mask_mat, axis=3).astype(np.float32)


# ----------------------------------------------------------------------------
# Parameter construction (deterministic, synthetic)
# ----------------------------------------------------------------------------
def _nrm(key, shape, scale=0.05):
    return jax.random.normal(key, shape, jnp.float32) * scale


def grouped_conv1d_weight(key, cin, cout, groups, k=3, scale=0.05):
    # PyTorch grouped-conv weights expanded to a dense block-diagonal matrix,
    # flattened to the (k*cin, cout) im2col layout (row index k*cin + c).
    cin_g, cout_g = cin // groups, cout // groups
    w_g = _nrm(key, (groups, k, cin_g, cout_g), scale)
    dense = jnp.zeros((k, cin, cout), jnp.float32)
    for g in range(groups):
        dense = dense.at[:, g * cin_g:(g + 1) * cin_g,
                         g * cout_g:(g + 1) * cout_g].set(w_g[g])
    return dense.reshape(k * cin, cout).astype(jnp.bfloat16)


def make_params(key, feat_dim, T, N, pbr, nspb):
    H1, H2, H3 = 256, 128, 512
    ks = jax.random.split(key, 24)
    p = {}
    # x_1d_b
    p["b1_w"] = grouped_conv1d_weight(ks[0], feat_dim, H1, 4)
    p["b1_b"] = _nrm(ks[1], (1, H1), 0.01)
    p["b2_w"] = grouped_conv1d_weight(ks[2], H1, H1, 4)
    p["b2_b"] = _nrm(ks[3], (1, H1), 0.01)
    # x_1d_s / x_1d_e (the 1-channel 1x1 heads are packed lane-dense: cols 0, 1)
    p["s1_w"] = grouped_conv1d_weight(ks[4], H1, H1, 4)
    p["s1_b"] = _nrm(ks[5], (1, H1), 0.01)
    p["e1_w"] = grouped_conv1d_weight(ks[8], H1, H1, 4)
    p["e1_b"] = _nrm(ks[9], (1, H1), 0.01)
    s2_w, s2_b = _nrm(ks[6], (H1,)), _nrm(ks[7], (), 0.01)
    e2_w, e2_b = _nrm(ks[10], (H1,)), _nrm(ks[11], (), 0.01)
    se_w = jnp.zeros((2, H1, 128), jnp.float32)
    p["se_w"] = se_w.at[0, :, 0].set(s2_w).at[1, :, 1].set(e2_w).astype(jnp.bfloat16)
    p["se_b"] = jnp.zeros((1, 128), jnp.float32).at[0, 0].set(s2_b).at[0, 1].set(e2_b)
    # x_1d_p (dense conv1d)
    p["p1_w"] = _nrm(ks[12], (3, H1, H1)).reshape(3 * H1, H1).astype(jnp.bfloat16)
    p["p1_b"] = _nrm(ks[13], (1, H1), 0.01)
    # x_3d_p : Conv3d(H1, H3, kernel=(N,1,1)) as a wide flat weight
    # (C, N*H3) with column index n*H3 + co, so Z = pfeat @ W3flat is ONE matmul
    # and a free wrapper-side reshape gives the (N*T, H3) layout the BM matmul
    # consumes (row t*N + n).
    p["c3d_w"] = _nrm(ks[14], (H1, N, H3)).reshape(H1, N * H3).astype(jnp.bfloat16)
    p["c3d_b"] = _nrm(ks[15], (1, H3), 0.01)
    # x_2d_p
    p["q1_w"] = _nrm(ks[16], (H3, H2)).astype(jnp.bfloat16)
    p["q1_b"] = _nrm(ks[17], (1, H2), 0.01)
    p["q2_w"] = _nrm(ks[18], (3, 3, H2, H2)).reshape(3, 3 * H2, H2).astype(jnp.bfloat16)
    p["q2_b"] = _nrm(ks[19], (1, H2), 0.01)
    p["q3_w"] = _nrm(ks[20], (3, 3, H2, H2)).reshape(3, 3 * H2, H2).astype(jnp.bfloat16)
    p["q3_b"] = _nrm(ks[21], (1, H2), 0.01)
    q4_w, q4_b = _nrm(ks[22], (H2, 2)), _nrm(ks[23], (1, 2), 0.01)
    p["q4_w"] = jnp.zeros((H2, 128), jnp.float32).at[:, :2].set(q4_w).astype(jnp.bfloat16)
    p["q4_b"] = jnp.zeros((1, 128), jnp.float32).at[:, :2].set(q4_b)
    # boundary-matching sample mask as (T*T, T*N): row s*T+e, column t*N+n
    mm = get_interp1d_mask(T, pbr, N, nspb)                       # (t, n, s, e)
    p["mask2d"] = jnp.asarray(
        np.transpose(mm, (2, 3, 0, 1)).reshape(T * T, T * N), jnp.bfloat16)
    return p


# ----------------------------------------------------------------------------
# Forward pass
# ----------------------------------------------------------------------------
def bmn_forward(x, params, *, T, N):
    # x: (B, feat_dim, T) — PyTorch NCW layout; convert to channels-last bf16.
    B = x.shape[0]
    xt = jnp.transpose(x, (0, 2, 1)).astype(jnp.bfloat16)         # (B, T, Cfeat)

    # Fused 1D stage: base -> {start, end, proposal features} in one kernel.
    pfeat, se = head1d_stack(xt, params)            # (B,T,256) bf16, (B,T,128) f32
    start = se[..., 0]                              # (B, T)
    end = se[..., 1]                                # (B, T)

    # Z precompute: one wide matmul (B*T, C) @ (C, N*H3); reshape (free, in HBM)
    # to (B, N*T, H3) with row index t*N + n matching the mask column layout.
    H1 = pfeat.shape[-1]
    NC = params["c3d_w"].shape[-1]
    H3 = NC // N
    zero_b = jnp.zeros((1, NC), jnp.float32)
    zwide = pointwise(pfeat.reshape(B * T, H1), params["c3d_w"], zero_b,
                      act="none")                                 # (B*T, N*H3)
    zflat = zwide.reshape(B, T * N, H3)

    # Boundary-matching matmul + Conv3d((N,1,1)) + ReLU, fused with q1 + ReLU.
    y = bm_conv3d_q1(params["mask2d"], zflat, params["c3d_b"],
                     params["q1_w"], params["q1_b"])              # (B, T*T, 128)
    H2 = y.shape[-1]

    y4 = y.reshape(B, T, T, H2)
    y4 = conv2d_k3(y4, params["q2_w"], params["q2_b"], act="relu")
    # Second 3x3 conv with the q4 (1x1 -> 2ch, sigmoid) head fused in; the
    # 2 real channels are lane-padded to 128 and sliced afterwards.
    y4 = conv2d_k3(y4, params["q3_w"], params["q3_b"], act="relu",
                   head_w=params["q4_w"], head_b=params["q4_b"],
                   head_act="sigmoid", out_dtype=jnp.float32)     # (B,T,T,128)

    conf = jnp.transpose(y4[..., :2], (0, 3, 1, 2))               # (B, 2, T, T)
    return conf, start, end


# ----------------------------------------------------------------------------
if __name__ == "__main__":
    # Small config consistent with the module's opt dict.
    B = 2
    FEAT_DIM = 16           # divisible by 4 (groups=4)
    TSCALE = 16
    NUM_SAMPLE = 4
    NUM_SAMPLE_PERBIN = 2
    PROP_BOUNDARY_RATIO = 0.5

    key = jax.random.PRNGKey(0)
    kx, kp = jax.random.split(key)
    params = make_params(kp, FEAT_DIM, TSCALE, NUM_SAMPLE,
                         PROP_BOUNDARY_RATIO, NUM_SAMPLE_PERBIN)
    x = jax.random.normal(kx, (B, FEAT_DIM, TSCALE), jnp.float32)

    fwd = jax.jit(functools.partial(bmn_forward, T=TSCALE, N=NUM_SAMPLE))
    conf, start, end = fwd(x, params)
    jax.block_until_ready((conf, start, end))

    assert conf.shape == (B, 2, TSCALE, TSCALE), conf.shape
    assert start.shape == (B, TSCALE), start.shape
    assert end.shape == (B, TSCALE), end.shape
    assert bool(jnp.all(jnp.isfinite(conf))) and bool(jnp.all(jnp.isfinite(start)))
    assert bool(jnp.all(jnp.isfinite(end)))
    print("KERNEL_OK")
</pallas_src>

<mosaic_0001>
module attributes {stable_mosaic.version = 11 : i64} {
  func.func @_head1d_kernel(%arg0: i32, %arg1: memref<1x16x16xbf16, #tpu.memory_space<vmem>>, %arg2: memref<48x256xbf16, #tpu.memory_space<vmem>>, %arg3: memref<1x256xf32, #tpu.memory_space<vmem>>, %arg4: memref<768x256xbf16, #tpu.memory_space<vmem>>, %arg5: memref<1x256xf32, #tpu.memory_space<vmem>>, %arg6: memref<768x256xbf16, #tpu.memory_space<vmem>>, %arg7: memref<1x256xf32, #tpu.memory_space<vmem>>, %arg8: memref<768x256xbf16, #tpu.memory_space<vmem>>, %arg9: memref<1x256xf32, #tpu.memory_space<vmem>>, %arg10: memref<768x256xbf16, #tpu.memory_space<vmem>>, %arg11: memref<1x256xf32, #tpu.memory_space<vmem>>, %arg12: memref<2x256x128xbf16, #tpu.memory_space<vmem>>, %arg13: memref<1x128xf32, #tpu.memory_space<vmem>>, %arg14: memref<1x16x256xbf16, #tpu.memory_space<vmem>>, %arg15: memref<1x16x128xf32, #tpu.memory_space<vmem>>) attributes {dimension_semantics = [#tpu.dimension_semantics<parallel>], iteration_bounds = array<i64: 2>, scalar_prefetch = 0 : i64, scratch_operands = 0 : i64, tpu.core_type = #tpu.core_type<tc>, window_params = [{transform_indices = @transform_0, window_bounds = array<i64: 1, 16, 16>}, {pipeline_mode = #tpu.pipeline_mode<synchronous>, transform_indices = @transform_1, window_bounds = array<i64: 48, 256>}, {pipeline_mode = #tpu.pipeline_mode<synchronous>, transform_indices = @transform_2, window_bounds = array<i64: 1, 256>}, {pipeline_mode = #tpu.pipeline_mode<synchronous>, transform_indices = @transform_3, window_bounds = array<i64: 768, 256>}, {pipeline_mode = #tpu.pipeline_mode<synchronous>, transform_indices = @transform_4, window_bounds = array<i64: 1, 256>}, {pipeline_mode = #tpu.pipeline_mode<synchronous>, transform_indices = @transform_5, window_bounds = array<i64: 768, 256>}, {pipeline_mode = #tpu.pipeline_mode<synchronous>, transform_indices = @transform_6, window_bounds = array<i64: 1, 256>}, {pipeline_mode = #tpu.pipeline_mode<synchronous>, transform_indices = @transform_7, window_bounds = array<i64: 768, 256>}, {pipeline_mode = #tpu.pipeline_mode<synchronous>, transform_indices = @transform_8, window_bounds = array<i64: 1, 256>}, {pipeline_mode = #tpu.pipeline_mode<synchronous>, transform_indices = @transform_9, window_bounds = array<i64: 768, 256>}, {pipeline_mode = #tpu.pipeline_mode<synchronous>, transform_indices = @transform_10, window_bounds = array<i64: 1, 256>}, {pipeline_mode = #tpu.pipeline_mode<synchronous>, transform_indices = @transform_11, window_bounds = array<i64: 2, 256, 128>}, {pipeline_mode = #tpu.pipeline_mode<synchronous>, transform_indices = @transform_12, window_bounds = array<i64: 1, 128>}, {transform_indices = @transform_13, window_bounds = array<i64: 1, 16, 256>}, {transform_indices = @transform_14, window_bounds = array<i64: 1, 16, 128>}]} {
    %c0 = arith.constant 0 : index
    %c0_0 = arith.constant 0 : index
    %c0_1 = arith.constant 0 : index
    %0 = vector.load %arg1[%c0, %c0_0, %c0_1] : memref<1x16x16xbf16, #tpu.memory_space<vmem>>, vector<1x16x16xbf16>
    %1 = vector.shape_cast %0 : vector<1x16x16xbf16> to vector<16x16xbf16>
    %c0_2 = arith.constant 0 : index
    %c0_3 = arith.constant 0 : index
    %2 = vector.load %arg2[%c0_2, %c0_3] : memref<48x256xbf16, #tpu.memory_space<vmem>>, vector<48x256xbf16>
    %c0_4 = arith.constant 0 : index
    %c0_5 = arith.constant 0 : index
    %3 = vector.load %arg3[%c0_4, %c0_5] : memref<1x256xf32, #tpu.memory_space<vmem>>, vector<1x256xf32>
    %cst = arith.constant 0.000000e+00 : bf16
    %4 = vector.broadcast %cst : bf16 to vector<1x16xbf16>
    %5 = vector.extract_strided_slice %1 {offsets = [0, 0], sizes = [15, 16], strides = [1, 1]} : vector<16x16xbf16> to vector<15x16xbf16>
    %6 = tpu.concatenate %4, %5 in 0 : vector<1x16xbf16>, vector<15x16xbf16> -> vector<16x16xbf16>
    %7 = vector.extract_strided_slice %1 {offsets = [1, 0], sizes = [15, 16], strides = [1, 1]} : vector<16x16xbf16> to vector<15x16xbf16>
    %8 = tpu.concatenate %7, %4 in 0 : vector<15x16xbf16>, vector<1x16xbf16> -> vector<16x16xbf16>
    %9 = vector.extract_strided_slice %2 {offsets = [0, 0], sizes = [16, 256], strides = [1, 1]} : vector<48x256xbf16> to vector<16x256xbf16>
    %cst_6 = arith.constant dense<0.000000e+00> : vector<16x256xf32>
    %10 = tpu.matmul %6, %9, %cst_6 {dimension_numbers = #tpu.dot_dimension_numbers<[1], [0], [0], [1], [0, 0, 1, 1], [], []>} : vector<16x16xbf16>, vector<16x256xbf16>, vector<16x256xf32> -> vector<16x256xf32>
    %11 = vector.extract_strided_slice %2 {offsets = [16, 0], sizes = [16, 256], strides = [1, 1]} : vector<48x256xbf16> to vector<16x256xbf16>
    %cst_7 = arith.constant dense<0.000000e+00> : vector<16x256xf32>
    %12 = tpu.matmul %1, %11, %cst_7 {dimension_numbers = #tpu.dot_dimension_numbers<[1], [0], [0], [1], [0, 0, 1, 1], [], []>} : vector<16x16xbf16>, vector<16x256xbf16>, vector<16x256xf32> -> vector<16x256xf32>
    %13 = arith.addf %10, %12 : vector<16x256xf32>
    %14 = vector.extract_strided_slice %2 {offsets = [32, 0], sizes = [16, 256], strides = [1, 1]} : vector<48x256xbf16> to vector<16x256xbf16>
    %cst_8 = arith.constant dense<0.000000e+00> : vector<16x256xf32>
    %15 = tpu.matmul %8, %14, %cst_8 {dimension_numbers = #tpu.dot_dimension_numbers<[1], [0], [0], [1], [0, 0, 1, 1], [], []>} : vector<16x16xbf16>, vector<16x256xbf16>, vector<16x256xf32> -> vector<16x256xf32>
    %16 = arith.addf %13, %15 : vector<16x256xf32>
    %17 = vector.broadcast %3 : vector<1x256xf32> to vector<16x256xf32>
    %18 = arith.addf %16, %17 : vector<16x256xf32>
    %cst_9 = arith.constant 0.000000e+00 : f32
    %19 = vector.broadcast %cst_9 : f32 to vector<16x256xf32>
    %20 = arith.maximumf %18, %19 : vector<16x256xf32>
    %21 = arith.truncf %20 : vector<16x256xf32> to vector<16x256xbf16>
    %c0_10 = arith.constant 0 : index
    %c0_11 = arith.constant 0 : index
    %22 = vector.load %arg4[%c0_10, %c0_11] : memref<768x256xbf16, #tpu.memory_space<vmem>>, vector<768x256xbf16>
    %c0_12 = arith.constant 0 : index
    %c0_13 = arith.constant 0 : index
    %23 = vector.load %arg5[%c0_12, %c0_13] : memref<1x256xf32, #tpu.memory_space<vmem>>, vector<1x256xf32>
    %cst_14 = arith.constant 0.000000e+00 : bf16
    %24 = vector.broadcast %cst_14 : bf16 to vector<1x256xbf16>
    %25 = vector.extract_strided_slice %21 {offsets = [0, 0], sizes = [15, 256], strides = [1, 1]} : vector<16x256xbf16> to vector<15x256xbf16>
    %26 = tpu.concatenate %24, %25 in 0 : vector<1x256xbf16>, vector<15x256xbf16> -> vector<16x256xbf16>
    %27 = vector.extract_strided_slice %21 {offsets = [1, 0], sizes = [15, 256], strides = [1, 1]} : vector<16x256xbf16> to vector<15x256xbf16>
    %28 = tpu.concatenate %27, %24 in 0 : vector<15x256xbf16>, vector<1x256xbf16> -> vector<16x256xbf16>
    %29 = tpu.concatenate %26, %21, %28 in 1 : vector<16x256xbf16>, vector<16x256xbf16>, vector<16x256xbf16> -> vector<16x768xbf16>
    %cst_15 = arith.constant dense<0.000000e+00> : vector<16x256xf32>
    %30 = tpu.matmul %29, %22, %cst_15 {dimension_numbers = #tpu.dot_dimension_numbers<[1], [0], [0], [1], [0, 0, 1, 1], [], []>} : vector<16x768xbf16>, vector<768x256xbf16>, vector<16x256xf32> -> vector<16x256xf32>
    %31 = vector.broadcast %23 : vector<1x256xf32> to vector<16x256xf32>
    %32 = arith.addf %30, %31 : vector<16x256xf32>
    %cst_16 = arith.constant 0.000000e+00 : f32
    %33 = vector.broadcast %cst_16 : f32 to vector<16x256xf32>
    %34 = arith.maximumf %32, %33 : vector<16x256xf32>
    %35 = arith.truncf %34 : vector<16x256xf32> to vector<16x256xbf16>
    %c0_17 = arith.constant 0 : index
    %c0_18 = arith.constant 0 : index
    %36 = vector.load %arg6[%c0_17, %c0_18] : memref<768x256xbf16, #tpu.memory_space<vmem>>, vector<768x256xbf16>
    %c0_19 = arith.constant 0 : index
    %c0_20 = arith.constant 0 : index
    %37 = vector.load %arg7[%c0_19, %c0_20] : memref<1x256xf32, #tpu.memory_space<vmem>>, vector<1x256xf32>
    %cst_21 = arith.constant 0.000000e+00 : bf16
    %38 = vector.broadcast %cst_21 : bf16 to vector<1x256xbf16>
    %39 = vector.extract_strided_slice %35 {offsets = [0, 0], sizes = [15, 256], strides = [1, 1]} : vector<16x256xbf16> to vector<15x256xbf16>
    %40 = tpu.concatenate %38, %39 in 0 : vector<1x256xbf16>, vector<15x256xbf16> -> vector<16x256xbf16>
    %41 = vector.extract_strided_slice %35 {offsets = [1, 0], sizes = [15, 256], strides = [1, 1]} : vector<16x256xbf16> to vector<15x256xbf16>
    %42 = tpu.concatenate %41, %38 in 0 : vector<15x256xbf16>, vector<1x256xbf16> -> vector<16x256xbf16>
    %43 = tpu.concatenate %40, %35, %42 in 1 : vector<16x256xbf16>, vector<16x256xbf16>, vector<16x256xbf16> -> vector<16x768xbf16>
    %cst_22 = arith.constant dense<0.000000e+00> : vector<16x256xf32>
    %44 = tpu.matmul %43, %36, %cst_22 {dimension_numbers = #tpu.dot_dimension_numbers<[1], [0], [0], [1], [0, 0, 1, 1], [], []>} : vector<16x768xbf16>, vector<768x256xbf16>, vector<16x256xf32> -> vector<16x256xf32>
    %45 = vector.broadcast %37 : vector<1x256xf32> to vector<16x256xf32>
    %46 = arith.addf %44, %45 : vector<16x256xf32>
    %cst_23 = arith.constant 0.000000e+00 : f32
    %47 = vector.broadcast %cst_23 : f32 to vector<16x256xf32>
    %48 = arith.maximumf %46, %47 : vector<16x256xf32>
    %49 = arith.truncf %48 : vector<16x256xf32> to vector<16x256xbf16>
    %c0_24 = arith.constant 0 : index
    %c0_25 = arith.constant 0 : index
    %50 = vector.load %arg8[%c0_24, %c0_25] : memref<768x256xbf16, #tpu.memory_space<vmem>>, vector<768x256xbf16>
    %c0_26 = arith.constant 0 : index
    %c0_27 = arith.constant 0 : index
    %51 = vector.load %arg9[%c0_26, %c0_27] : memref<1x256xf32, #tpu.memory_space<vmem>>, vector<1x256xf32>
    %cst_28 = arith.constant 0.000000e+00 : bf16
    %52 = vector.broadcast %cst_28 : bf16 to vector<1x256xbf16>
    %53 = vector.extract_strided_slice %35 {offsets = [0, 0], sizes = [15, 256], strides = [1, 1]} : vector<16x256xbf16> to vector<15x256xbf16>
    %54 = tpu.concatenate %52, %53 in 0 : vector<1x256xbf16>, vector<15x256xbf16> -> vector<16x256xbf16>
    %55 = vector.extract_strided_slice %35 {offsets = [1, 0], sizes = [15, 256], strides = [1, 1]} : vector<16x256xbf16> to vector<15x256xbf16>
    %56 = tpu.concatenate %55, %52 in 0 : vector<15x256xbf16>, vector<1x256xbf16> -> vector<16x256xbf16>
    %57 = tpu.concatenate %54, %35, %56 in 1 : vector<16x256xbf16>, vector<16x256xbf16>, vector<16x256xbf16> -> vector<16x768xbf16>
    %cst_29 = arith.constant dense<0.000000e+00> : vector<16x256xf32>
    %58 = tpu.matmul %57, %50, %cst_29 {dimension_numbers = #tpu.dot_dimension_numbers<[1], [0], [0], [1], [0, 0, 1, 1], [], []>} : vector<16x768xbf16>, vector<768x256xbf16>, vector<16x256xf32> -> vector<16x256xf32>
    %59 = vector.broadcast %51 : vector<1x256xf32> to vector<16x256xf32>
    %60 = arith.addf %58, %59 : vector<16x256xf32>
    %cst_30 = arith.constant 0.000000e+00 : f32
    %61 = vector.broadcast %cst_30 : f32 to vector<16x256xf32>
    %62 = arith.maximumf %60, %61 : vector<16x256xf32>
    %63 = arith.truncf %62 : vector<16x256xf32> to vector<16x256xbf16>
    %c0_31 = arith.constant 0 : index
    %c0_32 = arith.constant 0 : index
    %64 = vector.load %arg10[%c0_31, %c0_32] : memref<768x256xbf16, #tpu.memory_space<vmem>>, vector<768x256xbf16>
    %c0_33 = arith.constant 0 : index
    %c0_34 = arith.constant 0 : index
    %65 = vector.load %arg11[%c0_33, %c0_34] : memref<1x256xf32, #tpu.memory_space<vmem>>, vector<1x256xf32>
    %cst_35 = arith.constant 0.000000e+00 : bf16
    %66 = vector.broadcast %cst_35 : bf16 to vector<1x256xbf16>
    %67 = vector.extract_strided_slice %35 {offsets = [0, 0], sizes = [15, 256], strides = [1, 1]} : vector<16x256xbf16> to vector<15x256xbf16>
    %68 = tpu.concatenate %66, %67 in 0 : vector<1x256xbf16>, vector<15x256xbf16> -> vector<16x256xbf16>
    %69 = vector.extract_strided_slice %35 {offsets = [1, 0], sizes = [15, 256], strides = [1, 1]} : vector<16x256xbf16> to vector<15x256xbf16>
    %70 = tpu.concatenate %69, %66 in 0 : vector<15x256xbf16>, vector<1x256xbf16> -> vector<16x256xbf16>
    %71 = tpu.concatenate %68, %35, %70 in 1 : vector<16x256xbf16>, vector<16x256xbf16>, vector<16x256xbf16> -> vector<16x768xbf16>
    %cst_36 = arith.constant dense<0.000000e+00> : vector<16x256xf32>
    %72 = tpu.matmul %71, %64, %cst_36 {dimension_numbers = #tpu.dot_dimension_numbers<[1], [0], [0], [1], [0, 0, 1, 1], [], []>} : vector<16x768xbf16>, vector<768x256xbf16>, vector<16x256xf32> -> vector<16x256xf32>
    %73 = vector.broadcast %65 : vector<1x256xf32> to vector<16x256xf32>
    %74 = arith.addf %72, %73 : vector<16x256xf32>
    %cst_37 = arith.constant 0.000000e+00 : f32
    %75 = vector.broadcast %cst_37 : f32 to vector<16x256xf32>
    %76 = arith.maximumf %74, %75 : vector<16x256xf32>
    %77 = arith.truncf %76 : vector<16x256xf32> to vector<16x256xbf16>
    %c0_38 = arith.constant 0 : index
    %c0_39 = arith.constant 0 : index
    %c0_40 = arith.constant 0 : index
    %78 = vector.load %arg14[%c0_38, %c0_39, %c0_40] : memref<1x16x256xbf16, #tpu.memory_space<vmem>>, vector<1x16x256xbf16>
    %79 = vector.shape_cast %78 : vector<1x16x256xbf16> to vector<16x256xbf16>
    %80 = vector.shape_cast %77 : vector<16x256xbf16> to vector<1x16x256xbf16>
    tpu.vector_store %arg14[%c0_38, %c0_39, %c0_40], %80 {strides = array<i32>} : memref<1x16x256xbf16, #tpu.memory_space<vmem>>, vector<1x16x256xbf16>,
    %c0_41 = arith.constant 0 : index
    %c0_42 = arith.constant 0 : index
    %c0_43 = arith.constant 0 : index
    %81 = vector.load %arg12[%c0_41, %c0_42, %c0_43] : memref<2x256x128xbf16, #tpu.memory_space<vmem>>, vector<1x256x128xbf16>
    %82 = vector.shape_cast %81 : vector<1x256x128xbf16> to vector<256x128xbf16>
    %cst_44 = arith.constant dense<0.000000e+00> : vector<16x128xf32>
    %83 = tpu.matmul %49, %82, %cst_44 {dimension_numbers = #tpu.dot_dimension_numbers<[1], [0], [0], [1], [0, 0, 1, 1], [], []>} : vector<16x256xbf16>, vector<256x128xbf16>, vector<16x128xf32> -> vector<16x128xf32>
    %c1 = arith.constant 1 : index
    %c0_45 = arith.constant 0 : index
    %c0_46 = arith.constant 0 : index
    %84 = vector.load %arg12[%c1, %c0_45, %c0_46] : memref<2x256x128xbf16, #tpu.memory_space<vmem>>, vector<1x256x128xbf16>
    %85 = vector.shape_cast %84 : vector<1x256x128xbf16> to vector<256x128xbf16>
    %cst_47 = arith.constant dense<0.000000e+00> : vector<16x128xf32>
    %86 = tpu.matmul %63, %85, %cst_47 {dimension_numbers = #tpu.dot_dimension_numbers<[1], [0], [0], [1], [0, 0, 1, 1], [], []>} : vector<16x256xbf16>, vector<256x128xbf16>, vector<16x128xf32> -> vector<16x128xf32>
    %87 = arith.addf %83, %86 : vector<16x128xf32>
    %c0_48 = arith.constant 0 : index
    %c0_49 = arith.constant 0 : index
    %88 = vector.load %arg13[%c0_48, %c0_49] : memref<1x128xf32, #tpu.memory_space<vmem>>, vector<1x128xf32>
    %89 = vector.broadcast %88 : vector<1x128xf32> to vector<16x128xf32>
    %90 = arith.addf %87, %89 : vector<16x128xf32>
    %91 = arith.negf %90 : vector<16x128xf32>
    %92 = math.exp %91 : vector<16x128xf32>
    %cst_50 = arith.constant 1.000000e+00 : f32
    %93 = vector.broadcast %cst_50 : f32 to vector<16x128xf32>
    %94 = arith.addf %93, %92 : vector<16x128xf32>
    %95 = arith.divf %93, %94 : vector<16x128xf32>
    %c0_51 = arith.constant 0 : index
    %c0_52 = arith.constant 0 : index
    %c0_53 = arith.constant 0 : index
    %96 = vector.load %arg15[%c0_51, %c0_52, %c0_53] : memref<1x16x128xf32, #tpu.memory_space<vmem>>, vector<1x16x128xf32>
    %97 = vector.shape_cast %96 : vector<1x16x128xf32> to vector<16x128xf32>
    %98 = vector.shape_cast %95 : vector<16x128xf32> to vector<1x16x128xf32>
    tpu.vector_store %arg15[%c0_51, %c0_52, %c0_53], %98 {strides = array<i32>} : memref<1x16x128xf32, #tpu.memory_space<vmem>>, vector<1x16x128xf32>,
    return
  }
  func.func @transform_0(%arg0: i32) -> (i32, i32, i32) {
    %c0_i32 = arith.constant 0 : i32
    %c0_i32_0 = arith.constant 0 : i32
    %c0_i32_1 = arith.constant 0 : i32
    return %arg0, %c0_i32, %c0_i32_0 : i32, i32, i32
  }
  func.func @transform_1(%arg0: i32) -> (i32, i32) {
    %c0_i32 = arith.constant 0 : i32
    %c0_i32_0 = arith.constant 0 : i32
    %c0_i32_1 = arith.constant 0 : i32
    return %c0_i32, %c0_i32_0 : i32, i32
  }
  func.func @transform_2(%arg0: i32) -> (i32, i32) {
    %c0_i32 = arith.constant 0 : i32
    %c0_i32_0 = arith.constant 0 : i32
    %c0_i32_1 = arith.constant 0 : i32
    return %c0_i32, %c0_i32_0 : i32, i32
  }
  func.func @transform_3(%arg0: i32) -> (i32, i32) {
    %c0_i32 = arith.constant 0 : i32
    %c0_i32_0 = arith.constant 0 : i32
    %c0_i32_1 = arith.constant 0 : i32
    return %c0_i32, %c0_i32_0 : i32, i32
  }
  func.func @transform_4(%arg0: i32) -> (i32, i32) {
    %c0_i32 = arith.constant 0 : i32
    %c0_i32_0 = arith.constant 0 : i32
    %c0_i32_1 = arith.constant 0 : i32
    return %c0_i32, %c0_i32_0 : i32, i32
  }
  func.func @transform_5(%arg0: i32) -> (i32, i32) {
    %c0_i32 = arith.constant 0 : i32
    %c0_i32_0 = arith.constant 0 : i32
    %c0_i32_1 = arith.constant 0 : i32
    return %c0_i32, %c0_i32_0 : i32, i32
  }
  func.func @transform_6(%arg0: i32) -> (i32, i32) {
    %c0_i32 = arith.constant 0 : i32
    %c0_i32_0 = arith.constant 0 : i32
    %c0_i32_1 = arith.constant 0 : i32
    return %c0_i32, %c0_i32_0 : i32, i32
  }
  func.func @transform_7(%arg0: i32) -> (i32, i32) {
    %c0_i32 = arith.constant 0 : i32
    %c0_i32_0 = arith.constant 0 : i32
    %c0_i32_1 = arith.constant 0 : i32
    return %c0_i32, %c0_i32_0 : i32, i32
  }
  func.func @transform_8(%arg0: i32) -> (i32, i32) {
    %c0_i32 = arith.constant 0 : i32
    %c0_i32_0 = arith.constant 0 : i32
    %c0_i32_1 = arith.constant 0 : i32
    return %c0_i32, %c0_i32_0 : i32, i32
  }
  func.func @transform_9(%arg0: i32) -> (i32, i32) {
    %c0_i32 = arith.constant 0 : i32
    %c0_i32_0 = arith.constant 0 : i32
    %c0_i32_1 = arith.constant 0 : i32
    return %c0_i32, %c0_i32_0 : i32, i32
  }
  func.func @transform_10(%arg0: i32) -> (i32, i32) {
    %c0_i32 = arith.constant 0 : i32
    %c0_i32_0 = arith.constant 0 : i32
    %c0_i32_1 = arith.constant 0 : i32
    return %c0_i32, %c0_i32_0 : i32, i32
  }
  func.func @transform_11(%arg0: i32) -> (i32, i32, i32) {
    %c0_i32 = arith.constant 0 : i32
    %c0_i32_0 = arith.constant 0 : i32
    %c0_i32_1 = arith.constant 0 : i32
    %c0_i32_2 = arith.constant 0 : i32
    return %c0_i32, %c0_i32_0, %c0_i32_1 : i32, i32, i32
  }
  func.func @transform_12(%arg0: i32) -> (i32, i32) {
    %c0_i32 = arith.constant 0 : i32
    %c0_i32_0 = arith.constant 0 : i32
    %c0_i32_1 = arith.constant 0 : i32
    return %c0_i32, %c0_i32_0 : i32, i32
  }
  func.func @transform_13(%arg0: i32) -> (i32, i32, i32) {
    %c0_i32 = arith.constant 0 : i32
    %c0_i32_0 = arith.constant 0 : i32
    %c0_i32_1 = arith.constant 0 : i32
    return %arg0, %c0_i32, %c0_i32_0 : i32, i32, i32
  }
  func.func @transform_14(%arg0: i32) -> (i32, i32, i32) {
    %c0_i32 = arith.constant 0 : i32
    %c0_i32_0 = arith.constant 0 : i32
    %c0_i32_1 = arith.constant 0 : i32
    return %arg0, %c0_i32, %c0_i32_0 : i32, i32, i32
  }
}

module attributes {stable_mosaic.version = 11 : i64} {
  func.func @_matmul_bias_kernel(%arg0: i32, %arg1: i32, %arg2: memref<32x256xbf16, #tpu.memory_space<vmem>>, %arg3: memref<256x2048xbf16, #tpu.memory_space<vmem>>, %arg4: memref<1x2048xf32, #tpu.memory_space<vmem>>, %arg5: memref<32x2048xbf16, #tpu.memory_space<vmem>>) attributes {dimension_semantics = [#tpu.dimension_semantics<parallel>, #tpu.dimension_semantics<parallel>], iteration_bounds = array<i64: 1, 1>, scalar_prefetch = 0 : i64, scratch_operands = 0 : i64, tpu.core_type = #tpu.core_type<tc>, window_params = [{transform_indices = @transform_0, window_bounds = array<i64: 32, 256>}, {transform_indices = @transform_1, window_bounds = array<i64: 256, 2048>}, {transform_indices = @transform_2, window_bounds = array<i64: 1, 2048>}, {transform_indices = @transform_3, window_bounds = array<i64: 32, 2048>}]} {
    %c0 = arith.constant 0 : index
    %c0_0 = arith.constant 0 : index
    %0 = vector.load %arg2[%c0, %c0_0] : memref<32x256xbf16, #tpu.memory_space<vmem>>, vector<32x256xbf16>
    %c0_1 = arith.constant 0 : index
    %c0_2 = arith.constant 0 : index
    %1 = vector.load %arg3[%c0_1, %c0_2] : memref<256x2048xbf16, #tpu.memory_space<vmem>>, vector<256x2048xbf16>
    %cst = arith.constant dense<0.000000e+00> : vector<32x2048xf32>
    %2 = tpu.matmul %0, %1, %cst {dimension_numbers = #tpu.dot_dimension_numbers<[1], [0], [0], [1], [0, 0, 1, 1], [], []>} : vector<32x256xbf16>, vector<256x2048xbf16>, vector<32x2048xf32> -> vector<32x2048xf32>
    %c0_3 = arith.constant 0 : index
    %c0_4 = arith.constant 0 : index
    %3 = vector.load %arg4[%c0_3, %c0_4] : memref<1x2048xf32, #tpu.memory_space<vmem>>, vector<1x2048xf32>
    %4 = vector.broadcast %3 : vector<1x2048xf32> to vector<32x2048xf32>
    %5 = arith.addf %2, %4 : vector<32x2048xf32>
    %6 = arith.truncf %5 : vector<32x2048xf32> to vector<32x2048xbf16>
    %c0_5 = arith.constant 0 : index
    %c0_6 = arith.constant 0 : index
    %7 = vector.load %arg5[%c0_5, %c0_6] : memref<32x2048xbf16, #tpu.memory_space<vmem>>, vector<32x2048xbf16>
    tpu.vector_store %arg5[%c0_5, %c0_6], %6 {strides = array<i32>} : memref<32x2048xbf16, #tpu.memory_space<vmem>>, vector<32x2048xbf16>,
    return
  }
  func.func @transform_0(%arg0: i32, %arg1: i32) -> (i32, i32) {
    %c0_i32 = arith.constant 0 : i32
    %c0_i32_0 = arith.constant 0 : i32
    return %arg0, %c0_i32 : i32, i32
  }
  func.func @transform_1(%arg0: i32, %arg1: i32) -> (i32, i32) {
    %c0_i32 = arith.constant 0 : i32
    %c0_i32_0 = arith.constant 0 : i32
    return %c0_i32, %arg1 : i32, i32
  }
  func.func @transform_2(%arg0: i32, %arg1: i32) -> (i32, i32) {
    %c0_i32 = arith.constant 0 : i32
    %c0_i32_0 = arith.constant 0 : i32
    return %c0_i32, %arg1 : i32, i32
  }
  func.func @transform_3(%arg0: i32, %arg1: i32) -> (i32, i32) {
    %c0_i32 = arith.constant 0 : i32
    return %arg0, %arg1 : i32, i32
  }
}

module attributes {stable_mosaic.version = 11 : i64} {
  func.func @_conv2d_k3_kernel(%arg0: i32, %arg1: i32, %arg2: memref<1x16x16x128xbf16, #tpu.memory_space<vmem>>, %arg3: memref<3x384x128xbf16, #tpu.memory_space<vmem>>, %arg4: memref<1x128xf32, #tpu.memory_space<vmem>>, %arg5: memref<1x16x16x128xbf16, #tpu.memory_space<vmem>>) attributes {dimension_semantics = [#tpu.dimension_semantics<parallel>, #tpu.dimension_semantics<parallel>], iteration_bounds = array<i64: 2, 1>, scalar_prefetch = 0 : i64, scratch_operands = 0 : i64, tpu.core_type = #tpu.core_type<tc>, window_params = [{transform_indices = @transform_0, window_bounds = array<i64: 1, 16, 16, 128>}, {pipeline_mode = #tpu.pipeline_mode<synchronous>, transform_indices = @transform_1, window_bounds = array<i64: 3, 384, 128>}, {pipeline_mode = #tpu.pipeline_mode<synchronous>, transform_indices = @transform_2, window_bounds = array<i64: 1, 128>}, {transform_indices = @transform_3, window_bounds = array<i64: 1, 16, 16, 128>}]} {
    %c16_i32 = arith.constant 16 : i32
    %0 = arith.muli %arg1, %c16_i32 : i32
    %c0 = arith.constant 0 : index
    %1 = arith.index_cast %0 : i32 to index
    %c0_0 = arith.constant 0 : index
    %c0_1 = arith.constant 0 : index
    %2 = vector.load %arg2[%c0, %1, %c0_0, %c0_1] : memref<1x16x16x128xbf16, #tpu.memory_space<vmem>>, vector<1x16x16x128xbf16>
    %3 = vector.shape_cast %2 : vector<1x16x16x128xbf16> to vector<16x16x128xbf16>
    %c1_i32 = arith.constant 1 : i32
    %4 = arith.subi %0, %c1_i32 : i32
    %c0_i32 = arith.constant 0 : i32
    %5 = arith.maxsi %4, %c0_i32 : i32
    %c0_2 = arith.constant 0 : index
    %6 = arith.index_cast %5 : i32 to index
    %c0_3 = arith.constant 0 : index
    %c0_4 = arith.constant 0 : index
    %7 = vector.load %arg2[%c0_2, %6, %c0_3, %c0_4] : memref<1x16x16x128xbf16, #tpu.memory_space<vmem>>, vector<1x1x16x128xbf16>
    %8 = vector.shape_cast %7 : vector<1x1x16x128xbf16> to vector<1x16x128xbf16>
    %c16_i32_5 = arith.constant 16 : i32
    %9 = arith.addi %0, %c16_i32_5 : i32
    %c15_i32 = arith.constant 15 : i32
    %10 = arith.minsi %9, %c15_i32 : i32
    %c0_6 = arith.constant 0 : index
    %11 = arith.index_cast %10 : i32 to index
    %c0_7 = arith.constant 0 : index
    %c0_8 = arith.constant 0 : index
    %12 = vector.load %arg2[%c0_6, %11, %c0_7, %c0_8] : memref<1x16x16x128xbf16, #tpu.memory_space<vmem>>, vector<1x1x16x128xbf16>
    %13 = vector.shape_cast %12 : vector<1x1x16x128xbf16> to vector<1x16x128xbf16>
    %c0_i32_9 = arith.constant 0 : i32
    %14 = arith.cmpi sgt, %arg1, %c0_i32_9 : i32
    %cst = arith.constant 0.000000e+00 : bf16
    %15 = vector.broadcast %cst : bf16 to vector<1x16x128xbf16>
    %16 = arith.select %14, %8, %15 : vector<1x16x128xbf16>
    %c0_i32_10 = arith.constant 0 : i32
    %17 = arith.cmpi slt, %arg1, %c0_i32_10 : i32
    %cst_11 = arith.constant 0.000000e+00 : bf16
    %18 = vector.broadcast %cst_11 : bf16 to vector<1x16x128xbf16>
    %19 = arith.select %17, %13, %18 : vector<1x16x128xbf16>
    %20 = tpu.concatenate %16, %3, %19 in 0 : vector<1x16x128xbf16>, vector<16x16x128xbf16>, vector<1x16x128xbf16> -> vector<18x16x128xbf16>
    %cst_12 = arith.constant 0.000000e+00 : bf16
    %21 = vector.broadcast %cst_12 : bf16 to vector<18x1x128xbf16>
    %22 = vector.extract_strided_slice %20 {offsets = [0, 0, 0], sizes = [18, 15, 128], strides = [1, 1, 1]} : vector<18x16x128xbf16> to vector<18x15x128xbf16>
    %23 = tpu.concatenate %21, %22 in 1 : vector<18x1x128xbf16>, vector<18x15x128xbf16> -> vector<18x16x128xbf16>
    %24 = vector.extract_strided_slice %20 {offsets = [0, 1, 0], sizes = [18, 15, 128], strides = [1, 1, 1]} : vector<18x16x128xbf16> to vector<18x15x128xbf16>
    %25 = tpu.concatenate %24, %21 in 1 : vector<18x15x128xbf16>, vector<18x1x128xbf16> -> vector<18x16x128xbf16>
    %26 = tpu.concatenate %23, %20, %25 in 2 : vector<18x16x128xbf16>, vector<18x16x128xbf16>, vector<18x16x128xbf16> -> vector<18x16x384xbf16>
    %27 = vector.extract_strided_slice %26 {offsets = [0, 0, 0], sizes = [16, 16, 384], strides = [1, 1, 1]} : vector<18x16x384xbf16> to vector<16x16x384xbf16>
    %28 = vector.shape_cast %27 : vector<16x16x384xbf16> to vector<256x384xbf16>
    %c0_13 = arith.constant 0 : index
    %c0_14 = arith.constant 0 : index
    %c0_15 = arith.constant 0 : index
    %29 = vector.load %arg3[%c0_13, %c0_14, %c0_15] : memref<3x384x128xbf16, #tpu.memory_space<vmem>>, vector<1x384x128xbf16>
    %30 = vector.shape_cast %29 : vector<1x384x128xbf16> to vector<384x128xbf16>
    %cst_16 = arith.constant dense<0.000000e+00> : vector<256x128xf32>
    %31 = tpu.matmul %28, %30, %cst_16 {dimension_numbers = #tpu.dot_dimension_numbers<[1], [0], [0], [1], [0, 0, 1, 1], [], []>} : vector<256x384xbf16>, vector<384x128xbf16>, vector<256x128xf32> -> vector<256x128xf32>
    %32 = vector.extract_strided_slice %26 {offsets = [1, 0, 0], sizes = [16, 16, 384], strides = [1, 1, 1]} : vector<18x16x384xbf16> to vector<16x16x384xbf16>
    %33 = vector.shape_cast %32 : vector<16x16x384xbf16> to vector<256x384xbf16>
    %c1 = arith.constant 1 : index
    %c0_17 = arith.constant 0 : index
    %c0_18 = arith.constant 0 : index
    %34 = vector.load %arg3[%c1, %c0_17, %c0_18] : memref<3x384x128xbf16, #tpu.memory_space<vmem>>, vector<1x384x128xbf16>
    %35 = vector.shape_cast %34 : vector<1x384x128xbf16> to vector<384x128xbf16>
    %cst_19 = arith.constant dense<0.000000e+00> : vector<256x128xf32>
    %36 = tpu.matmul %33, %35, %cst_19 {dimension_numbers = #tpu.dot_dimension_numbers<[1], [0], [0], [1], [0, 0, 1, 1], [], []>} : vector<256x384xbf16>, vector<384x128xbf16>, vector<256x128xf32> -> vector<256x128xf32>
    %37 = arith.addf %31, %36 : vector<256x128xf32>
    %38 = vector.extract_strided_slice %26 {offsets = [2, 0, 0], sizes = [16, 16, 384], strides = [1, 1, 1]} : vector<18x16x384xbf16> to vector<16x16x384xbf16>
    %39 = vector.shape_cast %38 : vector<16x16x384xbf16> to vector<256x384xbf16>
    %c2 = arith.constant 2 : index
    %c0_20 = arith.constant 0 : index
    %c0_21 = arith.constant 0 : index
    %40 = vector.load %arg3[%c2, %c0_20, %c0_21] : memref<3x384x128xbf16, #tpu.memory_space<vmem>>, vector<1x384x128xbf16>
    %41 = vector.shape_cast %40 : vector<1x384x128xbf16> to vector<384x128xbf16>
    %cst_22 = arith.constant dense<0.000000e+00> : vector<256x128xf32>
    %42 = tpu.matmul %39, %41, %cst_22 {dimension_numbers = #tpu.dot_dimension_numbers<[1], [0], [0], [1], [0, 0, 1, 1], [], []>} : vector<256x384xbf16>, vector<384x128xbf16>, vector<256x128xf32> -> vector<256x128xf32>
    %43 = arith.addf %37, %42 : vector<256x128xf32>
    %c0_23 = arith.constant 0 : index
    %c0_24 = arith.constant 0 : index
    %44 = vector.load %arg4[%c0_23, %c0_24] : memref<1x128xf32, #tpu.memory_space<vmem>>, vector<1x128xf32>
    %45 = vector.broadcast %44 : vector<1x128xf32> to vector<256x128xf32>
    %46 = arith.addf %43, %45 : vector<256x128xf32>
    %cst_25 = arith.constant 0.000000e+00 : f32
    %47 = vector.broadcast %cst_25 : f32 to vector<256x128xf32>
    %48 = arith.maximumf %46, %47 : vector<256x128xf32>
    %49 = vector.shape_cast %48 : vector<256x128xf32> to vector<16x16x128xf32>
    %50 = arith.truncf %49 : vector<16x16x128xf32> to vector<16x16x128xbf16>
    %c0_26 = arith.constant 0 : index
    %c0_27 = arith.constant 0 : index
    %c0_28 = arith.constant 0 : index
    %c0_29 = arith.constant 0 : index
    %51 = vector.load %arg5[%c0_26, %c0_27, %c0_28, %c0_29] : memref<1x16x16x128xbf16, #tpu.memory_space<vmem>>, vector<1x16x16x128xbf16>
    %52 = vector.shape_cast %51 : vector<1x16x16x128xbf16> to vector<16x16x128xbf16>
    %53 = vector.shape_cast %50 : vector<16x16x128xbf16> to vector<1x16x16x128xbf16>
    tpu.vector_store %arg5[%c0_26, %c0_27, %c0_28, %c0_29], %53 {strides = array<i32>} : memref<1x16x16x128xbf16, #tpu.memory_space<vmem>>, vector<1x16x16x128xbf16>,
    return
  }
  func.func @transform_0(%arg0: i32, %arg1: i32) -> (i32, i32, i32, i32) {
    %c0_i32 = arith.constant 0 : i32
    %c0_i32_0 = arith.constant 0 : i32
    %c0_i32_1 = arith.constant 0 : i32
    %c0_i32_2 = arith.constant 0 : i32
    return %arg0, %c0_i32, %c0_i32_0, %c0_i32_1 : i32, i32, i32, i32
  }
  func.func @transform_1(%arg0: i32, %arg1: i32) -> (i32, i32, i32) {
    %c0_i32 = arith.constant 0 : i32
    %c0_i32_0 = arith.constant 0 : i32
    %c0_i32_1 = arith.constant 0 : i32
    %c0_i32_2 = arith.constant 0 : i32
    return %c0_i32, %c0_i32_0, %c0_i32_1 : i32, i32, i32
  }
  func.func @transform_2(%arg0: i32, %arg1: i32) -> (i32, i32) {
    %c0_i32 = arith.constant 0 : i32
    %c0_i32_0 = arith.constant 0 : i32
    %c0_i32_1 = arith.constant 0 : i32
    return %c0_i32, %c0_i32_0 : i32, i32
  }
  func.func @transform_3(%arg0: i32, %arg1: i32) -> (i32, i32, i32, i32) {
    %c0_i32 = arith.constant 0 : i32
    %c0_i32_0 = arith.constant 0 : i32
    %c0_i32_1 = arith.constant 0 : i32
    return %arg0, %arg1, %c0_i32, %c0_i32_0 : i32, i32, i32, i32
  }
}

module attributes {stable_mosaic.version = 11 : i64} {
  func.func @_bm_q1_kernel(%arg0: i32, %arg1: i32, %arg2: memref<256x64xbf16, #tpu.memory_space<vmem>>, %arg3: memref<1x64x512xbf16, #tpu.memory_space<vmem>>, %arg4: memref<1x512xf32, #tpu.memory_space<vmem>>, %arg5: memref<512x128xbf16, #tpu.memory_space<vmem>>, %arg6: memref<1x128xf32, #tpu.memory_space<vmem>>, %arg7: memref<1x256x128xbf16, #tpu.memory_space<vmem>>) attributes {dimension_semantics = [#tpu.dimension_semantics<parallel>, #tpu.dimension_semantics<arbitrary>], iteration_bounds = array<i64: 1, 2>, scalar_prefetch = 0 : i64, scratch_operands = 0 : i64, tpu.core_type = #tpu.core_type<tc>, window_params = [{transform_indices = @transform_0, window_bounds = array<i64: 256, 64>}, {transform_indices = @transform_1, window_bounds = array<i64: 1, 64, 512>}, {pipeline_mode = #tpu.pipeline_mode<synchronous>, transform_indices = @transform_2, window_bounds = array<i64: 1, 512>}, {pipeline_mode = #tpu.pipeline_mode<synchronous>, transform_indices = @transform_3, window_bounds = array<i64: 512, 128>}, {pipeline_mode = #tpu.pipeline_mode<synchronous>, transform_indices = @transform_4, window_bounds = array<i64: 1, 128>}, {transform_indices = @transform_5, window_bounds = array<i64: 1, 256, 128>}]} {
    %c0 = arith.constant 0 : index
    %c0_0 = arith.constant 0 : index
    %0 = vector.load %arg2[%c0, %c0_0] : memref<256x64xbf16, #tpu.memory_space<vmem>>, vector<256x64xbf16>
    %c0_1 = arith.constant 0 : index
    %c0_2 = arith.constant 0 : index
    %c0_3 = arith.constant 0 : index
    %1 = vector.load %arg3[%c0_1, %c0_2, %c0_3] : memref<1x64x512xbf16, #tpu.memory_space<vmem>>, vector<1x64x512xbf16>
    %2 = vector.shape_cast %1 : vector<1x64x512xbf16> to vector<64x512xbf16>
    %cst = arith.constant dense<0.000000e+00> : vector<256x512xf32>
    %3 = tpu.matmul %0, %2, %cst {dimension_numbers = #tpu.dot_dimension_numbers<[1], [0], [0], [1], [0, 0, 1, 1], [], []>} : vector<256x64xbf16>, vector<64x512xbf16>, vector<256x512xf32> -> vector<256x512xf32>
    %c0_4 = arith.constant 0 : index
    %c0_5 = arith.constant 0 : index
    %4 = vector.load %arg4[%c0_4, %c0_5] : memref<1x512xf32, #tpu.memory_space<vmem>>, vector<1x512xf32>
    %5 = vector.broadcast %4 : vector<1x512xf32> to vector<256x512xf32>
    %6 = arith.addf %3, %5 : vector<256x512xf32>
    %cst_6 = arith.constant 0.000000e+00 : f32
    %7 = vector.broadcast %cst_6 : f32 to vector<256x512xf32>
    %8 = arith.maximumf %6, %7 : vector<256x512xf32>
    %9 = arith.truncf %8 : vector<256x512xf32> to vector<256x512xbf16>
    %c0_7 = arith.constant 0 : index
    %c0_8 = arith.constant 0 : index
    %10 = vector.load %arg5[%c0_7, %c0_8] : memref<512x128xbf16, #tpu.memory_space<vmem>>, vector<512x128xbf16>
    %cst_9 = arith.constant dense<0.000000e+00> : vector<256x128xf32>
    %11 = tpu.matmul %9, %10, %cst_9 {dimension_numbers = #tpu.dot_dimension_numbers<[1], [0], [0], [1], [0, 0, 1, 1], [], []>} : vector<256x512xbf16>, vector<512x128xbf16>, vector<256x128xf32> -> vector<256x128xf32>
    %c0_10 = arith.constant 0 : index
    %c0_11 = arith.constant 0 : index
    %12 = vector.load %arg6[%c0_10, %c0_11] : memref<1x128xf32, #tpu.memory_space<vmem>>, vector<1x128xf32>
    %13 = vector.broadcast %12 : vector<1x128xf32> to vector<256x128xf32>
    %14 = arith.addf %11, %13 : vector<256x128xf32>
    %cst_12 = arith.constant 0.000000e+00 : f32
    %15 = vector.broadcast %cst_12 : f32 to vector<256x128xf32>
    %16 = arith.maximumf %14, %15 : vector<256x128xf32>
    %17 = arith.truncf %16 : vector<256x128xf32> to vector<256x128xbf16>
    %c0_13 = arith.constant 0 : index
    %c0_14 = arith.constant 0 : index
    %c0_15 = arith.constant 0 : index
    %18 = vector.load %arg7[%c0_13, %c0_14, %c0_15] : memref<1x256x128xbf16, #tpu.memory_space<vmem>>, vector<1x256x128xbf16>
    %19 = vector.shape_cast %18 : vector<1x256x128xbf16> to vector<256x128xbf16>
    %20 = vector.shape_cast %17 : vector<256x128xbf16> to vector<1x256x128xbf16>
    tpu.vector_store %arg7[%c0_13, %c0_14, %c0_15], %20 {strides = array<i32>} : memref<1x256x128xbf16, #tpu.memory_space<vmem>>, vector<1x256x128xbf16>,
    return
  }
  func.func @transform_0(%arg0: i32, %arg1: i32) -> (i32, i32) {
    %c0_i32 = arith.constant 0 : i32
    %c0_i32_0 = arith.constant 0 : i32
    return %arg0, %c0_i32 : i32, i32
  }
  func.func @transform_1(%arg0: i32, %arg1: i32) -> (i32, i32, i32) {
    %c0_i32 = arith.constant 0 : i32
    %c0_i32_0 = arith.constant 0 : i32
    %c0_i32_1 = arith.constant 0 : i32
    return %arg1, %c0_i32, %c0_i32_0 : i32, i32, i32
  }
  func.func @transform_2(%arg0: i32, %arg1: i32) -> (i32, i32) {
    %c0_i32 = arith.constant 0 : i32
    %c0_i32_0 = arith.constant 0 : i32
    %c0_i32_1 = arith.constant 0 : i32
    return %c0_i32, %c0_i32_0 : i32, i32
  }
  func.func @transform_3(%arg0: i32, %arg1: i32) -> (i32, i32) {
    %c0_i32 = arith.constant 0 : i32
    %c0_i32_0 = arith.constant 0 : i32
    %c0_i32_1 = arith.constant 0 : i32
    return %c0_i32, %c0_i32_0 : i32, i32
  }
  func.func @transform_4(%arg0: i32, %arg1: i32) -> (i32, i32) {
    %c0_i32 = arith.constant 0 : i32
    %c0_i32_0 = arith.constant 0 : i32
    %c0_i32_1 = arith.constant 0 : i32
    return %c0_i32, %c0_i32_0 : i32, i32
  }
  func.func @transform_5(%arg0: i32, %arg1: i32) -> (i32, i32, i32) {
    %c0_i32 = arith.constant 0 : i32
    %c0_i32_0 = arith.constant 0 : i32
    return %arg1, %arg0, %c0_i32 : i32, i32, i32
  }
}

module attributes {stable_mosaic.version = 11 : i64} {
  func.func @_conv2d_k3_kernel(%arg0: i32, %arg1: i32, %arg2: memref<1x16x16x128xbf16, #tpu.memory_space<vmem>>, %arg3: memref<3x384x128xbf16, #tpu.memory_space<vmem>>, %arg4: memref<1x128xf32, #tpu.memory_space<vmem>>, %arg5: memref<128x128xbf16, #tpu.memory_space<vmem>>, %arg6: memref<1x128xf32, #tpu.memory_space<vmem>>, %arg7: memref<1x16x16x128xf32, #tpu.memory_space<vmem>>) attributes {dimension_semantics = [#tpu.dimension_semantics<parallel>, #tpu.dimension_semantics<parallel>], iteration_bounds = array<i64: 2, 1>, scalar_prefetch = 0 : i64, scratch_operands = 0 : i64, tpu.core_type = #tpu.core_type<tc>, window_params = [{transform_indices = @transform_0, window_bounds = array<i64: 1, 16, 16, 128>}, {pipeline_mode = #tpu.pipeline_mode<synchronous>, transform_indices = @transform_1, window_bounds = array<i64: 3, 384, 128>}, {pipeline_mode = #tpu.pipeline_mode<synchronous>, transform_indices = @transform_2, window_bounds = array<i64: 1, 128>}, {pipeline_mode = #tpu.pipeline_mode<synchronous>, transform_indices = @transform_3, window_bounds = array<i64: 128, 128>}, {pipeline_mode = #tpu.pipeline_mode<synchronous>, transform_indices = @transform_4, window_bounds = array<i64: 1, 128>}, {transform_indices = @transform_5, window_bounds = array<i64: 1, 16, 16, 128>}]} {
    %c16_i32 = arith.constant 16 : i32
    %0 = arith.muli %arg1, %c16_i32 : i32
    %c0 = arith.constant 0 : index
    %1 = arith.index_cast %0 : i32 to index
    %c0_0 = arith.constant 0 : index
    %c0_1 = arith.constant 0 : index
    %2 = vector.load %arg2[%c0, %1, %c0_0, %c0_1] : memref<1x16x16x128xbf16, #tpu.memory_space<vmem>>, vector<1x16x16x128xbf16>
    %3 = vector.shape_cast %2 : vector<1x16x16x128xbf16> to vector<16x16x128xbf16>
    %c1_i32 = arith.constant 1 : i32
    %4 = arith.subi %0, %c1_i32 : i32
    %c0_i32 = arith.constant 0 : i32
    %5 = arith.maxsi %4, %c0_i32 : i32
    %c0_2 = arith.constant 0 : index
    %6 = arith.index_cast %5 : i32 to index
    %c0_3 = arith.constant 0 : index
    %c0_4 = arith.constant 0 : index
    %7 = vector.load %arg2[%c0_2, %6, %c0_3, %c0_4] : memref<1x16x16x128xbf16, #tpu.memory_space<vmem>>, vector<1x1x16x128xbf16>
    %8 = vector.shape_cast %7 : vector<1x1x16x128xbf16> to vector<1x16x128xbf16>
    %c16_i32_5 = arith.constant 16 : i32
    %9 = arith.addi %0, %c16_i32_5 : i32
    %c15_i32 = arith.constant 15 : i32
    %10 = arith.minsi %9, %c15_i32 : i32
    %c0_6 = arith.constant 0 : index
    %11 = arith.index_cast %10 : i32 to index
    %c0_7 = arith.constant 0 : index
    %c0_8 = arith.constant 0 : index
    %12 = vector.load %arg2[%c0_6, %11, %c0_7, %c0_8] : memref<1x16x16x128xbf16, #tpu.memory_space<vmem>>, vector<1x1x16x128xbf16>
    %13 = vector.shape_cast %12 : vector<1x1x16x128xbf16> to vector<1x16x128xbf16>
    %c0_i32_9 = arith.constant 0 : i32
    %14 = arith.cmpi sgt, %arg1, %c0_i32_9 : i32
    %cst = arith.constant 0.000000e+00 : bf16
    %15 = vector.broadcast %cst : bf16 to vector<1x16x128xbf16>
    %16 = arith.select %14, %8, %15 : vector<1x16x128xbf16>
    %c0_i32_10 = arith.constant 0 : i32
    %17 = arith.cmpi slt, %arg1, %c0_i32_10 : i32
    %cst_11 = arith.constant 0.000000e+00 : bf16
    %18 = vector.broadcast %cst_11 : bf16 to vector<1x16x128xbf16>
    %19 = arith.select %17, %13, %18 : vector<1x16x128xbf16>
    %20 = tpu.concatenate %16, %3, %19 in 0 : vector<1x16x128xbf16>, vector<16x16x128xbf16>, vector<1x16x128xbf16> -> vector<18x16x128xbf16>
    %cst_12 = arith.constant 0.000000e+00 : bf16
    %21 = vector.broadcast %cst_12 : bf16 to vector<18x1x128xbf16>
    %22 = vector.extract_strided_slice %20 {offsets = [0, 0, 0], sizes = [18, 15, 128], strides = [1, 1, 1]} : vector<18x16x128xbf16> to vector<18x15x128xbf16>
    %23 = tpu.concatenate %21, %22 in 1 : vector<18x1x128xbf16>, vector<18x15x128xbf16> -> vector<18x16x128xbf16>
    %24 = vector.extract_strided_slice %20 {offsets = [0, 1, 0], sizes = [18, 15, 128], strides = [1, 1, 1]} : vector<18x16x128xbf16> to vector<18x15x128xbf16>
    %25 = tpu.concatenate %24, %21 in 1 : vector<18x15x128xbf16>, vector<18x1x128xbf16> -> vector<18x16x128xbf16>
    %26 = tpu.concatenate %23, %20, %25 in 2 : vector<18x16x128xbf16>, vector<18x16x128xbf16>, vector<18x16x128xbf16> -> vector<18x16x384xbf16>
    %27 = vector.extract_strided_slice %26 {offsets = [0, 0, 0], sizes = [16, 16, 384], strides = [1, 1, 1]} : vector<18x16x384xbf16> to vector<16x16x384xbf16>
    %28 = vector.shape_cast %27 : vector<16x16x384xbf16> to vector<256x384xbf16>
    %c0_13 = arith.constant 0 : index
    %c0_14 = arith.constant 0 : index
    %c0_15 = arith.constant 0 : index
    %29 = vector.load %arg3[%c0_13, %c0_14, %c0_15] : memref<3x384x128xbf16, #tpu.memory_space<vmem>>, vector<1x384x128xbf16>
    %30 = vector.shape_cast %29 : vector<1x384x128xbf16> to vector<384x128xbf16>
    %cst_16 = arith.constant dense<0.000000e+00> : vector<256x128xf32>
    %31 = tpu.matmul %28, %30, %cst_16 {dimension_numbers = #tpu.dot_dimension_numbers<[1], [0], [0], [1], [0, 0, 1, 1], [], []>} : vector<256x384xbf16>, vector<384x128xbf16>, vector<256x128xf32> -> vector<256x128xf32>
    %32 = vector.extract_strided_slice %26 {offsets = [1, 0, 0], sizes = [16, 16, 384], strides = [1, 1, 1]} : vector<18x16x384xbf16> to vector<16x16x384xbf16>
    %33 = vector.shape_cast %32 : vector<16x16x384xbf16> to vector<256x384xbf16>
    %c1 = arith.constant 1 : index
    %c0_17 = arith.constant 0 : index
    %c0_18 = arith.constant 0 : index
    %34 = vector.load %arg3[%c1, %c0_17, %c0_18] : memref<3x384x128xbf16, #tpu.memory_space<vmem>>, vector<1x384x128xbf16>
    %35 = vector.shape_cast %34 : vector<1x384x128xbf16> to vector<384x128xbf16>
    %cst_19 = arith.constant dense<0.000000e+00> : vector<256x128xf32>
    %36 = tpu.matmul %33, %35, %cst_19 {dimension_numbers = #tpu.dot_dimension_numbers<[1], [0], [0], [1], [0, 0, 1, 1], [], []>} : vector<256x384xbf16>, vector<384x128xbf16>, vector<256x128xf32> -> vector<256x128xf32>
    %37 = arith.addf %31, %36 : vector<256x128xf32>
    %38 = vector.extract_strided_slice %26 {offsets = [2, 0, 0], sizes = [16, 16, 384], strides = [1, 1, 1]} : vector<18x16x384xbf16> to vector<16x16x384xbf16>
    %39 = vector.shape_cast %38 : vector<16x16x384xbf16> to vector<256x384xbf16>
    %c2 = arith.constant 2 : index
    %c0_20 = arith.constant 0 : index
    %c0_21 = arith.constant 0 : index
    %40 = vector.load %arg3[%c2, %c0_20, %c0_21] : memref<3x384x128xbf16, #tpu.memory_space<vmem>>, vector<1x384x128xbf16>
    %41 = vector.shape_cast %40 : vector<1x384x128xbf16> to vector<384x128xbf16>
    %cst_22 = arith.constant dense<0.000000e+00> : vector<256x128xf32>
    %42 = tpu.matmul %39, %41, %cst_22 {dimension_numbers = #tpu.dot_dimension_numbers<[1], [0], [0], [1], [0, 0, 1, 1], [], []>} : vector<256x384xbf16>, vector<384x128xbf16>, vector<256x128xf32> -> vector<256x128xf32>
    %43 = arith.addf %37, %42 : vector<256x128xf32>
    %c0_23 = arith.constant 0 : index
    %c0_24 = arith.constant 0 : index
    %44 = vector.load %arg4[%c0_23, %c0_24] : memref<1x128xf32, #tpu.memory_space<vmem>>, vector<1x128xf32>
    %45 = vector.broadcast %44 : vector<1x128xf32> to vector<256x128xf32>
    %46 = arith.addf %43, %45 : vector<256x128xf32>
    %cst_25 = arith.constant 0.000000e+00 : f32
    %47 = vector.broadcast %cst_25 : f32 to vector<256x128xf32>
    %48 = arith.maximumf %46, %47 : vector<256x128xf32>
    %49 = arith.truncf %48 : vector<256x128xf32> to vector<256x128xbf16>
    %c0_26 = arith.constant 0 : index
    %c0_27 = arith.constant 0 : index
    %50 = vector.load %arg5[%c0_26, %c0_27] : memref<128x128xbf16, #tpu.memory_space<vmem>>, vector<128x128xbf16>
    %cst_28 = arith.constant dense<0.000000e+00> : vector<256x128xf32>
    %51 = tpu.matmul %49, %50, %cst_28 {dimension_numbers = #tpu.dot_dimension_numbers<[1], [0], [0], [1], [0, 0, 1, 1], [], []>} : vector<256x128xbf16>, vector<128x128xbf16>, vector<256x128xf32> -> vector<256x128xf32>
    %c0_29 = arith.constant 0 : index
    %c0_30 = arith.constant 0 : index
    %52 = vector.load %arg6[%c0_29, %c0_30] : memref<1x128xf32, #tpu.memory_space<vmem>>, vector<1x128xf32>
    %53 = vector.broadcast %52 : vector<1x128xf32> to vector<256x128xf32>
    %54 = arith.addf %51, %53 : vector<256x128xf32>
    %55 = arith.negf %54 : vector<256x128xf32>
    %56 = math.exp %55 : vector<256x128xf32>
    %cst_31 = arith.constant 1.000000e+00 : f32
    %57 = vector.broadcast %cst_31 : f32 to vector<256x128xf32>
    %58 = arith.addf %57, %56 : vector<256x128xf32>
    %59 = arith.divf %57, %58 : vector<256x128xf32>
    %60 = vector.shape_cast %59 : vector<256x128xf32> to vector<16x16x128xf32>
    %c0_32 = arith.constant 0 : index
    %c0_33 = arith.constant 0 : index
    %c0_34 = arith.constant 0 : index
    %c0_35 = arith.constant 0 : index
    %61 = vector.load %arg7[%c0_32, %c0_33, %c0_34, %c0_35] : memref<1x16x16x128xf32, #tpu.memory_space<vmem>>, vector<1x16x16x128xf32>
    %62 = vector.shape_cast %61 : vector<1x16x16x128xf32> to vector<16x16x128xf32>
    %63 = vector.shape_cast %60 : vector<16x16x128xf32> to vector<1x16x16x128xf32>
    tpu.vector_store %arg7[%c0_32, %c0_33, %c0_34, %c0_35], %63 {strides = array<i32>} : memref<1x16x16x128xf32, #tpu.memory_space<vmem>>, vector<1x16x16x128xf32>,
    return
  }
  func.func @transform_0(%arg0: i32, %arg1: i32) -> (i32, i32, i32, i32) {
    %c0_i32 = arith.constant 0 : i32
    %c0_i32_0 = arith.constant 0 : i32
    %c0_i32_1 = arith.constant 0 : i32
    %c0_i32_2 = arith.constant 0 : i32
    return %arg0, %c0_i32, %c0_i32_0, %c0_i32_1 : i32, i32, i32, i32
  }
  func.func @transform_1(%arg0: i32, %arg1: i32) -> (i32, i32, i32) {
    %c0_i32 = arith.constant 0 : i32
    %c0_i32_0 = arith.constant 0 : i32
    %c0_i32_1 = arith.constant 0 : i32
    %c0_i32_2 = arith.constant 0 : i32
    return %c0_i32, %c0_i32_0, %c0_i32_1 : i32, i32, i32
  }
  func.func @transform_2(%arg0: i32, %arg1: i32) -> (i32, i32) {
    %c0_i32 = arith.constant 0 : i32
    %c0_i32_0 = arith.constant 0 : i32
    %c0_i32_1 = arith.constant 0 : i32
    return %c0_i32, %c0_i32_0 : i32, i32
  }
  func.func @transform_3(%arg0: i32, %arg1: i32) -> (i32, i32) {
    %c0_i32 = arith.constant 0 : i32
    %c0_i32_0 = arith.constant 0 : i32
    %c0_i32_1 = arith.constant 0 : i32
    return %c0_i32, %c0_i32_0 : i32, i32
  }
  func.func @transform_4(%arg0: i32, %arg1: i32) -> (i32, i32) {
    %c0_i32 = arith.constant 0 : i32
    %c0_i32_0 = arith.constant 0 : i32
    %c0_i32_1 = arith.constant 0 : i32
    return %c0_i32, %c0_i32_0 : i32, i32
  }
  func.func @transform_5(%arg0: i32, %arg1: i32) -> (i32, i32, i32, i32) {
    %c0_i32 = arith.constant 0 : i32
    %c0_i32_0 = arith.constant 0 : i32
    %c0_i32_1 = arith.constant 0 : i32
    return %arg0, %arg1, %c0_i32, %c0_i32_0 : i32, i32, i32, i32
  }
}

</mosaic_0001>

<bundles_post_ra>
// kernel: bmn_forward.7
= control target key start
LH: loop header
LB: loop body
LE: loop exit
PB: predicated region body
PF: predicated region fallthrough
CT: control target
= control target key end

     0   :  { %s2647_s18 = smov 0   ;;  %s2649_s19 = smov 0   ;;  %s3089_s0 = inlined_call_operand.vmem [shape: bf16[256,64], index: 0, kind: input, shape index: {}]   ;;  %s3090_s1 = inlined_call_operand.vmem [shape: bf16[2,64,512], index: 1, kind: input, shape index: {}]   ;;  %s3091_s2 = inlined_call_operand.vmem [shape: f32[1,512], index: 2, kind: input, shape index: {}]   ;;  %s3092_s3 = inlined_call_operand.vmem [shape: bf16[512,128], index: 3, kind: input, shape index: {}]   ;;  %s3093_s4 = inlined_call_operand.vmem [shape: f32[1,128], index: 4, kind: input, shape index: {}]   ;;  %s3094_s5 = inlined_call_operand.vmem [shape: bf16[2,256,128], index: 5, kind: output, shape index: {}]  }
   0x1   :  { %s2651_s20 = smov 0  }
   0x2 LB: > { %s24_s21 = sadd.s32 1, %s2610_s19  ;;  %p2006_p0 = scmp.ge.s32.totalorder %s2614_s20, 1  ;;  %s2614_s20 = sphi %s2651_s20, %s15_s20   ;;  %s2610_s19 = sphi %s2649_s19, %s3096_s19   ;;  %s2606_s18 = sphi %s2647_s18, %s3095_s18  }
   0x3   : > { %p25_p1 = scmp.ge.s32.totalorder %s24_s21, 2  ;;  %p212_p2 = scmp.lt.s32.totalorder %s2614_s20, 3 }
   0x5   : > { %s3098_s21 = smov (%p25_p1, %s24_s21), 0  ;;  %p213_p3 = pnand %p2006_p0, %p212_p2 }
   0x6   : > { %p255_p4 = scmp.lt.s32.totalorder (!%p213_p3), %s2606_s18, 1  ;;  %v2616_v0 = vmov (!%p213_p3), 0   ;;  %v2544_v17 = vld [vmem:[%s3089_s0] sm:$0xff] (!%p213_p3)   ;;  %vm501_vm0 = vcmask (!%p213_p3), 523264   ;;  %v2545_v22 = vld [vmem:[%s3089_s0 + $0x8] sm:$0xff] (!%p213_p3)   ;;  %v2546_v27 = vld [vmem:[%s3089_s0 + $0x10] sm:$0xff] (!%p213_p3)  }
   0x7   : > { %216 = sbr.rel (%p213_p3) target bundleno = 602 (0x25a), region = 40  ;;  %582 = vmatprep.mubr.bf16.mxu0 (!%p213_p3), %v2616_v0  ;;  %775 = vmatprep.mubr.bf16.mxu1 (!%p213_p3), %v2616_v0  ;;  %v2556_v18 = vld [vmem:[%s3092_s3 + $0x40] sm:$0xff] (!%p213_p3)   ;;  %v2562_v23 = vld [vmem:[%s3092_s3 + $0x48] sm:$0xff] (!%p213_p3)   ;;  %v2568_v28 = vld [vmem:[%s3092_s3 + $0x50] sm:$0xff] (!%p213_p3)  }
   0x8   : > { %v2557_v19 = vld [vmem:[%s3092_s3] sm:$0xff] (!%p213_p3)   ;;  %v2563_v24 = vld [vmem:[%s3092_s3 + $0x8] sm:$0xff] (!%p213_p3)   ;;  %v2569_v29 = vld [vmem:[%s3092_s3 + $0x10] sm:$0xff] (!%p213_p3)  }
   0x9   : > { %v2558_v20 = vld [vmem:[%s3092_s3 + $0xc0] sm:$0xff] (!%p213_p3)   ;;  %v2564_v25 = vld [vmem:[%s3092_s3 + $0xc8] sm:$0xff] (!%p213_p3)   ;;  %v2570_v30 = vld [vmem:[%s3092_s3 + $0xd0] sm:$0xff] (!%p213_p3)  }
   0xa   : > { %v2560_v21 = vld [vmem:[%s3092_s3 + $0x80] sm:$0xff] (!%p213_p3)   ;;  %v2566_v26 = vld [vmem:[%s3092_s3 + $0x88] sm:$0xff] (!%p213_p3)   ;;  %v2571_v31 = vld [vmem:[%s3092_s3 + $0x90] sm:$0xff] (!%p213_p3)  }
   0xb   : > { %v2572_v32 = vld [vmem:[%s3092_s3 + $0x58] sm:$0xff] (!%p213_p3)   ;;  %v2576_v37 = vld [vmem:[%s3092_s3 + $0x60] sm:$0xff] (!%p213_p3)   ;;  %v2580_v41 = vld [vmem:[%s3092_s3 + $0x68] sm:$0xff] (!%p213_p3)  }
   0xc   : > { %v2573_v33 = vld [vmem:[%s3092_s3 + $0x18] sm:$0xff] (!%p213_p3)   ;;  %v2577_v38 = vld [vmem:[%s3092_s3 + $0x20] sm:$0xff] (!%p213_p3)   ;;  %v2581_v42 = vld [vmem:[%s3092_s3 + $0x28] sm:$0xff] (!%p213_p3)  }
   0xd   : > { %v2574_v34 = vld [vmem:[%s3092_s3 + $0xd8] sm:$0xff] (!%p213_p3)   ;;  %v2578_v39 = vld [vmem:[%s3092_s3 + $0xe0] sm:$0xff] (!%p213_p3)   ;;  %v2582_v43 = vld [vmem:[%s3092_s3 + $0xe8] sm:$0xff] (!%p213_p3)  }
   0xe   : > { %s3100_s18 = smov (!%p255_p4, %s2606_s18), 1  ;;  %v2575_v35 = vld [vmem:[%s3092_s3 + $0x98] sm:$0xff]   ;;  %v2579_v40 = vld [vmem:[%s3092_s3 + $0xa0] sm:$0xff]   ;;  %v2583_v44 = vld [vmem:[%s3092_s3 + $0xa8] sm:$0xff]  }
   0xf   : > { %s2142_s22 = sshll.u32 %s3100_s18, 7  ;;  %v2547_v36 = vld [vmem:[%s3089_s0 + $0x18] sm:$0xff]   ;;  %v2548_v45 = vld [vmem:[%s3089_s0 + $0x20] sm:$0xff]   ;;  %v2584_v46 = vld [vmem:[%s3092_s3 + $0x70] sm:$0xff]  }
  0x10   : > { %s259_s25 = scalar_lea.vmem %s3090_s1, %s2142_s22  ;;  %v2585_v47 = vld [vmem:[%s3092_s3 + $0x30] sm:$0xff]   ;;  %v2588_v50 = vld [vmem:[%s3092_s3 + $0x78] sm:$0xff]   ;;  %v2549_v54 = vld [vmem:[%s3089_s0 + $0x28] sm:$0xff]   ;;  %s3032_s28 = scalar_lea.vmem %s3094_s5, %s2142_s22 }
  0x11   : > { %v2520_v1 = vld [vmem:[%s259_s25 + $0x4] ss:$16 sps:$4 sm:$0xff]   ;;  %v2522_v2 = vld [vmem:[%s259_s25 + $0xc] ss:$16 sps:$4 sm:$0xff]   ;;  %v2524_v3 = vld [vmem:[%s259_s25] ss:$16 sps:$4 sm:$0xff]  }
  0x12   : > { %550 = vmatprep.subr.bf16.mxu0 %v2520_v1  ;;  %v2525_v4 = vld [vmem:[%s259_s25 + $0x8] ss:$16 sps:$4 sm:$0xff]   ;;  %743 = vmatprep.subr.bf16.mxu1 %v2522_v2  ;;  %v2526_v5 = vld [vmem:[%s259_s25 + $0x24] ss:$16 sps:$4 sm:$0xff]   ;;  %v2528_v6 = vld [vmem:[%s259_s25 + $0x2c] ss:$16 sps:$4 sm:$0xff]   ;;  %v321_v2 = vlaneseq }
  0x13   : > { %551 = vmatpush1.bf16.msra.mxu0 %v2524_v3  ;;  %744 = vmatpush1.bf16.msra.mxu1 %v2525_v4  ;;  %v2530_v7 = vld [vmem:[%s259_s25 + $0x20] ss:$16 sps:$4 sm:$0xff]   ;;  %v2531_v8 = vld [vmem:[%s259_s25 + $0x28] ss:$16 sps:$4 sm:$0xff]   ;;  %v2532_v9 = vld [vmem:[%s259_s25 + $0x44] ss:$16 sps:$4 sm:$0xff]  }
  0x14   : > { %552 = vmatprep.subr.bf16.mxu0 %v2526_v5  ;;  %745 = vmatprep.subr.bf16.mxu1 %v2528_v6  ;;  %v2534_v10 = vld [vmem:[%s259_s25 + $0x4c] ss:$16 sps:$4 sm:$0xff]   ;;  %v2536_v11 = vld [vmem:[%s259_s25 + $0x40] ss:$16 sps:$4 sm:$0xff]   ;;  %v2537_v12 = vld [vmem:[%s259_s25 + $0x48] ss:$16 sps:$4 sm:$0xff]  }
  0x15   : > { %v2538_v13 = vld [vmem:[%s259_s25 + $0x64] ss:$16 sps:$4 sm:$0xff]   ;;  %v2540_v14 = vld [vmem:[%s259_s25 + $0x6c] ss:$16 sps:$4 sm:$0xff]   ;;  %v2542_v15 = vld [vmem:[%s259_s25 + $0x60] ss:$16 sps:$4 sm:$0xff]  }
  0x16   : > { %v2543_v16 = vld [vmem:[%s259_s25 + $0x68] ss:$16 sps:$4 sm:$0xff]   ;;  %v2586_v48 = vld [vmem:[%s3092_s3 + $0xf0] sm:$0xff]   ;;  %v2552_v57 = vld [vmem:[%s3089_s0 + $0x40] sm:$0xff]   ;;  %v322_v3 = vshrl.u32 %v321_v2, 7 }
  0x17   : > { %553 = vmatpush1.bf16.msra.mxu0 %v2530_v7  ;;  %746 = vmatpush1.bf16.msra.mxu1 %v2531_v8  ;;  %v2587_v49 = vld [vmem:[%s3092_s3 + $0xb0] sm:$0xff]   ;;  %v2589_v51 = vld [vmem:[%s3092_s3 + $0x38] sm:$0xff]   ;;  %v2553_v58 = vld [vmem:[%s3089_s0 + $0x48] sm:$0xff]  }
  0x18   : > { %554 = vmatprep.subr.bf16.mxu0 %v2532_v9  ;;  %747 = vmatprep.subr.bf16.mxu1 %v2534_v10  ;;  %v2590_v52 = vld [vmem:[%s3092_s3 + $0xf8] sm:$0xff]   ;;  %v2550_v55 = vld [vmem:[%s3089_s0 + $0x30] sm:$0xff]   ;;  %v2559_v61 = vld [vmem:[%s3089_s0 + $0x60] sm:$0xff]   ;;  %v323_v4 = vsub.s32 0, %v322_v3  ;;  %v331_v5 = vsub.s32 2, %v322_v3  ;;  %v327_v7 = vsub.s32 1, %v322_v3 }
  0x19   : > { %v2591_v53 = vld [vmem:[%s3092_s3 + $0xb8] sm:$0xff]   ;;  %v2554_v59 = vld [vmem:[%s3089_s0 + $0x50] sm:$0xff]   ;;  %v2561_v62 = vld [vmem:[%s3089_s0 + $0x68] sm:$0xff]   ;;  %v335_v8 = vsub.s32 3, %v322_v3 }
  0x1a   : > { %v2551_v56 = vld [vmem:[%s3089_s0 + $0x38] sm:$0xff]   ;;  %v2565_v63 = vld [vmem:[%s3089_s0 + $0x70] sm:$0xff]   ;;  %v319_v6 = vld [vmem:[%s3091_s2] sm:$0xf] }
  0x1b   : > { %555 = vmatpush1.bf16.msra.mxu0 %v2536_v11  ;;  %748 = vmatpush1.bf16.msra.mxu1 %v2537_v12  ;;  %v2555_v60 = vld [vmem:[%s3089_s0 + $0x58] sm:$0xff]   ;;  %v2884_v9 = vrot.slane %v319_v6, %v323_v4  ;;  %v2888_v10 = vrot.slane %v319_v6, %v327_v7  ;;  %v2890_v11 = vrot.slane %v319_v6, %v335_v8 }
  0x1c   : > { %556 = vmatprep.subr.bf16.mxu0 %v2538_v13  ;;  %749 = vmatprep.subr.bf16.mxu1 %v2540_v14  ;;  %v2567_v1 = vld [vmem:[%s3089_s0 + $0x78] sm:$0xff]  }
  0x1f   : > { %557 = vmatpush1.bf16.msra.mxu0 %v2542_v15  ;;  %750 = vmatpush1.bf16.msra.mxu1 %v2543_v16 }
  0x20   : > { %2271 = vmatprep.subr.bf16.mxu0 %v2556_v18  ;;  %2383 = vmatprep.subr.bf16.mxu1 %v2558_v20 }
  0x22   : > { %2043 = vmatmul.mubr.msk.bf16.vlgmr.msra.gmra.mrb[0].mxu0 %vm501_vm0, %v2544_v17  ;;  %2059 = vmatmul.mubr.msk.bf16.vlgmr.msra.gmra.mrb[0].mxu1 %vm501_vm0, %v2544_v17 }
  0x23   : > { %592 = vmatprep.mubr.bf16.mxu0 %v2616_v0  ;;  %785 = vmatprep.mubr.bf16.mxu1 %v2616_v0 }
  0x24   : > { %2272 = vmatpush3.bf16.msra.mxu0 %v2557_v19  ;;  %2384 = vmatpush3.bf16.msra.mxu1 %v2560_v21 }
  0x25   : > { %2273 = vmatprep.subr.bf16.mxu0 %v2562_v23  ;;  %2385 = vmatprep.subr.bf16.mxu1 %v2564_v25 }
  0x28   : > { %2274 = vmatpush3.bf16.msra.mxu0 %v2563_v24  ;;  %2386 = vmatpush3.bf16.msra.mxu1 %v2566_v26 }
  0x29   : > { %2275 = vmatprep.subr.bf16.mxu0 %v2568_v28  ;;  %2387 = vmatprep.subr.bf16.mxu1 %v2570_v30 }
  0x2a   : > { %2044 = vmatmul.mubr.msk.bf16.gmra.mrb[4].mxu0 %vm501_vm0, %v2545_v22  ;;  %2060 = vmatmul.mubr.msk.bf16.gmra.mrb[4].mxu1 %vm501_vm0, %v2545_v22 }
  0x2b   : > { %602 = vmatprep.mubr.bf16.mxu0 %v2616_v0  ;;  %795 = vmatprep.mubr.bf16.mxu1 %v2616_v0 }
  0x2c   : > { %2276 = vmatpush3.bf16.msra.mxu0 %v2569_v29  ;;  %2388 = vmatpush3.bf16.msra.mxu1 %v2571_v31 }
  0x2d   : > { %2277 = vmatprep.subr.bf16.mxu0 %v2572_v32  ;;  %2389 = vmatprep.subr.bf16.mxu1 %v2574_v34 }
  0x30   : > { %2278 = vmatpush3.bf16.msra.mxu0 %v2573_v33  ;;  %2390 = vmatpush3.bf16.msra.mxu1 %v2575_v35 }
  0x31   : > { %2279 = vmatprep.subr.bf16.mxu0 %v2576_v37  ;;  %2391 = vmatprep.subr.bf16.mxu1 %v2578_v39 }
  0x32   : > { %2045 = vmatmul.mubr.msk.bf16.gmra.mrb[8].mxu0 %vm501_vm0, %v2546_v27  ;;  %2061 = vmatmul.mubr.msk.bf16.gmra.mrb[8].mxu1 %vm501_vm0, %v2546_v27 }
  0x33   : > { %612 = vmatprep.mubr.bf16.mxu0 %v2616_v0  ;;  %805 = vmatprep.mubr.bf16.mxu1 %v2616_v0 }
  0x34   : > { %2280 = vmatpush3.bf16.msra.mxu0 %v2577_v38  ;;  %2392 = vmatpush3.bf16.msra.mxu1 %v2579_v40 }
  0x35   : > { %2281 = vmatprep.subr.bf16.mxu0 %v2580_v41  ;;  %2393 = vmatprep.subr.bf16.mxu1 %v2582_v43 }
  0x38   : > { %2282 = vmatpush3.bf16.msra.mxu0 %v2581_v42  ;;  %2394 = vmatpush3.bf16.msra.mxu1 %v2583_v44 }
  0x39   : > { %2283 = vmatprep.subr.bf16.mxu0 %v2584_v46  ;;  %2395 = vmatprep.subr.bf16.mxu1 %v2586_v48 }
  0x3a   : > { %2046 = vmatmul.mubr.msk.bf16.gmra.mrb[12].mxu0 %vm501_vm0, %v2547_v36  ;;  %2062 = vmatmul.mubr.msk.bf16.gmra.mrb[12].mxu1 %vm501_vm0, %v2547_v36 }
  0x3b   : > { %622 = vmatprep.mubr.bf16.mxu0 %v2616_v0  ;;  %815 = vmatprep.mubr.bf16.mxu1 %v2616_v0 }
  0x3c   : > { %2284 = vmatpush3.bf16.msra.mxu0 %v2585_v47  ;;  %2396 = vmatpush3.bf16.msra.mxu1 %v2587_v49 }
  0x3d   : > { %2285 = vmatprep.subr.bf16.mxu0 %v2588_v50  ;;  %2397 = vmatprep.subr.bf16.mxu1 %v2590_v52 }
  0x40   : > { %2286 = vmatpush3.bf16.msra.mxu0 %v2589_v51  ;;  %2398 = vmatpush3.bf16.msra.mxu1 %v2591_v53 }
  0x42   : > { %2047 = vmatmul.mubr.msk.bf16.gmra.mrb[16].mxu0 %vm501_vm0, %v2548_v45  ;;  %2063 = vmatmul.mubr.msk.bf16.gmra.mrb[16].mxu1 %vm501_vm0, %v2548_v45 }
  0x43   : > { %632 = vmatprep.mubr.bf16.mxu0 %v2616_v0  ;;  %825 = vmatprep.mubr.bf16.mxu1 %v2616_v0 }
  0x4a   : > { %2048 = vmatmul.mubr.msk.bf16.gmra.mrb[20].mxu0 %vm501_vm0, %v2549_v54  ;;  %2064 = vmatmul.mubr.msk.bf16.gmra.mrb[20].mxu1 %vm501_vm0, %v2549_v54 }
  0x4b   : > { %642 = vmatprep.mubr.bf16.mxu0 %v2616_v0  ;;  %835 = vmatprep.mubr.bf16.mxu1 %v2616_v0 }
  0x52   : > { %2049 = vmatmul.mubr.msk.bf16.gmra.mrb[24].mxu0 %vm501_vm0, %v2550_v55  ;;  %2065 = vmatmul.mubr.msk.bf16.gmra.mrb[24].mxu1 %vm501_vm0, %v2550_v55 }
  0x53   : > { %652 = vmatprep.mubr.bf16.mxu0 %v2616_v0  ;;  %845 = vmatprep.mubr.bf16.mxu1 %v2616_v0 }
  0x5a   : > { %2050 = vmatmul.mubr.msk.bf16.gmra.mrb[28].mxu0 %vm501_vm0, %v2551_v56  ;;  %2066 = vmatmul.mubr.msk.bf16.gmra.mrb[28].mxu1 %vm501_vm0, %v2551_v56 }
  0x5b   : > { %662 = vmatprep.mubr.bf16.mxu0 %v2616_v0  ;;  %855 = vmatprep.mubr.bf16.mxu1 %v2616_v0 }
  0x62   : > { %2051 = vmatmul.mubr.msk.bf16.gmra.mrb[32].mxu0 %vm501_vm0, %v2552_v57  ;;  %2067 = vmatmul.mubr.msk.bf16.gmra.mrb[32].mxu1 %vm501_vm0, %v2552_v57 }
  0x63   : > { %672 = vmatprep.mubr.bf16.mxu0 %v2616_v0  ;;  %865 = vmatprep.mubr.bf16.mxu1 %v2616_v0 }
  0x6a   : > { %2052 = vmatmul.mubr.msk.bf16.gmra.mrb[36].mxu0 %vm501_vm0, %v2553_v58  ;;  %2068 = vmatmul.mubr.msk.bf16.gmra.mrb[36].mxu1 %vm501_vm0, %v2553_v58 }
  0x6b   : > { %682 = vmatprep.mubr.bf16.mxu0 %v2616_v0  ;;  %875 = vmatprep.mubr.bf16.mxu1 %v2616_v0 }
  0x72   : > { %2053 = vmatmul.mubr.msk.bf16.gmra.mrb[40].mxu0 %vm501_vm0, %v2554_v59  ;;  %2069 = vmatmul.mubr.msk.bf16.gmra.mrb[40].mxu1 %vm501_vm0, %v2554_v59 }
  0x73   : > { %692 = vmatprep.mubr.bf16.mxu0 %v2616_v0  ;;  %885 = vmatprep.mubr.bf16.mxu1 %v2616_v0 }
  0x7a   : > { %2054 = vmatmul.mubr.msk.bf16.gmra.mrb[44].mxu0 %vm501_vm0, %v2555_v60  ;;  %2070 = vmatmul.mubr.msk.bf16.gmra.mrb[44].mxu1 %vm501_vm0, %v2555_v60 }
  0x7b   : > { %702 = vmatprep.mubr.bf16.mxu0 %v2616_v0  ;;  %895 = vmatprep.mubr.bf16.mxu1 %v2616_v0 }
  0x82   : > { %2055 = vmatmul.mubr.msk.bf16.gmra.mrb[48].mxu0 %vm501_vm0, %v2559_v61  ;;  %2071 = vmatmul.mubr.msk.bf16.gmra.mrb[48].mxu1 %vm501_vm0, %v2559_v61 }
  0x83   : > { %712 = vmatprep.mubr.bf16.mxu0 %v2616_v0  ;;  %905 = vmatprep.mubr.bf16.mxu1 %v2616_v0 }
  0x8a   : > { %2056 = vmatmul.mubr.msk.bf16.gmra.mrb[52].mxu0 %vm501_vm0, %v2561_v62  ;;  %2072 = vmatmul.mubr.msk.bf16.gmra.mrb[52].mxu1 %vm501_vm0, %v2561_v62 }
  0x8b   : > { %722 = vmatprep.mubr.bf16.mxu0 %v2616_v0  ;;  %915 = vmatprep.mubr.bf16.mxu1 %v2616_v0 }
  0x92   : > { %2057 = vmatmul.mubr.msk.bf16.gmra.mrb[56].mxu0 %vm501_vm0, %v2565_v63  ;;  %2073 = vmatmul.mubr.msk.bf16.gmra.mrb[56].mxu1 %vm501_vm0, %v2565_v63 }
  0x93   : > { %732 = vmatprep.mubr.bf16.mxu0 %v2616_v0  ;;  %925 = vmatprep.mubr.bf16.mxu1 %v2616_v0  ;;  %v2886_v0 = vrot.slane %v319_v6, %v331_v5 }
  0x9a   : > { %2058 = vmatmul.mubr.msk.bf16.gmra.mrb[60].mxu0 %vm501_vm0, %v2567_v1  ;;  %2074 = vmatmul.mubr.msk.bf16.gmra.mrb[60].mxu1 %vm501_vm0, %v2567_v1 }
  0xf5   : > { %v584_v12 = vpop.f32.mrb[0].mxu0  ;;  %v777_v13 = vpop.f32.mrb[0].mxu1 }
  0xf6   : > { %v585_v14 = vadd.f32 %v584_v12, %v2884_v9  ;;  %v778_v15 = vadd.f32 %v777_v13, %v2886_v0  ;;  %v586_v16 = vpop.f32.mrb[1].mxu0  ;;  %v779_v17 = vpop.f32.mrb[1].mxu1 }
  0xf7   : > { %v587_v18 = vadd.f32 %v586_v16, %v2888_v10  ;;  %v780_v19 = vadd.f32 %v779_v17, %v2890_v11  ;;  %v588_v20 = vpop.f32.mrb[2].mxu0  ;;  %v781_v21 = vpop.f32.mrb[2].mxu1 }
  0xf8   : > { %v938_v22 = vmax.f32 %v778_v15, 0.0  ;;  %v589_v23 = vadd.f32 %v588_v20, %v2884_v9  ;;  %v782_v24 = vadd.f32 %v781_v21, %v2886_v0  ;;  %v590_v25 = vpop.f32.mrb[3].mxu0  ;;  %v783_v26 = vpop.f32.mrb[3].mxu1  ;;  %v936_v30 = vmax.f32 %v585_v14, 0.0 }
  0xf9   : > { %v939_v27 = vmax.f32 %v780_v19, 0.0  ;;  %v591_v28 = vadd.f32 %v590_v25, %v2888_v10  ;;  %v784_v29 = vadd.f32 %v783_v26, %v2890_v11  ;;  %v937_v33 = vmax.f32 %v587_v18, 0.0 }
  0xfa   : > { %v940_v31 = vmax.f32 %v589_v23, 0.0  ;;  %v942_v32 = vmax.f32 %v782_v24, 0.0 }
  0xfb   : > { %v941_v34 = vmax.f32 %v591_v28, 0.0  ;;  %v943_v35 = vmax.f32 %v784_v29, 0.0 }
  0xfc   : > { %v1064_v36 = vpack.c.bf16 %v940_v31, %v936_v30  ;;  %v1066_v37 = vpack.c.bf16 %v942_v32, %v938_v22 }
  0xfd   : > { %v1065_v38 = vpack.c.bf16 %v941_v34, %v937_v33  ;;  %v1067_v39 = vpack.c.bf16 %v943_v35, %v939_v27  ;;  %v594_v40 = vpop.f32.mrb[4].mxu0  ;;  %v787_v41 = vpop.f32.mrb[4].mxu1 }
  0xfe   : > { %v595_v42 = vadd.f32 %v594_v40, %v2884_v9  ;;  %v788_v43 = vadd.f32 %v787_v41, %v2886_v0  ;;  %v596_v44 = vpop.f32.mrb[5].mxu0  ;;  %v789_v45 = vpop.f32.mrb[5].mxu1 }
  0xff   : > { %v597_v46 = vadd.f32 %v596_v44, %v2888_v10  ;;  %v790_v47 = vadd.f32 %v789_v45, %v2890_v11  ;;  %v598_v48 = vpop.f32.mrb[6].mxu0  ;;  %v791_v49 = vpop.f32.mrb[6].mxu1  ;;  %1423 = vmatprep.mubr.bf16.mxu0 %v1065_v38  ;;  %1584 = vmatprep.mubr.bf16.mxu1 %v1067_v39 }
 0x100   : > { %v946_v50 = vmax.f32 %v788_v43, 0.0  ;;  %v599_v51 = vadd.f32 %v598_v48, %v2884_v9  ;;  %v792_v52 = vadd.f32 %v791_v49, %v2886_v0  ;;  %v600_v53 = vpop.f32.mrb[7].mxu0  ;;  %v793_v54 = vpop.f32.mrb[7].mxu1  ;;  %1424 = vmatmul.mubr.bf16.vlgmr.msra.gmra.mrb[64].mxu0 %v1064_v36  ;;  %1585 = vmatmul.mubr.bf16.vlgmr.msra.gmra.mrb[64].mxu1 %v1066_v37  ;;  %v944_v58 = vmax.f32 %v595_v42, 0.0 }
 0x101   : > { %v947_v55 = vmax.f32 %v790_v47, 0.0  ;;  %v601_v56 = vadd.f32 %v600_v53, %v2888_v10  ;;  %v794_v57 = vadd.f32 %v793_v54, %v2890_v11  ;;  %v945_v61 = vmax.f32 %v597_v46, 0.0 }
 0x102   : > { %v948_v59 = vmax.f32 %v599_v51, 0.0  ;;  %v950_v60 = vmax.f32 %v792_v52, 0.0 }
 0x103   : > { %v949_v62 = vmax.f32 %v601_v56, 0.0  ;;  %v951_v63 = vmax.f32 %v794_v57, 0.0 }
 0x104   : > { %v1068_v1 = vpack.c.bf16 %v948_v59, %v944_v58  ;;  %v1070_v2 = vpack.c.bf16 %v950_v60, %v946_v50 }
 0x105   : > { %v1069_v3 = vpack.c.bf16 %v949_v62, %v945_v61  ;;  %v1071_v4 = vpack.c.bf16 %v951_v63, %v947_v55  ;;  %v604_v5 = vpop.f32.mrb[8].mxu0  ;;  %v797_v6 = vpop.f32.mrb[8].mxu1 }
 0x106   : > { %v605_v7 = vadd.f32 %v604_v5, %v2884_v9  ;;  %v798_v8 = vadd.f32 %v797_v6, %v2886_v0  ;;  %v606_v12 = vpop.f32.mrb[9].mxu0  ;;  %v799_v13 = vpop.f32.mrb[9].mxu1 }
 0x107   : > { %v607_v14 = vadd.f32 %v606_v12, %v2888_v10  ;;  %v800_v15 = vadd.f32 %v799_v13, %v2890_v11  ;;  %v608_v16 = vpop.f32.mrb[10].mxu0  ;;  %v801_v17 = vpop.f32.mrb[10].mxu1  ;;  %1431 = vmatprep.mubr.bf16.mxu0 %v1069_v3  ;;  %1592 = vmatprep.mubr.bf16.mxu1 %v1071_v4 }
 0x108   : > { %v954_v18 = vmax.f32 %v798_v8, 0.0  ;;  %v609_v19 = vadd.f32 %v608_v16, %v2884_v9  ;;  %v802_v20 = vadd.f32 %v801_v17, %v2886_v0  ;;  %v610_v21 = vpop.f32.mrb[11].mxu0  ;;  %v803_v22 = vpop.f32.mrb[11].mxu1  ;;  %1432 = vmatmul.mubr.bf16.gmra.mrb[68].mxu0 %v1068_v1  ;;  %1593 = vmatmul.mubr.bf16.gmra.mrb[68].mxu1 %v1070_v2  ;;  %v952_v26 = vmax.f32 %v605_v7, 0.0 }
 0x109   : > { %v955_v23 = vmax.f32 %v800_v15, 0.0  ;;  %v611_v24 = vadd.f32 %v610_v21, %v2888_v10  ;;  %v804_v25 = vadd.f32 %v803_v22, %v2890_v11  ;;  %v953_v29 = vmax.f32 %v607_v14, 0.0 }
 0x10a   : > { %v956_v27 = vmax.f32 %v609_v19, 0.0  ;;  %v958_v28 = vmax.f32 %v802_v20, 0.0 }
 0x10b   : > { %v957_v30 = vmax.f32 %v611_v24, 0.0  ;;  %v959_v31 = vmax.f32 %v804_v25, 0.0 }
 0x10c   : > { %v1072_v32 = vpack.c.bf16 %v956_v27, %v952_v26  ;;  %v1074_v33 = vpack.c.bf16 %v958_v28, %v954_v18 }
 0x10d   : > { %v1073_v34 = vpack.c.bf16 %v957_v30, %v953_v29  ;;  %v1075_v35 = vpack.c.bf16 %v959_v31, %v955_v23  ;;  %v614_v36 = vpop.f32.mrb[12].mxu0  ;;  %v807_v37 = vpop.f32.mrb[12].mxu1 }
 0x10e   : > { %v615_v38 = vadd.f32 %v614_v36, %v2884_v9  ;;  %v808_v39 = vadd.f32 %v807_v37, %v2886_v0  ;;  %v616_v40 = vpop.f32.mrb[13].mxu0  ;;  %v809_v41 = vpop.f32.mrb[13].mxu1 }
 0x10f   : > { %v617_v42 = vadd.f32 %v616_v40, %v2888_v10  ;;  %v810_v43 = vadd.f32 %v809_v41, %v2890_v11  ;;  %v618_v44 = vpop.f32.mrb[14].mxu0  ;;  %v811_v45 = vpop.f32.mrb[14].mxu1  ;;  %1439 = vmatprep.mubr.bf16.mxu0 %v1073_v34  ;;  %1600 = vmatprep.mubr.bf16.mxu1 %v1075_v35 }
 0x110   : > { %v962_v46 = vmax.f32 %v808_v39, 0.0  ;;  %v619_v47 = vadd.f32 %v618_v44, %v2884_v9  ;;  %v812_v48 = vadd.f32 %v811_v45, %v2886_v0  ;;  %v620_v49 = vpop.f32.mrb[15].mxu0  ;;  %v813_v50 = vpop.f32.mrb[15].mxu1  ;;  %1440 = vmatmul.mubr.bf16.gmra.mrb[72].mxu0 %v1072_v32  ;;  %1601 = vmatmul.mubr.bf16.gmra.mrb[72].mxu1 %v1074_v33  ;;  %v960_v54 = vmax.f32 %v615_v38, 0.0 }
 0x111   : > { %v963_v51 = vmax.f32 %v810_v43, 0.0  ;;  %v621_v52 = vadd.f32 %v620_v49, %v2888_v10  ;;  %v814_v53 = vadd.f32 %v813_v50, %v2890_v11  ;;  %v961_v57 = vmax.f32 %v617_v42, 0.0 }
 0x112   : > { %v964_v55 = vmax.f32 %v619_v47, 0.0  ;;  %v966_v56 = vmax.f32 %v812_v48, 0.0 }
 0x113   : > { %v965_v58 = vmax.f32 %v621_v52, 0.0  ;;  %v967_v59 = vmax.f32 %v814_v53, 0.0 }
 0x114   : > { %v1076_v60 = vpack.c.bf16 %v964_v55, %v960_v54  ;;  %v1078_v61 = vpack.c.bf16 %v966_v56, %v962_v46 }
 0x115   : > { %v1077_v62 = vpack.c.bf16 %v965_v58, %v961_v57  ;;  %v1079_v63 = vpack.c.bf16 %v967_v59, %v963_v51  ;;  %v624_v1 = vpop.f32.mrb[16].mxu0  ;;  %v817_v2 = vpop.f32.mrb[16].mxu1 }
 0x116   : > { %v625_v3 = vadd.f32 %v624_v1, %v2884_v9  ;;  %v818_v4 = vadd.f32 %v817_v2, %v2886_v0  ;;  %v626_v5 = vpop.f32.mrb[17].mxu0  ;;  %v819_v6 = vpop.f32.mrb[17].mxu1 }
 0x117   : > { %v627_v7 = vadd.f32 %v626_v5, %v2888_v10  ;;  %v820_v8 = vadd.f32 %v819_v6, %v2890_v11  ;;  %v628_v12 = vpop.f32.mrb[18].mxu0  ;;  %v821_v13 = vpop.f32.mrb[18].mxu1  ;;  %1447 = vmatprep.mubr.bf16.mxu0 %v1077_v62  ;;  %1608 = vmatprep.mubr.bf16.mxu1 %v1079_v63 }
 0x118   : > { %v970_v14 = vmax.f32 %v818_v4, 0.0  ;;  %v629_v15 = vadd.f32 %v628_v12, %v2884_v9  ;;  %v822_v16 = vadd.f32 %v821_v13, %v2886_v0  ;;  %v630_v17 = vpop.f32.mrb[19].mxu0  ;;  %v823_v18 = vpop.f32.mrb[19].mxu1  ;;  %1448 = vmatmul.mubr.bf16.gmra.mrb[76].mxu0 %v1076_v60  ;;  %1609 = vmatmul.mubr.bf16.gmra.mrb[76].mxu1 %v1078_v61  ;;  %v968_v22 = vmax.f32 %v625_v3, 0.0 }
 0x119   : > { %v971_v19 = vmax.f32 %v820_v8, 0.0  ;;  %v631_v20 = vadd.f32 %v630_v17, %v2888_v10  ;;  %v824_v21 = vadd.f32 %v823_v18, %v2890_v11  ;;  %v969_v25 = vmax.f32 %v627_v7, 0.0 }
 0x11a   : > { %v972_v23 = vmax.f32 %v629_v15, 0.0  ;;  %v974_v24 = vmax.f32 %v822_v16, 0.0 }
 0x11b   : > { %v973_v26 = vmax.f32 %v631_v20, 0.0  ;;  %v975_v27 = vmax.f32 %v824_v21, 0.0 }
 0x11c   : > { %v1080_v28 = vpack.c.bf16 %v972_v23, %v968_v22  ;;  %v1082_v29 = vpack.c.bf16 %v974_v24, %v970_v14 }
 0x11d   : > { %v1081_v30 = vpack.c.bf16 %v973_v26, %v969_v25  ;;  %v1083_v31 = vpack.c.bf16 %v975_v27, %v971_v19  ;;  %v634_v32 = vpop.f32.mrb[20].mxu0  ;;  %v827_v33 = vpop.f32.mrb[20].mxu1 }
 0x11e   : > { %v635_v34 = vadd.f32 %v634_v32, %v2884_v9  ;;  %v828_v35 = vadd.f32 %v827_v33, %v2886_v0  ;;  %v636_v36 = vpop.f32.mrb[21].mxu0  ;;  %v829_v37 = vpop.f32.mrb[21].mxu1 }
 0x11f   : > { %v637_v38 = vadd.f32 %v636_v36, %v2888_v10  ;;  %v830_v39 = vadd.f32 %v829_v37, %v2890_v11  ;;  %v638_v40 = vpop.f32.mrb[22].mxu0  ;;  %v831_v41 = vpop.f32.mrb[22].mxu1  ;;  %1455 = vmatprep.mubr.bf16.mxu0 %v1081_v30  ;;  %1616 = vmatprep.mubr.bf16.mxu1 %v1083_v31 }
 0x120   : > { %v978_v42 = vmax.f32 %v828_v35, 0.0  ;;  %v639_v43 = vadd.f32 %v638_v40, %v2884_v9  ;;  %v832_v44 = vadd.f32 %v831_v41, %v2886_v0  ;;  %v640_v45 = vpop.f32.mrb[23].mxu0  ;;  %v833_v46 = vpop.f32.mrb[23].mxu1  ;;  %1456 = vmatmul.mubr.bf16.gmra.mrb[80].mxu0 %v1080_v28  ;;  %1617 = vmatmul.mubr.bf16.gmra.mrb[80].mxu1 %v1082_v29  ;;  %v976_v50 = vmax.f32 %v635_v34, 0.0 }
 0x121   : > { %v979_v47 = vmax.f32 %v830_v39, 0.0  ;;  %v641_v48 = vadd.f32 %v640_v45, %v2888_v10  ;;  %v834_v49 = vadd.f32 %v833_v46, %v2890_v11  ;;  %v977_v53 = vmax.f32 %v637_v38, 0.0 }
 0x122   : > { %v980_v51 = vmax.f32 %v639_v43, 0.0  ;;  %v982_v52 = vmax.f32 %v832_v44, 0.0 }
 0x123   : > { %v981_v54 = vmax.f32 %v641_v48, 0.0  ;;  %v983_v55 = vmax.f32 %v834_v49, 0.0 }
 0x124   : > { %v1084_v56 = vpack.c.bf16 %v980_v51, %v976_v50  ;;  %v1086_v57 = vpack.c.bf16 %v982_v52, %v978_v42 }
 0x125   : > { %v1085_v58 = vpack.c.bf16 %v981_v54, %v977_v53  ;;  %v1087_v59 = vpack.c.bf16 %v983_v55, %v979_v47  ;;  %v644_v60 = vpop.f32.mrb[24].mxu0  ;;  %v837_v61 = vpop.f32.mrb[24].mxu1 }
 0x126   : > { %v645_v62 = vadd.f32 %v644_v60, %v2884_v9  ;;  %v838_v63 = vadd.f32 %v837_v61, %v2886_v0  ;;  %v646_v1 = vpop.f32.mrb[25].mxu0  ;;  %v839_v2 = vpop.f32.mrb[25].mxu1 }
 0x127   : > { %v647_v3 = vadd.f32 %v646_v1, %v2888_v10  ;;  %v840_v4 = vadd.f32 %v839_v2, %v2890_v11  ;;  %v648_v5 = vpop.f32.mrb[26].mxu0  ;;  %v841_v6 = vpop.f32.mrb[26].mxu1  ;;  %1463 = vmatprep.mubr.bf16.mxu0 %v1085_v58  ;;  %1624 = vmatprep.mubr.bf16.mxu1 %v1087_v59 }
 0x128   : > { %v986_v7 = vmax.f32 %v838_v63, 0.0  ;;  %v649_v8 = vadd.f32 %v648_v5, %v2884_v9  ;;  %v842_v12 = vadd.f32 %v841_v6, %v2886_v0  ;;  %v650_v13 = vpop.f32.mrb[27].mxu0  ;;  %v843_v14 = vpop.f32.mrb[27].mxu1  ;;  %1464 = vmatmul.mubr.bf16.gmra.mrb[84].mxu0 %v1084_v56  ;;  %1625 = vmatmul.mubr.bf16.gmra.mrb[84].mxu1 %v1086_v57  ;;  %v984_v18 = vmax.f32 %v645_v62, 0.0 }
 0x129   : > { %v987_v15 = vmax.f32 %v840_v4, 0.0  ;;  %v651_v16 = vadd.f32 %v650_v13, %v2888_v10  ;;  %v844_v17 = vadd.f32 %v843_v14, %v2890_v11  ;;  %v985_v21 = vmax.f32 %v647_v3, 0.0 }
 0x12a   : > { %v988_v19 = vmax.f32 %v649_v8, 0.0  ;;  %v990_v20 = vmax.f32 %v842_v12, 0.0 }
 0x12b   : > { %v989_v22 = vmax.f32 %v651_v16, 0.0  ;;  %v991_v23 = vmax.f32 %v844_v17, 0.0 }
 0x12c   : > { %v1088_v24 = vpack.c.bf16 %v988_v19, %v984_v18  ;;  %v1090_v25 = vpack.c.bf16 %v990_v20, %v986_v7 }
 0x12d   : > { %v1089_v26 = vpack.c.bf16 %v989_v22, %v985_v21  ;;  %v1091_v27 = vpack.c.bf16 %v991_v23, %v987_v15  ;;  %v654_v28 = vpop.f32.mrb[28].mxu0  ;;  %v847_v29 = vpop.f32.mrb[28].mxu1 }
 0x12e   : > { %v655_v30 = vadd.f32 %v654_v28, %v2884_v9  ;;  %v848_v31 = vadd.f32 %v847_v29, %v2886_v0  ;;  %v656_v32 = vpop.f32.mrb[29].mxu0  ;;  %v849_v33 = vpop.f32.mrb[29].mxu1 }
 0x12f   : > { %v657_v34 = vadd.f32 %v656_v32, %v2888_v10  ;;  %v850_v35 = vadd.f32 %v849_v33, %v2890_v11  ;;  %v658_v36 = vpop.f32.mrb[30].mxu0  ;;  %v851_v37 = vpop.f32.mrb[30].mxu1  ;;  %1471 = vmatprep.mubr.bf16.mxu0 %v1089_v26  ;;  %1632 = vmatprep.mubr.bf16.mxu1 %v1091_v27 }
 0x130   : > { %v994_v38 = vmax.f32 %v848_v31, 0.0  ;;  %v659_v39 = vadd.f32 %v658_v36, %v2884_v9  ;;  %v852_v40 = vadd.f32 %v851_v37, %v2886_v0  ;;  %v660_v41 = vpop.f32.mrb[31].mxu0  ;;  %v853_v42 = vpop.f32.mrb[31].mxu1  ;;  %1472 = vmatmul.mubr.bf16.gmra.mrb[88].mxu0 %v1088_v24  ;;  %1633 = vmatmul.mubr.bf16.gmra.mrb[88].mxu1 %v1090_v25  ;;  %v992_v46 = vmax.f32 %v655_v30, 0.0 }
 0x131   : > { %v995_v43 = vmax.f32 %v850_v35, 0.0  ;;  %v661_v44 = vadd.f32 %v660_v41, %v2888_v10  ;;  %v854_v45 = vadd.f32 %v853_v42, %v2890_v11  ;;  %v993_v49 = vmax.f32 %v657_v34, 0.0 }
 0x132   : > { %v996_v47 = vmax.f32 %v659_v39, 0.0  ;;  %v998_v48 = vmax.f32 %v852_v40, 0.0 }
 0x133   : > { %v997_v50 = vmax.f32 %v661_v44, 0.0  ;;  %v999_v51 = vmax.f32 %v854_v45, 0.0 }
 0x134   : > { %v1092_v52 = vpack.c.bf16 %v996_v47, %v992_v46  ;;  %v1094_v53 = vpack.c.bf16 %v998_v48, %v994_v38 }
 0x135   : > { %v1093_v54 = vpack.c.bf16 %v997_v50, %v993_v49  ;;  %v1095_v55 = vpack.c.bf16 %v999_v51, %v995_v43  ;;  %v664_v56 = vpop.f32.mrb[32].mxu0  ;;  %v857_v57 = vpop.f32.mrb[32].mxu1 }
 0x136   : > { %v665_v58 = vadd.f32 %v664_v56, %v2884_v9  ;;  %v858_v59 = vadd.f32 %v857_v57, %v2886_v0  ;;  %v666_v60 = vpop.f32.mrb[33].mxu0  ;;  %v859_v61 = vpop.f32.mrb[33].mxu1 }
 0x137   : > { %v667_v62 = vadd.f32 %v666_v60, %v2888_v10  ;;  %v860_v63 = vadd.f32 %v859_v61, %v2890_v11  ;;  %v668_v1 = vpop.f32.mrb[34].mxu0  ;;  %v861_v2 = vpop.f32.mrb[34].mxu1  ;;  %1479 = vmatprep.mubr.bf16.mxu0 %v1093_v54  ;;  %1640 = vmatprep.mubr.bf16.mxu1 %v1095_v55 }
 0x138   : > { %v1002_v3 = vmax.f32 %v858_v59, 0.0  ;;  %v669_v4 = vadd.f32 %v668_v1, %v2884_v9  ;;  %v862_v5 = vadd.f32 %v861_v2, %v2886_v0  ;;  %v670_v6 = vpop.f32.mrb[35].mxu0  ;;  %v863_v7 = vpop.f32.mrb[35].mxu1  ;;  %1480 = vmatmul.mubr.bf16.gmra.mrb[92].mxu0 %v1092_v52  ;;  %1641 = vmatmul.mubr.bf16.gmra.mrb[92].mxu1 %v1094_v53  ;;  %v1000_v14 = vmax.f32 %v665_v58, 0.0 }
 0x139   : > { %v1003_v8 = vmax.f32 %v860_v63, 0.0  ;;  %v671_v12 = vadd.f32 %v670_v6, %v2888_v10  ;;  %v864_v13 = vadd.f32 %v863_v7, %v2890_v11  ;;  %v1001_v17 = vmax.f32 %v667_v62, 0.0 }
 0x13a   : > { %v1004_v15 = vmax.f32 %v669_v4, 0.0  ;;  %v1006_v16 = vmax.f32 %v862_v5, 0.0 }
 0x13b   : > { %v1005_v18 = vmax.f32 %v671_v12, 0.0  ;;  %v1007_v19 = vmax.f32 %v864_v13, 0.0 }
 0x13c   : > { %v1096_v20 = vpack.c.bf16 %v1004_v15, %v1000_v14  ;;  %v1098_v21 = vpack.c.bf16 %v1006_v16, %v1002_v3 }
 0x13d   : > { %v1097_v22 = vpack.c.bf16 %v1005_v18, %v1001_v17  ;;  %v1099_v23 = vpack.c.bf16 %v1007_v19, %v1003_v8  ;;  %v674_v24 = vpop.f32.mrb[36].mxu0  ;;  %v867_v25 = vpop.f32.mrb[36].mxu1 }
 0x13e   : > { %v675_v26 = vadd.f32 %v674_v24, %v2884_v9  ;;  %v868_v27 = vadd.f32 %v867_v25, %v2886_v0  ;;  %v676_v28 = vpop.f32.mrb[37].mxu0  ;;  %v869_v29 = vpop.f32.mrb[37].mxu1 }
 0x13f   : > { %v677_v30 = vadd.f32 %v676_v28, %v2888_v10  ;;  %v870_v31 = vadd.f32 %v869_v29, %v2890_v11  ;;  %v678_v32 = vpop.f32.mrb[38].mxu0  ;;  %v871_v33 = vpop.f32.mrb[38].mxu1  ;;  %1487 = vmatprep.mubr.bf16.mxu0 %v1097_v22  ;;  %1648 = vmatprep.mubr.bf16.mxu1 %v1099_v23 }
 0x140   : > { %v1010_v34 = vmax.f32 %v868_v27, 0.0  ;;  %v679_v35 = vadd.f32 %v678_v32, %v2884_v9  ;;  %v872_v36 = vadd.f32 %v871_v33, %v2886_v0  ;;  %v680_v37 = vpop.f32.mrb[39].mxu0  ;;  %v873_v38 = vpop.f32.mrb[39].mxu1  ;;  %1488 = vmatmul.mubr.bf16.gmra.mrb[96].mxu0 %v1096_v20  ;;  %1649 = vmatmul.mubr.bf16.gmra.mrb[96].mxu1 %v1098_v21  ;;  %v1008_v42 = vmax.f32 %v675_v26, 0.0 }
 0x141   : > { %v1011_v39 = vmax.f32 %v870_v31, 0.0  ;;  %v681_v40 = vadd.f32 %v680_v37, %v2888_v10  ;;  %v874_v41 = vadd.f32 %v873_v38, %v2890_v11  ;;  %v1009_v45 = vmax.f32 %v677_v30, 0.0 }
 0x142   : > { %v1012_v43 = vmax.f32 %v679_v35, 0.0  ;;  %v1014_v44 = vmax.f32 %v872_v36, 0.0 }
 0x143   : > { %v1013_v46 = vmax.f32 %v681_v40, 0.0  ;;  %v1015_v47 = vmax.f32 %v874_v41, 0.0 }
 0x144   : > { %v1100_v48 = vpack.c.bf16 %v1012_v43, %v1008_v42  ;;  %v1102_v49 = vpack.c.bf16 %v1014_v44, %v1010_v34 }
 0x145   : > { %v1101_v50 = vpack.c.bf16 %v1013_v46, %v1009_v45  ;;  %v1103_v51 = vpack.c.bf16 %v1015_v47, %v1011_v39  ;;  %v684_v52 = vpop.f32.mrb[40].mxu0  ;;  %v877_v53 = vpop.f32.mrb[40].mxu1 }
 0x146   : > { %v685_v54 = vadd.f32 %v684_v52, %v2884_v9  ;;  %v878_v55 = vadd.f32 %v877_v53, %v2886_v0  ;;  %v686_v56 = vpop.f32.mrb[41].mxu0  ;;  %v879_v57 = vpop.f32.mrb[41].mxu1 }
 0x147   : > { %v687_v58 = vadd.f32 %v686_v56, %v2888_v10  ;;  %v880_v59 = vadd.f32 %v879_v57, %v2890_v11  ;;  %v688_v60 = vpop.f32.mrb[42].mxu0  ;;  %v881_v61 = vpop.f32.mrb[42].mxu1  ;;  %1495 = vmatprep.mubr.bf16.mxu0 %v1101_v50  ;;  %1656 = vmatprep.mubr.bf16.mxu1 %v1103_v51 }
 0x148   : > { %v1018_v62 = vmax.f32 %v878_v55, 0.0  ;;  %v689_v63 = vadd.f32 %v688_v60, %v2884_v9  ;;  %v882_v1 = vadd.f32 %v881_v61, %v2886_v0  ;;  %v690_v2 = vpop.f32.mrb[43].mxu0  ;;  %v883_v3 = vpop.f32.mrb[43].mxu1  ;;  %1496 = vmatmul.mubr.bf16.gmra.mrb[100].mxu0 %v1100_v48  ;;  %1657 = vmatmul.mubr.bf16.gmra.mrb[100].mxu1 %v1102_v49  ;;  %v1016_v7 = vmax.f32 %v685_v54, 0.0 }
 0x149   : > { %v1019_v4 = vmax.f32 %v880_v59, 0.0  ;;  %v691_v5 = vadd.f32 %v690_v2, %v2888_v10  ;;  %v884_v6 = vadd.f32 %v883_v3, %v2890_v11  ;;  %v1017_v13 = vmax.f32 %v687_v58, 0.0 }
 0x14a   : > { %v1020_v8 = vmax.f32 %v689_v63, 0.0  ;;  %v1022_v12 = vmax.f32 %v882_v1, 0.0 }
 0x14b   : > { %v1021_v14 = vmax.f32 %v691_v5, 0.0  ;;  %v1023_v15 = vmax.f32 %v884_v6, 0.0 }
 0x14c   : > { %v1104_v16 = vpack.c.bf16 %v1020_v8, %v1016_v7  ;;  %v1106_v17 = vpack.c.bf16 %v1022_v12, %v1018_v62 }
 0x14d   : > { %v1105_v18 = vpack.c.bf16 %v1021_v14, %v1017_v13  ;;  %v1107_v19 = vpack.c.bf16 %v1023_v15, %v1019_v4  ;;  %v694_v20 = vpop.f32.mrb[44].mxu0  ;;  %v887_v21 = vpop.f32.mrb[44].mxu1 }
 0x14e   : > { %v695_v22 = vadd.f32 %v694_v20, %v2884_v9  ;;  %v888_v23 = vadd.f32 %v887_v21, %v2886_v0  ;;  %v696_v24 = vpop.f32.mrb[45].mxu0  ;;  %v889_v25 = vpop.f32.mrb[45].mxu1 }
 0x14f   : > { %v697_v26 = vadd.f32 %v696_v24, %v2888_v10  ;;  %v890_v27 = vadd.f32 %v889_v25, %v2890_v11  ;;  %v698_v28 = vpop.f32.mrb[46].mxu0  ;;  %v891_v29 = vpop.f32.mrb[46].mxu1  ;;  %1503 = vmatprep.mubr.bf16.mxu0 %v1105_v18  ;;  %1664 = vmatprep.mubr.bf16.mxu1 %v1107_v19 }
 0x150   : > { %v1026_v30 = vmax.f32 %v888_v23, 0.0  ;;  %v699_v31 = vadd.f32 %v698_v28, %v2884_v9  ;;  %v892_v32 = vadd.f32 %v891_v29, %v2886_v0  ;;  %v700_v33 = vpop.f32.mrb[47].mxu0  ;;  %v893_v34 = vpop.f32.mrb[47].mxu1  ;;  %1504 = vmatmul.mubr.bf16.gmra.mrb[104].mxu0 %v1104_v16  ;;  %1665 = vmatmul.mubr.bf16.gmra.mrb[104].mxu1 %v1106_v17  ;;  %v1024_v38 = vmax.f32 %v695_v22, 0.0 }
 0x151   : > { %v1027_v35 = vmax.f32 %v890_v27, 0.0  ;;  %v701_v36 = vadd.f32 %v700_v33, %v2888_v10  ;;  %v894_v37 = vadd.f32 %v893_v34, %v2890_v11  ;;  %v1025_v41 = vmax.f32 %v697_v26, 0.0 }
 0x152   : > { %v1028_v39 = vmax.f32 %v699_v31, 0.0  ;;  %v1030_v40 = vmax.f32 %v892_v32, 0.0 }
 0x153   : > { %v1029_v42 = vmax.f32 %v701_v36, 0.0  ;;  %v1031_v43 = vmax.f32 %v894_v37, 0.0 }
 0x154   : > { %v1108_v44 = vpack.c.bf16 %v1028_v39, %v1024_v38  ;;  %v1110_v45 = vpack.c.bf16 %v1030_v40, %v1026_v30 }
 0x155   : > { %v1109_v46 = vpack.c.bf16 %v1029_v42, %v1025_v41  ;;  %v1111_v47 = vpack.c.bf16 %v1031_v43, %v1027_v35  ;;  %v704_v48 = vpop.f32.mrb[48].mxu0  ;;  %v897_v49 = vpop.f32.mrb[48].mxu1 }
 0x156   : > { %v705_v50 = vadd.f32 %v704_v48, %v2884_v9  ;;  %v898_v51 = vadd.f32 %v897_v49, %v2886_v0  ;;  %v706_v52 = vpop.f32.mrb[49].mxu0  ;;  %v899_v53 = vpop.f32.mrb[49].mxu1 }
 0x157   : > { %v707_v54 = vadd.f32 %v706_v52, %v2888_v10  ;;  %v900_v55 = vadd.f32 %v899_v53, %v2890_v11  ;;  %v708_v56 = vpop.f32.mrb[50].mxu0  ;;  %v901_v57 = vpop.f32.mrb[50].mxu1  ;;  %1511 = vmatprep.mubr.bf16.mxu0 %v1109_v46  ;;  %1672 = vmatprep.mubr.bf16.mxu1 %v1111_v47 }
 0x158   : > { %v1034_v58 = vmax.f32 %v898_v51, 0.0  ;;  %v709_v59 = vadd.f32 %v708_v56, %v2884_v9  ;;  %v902_v60 = vadd.f32 %v901_v57, %v2886_v0  ;;  %v710_v61 = vpop.f32.mrb[51].mxu0  ;;  %v903_v62 = vpop.f32.mrb[51].mxu1  ;;  %1512 = vmatmul.mubr.bf16.gmra.mrb[108].mxu0 %v1108_v44  ;;  %1673 = vmatmul.mubr.bf16.gmra.mrb[108].mxu1 %v1110_v45  ;;  %v1032_v3 = vmax.f32 %v705_v50, 0.0 }
 0x159   : > { %v1035_v63 = vmax.f32 %v900_v55, 0.0  ;;  %v711_v1 = vadd.f32 %v710_v61, %v2888_v10  ;;  %v904_v2 = vadd.f32 %v903_v62, %v2890_v11  ;;  %v1033_v6 = vmax.f32 %v707_v54, 0.0 }
 0x15a   : > { %v1036_v4 = vmax.f32 %v709_v59, 0.0  ;;  %v1038_v5 = vmax.f32 %v902_v60, 0.0 }
 0x15b   : > { %v1037_v7 = vmax.f32 %v711_v1, 0.0  ;;  %v1039_v8 = vmax.f32 %v904_v2, 0.0 }
 0x15c   : > { %v1112_v12 = vpack.c.bf16 %v1036_v4, %v1032_v3  ;;  %v1114_v13 = vpack.c.bf16 %v1038_v5, %v1034_v58 }
 0x15d   : > { %v1113_v14 = vpack.c.bf16 %v1037_v7, %v1033_v6  ;;  %v1115_v15 = vpack.c.bf16 %v1039_v8, %v1035_v63  ;;  %v714_v16 = vpop.f32.mrb[52].mxu0  ;;  %v907_v17 = vpop.f32.mrb[52].mxu1 }
 0x15e   : > { %v715_v18 = vadd.f32 %v714_v16, %v2884_v9  ;;  %v908_v19 = vadd.f32 %v907_v17, %v2886_v0  ;;  %v716_v20 = vpop.f32.mrb[53].mxu0  ;;  %v909_v21 = vpop.f32.mrb[53].mxu1 }
 0x15f   : > { %v717_v22 = vadd.f32 %v716_v20, %v2888_v10  ;;  %v910_v23 = vadd.f32 %v909_v21, %v2890_v11  ;;  %v718_v24 = vpop.f32.mrb[54].mxu0  ;;  %v911_v25 = vpop.f32.mrb[54].mxu1  ;;  %1519 = vmatprep.mubr.bf16.mxu0 %v1113_v14  ;;  %1680 = vmatprep.mubr.bf16.mxu1 %v1115_v15 }
 0x160   : > { %v1042_v26 = vmax.f32 %v908_v19, 0.0  ;;  %v719_v27 = vadd.f32 %v718_v24, %v2884_v9  ;;  %v912_v28 = vadd.f32 %v911_v25, %v2886_v0  ;;  %v720_v29 = vpop.f32.mrb[55].mxu0  ;;  %v913_v30 = vpop.f32.mrb[55].mxu1  ;;  %1520 = vmatmul.mubr.bf16.gmra.mrb[112].mxu0 %v1112_v12  ;;  %1681 = vmatmul.mubr.bf16.gmra.mrb[112].mxu1 %v1114_v13  ;;  %v1040_v34 = vmax.f32 %v715_v18, 0.0 }
 0x161   : > { %v1043_v31 = vmax.f32 %v910_v23, 0.0  ;;  %v721_v32 = vadd.f32 %v720_v29, %v2888_v10  ;;  %v914_v33 = vadd.f32 %v913_v30, %v2890_v11  ;;  %v1041_v37 = vmax.f32 %v717_v22, 0.0 }
 0x162   : > { %v1044_v35 = vmax.f32 %v719_v27, 0.0  ;;  %v1046_v36 = vmax.f32 %v912_v28, 0.0 }
 0x163   : > { %v1045_v38 = vmax.f32 %v721_v32, 0.0  ;;  %v1047_v39 = vmax.f32 %v914_v33, 0.0 }
 0x164   : > { %v1116_v40 = vpack.c.bf16 %v1044_v35, %v1040_v34  ;;  %v1118_v41 = vpack.c.bf16 %v1046_v36, %v1042_v26 }
 0x165   : > { %v1117_v42 = vpack.c.bf16 %v1045_v38, %v1041_v37  ;;  %v1119_v43 = vpack.c.bf16 %v1047_v39, %v1043_v31  ;;  %v724_v44 = vpop.f32.mrb[56].mxu0  ;;  %v917_v45 = vpop.f32.mrb[56].mxu1 }
 0x166   : > { %v725_v46 = vadd.f32 %v724_v44, %v2884_v9  ;;  %v918_v47 = vadd.f32 %v917_v45, %v2886_v0  ;;  %v726_v48 = vpop.f32.mrb[57].mxu0  ;;  %v919_v49 = vpop.f32.mrb[57].mxu1 }
 0x167   : > { %v727_v50 = vadd.f32 %v726_v48, %v2888_v10  ;;  %v920_v51 = vadd.f32 %v919_v49, %v2890_v11  ;;  %v728_v52 = vpop.f32.mrb[58].mxu0  ;;  %v921_v53 = vpop.f32.mrb[58].mxu1  ;;  %1527 = vmatprep.mubr.bf16.mxu0 %v1117_v42  ;;  %1688 = vmatprep.mubr.bf16.mxu1 %v1119_v43 }
 0x168   : > { %v1050_v54 = vmax.f32 %v918_v47, 0.0  ;;  %v729_v55 = vadd.f32 %v728_v52, %v2884_v9  ;;  %v922_v56 = vadd.f32 %v921_v53, %v2886_v0  ;;  %v730_v57 = vpop.f32.mrb[59].mxu0  ;;  %v923_v58 = vpop.f32.mrb[59].mxu1  ;;  %1528 = vmatmul.mubr.bf16.gmra.mrb[116].mxu0 %v1116_v40  ;;  %1689 = vmatmul.mubr.bf16.gmra.mrb[116].mxu1 %v1118_v41  ;;  %v1048_v62 = vmax.f32 %v725_v46, 0.0 }
 0x169   : > { %v1051_v59 = vmax.f32 %v920_v51, 0.0  ;;  %v731_v60 = vadd.f32 %v730_v57, %v2888_v10  ;;  %v924_v61 = vadd.f32 %v923_v58, %v2890_v11  ;;  %v1049_v2 = vmax.f32 %v727_v50, 0.0 }
 0x16a   : > { %v1052_v63 = vmax.f32 %v729_v55, 0.0  ;;  %v1054_v1 = vmax.f32 %v922_v56, 0.0 }
 0x16b   : > { %v1053_v3 = vmax.f32 %v731_v60, 0.0  ;;  %v1055_v4 = vmax.f32 %v924_v61, 0.0 }
 0x16c   : > { %v1120_v5 = vpack.c.bf16 %v1052_v63, %v1048_v62  ;;  %v1122_v6 = vpack.c.bf16 %v1054_v1, %v1050_v54 }
 0x16d   : > { %v1121_v7 = vpack.c.bf16 %v1053_v3, %v1049_v2  ;;  %v1123_v8 = vpack.c.bf16 %v1055_v4, %v1051_v59  ;;  %v734_v12 = vpop.f32.mrb[60].mxu0  ;;  %v927_v13 = vpop.f32.mrb[60].mxu1 }
 0x16e   : > { %v735_v14 = vadd.f32 %v734_v12, %v2884_v9  ;;  %v928_v15 = vadd.f32 %v927_v13, %v2886_v0  ;;  %v736_v16 = vpop.f32.mrb[61].mxu0  ;;  %v929_v17 = vpop.f32.mrb[61].mxu1 }
 0x16f   : > { %v737_v18 = vadd.f32 %v736_v16, %v2888_v10  ;;  %v930_v19 = vadd.f32 %v929_v17, %v2890_v11  ;;  %v738_v20 = vpop.f32.mrb[62].mxu0  ;;  %v931_v21 = vpop.f32.mrb[62].mxu1  ;;  %1535 = vmatprep.mubr.bf16.mxu0 %v1121_v7  ;;  %1696 = vmatprep.mubr.bf16.mxu1 %v1123_v8 }
 0x170   : > { %v1058_v22 = vmax.f32 %v928_v15, 0.0  ;;  %v739_v23 = vadd.f32 %v738_v20, %v2884_v9  ;;  %v932_v24 = vadd.f32 %v931_v21, %v2886_v0  ;;  %v740_v25 = vpop.f32.mrb[63].mxu0  ;;  %v933_v26 = vpop.f32.mrb[63].mxu1  ;;  %1536 = vmatmul.mubr.bf16.gmra.mrb[120].mxu0 %v1120_v5  ;;  %1697 = vmatmul.mubr.bf16.gmra.mrb[120].mxu1 %v1122_v6  ;;  %v1056_v30 = vmax.f32 %v735_v14, 0.0 }
 0x171   : > { %v1059_v27 = vmax.f32 %v930_v19, 0.0  ;;  %v741_v28 = vadd.f32 %v740_v25, %v2888_v10  ;;  %v934_v29 = vadd.f32 %v933_v26, %v2890_v11  ;;  %v1057_v33 = vmax.f32 %v737_v18, 0.0  ;;  %v3023_v10 = vld [vmem:[%s3093_s4] ss:$0 sm:$0xff] }
 0x172   : > { %v1060_v31 = vmax.f32 %v739_v23, 0.0  ;;  %v1062_v32 = vmax.f32 %v932_v24, 0.0 }
 0x173   : > { %v1061_v34 = vmax.f32 %v741_v28, 0.0  ;;  %v1063_v35 = vmax.f32 %v934_v29, 0.0 }
 0x174   : > { %v1124_v36 = vpack.c.bf16 %v1060_v31, %v1056_v30  ;;  %v1126_v37 = vpack.c.bf16 %v1062_v32, %v1058_v22 }
 0x175   : > { %v1125_v9 = vpack.c.bf16 %v1061_v34, %v1057_v33  ;;  %v1127_v38 = vpack.c.bf16 %v1063_v35, %v1059_v27 }
 0x177   : > { %1543 = vmatprep.mubr.bf16.mxu0 %v1125_v9  ;;  %1704 = vmatprep.mubr.bf16.mxu1 %v1127_v38 }
 0x178   : > { %1544 = vmatmul.mubr.bf16.gmra.mrb[124].mxu0 %v1124_v36  ;;  %1705 = vmatmul.mubr.bf16.gmra.mrb[124].mxu1 %v1126_v37 }
 0x1d3   : > { %v2287_v0 = vpop.f32.mrb[64].mxu0  ;;  %v2399_v39 = vpop.f32.mrb[64].mxu1 }
 0x1d4   : > { %v2288_v11 = vpop.f32.mrb[65].mxu0  ;;  %v2400_v40 = vpop.f32.mrb[65].mxu1 }
 0x1d5   : > { %v2289_v41 = vadd.f32 %v2288_v11, %v2287_v0  ;;  %v2401_v42 = vadd.f32 %v2400_v40, %v2399_v39  ;;  %v2290_v43 = vpop.f32.mrb[66].mxu0  ;;  %v2402_v44 = vpop.f32.mrb[66].mxu1 }
 0x1d6   : > { %v2291_v45 = vpop.f32.mrb[67].mxu0  ;;  %v2403_v46 = vpop.f32.mrb[67].mxu1 }
 0x1d7   : > { %v1426_v47 = vadd.f32 %v2289_v41, %v3023_v10  ;;  %v2292_v48 = vadd.f32 %v2291_v45, %v2290_v43  ;;  %v2404_v49 = vadd.f32 %v2403_v46, %v2402_v44 }
 0x1d9   : > { %v1587_v50 = vadd.f32 %v2401_v42, %v1426_v47  ;;  %v1429_v51 = vadd.f32 %v2292_v48, %v3023_v10 }
 0x1db   : > { %v1590_v52 = vadd.f32 %v2404_v49, %v1429_v51  ;;  %v2293_v53 = vpop.f32.mrb[68].mxu0  ;;  %v2405_v54 = vpop.f32.mrb[68].mxu1  ;;  %v1713_v57 = vmax.f32 %v1587_v50, 0.0 }
 0x1dc   : > { %v2294_v55 = vpop.f32.mrb[69].mxu0  ;;  %v2406_v56 = vpop.f32.mrb[69].mxu1 }
 0x1dd   : > { %v1714_v58 = vmax.f32 %v1590_v52, 0.0  ;;  %v2295_v59 = vadd.f32 %v2294_v55, %v2293_v53  ;;  %v2407_v60 = vadd.f32 %v2406_v56, %v2405_v54  ;;  %v2296_v61 = vpop.f32.mrb[70].mxu0  ;;  %v2408_v62 = vpop.f32.mrb[70].mxu1 }
 0x1de   : > { %v2297_v63 = vpop.f32.mrb[71].mxu0  ;;  %v2409_v1 = vpop.f32.mrb[71].mxu1 }
 0x1df   : > { %v2179_v2 = vpack.c.bf16 %v1714_v58, %v1713_v57  ;;  %v1434_v3 = vadd.f32 %v2295_v59, %v3023_v10  ;;  %v2298_v4 = vadd.f32 %v2297_v63, %v2296_v61  ;;  %v2410_v5 = vadd.f32 %v2409_v1, %v2408_v62 }
 0x1e1   : > { %2180 = vst [vmem:[%s3032_s28] sm:$0xff] %v2179_v2   ;;  %v1595_v6 = vadd.f32 %v2407_v60, %v1434_v3  ;;  %v1437_v7 = vadd.f32 %v2298_v4, %v3023_v10 }
 0x1e3   : > { %v1598_v8 = vadd.f32 %v2410_v5, %v1437_v7  ;;  %v2299_v12 = vpop.f32.mrb[72].mxu0  ;;  %v2411_v13 = vpop.f32.mrb[72].mxu1  ;;  %v1715_v16 = vmax.f32 %v1595_v6, 0.0 }
 0x1e4   : > { %v2300_v14 = vpop.f32.mrb[73].mxu0  ;;  %v2412_v15 = vpop.f32.mrb[73].mxu1 }
 0x1e5   : > { %v1716_v17 = vmax.f32 %v1598_v8, 0.0  ;;  %v2301_v18 = vadd.f32 %v2300_v14, %v2299_v12  ;;  %v2413_v19 = vadd.f32 %v2412_v15, %v2411_v13  ;;  %v2302_v20 = vpop.f32.mrb[74].mxu0  ;;  %v2414_v21 = vpop.f32.mrb[74].mxu1 }
 0x1e6   : > { %v2303_v22 = vpop.f32.mrb[75].mxu0  ;;  %v2415_v23 = vpop.f32.mrb[75].mxu1 }
 0x1e7   : > { %v2184_v24 = vpack.c.bf16 %v1716_v17, %v1715_v16  ;;  %v1442_v25 = vadd.f32 %v2301_v18, %v3023_v10  ;;  %v2304_v26 = vadd.f32 %v2303_v22, %v2302_v20  ;;  %v2416_v27 = vadd.f32 %v2415_v23, %v2414_v21 }
 0x1e9   : > { %2256 = vst [vmem:[%s3032_s28 + $0x8] sm:$0xff] %v2184_v24   ;;  %v1603_v28 = vadd.f32 %v2413_v19, %v1442_v25  ;;  %v1445_v29 = vadd.f32 %v2304_v26, %v3023_v10 }
 0x1eb   : > { %v1606_v30 = vadd.f32 %v2416_v27, %v1445_v29  ;;  %v2305_v31 = vpop.f32.mrb[76].mxu0  ;;  %v2417_v32 = vpop.f32.mrb[76].mxu1  ;;  %v1717_v35 = vmax.f32 %v1603_v28, 0.0 }
 0x1ec   : > { %v2306_v33 = vpop.f32.mrb[77].mxu0  ;;  %v2418_v34 = vpop.f32.mrb[77].mxu1 }
 0x1ed   : > { %v1718_v36 = vmax.f32 %v1606_v30, 0.0  ;;  %v2307_v37 = vadd.f32 %v2306_v33, %v2305_v31  ;;  %v2419_v9 = vadd.f32 %v2418_v34, %v2417_v32  ;;  %v2308_v38 = vpop.f32.mrb[78].mxu0  ;;  %v2420_v0 = vpop.f32.mrb[78].mxu1 }
 0x1ee   : > { %v2309_v39 = vpop.f32.mrb[79].mxu0  ;;  %v2421_v11 = vpop.f32.mrb[79].mxu1 }
 0x1ef   : > { %v2189_v40 = vpack.c.bf16 %v1718_v36, %v1717_v35  ;;  %v1450_v41 = vadd.f32 %v2307_v37, %v3023_v10  ;;  %v2310_v42 = vadd.f32 %v2309_v39, %v2308_v38  ;;  %v2422_v43 = vadd.f32 %v2421_v11, %v2420_v0 }
 0x1f1   : > { %2257 = vst [vmem:[%s3032_s28 + $0x10] sm:$0xff] %v2189_v40   ;;  %v1611_v44 = vadd.f32 %v2419_v9, %v1450_v41  ;;  %v1453_v45 = vadd.f32 %v2310_v42, %v3023_v10 }
 0x1f3   : > { %v1614_v46 = vadd.f32 %v2422_v43, %v1453_v45  ;;  %v2311_v47 = vpop.f32.mrb[80].mxu0  ;;  %v2423_v48 = vpop.f32.mrb[80].mxu1  ;;  %v1719_v51 = vmax.f32 %v1611_v44, 0.0 }
 0x1f4   : > { %v2312_v49 = vpop.f32.mrb[81].mxu0  ;;  %v2424_v50 = vpop.f32.mrb[81].mxu1 }
 0x1f5   : > { %v1720_v52 = vmax.f32 %v1614_v46, 0.0  ;;  %v2313_v53 = vadd.f32 %v2312_v49, %v2311_v47  ;;  %v2425_v54 = vadd.f32 %v2424_v50, %v2423_v48  ;;  %v2314_v55 = vpop.f32.mrb[82].mxu0  ;;  %v2426_v56 = vpop.f32.mrb[82].mxu1 }
 0x1f6   : > { %v2315_v57 = vpop.f32.mrb[83].mxu0  ;;  %v2427_v58 = vpop.f32.mrb[83].mxu1 }
 0x1f7   : > { %v2194_v59 = vpack.c.bf16 %v1720_v52, %v1719_v51  ;;  %v1458_v60 = vadd.f32 %v2313_v53, %v3023_v10  ;;  %v2316_v61 = vadd.f32 %v2315_v57, %v2314_v55  ;;  %v2428_v62 = vadd.f32 %v2427_v58, %v2426_v56 }
 0x1f9   : > { %2258 = vst [vmem:[%s3032_s28 + $0x18] sm:$0xff] %v2194_v59   ;;  %v1619_v63 = vadd.f32 %v2425_v54, %v1458_v60  ;;  %v1461_v1 = vadd.f32 %v2316_v61, %v3023_v10 }
 0x1fb   : > { %v1622_v2 = vadd.f32 %v2428_v62, %v1461_v1  ;;  %v2317_v3 = vpop.f32.mrb[84].mxu0  ;;  %v2429_v4 = vpop.f32.mrb[84].mxu1  ;;  %v1721_v7 = vmax.f32 %v1619_v63, 0.0 }
 0x1fc   : > { %v2318_v5 = vpop.f32.mrb[85].mxu0  ;;  %v2430_v6 = vpop.f32.mrb[85].mxu1 }
 0x1fd   : > { %v1722_v8 = vmax.f32 %v1622_v2, 0.0  ;;  %v2319_v12 = vadd.f32 %v2318_v5, %v2317_v3  ;;  %v2431_v13 = vadd.f32 %v2430_v6, %v2429_v4  ;;  %v2320_v14 = vpop.f32.mrb[86].mxu0  ;;  %v2432_v15 = vpop.f32.mrb[86].mxu1 }
 0x1fe   : > { %v2321_v16 = vpop.f32.mrb[87].mxu0  ;;  %v2433_v17 = vpop.f32.mrb[87].mxu1 }
 0x1ff   : > { %v2199_v18 = vpack.c.bf16 %v1722_v8, %v1721_v7  ;;  %v1466_v19 = vadd.f32 %v2319_v12, %v3023_v10  ;;  %v2322_v20 = vadd.f32 %v2321_v16, %v2320_v14  ;;  %v2434_v21 = vadd.f32 %v2433_v17, %v2432_v15 }
 0x201   : > { %2259 = vst [vmem:[%s3032_s28 + $0x20] sm:$0xff] %v2199_v18   ;;  %v1627_v22 = vadd.f32 %v2431_v13, %v1466_v19  ;;  %v1469_v23 = vadd.f32 %v2322_v20, %v3023_v10 }
 0x203   : > { %v1630_v24 = vadd.f32 %v2434_v21, %v1469_v23  ;;  %v2323_v25 = vpop.f32.mrb[88].mxu0  ;;  %v2435_v26 = vpop.f32.mrb[88].mxu1  ;;  %v1723_v29 = vmax.f32 %v1627_v22, 0.0 }
 0x204   : > { %v2324_v27 = vpop.f32.mrb[89].mxu0  ;;  %v2436_v28 = vpop.f32.mrb[89].mxu1 }
 0x205   : > { %v1724_v30 = vmax.f32 %v1630_v24, 0.0  ;;  %v2325_v31 = vadd.f32 %v2324_v27, %v2323_v25  ;;  %v2437_v32 = vadd.f32 %v2436_v28, %v2435_v26  ;;  %v2326_v33 = vpop.f32.mrb[90].mxu0  ;;  %v2438_v34 = vpop.f32.mrb[90].mxu1 }
 0x206   : > { %v2327_v35 = vpop.f32.mrb[91].mxu0  ;;  %v2439_v36 = vpop.f32.mrb[91].mxu1 }
 0x207   : > { %v2204_v37 = vpack.c.bf16 %v1724_v30, %v1723_v29  ;;  %v1474_v9 = vadd.f32 %v2325_v31, %v3023_v10  ;;  %v2328_v38 = vadd.f32 %v2327_v35, %v2326_v33  ;;  %v2440_v0 = vadd.f32 %v2439_v36, %v2438_v34 }
 0x209   : > { %2260 = vst [vmem:[%s3032_s28 + $0x28] sm:$0xff] %v2204_v37   ;;  %v1635_v39 = vadd.f32 %v2437_v32, %v1474_v9  ;;  %v1477_v11 = vadd.f32 %v2328_v38, %v3023_v10 }
 0x20b   : > { %v1638_v40 = vadd.f32 %v2440_v0, %v1477_v11  ;;  %v2329_v41 = vpop.f32.mrb[92].mxu0  ;;  %v2441_v42 = vpop.f32.mrb[92].mxu1  ;;  %v1725_v45 = vmax.f32 %v1635_v39, 0.0 }
 0x20c   : > { %v2330_v43 = vpop.f32.mrb[93].mxu0  ;;  %v2442_v44 = vpop.f32.mrb[93].mxu1 }
 0x20d   : > { %v1726_v46 = vmax.f32 %v1638_v40, 0.0  ;;  %v2331_v47 = vadd.f32 %v2330_v43, %v2329_v41  ;;  %v2443_v48 = vadd.f32 %v2442_v44, %v2441_v42  ;;  %v2332_v49 = vpop.f32.mrb[94].mxu0  ;;  %v2444_v50 = vpop.f32.mrb[94].mxu1 }
 0x20e   : > { %v2333_v51 = vpop.f32.mrb[95].mxu0  ;;  %v2445_v52 = vpop.f32.mrb[95].mxu1 }
 0x20f   : > { %v2209_v53 = vpack.c.bf16 %v1726_v46, %v1725_v45  ;;  %v1482_v54 = vadd.f32 %v2331_v47, %v3023_v10  ;;  %v2334_v55 = vadd.f32 %v2333_v51, %v2332_v49  ;;  %v2446_v56 = vadd.f32 %v2445_v52, %v2444_v50 }
 0x211   : > { %2261 = vst [vmem:[%s3032_s28 + $0x30] sm:$0xff] %v2209_v53   ;;  %v1643_v57 = vadd.f32 %v2443_v48, %v1482_v54  ;;  %v1485_v58 = vadd.f32 %v2334_v55, %v3023_v10 }
 0x213   : > { %v1646_v59 = vadd.f32 %v2446_v56, %v1485_v58  ;;  %v2335_v60 = vpop.f32.mrb[96].mxu0  ;;  %v2447_v61 = vpop.f32.mrb[96].mxu1  ;;  %v1727_v1 = vmax.f32 %v1643_v57, 0.0 }
 0x214   : > { %v2336_v62 = vpop.f32.mrb[97].mxu0  ;;  %v2448_v63 = vpop.f32.mrb[97].mxu1 }
 0x215   : > { %v1728_v2 = vmax.f32 %v1646_v59, 0.0  ;;  %v2337_v3 = vadd.f32 %v2336_v62, %v2335_v60  ;;  %v2449_v4 = vadd.f32 %v2448_v63, %v2447_v61  ;;  %v2338_v5 = vpop.f32.mrb[98].mxu0  ;;  %v2450_v6 = vpop.f32.mrb[98].mxu1 }
 0x216   : > { %v2339_v7 = vpop.f32.mrb[99].mxu0  ;;  %v2451_v8 = vpop.f32.mrb[99].mxu1 }
 0x217   : > { %v2214_v12 = vpack.c.bf16 %v1728_v2, %v1727_v1  ;;  %v1490_v13 = vadd.f32 %v2337_v3, %v3023_v10  ;;  %v2340_v14 = vadd.f32 %v2339_v7, %v2338_v5  ;;  %v2452_v15 = vadd.f32 %v2451_v8, %v2450_v6 }
 0x219   : > { %2262 = vst [vmem:[%s3032_s28 + $0x38] sm:$0xff] %v2214_v12   ;;  %v1651_v16 = vadd.f32 %v2449_v4, %v1490_v13  ;;  %v1493_v17 = vadd.f32 %v2340_v14, %v3023_v10 }
 0x21b   : > { %v1654_v18 = vadd.f32 %v2452_v15, %v1493_v17  ;;  %v2341_v19 = vpop.f32.mrb[100].mxu0  ;;  %v2453_v20 = vpop.f32.mrb[100].mxu1  ;;  %v1729_v23 = vmax.f32 %v1651_v16, 0.0 }
 0x21c   : > { %v2342_v21 = vpop.f32.mrb[101].mxu0  ;;  %v2454_v22 = vpop.f32.mrb[101].mxu1 }
 0x21d   : > { %v1730_v24 = vmax.f32 %v1654_v18, 0.0  ;;  %v2343_v25 = vadd.f32 %v2342_v21, %v2341_v19  ;;  %v2455_v26 = vadd.f32 %v2454_v22, %v2453_v20  ;;  %v2344_v27 = vpop.f32.mrb[102].mxu0  ;;  %v2456_v28 = vpop.f32.mrb[102].mxu1 }
 0x21e   : > { %v2345_v29 = vpop.f32.mrb[103].mxu0  ;;  %v2457_v30 = vpop.f32.mrb[103].mxu1 }
 0x21f   : > { %v2219_v31 = vpack.c.bf16 %v1730_v24, %v1729_v23  ;;  %v1498_v32 = vadd.f32 %v2343_v25, %v3023_v10  ;;  %v2346_v33 = vadd.f32 %v2345_v29, %v2344_v27  ;;  %v2458_v34 = vadd.f32 %v2457_v30, %v2456_v28 }
 0x221   : > { %2263 = vst [vmem:[%s3032_s28 + $0x40] sm:$0xff] %v2219_v31   ;;  %v1659_v35 = vadd.f32 %v2455_v26, %v1498_v32  ;;  %v1501_v36 = vadd.f32 %v2346_v33, %v3023_v10 }
 0x223   : > { %v1662_v37 = vadd.f32 %v2458_v34, %v1501_v36  ;;  %v2347_v9 = vpop.f32.mrb[104].mxu0  ;;  %v2459_v38 = vpop.f32.mrb[104].mxu1  ;;  %v1731_v11 = vmax.f32 %v1659_v35, 0.0 }
 0x224   : > { %v2348_v0 = vpop.f32.mrb[105].mxu0  ;;  %v2460_v39 = vpop.f32.mrb[105].mxu1 }
 0x225   : > { %v1732_v40 = vmax.f32 %v1662_v37, 0.0  ;;  %v2349_v41 = vadd.f32 %v2348_v0, %v2347_v9  ;;  %v2461_v42 = vadd.f32 %v2460_v39, %v2459_v38  ;;  %v2350_v43 = vpop.f32.mrb[106].mxu0  ;;  %v2462_v44 = vpop.f32.mrb[106].mxu1 }
 0x226   : > { %v2351_v45 = vpop.f32.mrb[107].mxu0  ;;  %v2463_v46 = vpop.f32.mrb[107].mxu1 }
 0x227   : > { %v2224_v47 = vpack.c.bf16 %v1732_v40, %v1731_v11  ;;  %v1506_v48 = vadd.f32 %v2349_v41, %v3023_v10  ;;  %v2352_v49 = vadd.f32 %v2351_v45, %v2350_v43  ;;  %v2464_v50 = vadd.f32 %v2463_v46, %v2462_v44 }
 0x229   : > { %2264 = vst [vmem:[%s3032_s28 + $0x48] sm:$0xff] %v2224_v47   ;;  %v1667_v51 = vadd.f32 %v2461_v42, %v1506_v48  ;;  %v1509_v52 = vadd.f32 %v2352_v49, %v3023_v10 }
 0x22b   : > { %v1670_v53 = vadd.f32 %v2464_v50, %v1509_v52  ;;  %v2353_v54 = vpop.f32.mrb[108].mxu0  ;;  %v2465_v55 = vpop.f32.mrb[108].mxu1  ;;  %v1733_v58 = vmax.f32 %v1667_v51, 0.0 }
 0x22c   : > { %v2354_v56 = vpop.f32.mrb[109].mxu0  ;;  %v2466_v57 = vpop.f32.mrb[109].mxu1 }
 0x22d   : > { %v1734_v59 = vmax.f32 %v1670_v53, 0.0  ;;  %v2355_v60 = vadd.f32 %v2354_v56, %v2353_v54  ;;  %v2467_v61 = vadd.f32 %v2466_v57, %v2465_v55  ;;  %v2356_v62 = vpop.f32.mrb[110].mxu0  ;;  %v2468_v63 = vpop.f32.mrb[110].mxu1 }
 0x22e   : > { %v2357_v1 = vpop.f32.mrb[111].mxu0  ;;  %v2469_v2 = vpop.f32.mrb[111].mxu1 }
 0x22f   : > { %v2229_v3 = vpack.c.bf16 %v1734_v59, %v1733_v58  ;;  %v1514_v4 = vadd.f32 %v2355_v60, %v3023_v10  ;;  %v2358_v5 = vadd.f32 %v2357_v1, %v2356_v62  ;;  %v2470_v6 = vadd.f32 %v2469_v2, %v2468_v63 }
 0x231   : > { %2265 = vst [vmem:[%s3032_s28 + $0x50] sm:$0xff] %v2229_v3   ;;  %v1675_v7 = vadd.f32 %v2467_v61, %v1514_v4  ;;  %v1517_v8 = vadd.f32 %v2358_v5, %v3023_v10 }
 0x233   : > { %v1678_v12 = vadd.f32 %v2470_v6, %v1517_v8  ;;  %v2359_v13 = vpop.f32.mrb[112].mxu0  ;;  %v2471_v14 = vpop.f32.mrb[112].mxu1  ;;  %v1735_v17 = vmax.f32 %v1675_v7, 0.0 }
 0x234   : > { %v2360_v15 = vpop.f32.mrb[113].mxu0  ;;  %v2472_v16 = vpop.f32.mrb[113].mxu1 }
 0x235   : > { %v1736_v18 = vmax.f32 %v1678_v12, 0.0  ;;  %v2361_v19 = vadd.f32 %v2360_v15, %v2359_v13  ;;  %v2473_v20 = vadd.f32 %v2472_v16, %v2471_v14  ;;  %v2362_v21 = vpop.f32.mrb[114].mxu0  ;;  %v2474_v22 = vpop.f32.mrb[114].mxu1 }
 0x236   : > { %v2363_v23 = vpop.f32.mrb[115].mxu0  ;;  %v2475_v24 = vpop.f32.mrb[115].mxu1 }
 0x237   : > { %v2234_v25 = vpack.c.bf16 %v1736_v18, %v1735_v17  ;;  %v1522_v26 = vadd.f32 %v2361_v19, %v3023_v10  ;;  %v2364_v27 = vadd.f32 %v2363_v23, %v2362_v21  ;;  %v2476_v28 = vadd.f32 %v2475_v24, %v2474_v22 }
 0x239   : > { %2266 = vst [vmem:[%s3032_s28 + $0x58] sm:$0xff] %v2234_v25   ;;  %v1683_v29 = vadd.f32 %v2473_v20, %v1522_v26  ;;  %v1525_v30 = vadd.f32 %v2364_v27, %v3023_v10 }
 0x23b   : > { %v1686_v31 = vadd.f32 %v2476_v28, %v1525_v30  ;;  %v2365_v32 = vpop.f32.mrb[116].mxu0  ;;  %v2477_v33 = vpop.f32.mrb[116].mxu1  ;;  %v1737_v36 = vmax.f32 %v1683_v29, 0.0 }
 0x23c   : > { %v2366_v34 = vpop.f32.mrb[117].mxu0  ;;  %v2478_v35 = vpop.f32.mrb[117].mxu1 }
 0x23d   : > { %v1738_v37 = vmax.f32 %v1686_v31, 0.0  ;;  %v2367_v9 = vadd.f32 %v2366_v34, %v2365_v32  ;;  %v2479_v38 = vadd.f32 %v2478_v35, %v2477_v33  ;;  %v2368_v0 = vpop.f32.mrb[118].mxu0  ;;  %v2480_v39 = vpop.f32.mrb[118].mxu1 }
 0x23e   : > { %v2369_v11 = vpop.f32.mrb[119].mxu0  ;;  %v2481_v40 = vpop.f32.mrb[119].mxu1 }
 0x23f   : > { %v2239_v41 = vpack.c.bf16 %v1738_v37, %v1737_v36  ;;  %v1530_v42 = vadd.f32 %v2367_v9, %v3023_v10  ;;  %v2370_v43 = vadd.f32 %v2369_v11, %v2368_v0  ;;  %v2482_v44 = vadd.f32 %v2481_v40, %v2480_v39 }
 0x241   : > { %2267 = vst [vmem:[%s3032_s28 + $0x60] sm:$0xff] %v2239_v41   ;;  %v1691_v45 = vadd.f32 %v2479_v38, %v1530_v42  ;;  %v1533_v46 = vadd.f32 %v2370_v43, %v3023_v10 }
 0x243   : > { %v1694_v47 = vadd.f32 %v2482_v44, %v1533_v46  ;;  %v2371_v48 = vpop.f32.mrb[120].mxu0  ;;  %v2483_v49 = vpop.f32.mrb[120].mxu1  ;;  %v1739_v52 = vmax.f32 %v1691_v45, 0.0 }
 0x244   : > { %v2372_v50 = vpop.f32.mrb[121].mxu0  ;;  %v2484_v51 = vpop.f32.mrb[121].mxu1 }
 0x245   : > { %v1740_v53 = vmax.f32 %v1694_v47, 0.0  ;;  %v2373_v54 = vadd.f32 %v2372_v50, %v2371_v48  ;;  %v2485_v55 = vadd.f32 %v2484_v51, %v2483_v49  ;;  %v2374_v56 = vpop.f32.mrb[122].mxu0  ;;  %v2486_v57 = vpop.f32.mrb[122].mxu1 }
 0x246   : > { %v2375_v58 = vpop.f32.mrb[123].mxu0  ;;  %v2487_v59 = vpop.f32.mrb[123].mxu1 }
 0x247   : > { %v2244_v60 = vpack.c.bf16 %v1740_v53, %v1739_v52  ;;  %v1538_v61 = vadd.f32 %v2373_v54, %v3023_v10  ;;  %v2376_v62 = vadd.f32 %v2375_v58, %v2374_v56  ;;  %v2488_v63 = vadd.f32 %v2487_v59, %v2486_v57 }
 0x249   : > { %2268 = vst [vmem:[%s3032_s28 + $0x68] sm:$0xff] %v2244_v60   ;;  %v1699_v1 = vadd.f32 %v2485_v55, %v1538_v61  ;;  %v1541_v2 = vadd.f32 %v2376_v62, %v3023_v10 }
 0x24b   : > { %v1702_v3 = vadd.f32 %v2488_v63, %v1541_v2  ;;  %v2377_v4 = vpop.f32.mrb[124].mxu0  ;;  %v2489_v5 = vpop.f32.mrb[124].mxu1  ;;  %v1741_v8 = vmax.f32 %v1699_v1, 0.0 }
 0x24c   : > { %v2378_v6 = vpop.f32.mrb[125].mxu0  ;;  %v2490_v7 = vpop.f32.mrb[125].mxu1 }
 0x24d   : > { %v1742_v12 = vmax.f32 %v1702_v3, 0.0  ;;  %v2379_v13 = vadd.f32 %v2378_v6, %v2377_v4  ;;  %v2491_v14 = vadd.f32 %v2490_v7, %v2489_v5  ;;  %v2380_v15 = vpop.f32.mrb[126].mxu0  ;;  %v2492_v16 = vpop.f32.mrb[126].mxu1 }
 0x24e   : > { %v2381_v17 = vpop.f32.mrb[127].mxu0  ;;  %v2493_v18 = vpop.f32.mrb[127].mxu1 }
 0x24f   : > { %v2249_v19 = vpack.c.bf16 %v1742_v12, %v1741_v8  ;;  %v1546_v20 = vadd.f32 %v2379_v13, %v3023_v10  ;;  %v2382_v21 = vadd.f32 %v2381_v17, %v2380_v15  ;;  %v2494_v22 = vadd.f32 %v2493_v18, %v2492_v16 }
 0x251   : > { %2269 = vst [vmem:[%s3032_s28 + $0x70] sm:$0xff] %v2249_v19   ;;  %v1707_v23 = vadd.f32 %v2491_v14, %v1546_v20  ;;  %v1549_v24 = vadd.f32 %v2382_v21, %v3023_v10 }
 0x253   : > { %v1710_v25 = vadd.f32 %v2494_v22, %v1549_v24  ;;  %v1743_v26 = vmax.f32 %v1707_v23, 0.0 }
 0x255   : > { %v1744_v27 = vmax.f32 %v1710_v25, 0.0 }
 0x257   : > { %v2254_v28 = vpack.c.bf16 %v1744_v27, %v1743_v26 }
 0x259   : > { %2270 = vst [vmem:[%s3032_s28 + $0x78] sm:$0xff] %v2254_v28  }
 0x25a PF: > { %s15_s20 = sadd.s32 1, %s2614_s20   ;;  %s3095_s18 = smov %s2610_s19 }
 0x25b   : > { %p12_p5 = scmp.ge.s32.totalorder %s15_s20, 4   ;;  %s3096_s19 = smov %s3098_s21 }
 0x25d   :  { %14 = sbr.rel (!%p12_p5) target bundleno = 2 (0x2), region = 73 }

// kernel: bmn_forward.6
= control target key start
LH: loop header
LB: loop body
LE: loop exit
PB: predicated region body
PF: predicated region fallthrough
CT: control target
= control target key end

     0   :  { %s3642_s1 = inlined_call_operand.vmem [shape: bf16[256,2048], index: 1, kind: input, shape index: {}]   ;;  %s3643_s0 = inlined_call_operand.vmem [shape: bf16[32,256], index: 0, kind: input, shape index: {}]   ;;  %s3644_s2 = inlined_call_operand.vmem [shape: f32[1,2048], index: 2, kind: input, shape index: {}]   ;;  %s3645_s3 = inlined_call_operand.vmem [shape: bf16[32,2048], index: 3, kind: output, shape index: {}]  }
   0x1   :  { %v18_v0 = vld [vmem:[%s3642_s1] sm:$0xff]  ;;  %v19_v2 = vld [vmem:[%s3642_s1 + $0x8] sm:$0xff] }
   0x2   :  { %v26_v1 = vld [vmem:[%s3642_s1 + $0x40] sm:$0xff]  ;;  %v27_v4 = vld [vmem:[%s3642_s1 + $0x48] sm:$0xff] }
   0x3   :  { %v2315_v3 = vcombine.high %v18_v0, %v26_v1  ;;  %v2314_v5 = vcombine.low %v18_v0, %v26_v1  ;;  %v34_v6 = vld [vmem:[%s3642_s1 + $0x80] sm:$0xff]  ;;  %v2317_v8 = vcombine.high %v19_v2, %v27_v4  ;;  %v2316_v9 = vcombine.low %v19_v2, %v27_v4  ;;  %v35_v11 = vld [vmem:[%s3642_s1 + $0x88] sm:$0xff] }
   0x4   :  { %v42_v7 = vld [vmem:[%s3642_s1 + $0xc0] sm:$0xff]  ;;  %v43_v12 = vld [vmem:[%s3642_s1 + $0xc8] sm:$0xff] }
   0x5   :  { %v2331_v10 = vcombine.high %v34_v6, %v42_v7  ;;  %v50_v13 = vld [vmem:[%s3642_s1 + $0x100] sm:$0xff]  ;;  %1658 = vmatprep.subr.bf16.mxu0 %v2315_v3  ;;  %v2333_v14 = vcombine.high %v35_v11, %v43_v12  ;;  %v51_v16 = vld [vmem:[%s3642_s1 + $0x108] sm:$0xff]  ;;  %1711 = vmatprep.subr.bf16.mxu1 %v2317_v8  ;;  %v2330_v18 = vcombine.low %v34_v6, %v42_v7 }
   0x6   :  { %v58_v15 = vld [vmem:[%s3642_s1 + $0x140] sm:$0xff]  ;;  %v59_v17 = vld [vmem:[%s3642_s1 + $0x148] sm:$0xff]  ;;  %1659 = vmatpush1.bf16.msra.mxu0 %v2314_v5  ;;  %1712 = vmatpush1.bf16.msra.mxu1 %v2316_v9  ;;  %v2332_v19 = vcombine.low %v35_v11, %v43_v12 }
   0x7   :  { %1660 = vmatprep.subr.bf16.mxu0 %v2331_v10  ;;  %v2347_v20 = vcombine.high %v50_v13, %v58_v15  ;;  %1713 = vmatprep.subr.bf16.mxu1 %v2333_v14  ;;  %v2349_v21 = vcombine.high %v51_v16, %v59_v17  ;;  %v66_v22 = vld [vmem:[%s3642_s1 + $0x180] sm:$0xff]  ;;  %v67_v24 = vld [vmem:[%s3642_s1 + $0x188] sm:$0xff]  ;;  %v2346_v26 = vcombine.low %v50_v13, %v58_v15 }
   0x8   :  { %v74_v23 = vld [vmem:[%s3642_s1 + $0x1c0] sm:$0xff]  ;;  %v75_v25 = vld [vmem:[%s3642_s1 + $0x1c8] sm:$0xff]  ;;  %v2348_v27 = vcombine.low %v51_v16, %v59_v17 }
   0x9   :  { %v2363_v28 = vcombine.high %v66_v22, %v74_v23  ;;  %v2365_v29 = vcombine.high %v67_v24, %v75_v25  ;;  %v82_v30 = vld [vmem:[%s3642_s1 + $0x200] sm:$0xff]  ;;  %v83_v32 = vld [vmem:[%s3642_s1 + $0x208] sm:$0xff]  ;;  %v2362_v34 = vcombine.low %v66_v22, %v74_v23  ;;  %v2364_v35 = vcombine.low %v67_v24, %v75_v25 }
   0xa   :  { %1661 = vmatpush1.bf16.msra.mxu0 %v2330_v18  ;;  %1714 = vmatpush1.bf16.msra.mxu1 %v2332_v19  ;;  %v90_v31 = vld [vmem:[%s3642_s1 + $0x240] sm:$0xff]  ;;  %v91_v33 = vld [vmem:[%s3642_s1 + $0x248] sm:$0xff] }
   0xb   :  { %1662 = vmatprep.subr.bf16.mxu0 %v2347_v20  ;;  %1715 = vmatprep.subr.bf16.mxu1 %v2349_v21  ;;  %v2379_v36 = vcombine.high %v82_v30, %v90_v31  ;;  %v2381_v37 = vcombine.high %v83_v32, %v91_v33  ;;  %v98_v38 = vld [vmem:[%s3642_s1 + $0x280] sm:$0xff]  ;;  %v99_v40 = vld [vmem:[%s3642_s1 + $0x288] sm:$0xff]  ;;  %v2378_v42 = vcombine.low %v82_v30, %v90_v31 }
   0xc   :  { %v106_v39 = vld [vmem:[%s3642_s1 + $0x2c0] sm:$0xff]  ;;  %v107_v41 = vld [vmem:[%s3642_s1 + $0x2c8] sm:$0xff]  ;;  %v2380_v43 = vcombine.low %v83_v32, %v91_v33 }
   0xd   :  { %v2395_v44 = vcombine.high %v98_v38, %v106_v39  ;;  %v2397_v45 = vcombine.high %v99_v40, %v107_v41  ;;  %v114_v46 = vld [vmem:[%s3642_s1 + $0x300] sm:$0xff]  ;;  %v115_v48 = vld [vmem:[%s3642_s1 + $0x308] sm:$0xff]  ;;  %v2394_v50 = vcombine.low %v98_v38, %v106_v39  ;;  %v2396_v51 = vcombine.low %v99_v40, %v107_v41 }
   0xe   :  { %1663 = vmatpush1.bf16.msra.mxu0 %v2346_v26  ;;  %1716 = vmatpush1.bf16.msra.mxu1 %v2348_v27  ;;  %v122_v47 = vld [vmem:[%s3642_s1 + $0x340] sm:$0xff]  ;;  %v123_v49 = vld [vmem:[%s3642_s1 + $0x348] sm:$0xff] }
   0xf   :  { %1664 = vmatprep.subr.bf16.mxu0 %v2363_v28  ;;  %1717 = vmatprep.subr.bf16.mxu1 %v2365_v29  ;;  %v2411_v52 = vcombine.high %v114_v46, %v122_v47  ;;  %v2413_v53 = vcombine.high %v115_v48, %v123_v49  ;;  %v130_v54 = vld [vmem:[%s3642_s1 + $0x380] sm:$0xff]  ;;  %v131_v57 = vld [vmem:[%s3642_s1 + $0x388] sm:$0xff]  ;;  %v2410_v59 = vcombine.low %v114_v46, %v122_v47 }
  0x10   :  { %v138_v55 = vld [vmem:[%s3642_s1 + $0x3c0] sm:$0xff]  ;;  %v139_v58 = vld [vmem:[%s3642_s1 + $0x3c8] sm:$0xff]  ;;  %v2412_v60 = vcombine.low %v115_v48, %v123_v49 }
  0x11   :  { %v2757_v56 = vld [vmem:[%s3643_s0 + $0x4] ss:$8 sps:$4 sm:$0xff]   ;;  %v2427_v61 = vcombine.high %v130_v54, %v138_v55  ;;  %v2429_v62 = vcombine.high %v131_v57, %v139_v58  ;;  %v2426_v3 = vcombine.low %v130_v54, %v138_v55  ;;  %v2428_v4 = vcombine.low %v131_v57, %v139_v58 }
  0x12   :  { %1665 = vmatpush1.bf16.msra.mxu0 %v2362_v34  ;;  %1718 = vmatpush1.bf16.msra.mxu1 %v2364_v35  ;;  %v146_v63 = vld [vmem:[%s3642_s1 + $0x400] sm:$0xff]  ;;  %v147_v1 = vld [vmem:[%s3642_s1 + $0x408] sm:$0xff] }
  0x13   :  { %1666 = vmatprep.subr.bf16.mxu0 %v2379_v36  ;;  %1719 = vmatprep.subr.bf16.mxu1 %v2381_v37  ;;  %v154_v0 = vld [vmem:[%s3642_s1 + $0x440] sm:$0xff]  ;;  %v155_v2 = vld [vmem:[%s3642_s1 + $0x448] sm:$0xff] }
  0x14   :  { %1690 = vmatprep.mubr.bf16.mxu0 %v2757_v56  ;;  %1743 = vmatprep.mubr.bf16.mxu1 %v2757_v56  ;;  %v2443_v5 = vcombine.high %v146_v63, %v154_v0  ;;  %v2445_v6 = vcombine.high %v147_v1, %v155_v2  ;;  %v162_v7 = vld [vmem:[%s3642_s1 + $0x480] sm:$0xff]  ;;  %v163_v9 = vld [vmem:[%s3642_s1 + $0x488] sm:$0xff]  ;;  %v2442_v11 = vcombine.low %v146_v63, %v154_v0  ;;  %v20_v0 = vld [vmem:[%s3642_s1 + $0x10] sm:$0xff] }
  0x15   :  { %v170_v8 = vld [vmem:[%s3642_s1 + $0x4c0] sm:$0xff]  ;;  %v171_v10 = vld [vmem:[%s3642_s1 + $0x4c8] sm:$0xff]  ;;  %v2444_v12 = vcombine.low %v147_v1, %v155_v2  ;;  %v28_v1 = vld [vmem:[%s3642_s1 + $0x50] sm:$0xff] }
  0x16   :  { %1667 = vmatpush1.bf16.msra.mxu0 %v2378_v42  ;;  %1720 = vmatpush1.bf16.msra.mxu1 %v2380_v43  ;;  %v2459_v13 = vcombine.high %v162_v7, %v170_v8  ;;  %v2461_v14 = vcombine.high %v163_v9, %v171_v10  ;;  %v178_v15 = vld [vmem:[%s3642_s1 + $0x500] sm:$0xff]  ;;  %v179_v17 = vld [vmem:[%s3642_s1 + $0x508] sm:$0xff]  ;;  %v2458_v19 = vcombine.low %v162_v7, %v170_v8  ;;  %v21_v2 = vld [vmem:[%s3642_s1 + $0x18] sm:$0xff] }
  0x17   :  { %1668 = vmatprep.subr.bf16.mxu0 %v2395_v44  ;;  %1721 = vmatprep.subr.bf16.mxu1 %v2397_v45  ;;  %v186_v16 = vld [vmem:[%s3642_s1 + $0x540] sm:$0xff]  ;;  %v187_v18 = vld [vmem:[%s3642_s1 + $0x548] sm:$0xff]  ;;  %v2460_v20 = vcombine.low %v163_v9, %v171_v10  ;;  %v36_v8 = vld [vmem:[%s3642_s1 + $0x90] sm:$0xff] }
  0x18   :  { %v2475_v21 = vcombine.high %v178_v15, %v186_v16  ;;  %v2477_v22 = vcombine.high %v179_v17, %v187_v18  ;;  %v194_v23 = vld [vmem:[%s3642_s1 + $0x580] sm:$0xff]  ;;  %v195_v25 = vld [vmem:[%s3642_s1 + $0x588] sm:$0xff]  ;;  %v2474_v27 = vcombine.low %v178_v15, %v186_v16  ;;  %v2476_v28 = vcombine.low %v179_v17, %v187_v18  ;;  %v44_v9 = vld [vmem:[%s3642_s1 + $0xd0] sm:$0xff] }
  0x19   :  { %v202_v24 = vld [vmem:[%s3642_s1 + $0x5c0] sm:$0xff]  ;;  %v203_v26 = vld [vmem:[%s3642_s1 + $0x5c8] sm:$0xff]  ;;  %v2335_v15 = vcombine.high %v36_v8, %v44_v9  ;;  %v52_v17 = vld [vmem:[%s3642_s1 + $0x110] sm:$0xff] }
  0x1a   :  { %1669 = vmatpush1.bf16.msra.mxu0 %v2394_v50  ;;  %1722 = vmatpush1.bf16.msra.mxu1 %v2396_v51  ;;  %v2491_v29 = vcombine.high %v194_v23, %v202_v24  ;;  %v2493_v30 = vcombine.high %v195_v25, %v203_v26  ;;  %v210_v31 = vld [vmem:[%s3642_s1 + $0x600] sm:$0xff]  ;;  %v211_v33 = vld [vmem:[%s3642_s1 + $0x608] sm:$0xff]  ;;  %v2490_v35 = vcombine.low %v194_v23, %v202_v24  ;;  %v60_v18 = vld [vmem:[%s3642_s1 + $0x150] sm:$0xff] }
  0x1b   :  { %1670 = vmatprep.subr.bf16.mxu0 %v2411_v52  ;;  %1723 = vmatprep.subr.bf16.mxu1 %v2413_v53  ;;  %v218_v32 = vld [vmem:[%s3642_s1 + $0x640] sm:$0xff]  ;;  %v219_v34 = vld [vmem:[%s3642_s1 + $0x648] sm:$0xff]  ;;  %v2492_v36 = vcombine.low %v195_v25, %v203_v26  ;;  %v2351_v24 = vcombine.high %v52_v17, %v60_v18  ;;  %v68_v26 = vld [vmem:[%s3642_s1 + $0x190] sm:$0xff] }
  0x1c   :  { %v2507_v37 = vcombine.high %v210_v31, %v218_v32  ;;  %v2509_v38 = vcombine.high %v211_v33, %v219_v34  ;;  %v226_v39 = vld [vmem:[%s3642_s1 + $0x680] sm:$0xff]  ;;  %v227_v41 = vld [vmem:[%s3642_s1 + $0x688] sm:$0xff]  ;;  %v2506_v43 = vcombine.low %v210_v31, %v218_v32  ;;  %v2508_v44 = vcombine.low %v211_v33, %v219_v34 }
  0x1d   :  { %v234_v40 = vld [vmem:[%s3642_s1 + $0x6c0] sm:$0xff]  ;;  %v235_v42 = vld [vmem:[%s3642_s1 + $0x6c8] sm:$0xff]  ;;  %v2350_v31 = vcombine.low %v52_v17, %v60_v18 }
  0x1e   :  { %1671 = vmatpush1.bf16.msra.mxu0 %v2410_v59  ;;  %1724 = vmatpush1.bf16.msra.mxu1 %v2412_v60  ;;  %v2523_v45 = vcombine.high %v226_v39, %v234_v40  ;;  %v2525_v46 = vcombine.high %v227_v41, %v235_v42  ;;  %v242_v47 = vld [vmem:[%s3642_s1 + $0x700] sm:$0xff]  ;;  %v243_v49 = vld [vmem:[%s3642_s1 + $0x708] sm:$0xff]  ;;  %v2522_v51 = vcombine.low %v226_v39, %v234_v40 }
  0x1f   :  { %1672 = vmatprep.subr.bf16.mxu0 %v2427_v61  ;;  %1725 = vmatprep.subr.bf16.mxu1 %v2429_v62  ;;  %v250_v48 = vld [vmem:[%s3642_s1 + $0x740] sm:$0xff]  ;;  %v251_v50 = vld [vmem:[%s3642_s1 + $0x748] sm:$0xff]  ;;  %v2524_v52 = vcombine.low %v227_v41, %v235_v42 }
  0x20   :  { %v2539_v53 = vcombine.high %v242_v47, %v250_v48  ;;  %v2541_v54 = vcombine.high %v243_v49, %v251_v50  ;;  %v258_v55 = vld [vmem:[%s3642_s1 + $0x780] sm:$0xff]  ;;  %v259_v58 = vld [vmem:[%s3642_s1 + $0x788] sm:$0xff]  ;;  %v2538_v60 = vcombine.low %v242_v47, %v250_v48  ;;  %v2540_v61 = vcombine.low %v243_v49, %v251_v50 }
  0x21   :  { %v266_v57 = vld [vmem:[%s3642_s1 + $0x7c0] sm:$0xff]  ;;  %v267_v59 = vld [vmem:[%s3642_s1 + $0x7c8] sm:$0xff] }
  0x22   :  { %1673 = vmatpush1.bf16.msra.mxu0 %v2426_v3  ;;  %1726 = vmatpush1.bf16.msra.mxu1 %v2428_v4  ;;  %v2555_v62 = vcombine.high %v258_v55, %v266_v57  ;;  %v2557_v63 = vcombine.high %v259_v58, %v267_v59  ;;  %v29_v3 = vld [vmem:[%s3642_s1 + $0x58] sm:$0xff]  ;;  %v2554_v4 = vcombine.low %v258_v55, %v266_v57  ;;  %v2884_v10 = vld [vmem:[%s3643_s0] ss:$8 sps:$4 sm:$0xff]  }
  0x23   :  { %1674 = vmatprep.subr.bf16.mxu0 %v2443_v5  ;;  %1727 = vmatprep.subr.bf16.mxu1 %v2445_v6  ;;  %v2556_v5 = vcombine.low %v259_v58, %v267_v59  ;;  %v2319_v6 = vcombine.high %v20_v0, %v28_v1  ;;  %v2321_v7 = vcombine.high %v21_v2, %v29_v3 }
  0x26   :  { %1675 = vmatpush1.bf16.msra.mxu0 %v2442_v11  ;;  %1728 = vmatpush1.bf16.msra.mxu1 %v2444_v12  ;;  %v37_v11 = vld [vmem:[%s3642_s1 + $0x98] sm:$0xff] }
  0x27   :  { %1676 = vmatprep.subr.bf16.mxu0 %v2459_v13  ;;  %1729 = vmatprep.subr.bf16.mxu1 %v2461_v14  ;;  %v45_v12 = vld [vmem:[%s3642_s1 + $0xd8] sm:$0xff]  ;;  %v2318_v13 = vcombine.low %v20_v0, %v28_v1  ;;  %v2320_v14 = vcombine.low %v21_v2, %v29_v3 }
  0x28   :  { %v2337_v16 = vcombine.high %v37_v11, %v45_v12  ;;  %v2336_v23 = vcombine.low %v37_v11, %v45_v12 }
  0x2a   :  { %1677 = vmatpush1.bf16.msra.mxu0 %v2458_v19  ;;  %1730 = vmatpush1.bf16.msra.mxu1 %v2460_v20  ;;  %v2901_v19 = vld [vmem:[%s3643_s0 + $0x14] ss:$8 sps:$4 sm:$0xff]  }
  0x2b   :  { %1678 = vmatprep.subr.bf16.mxu0 %v2475_v21  ;;  %1731 = vmatprep.subr.bf16.mxu1 %v2477_v22  ;;  %v53_v20 = vld [vmem:[%s3642_s1 + $0x118] sm:$0xff]  ;;  %v2334_v22 = vcombine.low %v36_v8, %v44_v9 }
  0x2c   :  { %v61_v21 = vld [vmem:[%s3642_s1 + $0x158] sm:$0xff] }
  0x2d   :  { %v2353_v25 = vcombine.high %v53_v20, %v61_v21  ;;  %v2352_v32 = vcombine.low %v53_v20, %v61_v21 }
  0x2e   :  { %1679 = vmatpush1.bf16.msra.mxu0 %v2474_v27  ;;  %1732 = vmatpush1.bf16.msra.mxu1 %v2476_v28  ;;  %v76_v27 = vld [vmem:[%s3642_s1 + $0x1d0] sm:$0xff]  ;;  %v69_v28 = vld [vmem:[%s3642_s1 + $0x198] sm:$0xff] }
  0x2f   :  { %1680 = vmatprep.subr.bf16.mxu0 %v2491_v29  ;;  %1733 = vmatprep.subr.bf16.mxu1 %v2493_v30  ;;  %v77_v29 = vld [vmem:[%s3642_s1 + $0x1d8] sm:$0xff]  ;;  %v2367_v33 = vcombine.high %v68_v26, %v76_v27  ;;  %v2366_v39 = vcombine.low %v68_v26, %v76_v27 }
  0x30   :  { %v2928_v30 = vld [vmem:[%s3643_s0 + $0x10] ss:$8 sps:$4 sm:$0xff]   ;;  %v2369_v34 = vcombine.high %v69_v28, %v77_v29  ;;  %v2368_v40 = vcombine.low %v69_v28, %v77_v29 }
  0x32   :  { %1681 = vmatpush1.bf16.msra.mxu0 %v2490_v35  ;;  %1734 = vmatpush1.bf16.msra.mxu1 %v2492_v36  ;;  %v84_v35 = vld [vmem:[%s3642_s1 + $0x210] sm:$0xff] }
  0x33   :  { %1682 = vmatprep.subr.bf16.mxu0 %v2507_v37  ;;  %1735 = vmatprep.subr.bf16.mxu1 %v2509_v38  ;;  %v92_v36 = vld [vmem:[%s3642_s1 + $0x250] sm:$0xff]  ;;  %v85_v37 = vld [vmem:[%s3642_s1 + $0x218] sm:$0xff] }
  0x34   :  { %v93_v38 = vld [vmem:[%s3642_s1 + $0x258] sm:$0xff]  ;;  %v2383_v41 = vcombine.high %v84_v35, %v92_v36  ;;  %v2382_v47 = vcombine.low %v84_v35, %v92_v36 }
  0x35   :  { %v2385_v42 = vcombine.high %v85_v37, %v93_v38  ;;  %v2384_v48 = vcombine.low %v85_v37, %v93_v38 }
  0x36   :  { %1683 = vmatpush1.bf16.msra.mxu0 %v2506_v43  ;;  %1736 = vmatpush1.bf16.msra.mxu1 %v2508_v44  ;;  %v100_v43 = vld [vmem:[%s3642_s1 + $0x290] sm:$0xff] }
  0x37   :  { %1684 = vmatprep.subr.bf16.mxu0 %v2523_v45  ;;  %1737 = vmatprep.subr.bf16.mxu1 %v2525_v46  ;;  %v108_v44 = vld [vmem:[%s3642_s1 + $0x2d0] sm:$0xff]  ;;  %v101_v45 = vld [vmem:[%s3642_s1 + $0x298] sm:$0xff] }
  0x38   :  { %v109_v46 = vld [vmem:[%s3642_s1 + $0x2d8] sm:$0xff]  ;;  %v2399_v49 = vcombine.high %v100_v43, %v108_v44  ;;  %v2398_v55 = vcombine.low %v100_v43, %v108_v44 }
  0x39   :  { %v2401_v50 = vcombine.high %v101_v45, %v109_v46  ;;  %v2400_v57 = vcombine.low %v101_v45, %v109_v46 }
  0x3a   :  { %1685 = vmatpush1.bf16.msra.mxu0 %v2522_v51  ;;  %1738 = vmatpush1.bf16.msra.mxu1 %v2524_v52  ;;  %v116_v51 = vld [vmem:[%s3642_s1 + $0x310] sm:$0xff] }
  0x3b   :  { %1686 = vmatprep.subr.bf16.mxu0 %v2539_v53  ;;  %1739 = vmatprep.subr.bf16.mxu1 %v2541_v54  ;;  %v124_v52 = vld [vmem:[%s3642_s1 + $0x350] sm:$0xff]  ;;  %v117_v53 = vld [vmem:[%s3642_s1 + $0x318] sm:$0xff] }
  0x3c   :  { %v125_v54 = vld [vmem:[%s3642_s1 + $0x358] sm:$0xff]  ;;  %v2415_v58 = vcombine.high %v116_v51, %v124_v52  ;;  %v2414_v0 = vcombine.low %v116_v51, %v124_v52 }
  0x3d   :  { %v2417_v59 = vcombine.high %v117_v53, %v125_v54  ;;  %v2416_v1 = vcombine.low %v117_v53, %v125_v54 }
  0x3e   :  { %1687 = vmatpush1.bf16.msra.mxu0 %v2538_v60  ;;  %1740 = vmatpush1.bf16.msra.mxu1 %v2540_v61  ;;  %v132_v60 = vld [vmem:[%s3642_s1 + $0x390] sm:$0xff] }
  0x3f   :  { %1688 = vmatprep.subr.bf16.mxu0 %v2555_v62  ;;  %1741 = vmatprep.subr.bf16.mxu1 %v2557_v63  ;;  %v140_v61 = vld [vmem:[%s3642_s1 + $0x3d0] sm:$0xff]  ;;  %v133_v62 = vld [vmem:[%s3642_s1 + $0x398] sm:$0xff] }
  0x40   :  { %v141_v63 = vld [vmem:[%s3642_s1 + $0x3d8] sm:$0xff]  ;;  %v2431_v2 = vcombine.high %v132_v60, %v140_v61  ;;  %v2430_v8 = vcombine.low %v132_v60, %v140_v61 }
  0x41   :  { %v2433_v3 = vcombine.high %v133_v62, %v141_v63  ;;  %v2432_v9 = vcombine.low %v133_v62, %v141_v63 }
  0x42   :  { %1689 = vmatpush1.bf16.msra.mxu0 %v2554_v4  ;;  %1742 = vmatpush1.bf16.msra.mxu1 %v2556_v5  ;;  %v148_v4 = vld [vmem:[%s3642_s1 + $0x410] sm:$0xff] }
  0x43   :  { %1764 = vmatprep.subr.bf16.mxu0 %v2319_v6  ;;  %1817 = vmatprep.subr.bf16.mxu1 %v2321_v7  ;;  %v156_v5 = vld [vmem:[%s3642_s1 + $0x450] sm:$0xff]  ;;  %v149_v6 = vld [vmem:[%s3642_s1 + $0x418] sm:$0xff] }
  0x44   :  { %v157_v7 = vld [vmem:[%s3642_s1 + $0x458] sm:$0xff]  ;;  %v2447_v11 = vcombine.high %v148_v4, %v156_v5  ;;  %v2446_v17 = vcombine.low %v148_v4, %v156_v5 }
  0x45   :  { %1691 = vmatmul.mubr.bf16.vlgmr.msra.gmra.mrb[0].mxu0 %v2884_v10  ;;  %1744 = vmatmul.mubr.bf16.vlgmr.msra.gmra.mrb[0].mxu1 %v2884_v10  ;;  %v2449_v12 = vcombine.high %v149_v6, %v157_v7  ;;  %v2448_v18 = vcombine.low %v149_v6, %v157_v7 }
  0x46   :  { %1765 = vmatpush1.bf16.msra.mxu0 %v2318_v13  ;;  %1818 = vmatpush1.bf16.msra.mxu1 %v2320_v14  ;;  %v164_v13 = vld [vmem:[%s3642_s1 + $0x490] sm:$0xff] }
  0x47   :  { %1766 = vmatprep.subr.bf16.mxu0 %v2335_v15  ;;  %1819 = vmatprep.subr.bf16.mxu1 %v2337_v16  ;;  %v172_v14 = vld [vmem:[%s3642_s1 + $0x4d0] sm:$0xff]  ;;  %v165_v15 = vld [vmem:[%s3642_s1 + $0x498] sm:$0xff] }
  0x48   :  { %1700 = vmatprep.mubr.bf16.mxu0 %v2901_v19  ;;  %1753 = vmatprep.mubr.bf16.mxu1 %v2901_v19  ;;  %v173_v16 = vld [vmem:[%s3642_s1 + $0x4d8] sm:$0xff]  ;;  %v2463_v20 = vcombine.high %v164_v13, %v172_v14  ;;  %v2462_v26 = vcombine.low %v164_v13, %v172_v14 }
  0x49   :  { %v2465_v21 = vcombine.high %v165_v15, %v173_v16  ;;  %v2464_v27 = vcombine.low %v165_v15, %v173_v16 }
  0x4a   :  { %1767 = vmatpush1.bf16.msra.mxu0 %v2334_v22  ;;  %1820 = vmatpush1.bf16.msra.mxu1 %v2336_v23  ;;  %v180_v22 = vld [vmem:[%s3642_s1 + $0x510] sm:$0xff] }
  0x4b   :  { %1768 = vmatprep.subr.bf16.mxu0 %v2351_v24  ;;  %1821 = vmatprep.subr.bf16.mxu1 %v2353_v25  ;;  %v188_v23 = vld [vmem:[%s3642_s1 + $0x550] sm:$0xff]  ;;  %v181_v24 = vld [vmem:[%s3642_s1 + $0x518] sm:$0xff] }
  0x4c   :  { %v189_v25 = vld [vmem:[%s3642_s1 + $0x558] sm:$0xff]  ;;  %v2479_v28 = vcombine.high %v180_v22, %v188_v23  ;;  %v2478_v35 = vcombine.low %v180_v22, %v188_v23 }
  0x4d   :  { %1701 = vmatmul.mubr.bf16.gmra.mrb[4].mxu0 %v2928_v30  ;;  %1754 = vmatmul.mubr.bf16.gmra.mrb[4].mxu1 %v2928_v30  ;;  %v2481_v29 = vcombine.high %v181_v24, %v189_v25  ;;  %v2480_v36 = vcombine.low %v181_v24, %v189_v25 }
  0x4e   :  { %1769 = vmatpush1.bf16.msra.mxu0 %v2350_v31  ;;  %1822 = vmatpush1.bf16.msra.mxu1 %v2352_v32  ;;  %v196_v31 = vld [vmem:[%s3642_s1 + $0x590] sm:$0xff] }
  0x4f   :  { %1770 = vmatprep.subr.bf16.mxu0 %v2367_v33  ;;  %1823 = vmatprep.subr.bf16.mxu1 %v2369_v34  ;;  %v204_v32 = vld [vmem:[%s3642_s1 + $0x5d0] sm:$0xff]  ;;  %v197_v33 = vld [vmem:[%s3642_s1 + $0x598] sm:$0xff] }
  0x50   :  { %1796 = vmatprep.mubr.bf16.mxu0 %v2757_v56  ;;  %1849 = vmatprep.mubr.bf16.mxu1 %v2757_v56  ;;  %v205_v34 = vld [vmem:[%s3642_s1 + $0x5d8] sm:$0xff]  ;;  %v2495_v37 = vcombine.high %v196_v31, %v204_v32  ;;  %v2494_v43 = vcombine.low %v196_v31, %v204_v32 }
  0x51   :  { %v2497_v38 = vcombine.high %v197_v33, %v205_v34  ;;  %v2496_v44 = vcombine.low %v197_v33, %v205_v34 }
  0x52   :  { %1771 = vmatpush1.bf16.msra.mxu0 %v2366_v39  ;;  %1824 = vmatpush1.bf16.msra.mxu1 %v2368_v40  ;;  %v212_v39 = vld [vmem:[%s3642_s1 + $0x610] sm:$0xff] }
  0x53   :  { %1772 = vmatprep.subr.bf16.mxu0 %v2383_v41  ;;  %1825 = vmatprep.subr.bf16.mxu1 %v2385_v42  ;;  %v220_v40 = vld [vmem:[%s3642_s1 + $0x650] sm:$0xff]  ;;  %v213_v41 = vld [vmem:[%s3642_s1 + $0x618] sm:$0xff] }
  0x54   :  { %v221_v42 = vld [vmem:[%s3642_s1 + $0x658] sm:$0xff]  ;;  %v2511_v45 = vcombine.high %v212_v39, %v220_v40  ;;  %v2510_v51 = vcombine.low %v212_v39, %v220_v40 }
  0x55   :  { %v2513_v46 = vcombine.high %v213_v41, %v221_v42  ;;  %v2512_v52 = vcombine.low %v213_v41, %v221_v42 }
  0x56   :  { %1773 = vmatpush1.bf16.msra.mxu0 %v2382_v47  ;;  %1826 = vmatpush1.bf16.msra.mxu1 %v2384_v48  ;;  %v228_v47 = vld [vmem:[%s3642_s1 + $0x690] sm:$0xff] }
  0x57   :  { %1774 = vmatprep.subr.bf16.mxu0 %v2399_v49  ;;  %1827 = vmatprep.subr.bf16.mxu1 %v2401_v50  ;;  %v236_v48 = vld [vmem:[%s3642_s1 + $0x6d0] sm:$0xff]  ;;  %v229_v49 = vld [vmem:[%s3642_s1 + $0x698] sm:$0xff] }
  0x58   :  { %v237_v50 = vld [vmem:[%s3642_s1 + $0x6d8] sm:$0xff]  ;;  %v2527_v53 = vcombine.high %v228_v47, %v236_v48  ;;  %v2526_v60 = vcombine.low %v228_v47, %v236_v48 }
  0x59   :  { %v2529_v54 = vcombine.high %v229_v49, %v237_v50  ;;  %v2528_v61 = vcombine.low %v229_v49, %v237_v50 }
  0x5a   :  { %1775 = vmatpush1.bf16.msra.mxu0 %v2398_v55  ;;  %1828 = vmatpush1.bf16.msra.mxu1 %v2400_v57  ;;  %v244_v55 = vld [vmem:[%s3642_s1 + $0x710] sm:$0xff] }
  0x5b   :  { %1776 = vmatprep.subr.bf16.mxu0 %v2415_v58  ;;  %1829 = vmatprep.subr.bf16.mxu1 %v2417_v59  ;;  %v252_v57 = vld [vmem:[%s3642_s1 + $0x750] sm:$0xff]  ;;  %v245_v58 = vld [vmem:[%s3642_s1 + $0x718] sm:$0xff] }
  0x5c   :  { %v253_v59 = vld [vmem:[%s3642_s1 + $0x758] sm:$0xff]  ;;  %v2543_v62 = vcombine.high %v244_v55, %v252_v57  ;;  %v2542_v4 = vcombine.low %v244_v55, %v252_v57 }
  0x5d   :  { %v2545_v63 = vcombine.high %v245_v58, %v253_v59  ;;  %v2544_v5 = vcombine.low %v245_v58, %v253_v59 }
  0x5e   :  { %1777 = vmatpush1.bf16.msra.mxu0 %v2414_v0  ;;  %1830 = vmatpush1.bf16.msra.mxu1 %v2416_v1  ;;  %v260_v0 = vld [vmem:[%s3642_s1 + $0x790] sm:$0xff] }
  0x5f   :  { %1778 = vmatprep.subr.bf16.mxu0 %v2431_v2  ;;  %1831 = vmatprep.subr.bf16.mxu1 %v2433_v3  ;;  %v268_v1 = vld [vmem:[%s3642_s1 + $0x7d0] sm:$0xff]  ;;  %v261_v2 = vld [vmem:[%s3642_s1 + $0x798] sm:$0xff] }
  0x60   :  { %v269_v3 = vld [vmem:[%s3642_s1 + $0x7d8] sm:$0xff]  ;;  %v2559_v6 = vcombine.high %v260_v0, %v268_v1  ;;  %v2558_v13 = vcombine.low %v260_v0, %v268_v1 }
  0x61   :  { %v2561_v7 = vcombine.high %v261_v2, %v269_v3  ;;  %v2560_v14 = vcombine.low %v261_v2, %v269_v3  ;;  %v134_v3 = vld [vmem:[%s3642_s1 + $0x3a0] sm:$0xff] }
  0x62   :  { %1779 = vmatpush1.bf16.msra.mxu0 %v2430_v8  ;;  %1832 = vmatpush1.bf16.msra.mxu1 %v2432_v9  ;;  %v22_v8 = vld [vmem:[%s3642_s1 + $0x20] sm:$0xff] }
  0x63   :  { %1780 = vmatprep.subr.bf16.mxu0 %v2447_v11  ;;  %1833 = vmatprep.subr.bf16.mxu1 %v2449_v12  ;;  %v30_v9 = vld [vmem:[%s3642_s1 + $0x60] sm:$0xff]  ;;  %v23_v11 = vld [vmem:[%s3642_s1 + $0x28] sm:$0xff] }
  0x64   :  { %v31_v12 = vld [vmem:[%s3642_s1 + $0x68] sm:$0xff]  ;;  %v2323_v15 = vcombine.high %v22_v8, %v30_v9  ;;  %v2322_v22 = vcombine.low %v22_v8, %v30_v9 }
  0x65   :  { %v2325_v16 = vcombine.high %v23_v11, %v31_v12  ;;  %v2324_v23 = vcombine.low %v23_v11, %v31_v12  ;;  %v150_v12 = vld [vmem:[%s3642_s1 + $0x420] sm:$0xff] }
  0x66   :  { %1781 = vmatpush1.bf16.msra.mxu0 %v2446_v17  ;;  %1834 = vmatpush1.bf16.msra.mxu1 %v2448_v18  ;;  %v38_v17 = vld [vmem:[%s3642_s1 + $0xa0] sm:$0xff] }
  0x67   :  { %1782 = vmatprep.subr.bf16.mxu0 %v2463_v20  ;;  %1835 = vmatprep.subr.bf16.mxu1 %v2465_v21  ;;  %v46_v18 = vld [vmem:[%s3642_s1 + $0xe0] sm:$0xff]  ;;  %v39_v20 = vld [vmem:[%s3642_s1 + $0xa8] sm:$0xff] }
  0x68   :  { %v47_v21 = vld [vmem:[%s3642_s1 + $0xe8] sm:$0xff]  ;;  %v2339_v24 = vcombine.high %v38_v17, %v46_v18  ;;  %v2338_v31 = vcombine.low %v38_v17, %v46_v18 }
  0x69   :  { %v2341_v25 = vcombine.high %v39_v20, %v47_v21  ;;  %v2340_v32 = vcombine.low %v39_v20, %v47_v21  ;;  %v166_v21 = vld [vmem:[%s3642_s1 + $0x4a0] sm:$0xff] }
  0x6a   :  { %1783 = vmatpush1.bf16.msra.mxu0 %v2462_v26  ;;  %1836 = vmatpush1.bf16.msra.mxu1 %v2464_v27  ;;  %v54_v26 = vld [vmem:[%s3642_s1 + $0x120] sm:$0xff] }
  0x6b   :  { %1784 = vmatprep.subr.bf16.mxu0 %v2479_v28  ;;  %1837 = vmatprep.subr.bf16.mxu1 %v2481_v29  ;;  %v62_v27 = vld [vmem:[%s3642_s1 + $0x160] sm:$0xff]  ;;  %v55_v28 = vld [vmem:[%s3642_s1 + $0x128] sm:$0xff] }
  0x6c   :  { %v63_v29 = vld [vmem:[%s3642_s1 + $0x168] sm:$0xff]  ;;  %v2355_v33 = vcombine.high %v54_v26, %v62_v27  ;;  %v2354_v39 = vcombine.low %v54_v26, %v62_v27 }
  0x6d   :  { %v2357_v34 = vcombine.high %v55_v28, %v63_v29  ;;  %v2356_v40 = vcombine.low %v55_v28, %v63_v29  ;;  %v182_v29 = vld [vmem:[%s3642_s1 + $0x520] sm:$0xff] }
  0x6e   :  { %1785 = vmatpush1.bf16.msra.mxu0 %v2478_v35  ;;  %1838 = vmatpush1.bf16.msra.mxu1 %v2480_v36  ;;  %v70_v35 = vld [vmem:[%s3642_s1 + $0x1a0] sm:$0xff] }
  0x6f   :  { %1786 = vmatprep.subr.bf16.mxu0 %v2495_v37  ;;  %1839 = vmatprep.subr.bf16.mxu1 %v2497_v38  ;;  %v78_v36 = vld [vmem:[%s3642_s1 + $0x1e0] sm:$0xff]  ;;  %v71_v37 = vld [vmem:[%s3642_s1 + $0x1a8] sm:$0xff] }
  0x70   :  { %v79_v38 = vld [vmem:[%s3642_s1 + $0x1e8] sm:$0xff]  ;;  %v2371_v41 = vcombine.high %v70_v35, %v78_v36  ;;  %v2370_v47 = vcombine.low %v70_v35, %v78_v36 }
  0x71   :  { %v2373_v42 = vcombine.high %v71_v37, %v79_v38  ;;  %v2372_v48 = vcombine.low %v71_v37, %v79_v38  ;;  %v198_v38 = vld [vmem:[%s3642_s1 + $0x5a0] sm:$0xff] }
  0x72   :  { %1787 = vmatpush1.bf16.msra.mxu0 %v2494_v43  ;;  %1840 = vmatpush1.bf16.msra.mxu1 %v2496_v44  ;;  %v86_v43 = vld [vmem:[%s3642_s1 + $0x220] sm:$0xff] }
  0x73   :  { %1788 = vmatprep.subr.bf16.mxu0 %v2511_v45  ;;  %1841 = vmatprep.subr.bf16.mxu1 %v2513_v46  ;;  %v94_v44 = vld [vmem:[%s3642_s1 + $0x260] sm:$0xff]  ;;  %v87_v45 = vld [vmem:[%s3642_s1 + $0x228] sm:$0xff] }
  0x74   :  { %v95_v46 = vld [vmem:[%s3642_s1 + $0x268] sm:$0xff]  ;;  %v2387_v49 = vcombine.high %v86_v43, %v94_v44  ;;  %v2386_v55 = vcombine.low %v86_v43, %v94_v44 }
  0x75   :  { %v2389_v50 = vcombine.high %v87_v45, %v95_v46  ;;  %v2388_v57 = vcombine.low %v87_v45, %v95_v46  ;;  %v214_v46 = vld [vmem:[%s3642_s1 + $0x620] sm:$0xff] }
  0x76   :  { %1789 = vmatpush1.bf16.msra.mxu0 %v2510_v51  ;;  %1842 = vmatpush1.bf16.msra.mxu1 %v2512_v52  ;;  %v102_v51 = vld [vmem:[%s3642_s1 + $0x2a0] sm:$0xff] }
  0x77   :  { %1790 = vmatprep.subr.bf16.mxu0 %v2527_v53  ;;  %1843 = vmatprep.subr.bf16.mxu1 %v2529_v54  ;;  %v110_v52 = vld [vmem:[%s3642_s1 + $0x2e0] sm:$0xff]  ;;  %v103_v53 = vld [vmem:[%s3642_s1 + $0x2a8] sm:$0xff] }
  0x78   :  { %v111_v54 = vld [vmem:[%s3642_s1 + $0x2e8] sm:$0xff]  ;;  %v2403_v58 = vcombine.high %v102_v51, %v110_v52 }
  0x79   :  { %v2405_v59 = vcombine.high %v103_v53, %v111_v54  ;;  %v2404_v0 = vcombine.low %v103_v53, %v111_v54  ;;  %v230_v54 = vld [vmem:[%s3642_s1 + $0x6a0] sm:$0xff] }
  0x7a   :  { %1791 = vmatpush1.bf16.msra.mxu0 %v2526_v60  ;;  %1844 = vmatpush1.bf16.msra.mxu1 %v2528_v61  ;;  %v118_v60 = vld [vmem:[%s3642_s1 + $0x320] sm:$0xff] }
  0x7b   :  { %1792 = vmatprep.subr.bf16.mxu0 %v2543_v62  ;;  %1845 = vmatprep.subr.bf16.mxu1 %v2545_v63  ;;  %v126_v61 = vld [vmem:[%s3642_s1 + $0x360] sm:$0xff]  ;;  %v127_v62 = vld [vmem:[%s3642_s1 + $0x368] sm:$0xff]  ;;  %v2402_v63 = vcombine.low %v102_v51, %v110_v52 }
  0x7c   :  { %v2419_v1 = vcombine.high %v118_v60, %v126_v61 }
  0x7e   :  { %1793 = vmatpush1.bf16.msra.mxu0 %v2542_v4  ;;  %1846 = vmatpush1.bf16.msra.mxu1 %v2544_v5  ;;  %v142_v4 = vld [vmem:[%s3642_s1 + $0x3e0] sm:$0xff]  ;;  %v135_v5 = vld [vmem:[%s3642_s1 + $0x3a8] sm:$0xff] }
  0x7f   :  { %1794 = vmatprep.subr.bf16.mxu0 %v2559_v6  ;;  %1847 = vmatprep.subr.bf16.mxu1 %v2561_v7  ;;  %v143_v6 = vld [vmem:[%s3642_s1 + $0x3e8] sm:$0xff]  ;;  %v2418_v7 = vcombine.low %v118_v60, %v126_v61  ;;  %v2435_v9 = vcombine.high %v134_v3, %v142_v4 }
  0x80   :  { %v2437_v11 = vcombine.high %v135_v5, %v143_v6  ;;  %v2436_v17 = vcombine.low %v135_v5, %v143_v6  ;;  %v262_v6 = vld [vmem:[%s3642_s1 + $0x7a0] sm:$0xff] }
  0x82   :  { %1795 = vmatpush1.bf16.msra.mxu0 %v2558_v13  ;;  %1848 = vmatpush1.bf16.msra.mxu1 %v2560_v14  ;;  %v158_v13 = vld [vmem:[%s3642_s1 + $0x460] sm:$0xff]  ;;  %v151_v14 = vld [vmem:[%s3642_s1 + $0x428] sm:$0xff] }
  0x83   :  { %1870 = vmatprep.subr.bf16.mxu0 %v2323_v15  ;;  %1923 = vmatprep.subr.bf16.mxu1 %v2325_v16  ;;  %v159_v15 = vld [vmem:[%s3642_s1 + $0x468] sm:$0xff]  ;;  %v2434_v16 = vcombine.low %v134_v3, %v142_v4  ;;  %v2451_v18 = vcombine.high %v150_v12, %v158_v13 }
  0x84   :  { %v2453_v20 = vcombine.high %v151_v14, %v159_v15  ;;  %v2452_v26 = vcombine.low %v151_v14, %v159_v15  ;;  %v24_v15 = vld [vmem:[%s3642_s1 + $0x30] sm:$0xff] }
  0x85   :  { %1797 = vmatmul.mubr.bf16.vlgmr.msra.gmra.mrb[8].mxu0 %v2884_v10  ;;  %1850 = vmatmul.mubr.bf16.vlgmr.msra.gmra.mrb[8].mxu1 %v2884_v10 }
  0x86   :  { %1871 = vmatpush1.bf16.msra.mxu0 %v2322_v22  ;;  %1924 = vmatpush1.bf16.msra.mxu1 %v2324_v23  ;;  %v174_v22 = vld [vmem:[%s3642_s1 + $0x4e0] sm:$0xff]  ;;  %v167_v23 = vld [vmem:[%s3642_s1 + $0x4a8] sm:$0xff] }
  0x87   :  { %1872 = vmatprep.subr.bf16.mxu0 %v2339_v24  ;;  %1925 = vmatprep.subr.bf16.mxu1 %v2341_v25  ;;  %v175_v24 = vld [vmem:[%s3642_s1 + $0x4e8] sm:$0xff]  ;;  %v2450_v25 = vcombine.low %v150_v12, %v158_v13  ;;  %v2467_v27 = vcombine.high %v166_v21, %v174_v22 }
  0x88   :  { %1806 = vmatprep.mubr.bf16.mxu0 %v2901_v19  ;;  %1859 = vmatprep.mubr.bf16.mxu1 %v2901_v19  ;;  %v2469_v28 = vcombine.high %v167_v23, %v175_v24  ;;  %v2468_v35 = vcombine.low %v167_v23, %v175_v24  ;;  %v40_v24 = vld [vmem:[%s3642_s1 + $0xb0] sm:$0xff] }
  0x8a   :  { %1873 = vmatpush1.bf16.msra.mxu0 %v2338_v31  ;;  %1926 = vmatpush1.bf16.msra.mxu1 %v2340_v32  ;;  %v190_v31 = vld [vmem:[%s3642_s1 + $0x560] sm:$0xff]  ;;  %v183_v32 = vld [vmem:[%s3642_s1 + $0x528] sm:$0xff] }
  0x8b   :  { %1874 = vmatprep.subr.bf16.mxu0 %v2355_v33  ;;  %1927 = vmatprep.subr.bf16.mxu1 %v2357_v34  ;;  %v191_v33 = vld [vmem:[%s3642_s1 + $0x568] sm:$0xff]  ;;  %v2466_v34 = vcombine.low %v166_v21, %v174_v22  ;;  %v2483_v36 = vcombine.high %v182_v29, %v190_v31 }
  0x8c   :  { %v2485_v37 = vcombine.high %v183_v32, %v191_v33  ;;  %v2484_v43 = vcombine.low %v183_v32, %v191_v33  ;;  %v56_v33 = vld [vmem:[%s3642_s1 + $0x130] sm:$0xff] }
  0x8d   :  { %1807 = vmatmul.mubr.bf16.gmra.mrb[12].mxu0 %v2928_v30  ;;  %1860 = vmatmul.mubr.bf16.gmra.mrb[12].mxu1 %v2928_v30 }
  0x8e   :  { %1875 = vmatpush1.bf16.msra.mxu0 %v2354_v39  ;;  %1928 = vmatpush1.bf16.msra.mxu1 %v2356_v40  ;;  %v206_v39 = vld [vmem:[%s3642_s1 + $0x5e0] sm:$0xff]  ;;  %v199_v40 = vld [vmem:[%s3642_s1 + $0x5a8] sm:$0xff] }
  0x8f   :  { %1876 = vmatprep.subr.bf16.mxu0 %v2371_v41  ;;  %1929 = vmatprep.subr.bf16.mxu1 %v2373_v42  ;;  %v207_v41 = vld [vmem:[%s3642_s1 + $0x5e8] sm:$0xff]  ;;  %v2482_v42 = vcombine.low %v182_v29, %v190_v31  ;;  %v2499_v44 = vcombine.high %v198_v38, %v206_v39 }
  0x90   :  { %1902 = vmatprep.mubr.bf16.mxu0 %v2757_v56  ;;  %1955 = vmatprep.mubr.bf16.mxu1 %v2757_v56  ;;  %v119_v56 = vld [vmem:[%s3642_s1 + $0x328] sm:$0xff]  ;;  %v2501_v45 = vcombine.high %v199_v40, %v207_v41  ;;  %v2500_v51 = vcombine.low %v199_v40, %v207_v41  ;;  %v72_v41 = vld [vmem:[%s3642_s1 + $0x1b0] sm:$0xff] }
  0x91   :  { %v2421_v2 = vcombine.high %v119_v56, %v127_v62  ;;  %v2420_v8 = vcombine.low %v119_v56, %v127_v62  ;;  %v246_v62 = vld [vmem:[%s3642_s1 + $0x720] sm:$0xff] }
  0x92   :  { %1877 = vmatpush1.bf16.msra.mxu0 %v2370_v47  ;;  %1930 = vmatpush1.bf16.msra.mxu1 %v2372_v48  ;;  %v222_v47 = vld [vmem:[%s3642_s1 + $0x660] sm:$0xff]  ;;  %v215_v48 = vld [vmem:[%s3642_s1 + $0x628] sm:$0xff] }
  0x93   :  { %1878 = vmatprep.subr.bf16.mxu0 %v2387_v49  ;;  %1931 = vmatprep.subr.bf16.mxu1 %v2389_v50  ;;  %v223_v49 = vld [vmem:[%s3642_s1 + $0x668] sm:$0xff]  ;;  %v2498_v50 = vcombine.low %v198_v38, %v206_v39  ;;  %v2515_v52 = vcombine.high %v214_v46, %v222_v47 }
  0x94   :  { %v2517_v53 = vcombine.high %v215_v48, %v223_v49  ;;  %v2516_v60 = vcombine.low %v215_v48, %v223_v49  ;;  %v88_v48 = vld [vmem:[%s3642_s1 + $0x230] sm:$0xff] }
  0x95   :  { %v96_v49 = vld [vmem:[%s3642_s1 + $0x270] sm:$0xff] }
  0x96   :  { %1879 = vmatpush1.bf16.msra.mxu0 %v2386_v55  ;;  %1932 = vmatpush1.bf16.msra.mxu1 %v2388_v57  ;;  %v238_v55 = vld [vmem:[%s3642_s1 + $0x6e0] sm:$0xff]  ;;  %v231_v57 = vld [vmem:[%s3642_s1 + $0x6a8] sm:$0xff] }
  0x97   :  { %1880 = vmatprep.subr.bf16.mxu0 %v2403_v58  ;;  %1933 = vmatprep.subr.bf16.mxu1 %v2405_v59  ;;  %v239_v58 = vld [vmem:[%s3642_s1 + $0x6e8] sm:$0xff]  ;;  %v2514_v59 = vcombine.low %v214_v46, %v222_v47  ;;  %v2531_v61 = vcombine.high %v230_v54, %v238_v55 }
  0x98   :  { %v2533_v56 = vcombine.high %v231_v57, %v239_v58  ;;  %v2532_v3 = vcombine.low %v231_v57, %v239_v58  ;;  %v112_v57 = vld [vmem:[%s3642_s1 + $0x2f0] sm:$0xff]  ;;  %v2640_v58 = vld [vmem:[%s3643_s0 + $0x4] ss:$8 sps:$4 sm:$0xff]  }
  0x9a   :  { %1881 = vmatpush1.bf16.msra.mxu0 %v2402_v63  ;;  %1934 = vmatpush1.bf16.msra.mxu1 %v2404_v0  ;;  %v254_v63 = vld [vmem:[%s3642_s1 + $0x760] sm:$0xff]  ;;  %v247_v0 = vld [vmem:[%s3642_s1 + $0x728] sm:$0xff] }
  0x9b   :  { %1882 = vmatprep.subr.bf16.mxu0 %v2419_v1  ;;  %1935 = vmatprep.subr.bf16.mxu1 %v2421_v2  ;;  %v255_v1 = vld [vmem:[%s3642_s1 + $0x768] sm:$0xff]  ;;  %v2530_v2 = vcombine.low %v230_v54, %v238_v55  ;;  %v2547_v4 = vcombine.high %v246_v62, %v254_v63  ;;  %v104_v55 = vld [vmem:[%s3642_s1 + $0x2b0] sm:$0xff] }
  0x9c   :  { %v2549_v5 = vcombine.high %v247_v0, %v255_v1  ;;  %v2548_v12 = vcombine.low %v247_v0, %v255_v1  ;;  %v128_v0 = vld [vmem:[%s3642_s1 + $0x370] sm:$0xff]  ;;  %v121_v1 = vld [vmem:[%s3642_s1 + $0x338] sm:$0xff] }
  0x9e   :  { %1883 = vmatpush1.bf16.msra.mxu0 %v2418_v7  ;;  %1936 = vmatpush1.bf16.msra.mxu1 %v2420_v8  ;;  %v270_v7 = vld [vmem:[%s3642_s1 + $0x7e0] sm:$0xff]  ;;  %v263_v8 = vld [vmem:[%s3642_s1 + $0x7a8] sm:$0xff] }
  0x9f   :  { %1884 = vmatprep.subr.bf16.mxu0 %v2435_v9  ;;  %1937 = vmatprep.subr.bf16.mxu1 %v2437_v11  ;;  %v271_v9 = vld [vmem:[%s3642_s1 + $0x7e8] sm:$0xff]  ;;  %v2546_v11 = vcombine.low %v246_v62, %v254_v63  ;;  %v2563_v13 = vcombine.high %v262_v6, %v270_v7  ;;  %v120_v63 = vld [vmem:[%s3642_s1 + $0x330] sm:$0xff] }
  0xa0   :  { %v2565_v14 = vcombine.high %v263_v8, %v271_v9  ;;  %v2564_v21 = vcombine.low %v263_v8, %v271_v9  ;;  %v144_v8 = vld [vmem:[%s3642_s1 + $0x3f0] sm:$0xff]  ;;  %v137_v9 = vld [vmem:[%s3642_s1 + $0x3b8] sm:$0xff] }
  0xa2   :  { %1885 = vmatpush1.bf16.msra.mxu0 %v2434_v16  ;;  %1938 = vmatpush1.bf16.msra.mxu1 %v2436_v17  ;;  %v32_v16 = vld [vmem:[%s3642_s1 + $0x70] sm:$0xff]  ;;  %v25_v17 = vld [vmem:[%s3642_s1 + $0x38] sm:$0xff] }
  0xa3   :  { %1886 = vmatprep.subr.bf16.mxu0 %v2451_v18  ;;  %1939 = vmatprep.subr.bf16.mxu1 %v2453_v20  ;;  %v33_v18 = vld [vmem:[%s3642_s1 + $0x78] sm:$0xff]  ;;  %v2562_v20 = vcombine.low %v262_v6, %v270_v7  ;;  %v2327_v22 = vcombine.high %v24_v15, %v32_v16  ;;  %v136_v7 = vld [vmem:[%s3642_s1 + $0x3b0] sm:$0xff] }
  0xa4   :  { %v2329_v23 = vcombine.high %v25_v17, %v33_v18  ;;  %v2328_v29 = vcombine.low %v25_v17, %v33_v18  ;;  %v160_v17 = vld [vmem:[%s3642_s1 + $0x470] sm:$0xff]  ;;  %v153_v18 = vld [vmem:[%s3642_s1 + $0x438] sm:$0xff] }
  0xa6   :  { %1887 = vmatpush1.bf16.msra.mxu0 %v2450_v25  ;;  %1940 = vmatpush1.bf16.msra.mxu1 %v2452_v26  ;;  %v48_v25 = vld [vmem:[%s3642_s1 + $0xf0] sm:$0xff]  ;;  %v41_v26 = vld [vmem:[%s3642_s1 + $0xb8] sm:$0xff] }
  0xa7   :  { %1888 = vmatprep.subr.bf16.mxu0 %v2467_v27  ;;  %1941 = vmatprep.subr.bf16.mxu1 %v2469_v28  ;;  %v49_v27 = vld [vmem:[%s3642_s1 + $0xf8] sm:$0xff]  ;;  %v2326_v28 = vcombine.low %v24_v15, %v32_v16  ;;  %v2343_v31 = vcombine.high %v40_v24, %v48_v25  ;;  %v152_v16 = vld [vmem:[%s3642_s1 + $0x430] sm:$0xff] }
  0xa8   :  { %v2345_v32 = vcombine.high %v41_v26, %v49_v27  ;;  %v2344_v38 = vcombine.low %v41_v26, %v49_v27  ;;  %v176_v26 = vld [vmem:[%s3642_s1 + $0x4f0] sm:$0xff]  ;;  %v169_v27 = vld [vmem:[%s3642_s1 + $0x4b8] sm:$0xff] }
  0xaa   :  { %1889 = vmatpush1.bf16.msra.mxu0 %v2466_v34  ;;  %1942 = vmatpush1.bf16.msra.mxu1 %v2468_v35  ;;  %v64_v34 = vld [vmem:[%s3642_s1 + $0x170] sm:$0xff]  ;;  %v57_v35 = vld [vmem:[%s3642_s1 + $0x138] sm:$0xff] }
  0xab   :  { %1890 = vmatprep.subr.bf16.mxu0 %v2483_v36  ;;  %1943 = vmatprep.subr.bf16.mxu1 %v2485_v37  ;;  %v65_v36 = vld [vmem:[%s3642_s1 + $0x178] sm:$0xff]  ;;  %v2342_v37 = vcombine.low %v40_v24, %v48_v25  ;;  %v2359_v39 = vcombine.high %v56_v33, %v64_v34  ;;  %v168_v25 = vld [vmem:[%s3642_s1 + $0x4b0] sm:$0xff] }
  0xac   :  { %v2361_v40 = vcombine.high %v57_v35, %v65_v36 }
  0xae   :  { %1891 = vmatpush1.bf16.msra.mxu0 %v2482_v42  ;;  %1944 = vmatpush1.bf16.msra.mxu1 %v2484_v43  ;;  %v80_v42 = vld [vmem:[%s3642_s1 + $0x1f0] sm:$0xff]  ;;  %v81_v43 = vld [vmem:[%s3642_s1 + $0x1f8] sm:$0xff] }
  0xaf   :  { %1892 = vmatprep.subr.bf16.mxu0 %v2499_v44  ;;  %1945 = vmatprep.subr.bf16.mxu1 %v2501_v45  ;;  %v2358_v44 = vcombine.low %v56_v33, %v64_v34  ;;  %v2360_v45 = vcombine.low %v57_v35, %v65_v36  ;;  %v2375_v46 = vcombine.high %v72_v41, %v80_v42  ;;  %v184_v34 = vld [vmem:[%s3642_s1 + $0x530] sm:$0xff]  ;;  %v185_v36 = vld [vmem:[%s3642_s1 + $0x538] sm:$0xff] }
  0xb0   :  { %v192_v35 = vld [vmem:[%s3642_s1 + $0x570] sm:$0xff] }
  0xb2   :  { %1893 = vmatpush1.bf16.msra.mxu0 %v2498_v50  ;;  %1946 = vmatpush1.bf16.msra.mxu1 %v2500_v51  ;;  %v97_v50 = vld [vmem:[%s3642_s1 + $0x278] sm:$0xff]  ;;  %v2374_v51 = vcombine.low %v72_v41, %v80_v42  ;;  %v200_v42 = vld [vmem:[%s3642_s1 + $0x5b0] sm:$0xff] }
  0xb3   :  { %1894 = vmatprep.subr.bf16.mxu0 %v2515_v52  ;;  %1947 = vmatprep.subr.bf16.mxu1 %v2517_v53  ;;  %v2391_v53 = vcombine.high %v88_v48, %v96_v49 }
  0xb6   :  { %1895 = vmatpush1.bf16.msra.mxu0 %v2514_v59  ;;  %1948 = vmatpush1.bf16.msra.mxu1 %v2516_v60  ;;  %v113_v59 = vld [vmem:[%s3642_s1 + $0x2f8] sm:$0xff]  ;;  %v2390_v60 = vcombine.low %v88_v48, %v96_v49  ;;  %v216_v49 = vld [vmem:[%s3642_s1 + $0x630] sm:$0xff] }
  0xb7   :  { %1896 = vmatprep.subr.bf16.mxu0 %v2531_v61  ;;  %1949 = vmatprep.subr.bf16.mxu1 %v2533_v56  ;;  %v2407_v56 = vcombine.high %v104_v55, %v112_v57 }
  0xba   :  { %1897 = vmatpush1.bf16.msra.mxu0 %v2530_v2  ;;  %1950 = vmatpush1.bf16.msra.mxu1 %v2532_v3  ;;  %v129_v2 = vld [vmem:[%s3642_s1 + $0x378] sm:$0xff]  ;;  %v2406_v3 = vcombine.low %v104_v55, %v112_v57  ;;  %v232_v57 = vld [vmem:[%s3642_s1 + $0x6b0] sm:$0xff] }
  0xbb   :  { %1898 = vmatprep.subr.bf16.mxu0 %v2547_v4  ;;  %1951 = vmatprep.subr.bf16.mxu1 %v2549_v5  ;;  %v2423_v5 = vcombine.high %v120_v63, %v128_v0  ;;  %v2425_v6 = vcombine.high %v121_v1, %v129_v2 }
  0xbe   :  { %1899 = vmatpush1.bf16.msra.mxu0 %v2546_v11  ;;  %1952 = vmatpush1.bf16.msra.mxu1 %v2548_v12  ;;  %v145_v11 = vld [vmem:[%s3642_s1 + $0x3f8] sm:$0xff]  ;;  %v2422_v12 = vcombine.low %v120_v63, %v128_v0  ;;  %v248_v63 = vld [vmem:[%s3642_s1 + $0x730] sm:$0xff] }
  0xbf   :  { %1900 = vmatprep.subr.bf16.mxu0 %v2563_v13  ;;  %1953 = vmatprep.subr.bf16.mxu1 %v2565_v14  ;;  %v2424_v13 = vcombine.low %v121_v1, %v129_v2  ;;  %v2439_v14 = vcombine.high %v136_v7, %v144_v8  ;;  %v2441_v15 = vcombine.high %v137_v9, %v145_v11  ;;  %v256_v0 = vld [vmem:[%s3642_s1 + $0x770] sm:$0xff]  ;;  %v249_v1 = vld [vmem:[%s3642_s1 + $0x738] sm:$0xff] }
  0xc0   :  { %v257_v2 = vld [vmem:[%s3642_s1 + $0x778] sm:$0xff] }
  0xc2   :  { %1901 = vmatpush1.bf16.msra.mxu0 %v2562_v20  ;;  %1954 = vmatpush1.bf16.msra.mxu1 %v2564_v21  ;;  %v161_v20 = vld [vmem:[%s3642_s1 + $0x478] sm:$0xff]  ;;  %v2438_v21 = vcombine.low %v136_v7, %v144_v8  ;;  %v264_v7 = vld [vmem:[%s3642_s1 + $0x7b0] sm:$0xff] }
  0xc3   :  { %1976 = vmatprep.subr.bf16.mxu0 %v2327_v22  ;;  %2029 = vmatprep.subr.bf16.mxu1 %v2329_v23  ;;  %v2440_v22 = vcombine.low %v137_v9, %v145_v11  ;;  %v2455_v23 = vcombine.high %v152_v16, %v160_v17  ;;  %v2457_v24 = vcombine.high %v153_v18, %v161_v20  ;;  %v272_v8 = vld [vmem:[%s3642_s1 + $0x7f0] sm:$0xff]  ;;  %v265_v9 = vld [vmem:[%s3642_s1 + $0x7b8] sm:$0xff] }
  0xc4   :  { %v273_v11 = vld [vmem:[%s3642_s1 + $0x7f8] sm:$0xff] }
  0xc5   :  { %1903 = vmatmul.mubr.bf16.vlgmr.msra.gmra.mrb[16].mxu0 %v2884_v10  ;;  %1956 = vmatmul.mubr.bf16.vlgmr.msra.gmra.mrb[16].mxu1 %v2884_v10  ;;  %v73_v10 = vld [vmem:[%s3642_s1 + $0x1b8] sm:$0xff] }
  0xc6   :  { %1977 = vmatpush1.bf16.msra.mxu0 %v2326_v28  ;;  %2030 = vmatpush1.bf16.msra.mxu1 %v2328_v29  ;;  %v2377_v47 = vcombine.high %v73_v10, %v81_v43  ;;  %v2376_v52 = vcombine.low %v73_v10, %v81_v43  ;;  %v177_v28 = vld [vmem:[%s3642_s1 + $0x4f8] sm:$0xff]  ;;  %v2454_v29 = vcombine.low %v152_v16, %v160_v17  ;;  %v208_v10 = vld [vmem:[%s3642_s1 + $0x5f0] sm:$0xff] }
  0xc7   :  { %1978 = vmatprep.subr.bf16.mxu0 %v2343_v31  ;;  %2031 = vmatprep.subr.bf16.mxu1 %v2345_v32  ;;  %v2456_v31 = vcombine.low %v153_v18, %v161_v20  ;;  %v2471_v32 = vcombine.high %v168_v25, %v176_v26  ;;  %v2473_v33 = vcombine.high %v169_v27, %v177_v28  ;;  %v201_v43 = vld [vmem:[%s3642_s1 + $0x5b8] sm:$0xff]  ;;  %v2641_v18 = vld [vmem:[%s3643_s0] ss:$8 sps:$4 sm:$0xff]  }
  0xc8   :  { %1912 = vmatprep.mubr.bf16.mxu0 %v2901_v19  ;;  %1965 = vmatprep.mubr.bf16.mxu1 %v2901_v19  ;;  %v89_v19 = vld [vmem:[%s3642_s1 + $0x238] sm:$0xff]  ;;  %v2566_v16 = vcombine.low %v264_v7, %v272_v8  ;;  %v2568_v17 = vcombine.low %v265_v9, %v273_v11 }
  0xc9   :  { %v2393_v54 = vcombine.high %v89_v19, %v97_v50  ;;  %v2392_v61 = vcombine.low %v89_v19, %v97_v50  ;;  %v224_v19 = vld [vmem:[%s3642_s1 + $0x670] sm:$0xff]  ;;  %v217_v50 = vld [vmem:[%s3642_s1 + $0x638] sm:$0xff] }
  0xca   :  { %1979 = vmatpush1.bf16.msra.mxu0 %v2342_v37  ;;  %2032 = vmatpush1.bf16.msra.mxu1 %v2344_v38  ;;  %v193_v37 = vld [vmem:[%s3642_s1 + $0x578] sm:$0xff]  ;;  %v2470_v38 = vcombine.low %v168_v25, %v176_v26  ;;  %v3494_v25 = vld [vmem:[%s3644_s2] sm:$0xff] }
  0xcb   :  { %1980 = vmatprep.subr.bf16.mxu0 %v2359_v39  ;;  %2033 = vmatprep.subr.bf16.mxu1 %v2361_v40  ;;  %v2472_v39 = vcombine.low %v169_v27, %v177_v28  ;;  %v2487_v40 = vcombine.high %v184_v34, %v192_v35  ;;  %v2489_v41 = vcombine.high %v185_v36, %v193_v37  ;;  %v2642_v20 = vld [vmem:[%s3643_s0 + $0x14] ss:$8 sps:$4 sm:$0xff]  }
  0xcd   :  { %1913 = vmatmul.mubr.bf16.gmra.mrb[20].mxu0 %v2928_v30  ;;  %1966 = vmatmul.mubr.bf16.gmra.mrb[20].mxu1 %v2928_v30  ;;  %v105_v30 = vld [vmem:[%s3642_s1 + $0x2b8] sm:$0xff] }
  0xce   :  { %1981 = vmatpush1.bf16.msra.mxu0 %v2358_v44  ;;  %2034 = vmatpush1.bf16.msra.mxu1 %v2360_v45  ;;  %v2409_v62 = vcombine.high %v105_v30, %v113_v59  ;;  %v2408_v4 = vcombine.low %v105_v30, %v113_v59  ;;  %v209_v44 = vld [vmem:[%s3642_s1 + $0x5f8] sm:$0xff]  ;;  %v2486_v45 = vcombine.low %v184_v34, %v192_v35 }
  0xcf   :  { %1982 = vmatprep.subr.bf16.mxu0 %v2375_v46  ;;  %2035 = vmatprep.subr.bf16.mxu1 %v2377_v47  ;;  %v2488_v46 = vcombine.low %v185_v36, %v193_v37  ;;  %v2503_v47 = vcombine.high %v200_v42, %v208_v10  ;;  %v2505_v48 = vcombine.high %v201_v43, %v209_v44  ;;  %v233_v30 = vld [vmem:[%s3642_s1 + $0x6b8] sm:$0xff] }
  0xd0   :  { %2008 = vmatprep.mubr.bf16.mxu0 %v2640_v58  ;;  %2061 = vmatprep.mubr.bf16.mxu1 %v2640_v58  ;;  %v240_v58 = vld [vmem:[%s3642_s1 + $0x6f0] sm:$0xff]  ;;  %v241_v59 = vld [vmem:[%s3642_s1 + $0x6f8] sm:$0xff] }
  0xd2   :  { %1983 = vmatpush1.bf16.msra.mxu0 %v2374_v51  ;;  %2036 = vmatpush1.bf16.msra.mxu1 %v2376_v52  ;;  %v225_v51 = vld [vmem:[%s3642_s1 + $0x678] sm:$0xff]  ;;  %v2502_v52 = vcombine.low %v200_v42, %v208_v10 }
  0xd3   :  { %1984 = vmatprep.subr.bf16.mxu0 %v2391_v53  ;;  %2037 = vmatprep.subr.bf16.mxu1 %v2393_v54  ;;  %v2504_v53 = vcombine.low %v201_v43, %v209_v44  ;;  %v2519_v54 = vcombine.high %v216_v49, %v224_v19  ;;  %v2521_v55 = vcombine.high %v217_v50, %v225_v51 }
  0xd6   :  { %1985 = vmatpush1.bf16.msra.mxu0 %v2390_v60  ;;  %2038 = vmatpush1.bf16.msra.mxu1 %v2392_v61  ;;  %v2518_v60 = vcombine.low %v216_v49, %v224_v19  ;;  %v2520_v61 = vcombine.low %v217_v50, %v225_v51 }
  0xd7   :  { %1986 = vmatprep.subr.bf16.mxu0 %v2407_v56  ;;  %2039 = vmatprep.subr.bf16.mxu1 %v2409_v62  ;;  %v2535_v56 = vcombine.high %v232_v57, %v240_v58  ;;  %v2537_v62 = vcombine.high %v233_v30, %v241_v59 }
  0xda   :  { %1987 = vmatpush1.bf16.msra.mxu0 %v2406_v3  ;;  %2040 = vmatpush1.bf16.msra.mxu1 %v2408_v4  ;;  %v2534_v3 = vcombine.low %v232_v57, %v240_v58  ;;  %v2536_v4 = vcombine.low %v233_v30, %v241_v59 }
  0xdb   :  { %1988 = vmatprep.subr.bf16.mxu0 %v2423_v5  ;;  %2041 = vmatprep.subr.bf16.mxu1 %v2425_v6  ;;  %v2551_v5 = vcombine.high %v248_v63, %v256_v0  ;;  %v2553_v6 = vcombine.high %v249_v1, %v257_v2 }
  0xde   :  { %1989 = vmatpush1.bf16.msra.mxu0 %v2422_v12  ;;  %2042 = vmatpush1.bf16.msra.mxu1 %v2424_v13  ;;  %v2550_v12 = vcombine.low %v248_v63, %v256_v0  ;;  %v2552_v13 = vcombine.low %v249_v1, %v257_v2 }
  0xdf   :  { %1990 = vmatprep.subr.bf16.mxu0 %v2439_v14  ;;  %2043 = vmatprep.subr.bf16.mxu1 %v2441_v15  ;;  %v2567_v14 = vcombine.high %v264_v7, %v272_v8  ;;  %v2569_v15 = vcombine.high %v265_v9, %v273_v11 }
  0xe2   :  { %1991 = vmatpush1.bf16.msra.mxu0 %v2438_v21  ;;  %2044 = vmatpush1.bf16.msra.mxu1 %v2440_v22  ;;  %v278_v21 = vlaneseq  ;;  %v2643_v22 = vld [vmem:[%s3643_s0 + $0x10] ss:$8 sps:$4 sm:$0xff]  }
  0xe3   :  { %1992 = vmatprep.subr.bf16.mxu0 %v2455_v23  ;;  %2045 = vmatprep.subr.bf16.mxu1 %v2457_v24 }
  0xe4   :  { %v3488_v23 = vshrl.u32 %v278_v21, 7 }
  0xe6   :  { %1993 = vmatpush1.bf16.msra.mxu0 %v2454_v29  ;;  %2046 = vmatpush1.bf16.msra.mxu1 %v2456_v31  ;;  %v280_v24 = vsub.s32 0, %v3488_v23  ;;  %v288_v26 = vsub.s32 2, %v3488_v23  ;;  %v284_v27 = vsub.s32 1, %v3488_v23  ;;  %v292_v28 = vsub.s32 3, %v3488_v23 }
  0xe7   :  { %1994 = vmatprep.subr.bf16.mxu0 %v2471_v32  ;;  %2047 = vmatprep.subr.bf16.mxu1 %v2473_v33  ;;  %v296_v7 = vsub.s32 4, %v3488_v23  ;;  %v304_v8 = vsub.s32 6, %v3488_v23  ;;  %v300_v9 = vsub.s32 5, %v3488_v23  ;;  %v308_v11 = vsub.s32 7, %v3488_v23 }
  0xe8   :  { %v281_v29 = vrot.slane %v3494_v25, %v280_v24  ;;  %v289_v31 = vrot.slane %v3494_v25, %v288_v26  ;;  %v285_v32 = vrot.slane %v3494_v25, %v284_v27  ;;  %v293_v33 = vrot.slane %v3494_v25, %v292_v28 }
  0xea   :  { %1995 = vmatpush1.bf16.msra.mxu0 %v2470_v38  ;;  %2048 = vmatpush1.bf16.msra.mxu1 %v2472_v39 }
  0xeb   :  { %1996 = vmatprep.subr.bf16.mxu0 %v2487_v40  ;;  %2049 = vmatprep.subr.bf16.mxu1 %v2489_v41 }
  0xee   :  { %1997 = vmatpush1.bf16.msra.mxu0 %v2486_v45  ;;  %2050 = vmatpush1.bf16.msra.mxu1 %v2488_v46 }
  0xef   :  { %1998 = vmatprep.subr.bf16.mxu0 %v2503_v47  ;;  %2051 = vmatprep.subr.bf16.mxu1 %v2505_v48 }
  0xf2   :  { %1999 = vmatpush1.bf16.msra.mxu0 %v2502_v52  ;;  %2052 = vmatpush1.bf16.msra.mxu1 %v2504_v53 }
  0xf3   :  { %2000 = vmatprep.subr.bf16.mxu0 %v2519_v54  ;;  %2053 = vmatprep.subr.bf16.mxu1 %v2521_v55 }
  0xf6   :  { %2001 = vmatpush1.bf16.msra.mxu0 %v2518_v60  ;;  %2054 = vmatpush1.bf16.msra.mxu1 %v2520_v61 }
  0xf7   :  { %2002 = vmatprep.subr.bf16.mxu0 %v2535_v56  ;;  %2055 = vmatprep.subr.bf16.mxu1 %v2537_v62 }
  0xfa   :  { %2003 = vmatpush1.bf16.msra.mxu0 %v2534_v3  ;;  %2056 = vmatpush1.bf16.msra.mxu1 %v2536_v4 }
  0xfb   :  { %2004 = vmatprep.subr.bf16.mxu0 %v2551_v5  ;;  %2057 = vmatprep.subr.bf16.mxu1 %v2553_v6 }
  0xfe   :  { %2005 = vmatpush1.bf16.msra.mxu0 %v2550_v12  ;;  %2058 = vmatpush1.bf16.msra.mxu1 %v2552_v13  ;;  %v297_v12 = vrot.slane %v3494_v25, %v296_v7  ;;  %v305_v13 = vrot.slane %v3494_v25, %v304_v8 }
  0xff   :  { %2006 = vmatprep.subr.bf16.mxu0 %v2567_v14  ;;  %2059 = vmatprep.subr.bf16.mxu1 %v2569_v15  ;;  %v301_v14 = vrot.slane %v3494_v25, %v300_v9  ;;  %v309_v15 = vrot.slane %v3494_v25, %v308_v11 }
 0x102   :  { %2007 = vmatpush1.bf16.msra.mxu0 %v2566_v16  ;;  %2060 = vmatpush1.bf16.msra.mxu1 %v2568_v17 }
 0x105   :  { %2009 = vmatmul.mubr.bf16.vlgmr.msra.gmra.mrb[24].mxu0 %v2641_v18  ;;  %2062 = vmatmul.mubr.bf16.vlgmr.msra.gmra.mrb[24].mxu1 %v2641_v18 }
 0x106   :  { %2018 = vmatprep.mubr.bf16.mxu0 %v2642_v20  ;;  %2071 = vmatprep.mubr.bf16.mxu1 %v2642_v20 }
 0x10d   :  { %2019 = vmatmul.mubr.bf16.gmra.mrb[28].mxu0 %v2643_v22  ;;  %2072 = vmatmul.mubr.bf16.gmra.mrb[28].mxu1 %v2643_v22 }
 0x118   :  { %v1692_v34 = vpop.f32.mrb[0].mxu0  ;;  %v1745_v36 = vpop.f32.mrb[0].mxu1 }
 0x119   :  { %v1693_v35 = vadd.f32 %v1692_v34, %v281_v29  ;;  %v1694_v37 = vpop.f32.mrb[1].mxu0  ;;  %v1746_v38 = vadd.f32 %v1745_v36, %v289_v31  ;;  %v1747_v40 = vpop.f32.mrb[1].mxu1 }
 0x11a   :  { %v1695_v39 = vadd.f32 %v1694_v37, %v285_v32  ;;  %v1696_v41 = vpop.f32.mrb[2].mxu0  ;;  %v1748_v42 = vadd.f32 %v1747_v40, %v293_v33  ;;  %v1749_v43 = vpop.f32.mrb[2].mxu1 }
 0x11b   :  { %v1697_v10 = vadd.f32 %v1696_v41, %v281_v29  ;;  %v1698_v44 = vpop.f32.mrb[3].mxu0  ;;  %v1750_v46 = vadd.f32 %v1749_v43, %v289_v31  ;;  %v1751_v48 = vpop.f32.mrb[3].mxu1 }
 0x11c   :  { %v2602_v45 = vpack.c.bf16 %v1695_v39, %v1693_v35  ;;  %v1699_v47 = vadd.f32 %v1698_v44, %v285_v32  ;;  %v2603_v49 = vpack.c.bf16 %v1748_v42, %v1746_v38  ;;  %v1752_v19 = vadd.f32 %v1751_v48, %v293_v33 }
 0x11e   :  { %2274 = vst [vmem:[%s3645_s3] sm:$0xff] %v2602_v45  ;;  %v2610_v50 = vpack.c.bf16 %v1699_v47, %v1697_v10  ;;  %2275 = vst [vmem:[%s3645_s3 + $0x8] sm:$0xff] %v2603_v49  ;;  %v2611_v51 = vpack.c.bf16 %v1752_v19, %v1750_v46 }
 0x120   :  { %2282 = vst [vmem:[%s3645_s3 + $0x40] sm:$0xff] %v2610_v50  ;;  %v1702_v52 = vpop.f32.mrb[4].mxu0  ;;  %2283 = vst [vmem:[%s3645_s3 + $0x48] sm:$0xff] %v2611_v51  ;;  %v1755_v54 = vpop.f32.mrb[4].mxu1 }
 0x121   :  { %v1703_v53 = vadd.f32 %v1702_v52, %v281_v29  ;;  %v1704_v55 = vpop.f32.mrb[5].mxu0  ;;  %v1756_v57 = vadd.f32 %v1755_v54, %v289_v31  ;;  %v1757_v30 = vpop.f32.mrb[5].mxu1 }
 0x122   :  { %v1705_v58 = vadd.f32 %v1704_v55, %v285_v32  ;;  %v1706_v59 = vpop.f32.mrb[6].mxu0  ;;  %v1758_v60 = vadd.f32 %v1757_v30, %v293_v33  ;;  %v1759_v56 = vpop.f32.mrb[6].mxu1 }
 0x123   :  { %v1707_v61 = vadd.f32 %v1706_v59, %v281_v29  ;;  %v1708_v62 = vpop.f32.mrb[7].mxu0  ;;  %v1760_v0 = vadd.f32 %v1759_v56, %v289_v31  ;;  %v1761_v2 = vpop.f32.mrb[7].mxu1 }
 0x124   :  { %v2618_v63 = vpack.c.bf16 %v1705_v58, %v1703_v53  ;;  %v1709_v1 = vadd.f32 %v1708_v62, %v285_v32  ;;  %v2619_v3 = vpack.c.bf16 %v1758_v60, %v1756_v57  ;;  %v1762_v4 = vadd.f32 %v1761_v2, %v293_v33 }
 0x126   :  { %2290 = vst [vmem:[%s3645_s3 + $0x80] sm:$0xff] %v2618_v63  ;;  %v2626_v5 = vpack.c.bf16 %v1709_v1, %v1707_v61  ;;  %2291 = vst [vmem:[%s3645_s3 + $0x88] sm:$0xff] %v2619_v3  ;;  %v2627_v6 = vpack.c.bf16 %v1762_v4, %v1760_v0  ;;  %v275_v61 = vld [vmem:[%s3644_s2 + $0x8] sm:$0xff] }
 0x127   :  { %v313_v56 = vrot.slane %v275_v61, %v280_v24  ;;  %v321_v62 = vrot.slane %v275_v61, %v288_v26  ;;  %v317_v63 = vrot.slane %v275_v61, %v284_v27  ;;  %v325_v0 = vrot.slane %v275_v61, %v292_v28 }
 0x128   :  { %2298 = vst [vmem:[%s3645_s3 + $0xc0] sm:$0xff] %v2626_v5  ;;  %2299 = vst [vmem:[%s3645_s3 + $0xc8] sm:$0xff] %v2627_v6 }
 0x158   :  { %v1798_v16 = vpop.f32.mrb[8].mxu0  ;;  %v1851_v18 = vpop.f32.mrb[8].mxu1 }
 0x159   :  { %v1799_v17 = vadd.f32 %v1798_v16, %v297_v12  ;;  %v1800_v20 = vpop.f32.mrb[9].mxu0  ;;  %v1852_v21 = vadd.f32 %v1851_v18, %v305_v13  ;;  %v1853_v29 = vpop.f32.mrb[9].mxu1 }
 0x15a   :  { %v1801_v22 = vadd.f32 %v1800_v20, %v301_v14  ;;  %v1802_v31 = vpop.f32.mrb[10].mxu0  ;;  %v1854_v32 = vadd.f32 %v1853_v29, %v309_v15  ;;  %v1855_v34 = vpop.f32.mrb[10].mxu1 }
 0x15b   :  { %v1803_v33 = vadd.f32 %v1802_v31, %v297_v12  ;;  %v1804_v35 = vpop.f32.mrb[11].mxu0  ;;  %v1856_v37 = vadd.f32 %v1855_v34, %v305_v13  ;;  %v1857_v39 = vpop.f32.mrb[11].mxu1 }
 0x15c   :  { %v2604_v36 = vpack.c.bf16 %v1801_v22, %v1799_v17  ;;  %v1805_v38 = vadd.f32 %v1804_v35, %v301_v14  ;;  %v2605_v40 = vpack.c.bf16 %v1854_v32, %v1852_v21  ;;  %v1858_v41 = vadd.f32 %v1857_v39, %v309_v15 }
 0x15e   :  { %2276 = vst [vmem:[%s3645_s3 + $0x10] sm:$0xff] %v2604_v36  ;;  %v2612_v25 = vpack.c.bf16 %v1805_v38, %v1803_v33  ;;  %2277 = vst [vmem:[%s3645_s3 + $0x18] sm:$0xff] %v2605_v40  ;;  %v2613_v42 = vpack.c.bf16 %v1858_v41, %v1856_v37 }
 0x160   :  { %2284 = vst [vmem:[%s3645_s3 + $0x50] sm:$0xff] %v2612_v25  ;;  %v1808_v10 = vpop.f32.mrb[12].mxu0  ;;  %2285 = vst [vmem:[%s3645_s3 + $0x58] sm:$0xff] %v2613_v42  ;;  %v1861_v44 = vpop.f32.mrb[12].mxu1 }
 0x161   :  { %v1809_v43 = vadd.f32 %v1808_v10, %v297_v12  ;;  %v1810_v45 = vpop.f32.mrb[13].mxu0  ;;  %v1862_v46 = vadd.f32 %v1861_v44, %v305_v13  ;;  %v1863_v48 = vpop.f32.mrb[13].mxu1 }
 0x162   :  { %v1811_v47 = vadd.f32 %v1810_v45, %v301_v14  ;;  %v1812_v49 = vpop.f32.mrb[14].mxu0  ;;  %v1864_v19 = vadd.f32 %v1863_v48, %v309_v15  ;;  %v1865_v51 = vpop.f32.mrb[14].mxu1  ;;  %v329_v48 = vrot.slane %v275_v61, %v296_v7 }
 0x163   :  { %v1813_v50 = vadd.f32 %v1812_v49, %v297_v12  ;;  %v1814_v52 = vpop.f32.mrb[15].mxu0  ;;  %v1866_v54 = vadd.f32 %v1865_v51, %v305_v13  ;;  %v1867_v57 = vpop.f32.mrb[15].mxu1  ;;  %v337_v49 = vrot.slane %v275_v61, %v304_v8 }
 0x164   :  { %v2620_v53 = vpack.c.bf16 %v1811_v47, %v1809_v43  ;;  %v1815_v55 = vadd.f32 %v1814_v52, %v301_v14  ;;  %v2621_v58 = vpack.c.bf16 %v1864_v19, %v1862_v46  ;;  %v1868_v30 = vadd.f32 %v1867_v57, %v309_v15 }
 0x165   :  { %v333_v19 = vrot.slane %v275_v61, %v300_v9 }
 0x166   :  { %2292 = vst [vmem:[%s3645_s3 + $0x90] sm:$0xff] %v2620_v53  ;;  %v2628_v59 = vpack.c.bf16 %v1815_v55, %v1813_v50  ;;  %2293 = vst [vmem:[%s3645_s3 + $0x98] sm:$0xff] %v2621_v58  ;;  %v2629_v60 = vpack.c.bf16 %v1868_v30, %v1866_v54  ;;  %v341_v50 = vrot.slane %v275_v61, %v308_v11 }
 0x168   :  { %2300 = vst [vmem:[%s3645_s3 + $0xd0] sm:$0xff] %v2628_v59  ;;  %2301 = vst [vmem:[%s3645_s3 + $0xd8] sm:$0xff] %v2629_v60 }
 0x198   :  { %v1904_v1 = vpop.f32.mrb[16].mxu0  ;;  %v1957_v3 = vpop.f32.mrb[16].mxu1 }
 0x199   :  { %v1905_v2 = vadd.f32 %v1904_v1, %v313_v56  ;;  %v1906_v4 = vpop.f32.mrb[17].mxu0  ;;  %v1958_v5 = vadd.f32 %v1957_v3, %v321_v62  ;;  %v1959_v12 = vpop.f32.mrb[17].mxu1 }
 0x19a   :  { %v1907_v6 = vadd.f32 %v1906_v4, %v317_v63  ;;  %v1908_v13 = vpop.f32.mrb[18].mxu0  ;;  %v1960_v14 = vadd.f32 %v1959_v12, %v325_v0  ;;  %v1961_v24 = vpop.f32.mrb[18].mxu1 }
 0x19b   :  { %v1909_v15 = vadd.f32 %v1908_v13, %v313_v56  ;;  %v1910_v16 = vpop.f32.mrb[19].mxu0  ;;  %v1962_v26 = vadd.f32 %v1961_v24, %v321_v62  ;;  %v1963_v20 = vpop.f32.mrb[19].mxu1 }
 0x19c   :  { %v2606_v17 = vpack.c.bf16 %v1907_v6, %v1905_v2  ;;  %v1911_v18 = vadd.f32 %v1910_v16, %v317_v63  ;;  %v2607_v27 = vpack.c.bf16 %v1960_v14, %v1958_v5  ;;  %v1964_v21 = vadd.f32 %v1963_v20, %v325_v0 }
 0x19e   :  { %2278 = vst [vmem:[%s3645_s3 + $0x20] sm:$0xff] %v2606_v17  ;;  %v2614_v28 = vpack.c.bf16 %v1911_v18, %v1909_v15  ;;  %2279 = vst [vmem:[%s3645_s3 + $0x28] sm:$0xff] %v2607_v27  ;;  %v2615_v22 = vpack.c.bf16 %v1964_v21, %v1962_v26 }
 0x1a0   :  { %2286 = vst [vmem:[%s3645_s3 + $0x60] sm:$0xff] %v2614_v28  ;;  %v1914_v29 = vpop.f32.mrb[20].mxu0  ;;  %2287 = vst [vmem:[%s3645_s3 + $0x68] sm:$0xff] %v2615_v22  ;;  %v1967_v32 = vpop.f32.mrb[20].mxu1 }
 0x1a1   :  { %v1915_v31 = vadd.f32 %v1914_v29, %v313_v56  ;;  %v1916_v33 = vpop.f32.mrb[21].mxu0  ;;  %v1968_v34 = vadd.f32 %v1967_v32, %v321_v62  ;;  %v1969_v36 = vpop.f32.mrb[21].mxu1 }
 0x1a2   :  { %v1917_v35 = vadd.f32 %v1916_v33, %v317_v63  ;;  %v1918_v37 = vpop.f32.mrb[22].mxu0  ;;  %v1970_v38 = vadd.f32 %v1969_v36, %v325_v0  ;;  %v1971_v40 = vpop.f32.mrb[22].mxu1 }
 0x1a3   :  { %v1919_v39 = vadd.f32 %v1918_v37, %v313_v56  ;;  %v1920_v41 = vpop.f32.mrb[23].mxu0  ;;  %v1972_v42 = vadd.f32 %v1971_v40, %v321_v62  ;;  %v1973_v43 = vpop.f32.mrb[23].mxu1 }
 0x1a4   :  { %v2622_v25 = vpack.c.bf16 %v1917_v35, %v1915_v31  ;;  %v1921_v10 = vadd.f32 %v1920_v41, %v317_v63  ;;  %v2623_v44 = vpack.c.bf16 %v1970_v38, %v1968_v34  ;;  %v1974_v45 = vadd.f32 %v1973_v43, %v325_v0 }
 0x1a6   :  { %2294 = vst [vmem:[%s3645_s3 + $0xa0] sm:$0xff] %v2622_v25  ;;  %v2630_v46 = vpack.c.bf16 %v1921_v10, %v1919_v39  ;;  %2295 = vst [vmem:[%s3645_s3 + $0xa8] sm:$0xff] %v2623_v44  ;;  %v2631_v47 = vpack.c.bf16 %v1974_v45, %v1972_v42 }
 0x1a8   :  { %2302 = vst [vmem:[%s3645_s3 + $0xe0] sm:$0xff] %v2630_v46  ;;  %2303 = vst [vmem:[%s3645_s3 + $0xe8] sm:$0xff] %v2631_v47 }
 0x1d8   :  { %v2010_v51 = vpop.f32.mrb[24].mxu0  ;;  %v2063_v53 = vpop.f32.mrb[24].mxu1 }
 0x1d9   :  { %v2011_v52 = vadd.f32 %v2010_v51, %v329_v48  ;;  %v2012_v54 = vpop.f32.mrb[25].mxu0  ;;  %v2064_v55 = vadd.f32 %v2063_v53, %v337_v49  ;;  %v2065_v58 = vpop.f32.mrb[25].mxu1 }
 0x1da   :  { %v2013_v57 = vadd.f32 %v2012_v54, %v333_v19  ;;  %v2014_v30 = vpop.f32.mrb[26].mxu0  ;;  %v2066_v59 = vadd.f32 %v2065_v58, %v341_v50  ;;  %v2067_v7 = vpop.f32.mrb[26].mxu1 }
 0x1db   :  { %v2015_v60 = vadd.f32 %v2014_v30, %v329_v48  ;;  %v2016_v56 = vpop.f32.mrb[27].mxu0  ;;  %v2068_v8 = vadd.f32 %v2067_v7, %v337_v49  ;;  %v2069_v0 = vpop.f32.mrb[27].mxu1 }
 0x1dc   :  { %v2608_v62 = vpack.c.bf16 %v2013_v57, %v2011_v52  ;;  %v2017_v63 = vadd.f32 %v2016_v56, %v333_v19  ;;  %v2609_v9 = vpack.c.bf16 %v2066_v59, %v2064_v55  ;;  %v2070_v1 = vadd.f32 %v2069_v0, %v341_v50 }
 0x1de   :  { %2280 = vst [vmem:[%s3645_s3 + $0x30] sm:$0xff] %v2608_v62  ;;  %v2616_v23 = vpack.c.bf16 %v2017_v63, %v2015_v60  ;;  %2281 = vst [vmem:[%s3645_s3 + $0x38] sm:$0xff] %v2609_v9  ;;  %v2617_v11 = vpack.c.bf16 %v2070_v1, %v2068_v8 }
 0x1e0   :  { %2288 = vst [vmem:[%s3645_s3 + $0x70] sm:$0xff] %v2616_v23  ;;  %v2020_v61 = vpop.f32.mrb[28].mxu0  ;;  %2289 = vst [vmem:[%s3645_s3 + $0x78] sm:$0xff] %v2617_v11  ;;  %v2073_v3 = vpop.f32.mrb[28].mxu1 }
 0x1e1   :  { %v2021_v2 = vadd.f32 %v2020_v61, %v329_v48  ;;  %v2022_v4 = vpop.f32.mrb[29].mxu0  ;;  %v2074_v5 = vadd.f32 %v2073_v3, %v337_v49  ;;  %v2075_v12 = vpop.f32.mrb[29].mxu1 }
 0x1e2   :  { %v2023_v6 = vadd.f32 %v2022_v4, %v333_v19  ;;  %v2024_v13 = vpop.f32.mrb[30].mxu0  ;;  %v2076_v14 = vadd.f32 %v2075_v12, %v341_v50  ;;  %v2077_v24 = vpop.f32.mrb[30].mxu1 }
 0x1e3   :  { %v2025_v15 = vadd.f32 %v2024_v13, %v329_v48  ;;  %v2026_v16 = vpop.f32.mrb[31].mxu0  ;;  %v2078_v26 = vadd.f32 %v2077_v24, %v337_v49  ;;  %v2079_v20 = vpop.f32.mrb[31].mxu1 }
 0x1e4   :  { %v2624_v17 = vpack.c.bf16 %v2023_v6, %v2021_v2  ;;  %v2027_v18 = vadd.f32 %v2026_v16, %v333_v19  ;;  %v2625_v27 = vpack.c.bf16 %v2076_v14, %v2074_v5  ;;  %v2080_v21 = vadd.f32 %v2079_v20, %v341_v50 }
 0x1e6   :  { %2296 = vst [vmem:[%s3645_s3 + $0xb0] sm:$0xff] %v2624_v17  ;;  %v2632_v28 = vpack.c.bf16 %v2027_v18, %v2025_v15  ;;  %2297 = vst [vmem:[%s3645_s3 + $0xb8] sm:$0xff] %v2625_v27  ;;  %v2633_v22 = vpack.c.bf16 %v2080_v21, %v2078_v26 }
 0x1e8   :  { %2304 = vst [vmem:[%s3645_s3 + $0xf0] sm:$0xff] %v2632_v28  ;;  %2305 = vst [vmem:[%s3645_s3 + $0xf8] sm:$0xff] %v2633_v22 }

// kernel: bmn_forward.8
= control target key start
LH: loop header
LB: loop body
LE: loop exit
PB: predicated region body
PF: predicated region fallthrough
CT: control target
= control target key end

     0   :  { %s3758_s12 = smov 0   ;;  %s3760_s13 = smov 0   ;;  %s4892_s0 = inlined_call_operand.vmem [shape: bf16[2,16,16,128], index: 0, kind: input, shape index: {}]   ;;  %s4893_s1 = inlined_call_operand.vmem [shape: bf16[3,384,128], index: 1, kind: input, shape index: {}]   ;;  %s4894_s2 = inlined_call_operand.vmem [shape: f32[1,128], index: 2, kind: input, shape index: {}]   ;;  %s4895_s3 = inlined_call_operand.vmem [shape: bf16[2,16,16,128], index: 3, kind: output, shape index: {}]  }
   0x1   :  { %s3762_s14 = smov 0  }
   0x2 LB: > { %s25_s15 = sadd.s32 1, %s3731_s13  ;;  %p2513_p0 = scmp.ge.s32.totalorder %s3735_s14, 1  ;;  %s3735_s14 = sphi %s3762_s14, %s13_s14   ;;  %s3731_s13 = sphi %s3760_s13, %s4915_s13   ;;  %s3727_s12 = sphi %s3758_s12, %s4914_s12  }
   0x3   : > { %p27_p1 = scmp.ge.s32.totalorder %s25_s15, 2  ;;  %p151_p2 = scmp.lt.s32.totalorder %s3735_s14, 3 }
   0x5   : > { %s4917_s15 = smov (%p27_p1, %s25_s15), 0  ;;  %p152_p3 = pnand %p2513_p0, %p151_p2 }
   0x7   : > { %155 = sbr.rel (%p152_p3) target bundleno = 556 (0x22c), region = 32 }
   0xe   : > { %v3623_v0 = vld [vmem:[%s4893_s1 + $0x100] sm:$0xff]   ;;  %v3626_v3 = vld [vmem:[%s4893_s1 + $0x108] sm:$0xff]   ;;  %v3629_v6 = vld [vmem:[%s4893_s1 + $0x110] sm:$0xff]   ;;  %p180_p4 = scmp.lt.s32.totalorder %s3727_s12, 1  ;;  %vm570_vm0 = vcmask 1047552   ;;  %vm495_vm1 = vcmask 1040384  }
   0xf   : > { %v3784_v1 = vld [vmem:[%s4893_s1 + $0x140] sm:$0xff]   ;;  %2870 = vmatprep.subr.bf16.mxu0 %v3623_v0  ;;  %v3797_v4 = vld [vmem:[%s4893_s1 + $0x148] sm:$0xff]   ;;  %v3809_v7 = vld [vmem:[%s4893_s1 + $0x150] sm:$0xff]   ;;  %vm571_vm2 = vsmask.f32 7424 }
  0x10   : > { %v3625_v2 = vld [vmem:[%s4893_s1 + $0xc0] sm:$0xff]   ;;  %3422 = vmatprep.subr.bf16.mxu1 %v3784_v1  ;;  %v3628_v5 = vld [vmem:[%s4893_s1 + $0xc8] sm:$0xff]   ;;  %v3631_v8 = vld [vmem:[%s4893_s1 + $0xd0] sm:$0xff]   ;;  %s4919_s12 = smov (!%p180_p4, %s3727_s12), 1  ;;  %vm496_vm3 = vsmask.f32 256 }
  0x11   : > { %2871 = vmatpush3.bf16.msra.mxu0 %v3625_v2  ;;  %3430 = vmatpush3.bf16.msra.mxu1 %v3784_v1  ;;  %v3632_v9 = vld [vmem:[%s4893_s1 + $0x118] sm:$0xff]   ;;  %v3635_v12 = vld [vmem:[%s4893_s1 + $0x120] sm:$0xff]   ;;  %v3638_v15 = vld [vmem:[%s4893_s1 + $0x128] sm:$0xff]   ;;  %s2741_s27 = sshll.u32 %s4919_s12, 7 }
  0x12   : > { %2872 = vmatprep.subr.bf16.mxu0 %v3626_v3  ;;  %3423 = vmatprep.subr.bf16.mxu1 %v3797_v4  ;;  %v3822_v10 = vld [vmem:[%s4893_s1 + $0x158] sm:$0xff]   ;;  %v3836_v13 = vld [vmem:[%s4893_s1 + $0x160] sm:$0xff]   ;;  %v3852_v16 = vld [vmem:[%s4893_s1 + $0x168] sm:$0xff]   ;;  %s3873_s9 = scalar_lea.vmem %s4892_s0, %s2741_s27  ;;  %s4797_s16 = scalar_lea.vmem %s4895_s3, %s2741_s27 }
  0x13   : > { %v3634_v11 = vld [vmem:[%s4893_s1 + $0xd8] sm:$0xff]   ;;  %v3637_v14 = vld [vmem:[%s4893_s1 + $0xe0] sm:$0xff]   ;;  %v3640_v17 = vld [vmem:[%s4893_s1 + $0xe8] sm:$0xff]  }
  0x14   : > { %v3641_v18 = vld [vmem:[%s4893_s1 + $0x130] sm:$0xff]   ;;  %v3644_v21 = vld [vmem:[%s4893_s1 + $0x138] sm:$0xff]   ;;  %v3888_v23 = vld [vmem:[%s3873_s9] sm:$0xff]  }
  0x15   : > { %2873 = vmatpush3.bf16.msra.mxu0 %v3628_v5  ;;  %3431 = vmatpush3.bf16.msra.mxu1 %v3797_v4  ;;  %v3866_v19 = vld [vmem:[%s4893_s1 + $0x170] sm:$0xff]   ;;  %v3884_v22 = vld [vmem:[%s4893_s1 + $0x178] sm:$0xff]   ;;  %v3892_v24 = vld [vmem:[%s3873_s9 + $0x40] sm:$0xff]   ;;  %v359_v26 = vshrl.u32 %v3888_v23, 16  ;;  %v362_v27 = vshll.u32 %v3888_v23, 16  ;;  %v3737_v5 = vmov 0  }
  0x16   : > { %2874 = vmatprep.subr.bf16.mxu0 %v3629_v6  ;;  %3424 = vmatprep.subr.bf16.mxu1 %v3809_v7  ;;  %v3643_v20 = vld [vmem:[%s4893_s1 + $0xf0] sm:$0xff]   ;;  %v3646_v25 = vld [vmem:[%s4893_s1 + $0xf8] sm:$0xff]   ;;  %v415_v28 = vshrl.u32 %v3892_v24, 16  ;;  %v418_v29 = vshll.u32 %v3892_v24, 16  ;;  %vm3905_vm4 = vmand %vm495_vm1, %vm496_vm3  ;;  %v4000_v6 = vcombine.low %v3737_v5, %v3737_v5 }
  0x17   : > { %882 = vmatprep.mubr.bf16.mxu0 %v3888_v23  ;;  %v361_v30 = vrot.slane %v359_v26, 7  ;;  %v3910_v32 = vld [vmem:[%s3873_s9 + $0x48] sm:$0xff]   ;;  %v3650_v34 = vld [vmem:[%s4893_s1 + $0x40] sm:$0xff]   ;;  %vm3920_vm5 = vmand %vm570_vm0, %vm571_vm2 }
  0x18   : > { %v534_v33 = vrot.slane %v418_v29, 1  ;;  %v422_v37 = vshrl.u32 %v3910_v32, 16  ;;  %v425_v38 = vshll.u32 %v3910_v32, 16  ;;  %v3651_v42 = vld [vmem:[%s4893_s1] sm:$0xff]   ;;  %v3941_v43 = vld [vmem:[%s3873_s9 + $0x8] sm:$0xff]   ;;  %v3952_v46 = vld [vmem:[%s3873_s9 + $0x50] sm:$0xff]  }
  0x19   : > { %2875 = vmatpush3.bf16.msra.mxu0 %v3631_v8  ;;  %3432 = vmatpush3.bf16.msra.mxu1 %v3809_v7  ;;  %v364_v36 = vor.u32 %v362_v27, %v361_v30  ;;  %v3652_v45 = vld [vmem:[%s4893_s1 + $0x48] sm:$0xff]   ;;  %v366_v48 = vshrl.u32 %v3941_v43, 16  ;;  %v369_v49 = vshll.u32 %v3941_v43, 16  ;;  %v429_v50 = vshrl.u32 %v3952_v46, 16  ;;  %v3969_v55 = vld [vmem:[%s3873_s9 + $0x58] sm:$0xff]   ;;  %v3657_v61 = vld [vmem:[%s4893_s1 + $0x50] sm:$0xff]  }
  0x1a   : > { %2876 = vmatprep.subr.bf16.mxu0 %v3632_v9  ;;  %3425 = vmatprep.subr.bf16.mxu1 %v3822_v10  ;;  %v535_v39 = vor.u32 %v534_v33, %v415_v28  ;;  %v536_v41 = vrot.slane %v425_v38, 1  ;;  %v432_v51 = vshll.u32 %v3952_v46, 16  ;;  %v3653_v57 = vld [vmem:[%s4893_s1 + $0x8] sm:$0xff]   ;;  %v436_v59 = vshrl.u32 %v3969_v55, 16  ;;  %v3658_v2 = vld [vmem:[%s4893_s1 + $0x10] sm:$0xff]   ;;  %v3659_v9 = vld [vmem:[%s4893_s1 + $0x58] sm:$0xff]  }
  0x1b   : > { %v3933_v40 = vsel %vm3905_vm4, 0, %v364_v36  ;;  %v368_v53 = vrot.slane %v366_v48, 7  ;;  %v520_v54 = vrot.slane %v369_v49, 1  ;;  %v439_v60 = vshll.u32 %v3969_v55, 16  ;;  %v3997_v3 = vld [vmem:[%s3873_s9 + $0x10] sm:$0xff]   ;;  %v3660_v30 = vld [vmem:[%s4893_s1 + $0x18] sm:$0xff]  }
  0x1c   : > { %v3945_v44 = vsel %vm3920_vm5, %v535_v39, 0  ;;  %v537_v47 = vor.u32 %v536_v41, %v422_v37  ;;  %v538_v56 = vrot.slane %v432_v51, 1  ;;  %v3664_v41 = vld [vmem:[%s4893_s1 + $0x60] sm:$0xff]   ;;  %v4090_v5 = vld [vmem:[%s3873_s9 + $0x78] sm:$0xff]   ;;  %v3704_v35 = vld [vmem:[%s4893_s1 + $0x208] sm:$0xff]  }
  0x1d   : > { %2877 = vmatpush3.bf16.msra.mxu0 %v3634_v11  ;;  %3433 = vmatpush3.bf16.msra.mxu1 %v3822_v10  ;;  %v371_v58 = vor.u32 %v369_v49, %v368_v53  ;;  %v3983_v62 = vor.u32 %v520_v54, %v366_v48  ;;  %v4010_v11 = vld [vmem:[%s3873_s9 + $0x60] sm:$0xff]   ;;  %v4060_v49 = vld [vmem:[%s3873_s9 + $0x18] sm:$0xff]   ;;  %v3666_v54 = vld [vmem:[%s4893_s1 + $0x68] sm:$0xff]  }
  0x1e   : > { %2878 = vmatprep.subr.bf16.mxu0 %v3635_v12  ;;  %3426 = vmatprep.subr.bf16.mxu1 %v3836_v13  ;;  %v3964_v52 = vsel %vm3920_vm5, %v537_v47, 0  ;;  %v539_v63 = vor.u32 %v538_v56, %v429_v50  ;;  %v4901_v12 = vshrl.u32 %v3997_v3, 16  ;;  %v3665_v48 = vld [vmem:[%s4893_s1 + $0x20] sm:$0xff]   ;;  %v4071_v56 = vld [vmem:[%s3873_s9 + $0x70] sm:$0xff]  }
  0x1f   : > { %3310 = vmatprep.mubr.bf16.mxu1 %v3945_v44  ;;  %v3989_v0 = vsel %vm3905_vm4, 0, %v371_v58  ;;  %v383_v58 = vshll.u32 %v4060_v49, 16  ;;  %v4359_v31 = vld [vmem:[%s4893_s1 + $0x200] sm:$0xff]  }
  0x20   : > { %v4004_v8 = vsel %vm3920_vm5, %v539_v63, 0  ;;  %v460_v63 = vshll.u32 %v4071_v56, 16 }
  0x21   : > { %2879 = vmatpush3.bf16.msra.mxu0 %v3637_v14  ;;  %3434 = vmatpush3.bf16.msra.mxu1 %v3836_v13  ;;  %v376_v14 = vshll.u32 %v3997_v3, 16 }
  0x22   : > { %2880 = vmatprep.subr.bf16.mxu0 %v3638_v15  ;;  %3427 = vmatprep.subr.bf16.mxu1 %v3852_v16  ;;  %v443_v15 = vshrl.u32 %v4010_v11, 16 }
  0x25   : > { %2881 = vmatpush3.bf16.msra.mxu0 %v3640_v17  ;;  %3435 = vmatpush3.bf16.msra.mxu1 %v3852_v16  ;;  %v446_v17 = vshll.u32 %v4010_v11, 16 }
  0x26   : > { %2882 = vmatprep.subr.bf16.mxu0 %v3641_v18  ;;  %3428 = vmatprep.subr.bf16.mxu1 %v3866_v19 }
  0x27   : > { %v542_v33 = vrot.slane %v446_v17, 1 }
  0x29   : > { %2883 = vmatpush3.bf16.msra.mxu0 %v3643_v20  ;;  %3436 = vmatpush3.bf16.msra.mxu1 %v3866_v19  ;;  %v375_v20 = vrot.slane %v4901_v12, 7  ;;  %v543_v39 = vor.u32 %v542_v33, %v443_v15  ;;  %v464_v33 = vshrl.u32 %v4090_v5, 16 }
  0x2a   : > { %2884 = vmatprep.subr.bf16.mxu0 %v3644_v21  ;;  %3429 = vmatprep.subr.bf16.mxu1 %v3884_v22  ;;  %v4029_v21 = vld [vmem:[%s3873_s9 + $0x68] sm:$0xff]  }
  0x2b   : > { %v450_v36 = vshrl.u32 %v4029_v21, 16  ;;  %v4065_v53 = vsel %vm3920_vm5, %v543_v39, 0  ;;  %v3671_v39 = vld [vmem:[%s4893_s1 + $0x70] sm:$0xff]  }
  0x2d   : > { %2885 = vmatpush3.bf16.msra.mxu0 %v3646_v25  ;;  %3437 = vmatpush3.bf16.msra.mxu1 %v3884_v22  ;;  %v4896_v25 = vshrl.u32 %v4000_v6, 16 }
  0x2e   : > { %3278 = vmatprep.subr.bf16.mxu0 %v3784_v1  ;;  %3006 = vmatprep.subr.bf16.mxu1 %v3650_v34  ;;  %v378_v34 = vor.u32 %v376_v14, %v375_v20  ;;  %v546_v20 = vrot.slane %v460_v63, 1 }
  0x30   : > { %883 = vmatmul.mubr.bf16.vlgmr.msra.gmra.mrb[0].mxu0 %v3933_v40  ;;  %3311 = vmatmul.mubr.bf16.vlgmr.msra.gmra.mrb[0].mxu1 %v3964_v52 }
  0x31   : > { %3279 = vmatpush3.bf16.msra.mxu0 %v3784_v1  ;;  %890 = vmatprep.mubr.bf16.mxu0 %v3941_v43  ;;  %v540_v1 = vrot.slane %v439_v60, 1 }
  0x32   : > { %3280 = vmatprep.subr.bf16.mxu0 %v3797_v4  ;;  %3007 = vmatpush3.bf16.msra.mxu1 %v3651_v42  ;;  %v4898_v42 = vshll.u32 %v4000_v6, 16 }
  0x33   : > { %3008 = vmatprep.subr.bf16.mxu1 %v3652_v45  ;;  %3314 = vmatprep.mubr.bf16.mxu1 %v4004_v8  ;;  %v4052_v45 = vsel %vm3905_vm4, 0, %v378_v34 }
  0x35   : > { %3281 = vmatpush3.bf16.msra.mxu0 %v3797_v4  ;;  %v541_v4 = vor.u32 %v540_v1, %v436_v59 }
  0x36   : > { %3282 = vmatprep.subr.bf16.mxu0 %v3809_v7  ;;  %3009 = vmatpush3.bf16.msra.mxu1 %v3653_v57 }
  0x37   : > { %3010 = vmatprep.subr.bf16.mxu1 %v3657_v61  ;;  %v4023_v18 = vsel %vm3920_vm5, %v541_v4, 0  ;;  %v457_v61 = vshrl.u32 %v4071_v56, 16  ;;  %v3667_v4 = vld [vmem:[%s4893_s1 + $0x28] sm:$0xff]  }
  0x38   : > { %891 = vmatmul.mubr.bf16.gmra.mrb[4].mxu0 %v3989_v0  ;;  %3315 = vmatmul.mubr.bf16.gmra.mrb[4].mxu1 %v4023_v18 }
  0x39   : > { %898 = vmatprep.mubr.bf16.mxu0 %v3997_v3  ;;  %3283 = vmatpush3.bf16.msra.mxu0 %v3809_v7  ;;  %v453_v7 = vshll.u32 %v4029_v21, 16  ;;  %v547_v34 = vor.u32 %v546_v20, %v457_v61 }
  0x3a   : > { %3284 = vmatprep.subr.bf16.mxu0 %v3822_v10  ;;  %3011 = vmatpush3.bf16.msra.mxu1 %v3658_v2 }
  0x3b   : > { %3012 = vmatprep.subr.bf16.mxu1 %v3659_v9  ;;  %v544_v47 = vrot.slane %v453_v7, 1  ;;  %3318 = vmatprep.mubr.bf16.mxu1 %v4065_v53  ;;  %v354_v9 = vrot.slane %v4896_v25, 7  ;;  %v4143_v25 = vld [vmem:[%s3873_s9 + $0x28] sm:$0xff]  }
  0x3d   : > { %3285 = vmatpush3.bf16.msra.mxu0 %v3822_v10  ;;  %v545_v57 = vor.u32 %v544_v47, %v450_v36  ;;  %v4899_v10 = vshrl.u32 %v4060_v49, 16 }
  0x3e   : > { %3286 = vmatprep.subr.bf16.mxu0 %v3836_v13  ;;  %3013 = vmatpush3.bf16.msra.mxu1 %v3660_v30 }
  0x3f   : > { %3014 = vmatprep.subr.bf16.mxu1 %v3664_v41  ;;  %v4084_v1 = vsel %vm3920_vm5, %v545_v57, 0  ;;  %v382_v2 = vrot.slane %v4899_v10, 7  ;;  %v417_v41 = vrot.slane %v415_v28, 7  ;;  %v4123_v57 = vld [vmem:[%s3873_s9 + $0x20] sm:$0xff]   ;;  %v3673_v28 = vld [vmem:[%s4893_s1 + $0x78] sm:$0xff]  }
  0x40   : > { %899 = vmatmul.mubr.bf16.gmra.mrb[8].mxu0 %v4052_v45  ;;  %3319 = vmatmul.mubr.bf16.gmra.mrb[8].mxu1 %v4084_v1 }
  0x41   : > { %906 = vmatprep.mubr.bf16.mxu0 %v4060_v49  ;;  %3287 = vmatpush3.bf16.msra.mxu0 %v3836_v13  ;;  %v385_v30 = vor.u32 %v383_v58, %v382_v2  ;;  %v467_v13 = vshll.u32 %v4090_v5, 16  ;;  %v4128_v2 = vsel %vm3920_vm5, %v547_v34, 0  ;;  %v420_v20 = vor.u32 %v418_v29, %v417_v41 }
  0x42   : > { %3288 = vmatprep.subr.bf16.mxu0 %v3852_v16  ;;  %3015 = vmatpush3.bf16.msra.mxu1 %v3665_v48  ;;  %v390_v34 = vshll.u32 %v4123_v57, 16 }
  0x43   : > { %3016 = vmatprep.subr.bf16.mxu1 %v3666_v54  ;;  %v4115_v47 = vsel %vm3905_vm4, 0, %v385_v30  ;;  %v548_v48 = vrot.slane %v467_v13, 1  ;;  %v3672_v54 = vld [vmem:[%s4893_s1 + $0x30] sm:$0xff]   ;;  %3322 = vmatprep.mubr.bf16.mxu1 %v4128_v2  ;;  %v4897_v30 = vshrl.u32 %v4123_v57, 16  ;;  %v4147_v29 = vsel %vm3905_vm4, 0, %v420_v20 }
  0x44   : > { %v4900_v20 = vshrl.u32 %v4143_v25, 16 }
  0x45   : > { %3289 = vmatpush3.bf16.msra.mxu0 %v3852_v16  ;;  %v549_v16 = vor.u32 %v548_v48, %v464_v33  ;;  %v389_v41 = vrot.slane %v4897_v30, 7  ;;  %v357_v48 = vor.u32 %v4898_v42, %v354_v9  ;;  %v3676_v30 = vld [vmem:[%s4893_s1 + $0x80] sm:$0xff]   ;;  %v397_v42 = vshll.u32 %v4143_v25, 16 }
  0x46   : > { %3290 = vmatprep.subr.bf16.mxu0 %v3866_v19  ;;  %3017 = vmatpush3.bf16.msra.mxu1 %v3667_v4  ;;  %v396_v9 = vrot.slane %v4900_v20, 7 }
  0x47   : > { %3018 = vmatprep.subr.bf16.mxu1 %v3671_v39  ;;  %v4151_v4 = vsel %vm3920_vm5, %v549_v16, 0  ;;  %v3674_v39 = vld [vmem:[%s4893_s1 + $0x38] sm:$0xff]   ;;  %v4165_v16 = vld [vmem:[%s3873_s9 + $0x30] sm:$0xff]  }
  0x48   : > { %907 = vmatmul.mubr.bf16.gmra.mrb[12].mxu0 %v4115_v47  ;;  %3323 = vmatmul.mubr.bf16.gmra.mrb[12].mxu1 %v4151_v4  ;;  %v401_v20 = vshrl.u32 %v4165_v16, 16 }
  0x49   : > { %914 = vmatprep.mubr.bf16.mxu0 %v4123_v57  ;;  %3291 = vmatpush3.bf16.msra.mxu0 %v3866_v19  ;;  %v392_v19 = vor.u32 %v390_v34, %v389_v41  ;;  %v431_v41 = vrot.slane %v429_v50, 7  ;;  %v399_v50 = vor.u32 %v397_v42, %v396_v9 }
  0x4a   : > { %3292 = vmatprep.subr.bf16.mxu0 %v3884_v22  ;;  %3019 = vmatpush3.bf16.msra.mxu1 %v3672_v54  ;;  %v424_v54 = vrot.slane %v422_v37, 7  ;;  %v438_v37 = vrot.slane %v436_v59, 7 }
  0x4b   : > { %1348 = vmatprep.mubr.bf16.mxu1 %v4000_v6  ;;  %3020 = vmatprep.subr.bf16.mxu1 %v3673_v28  ;;  %v4179_v10 = vsel %vm3905_vm4, 0, %v392_v19  ;;  %v4188_v28 = vsel %vm3905_vm4, 0, %v357_v48  ;;  %v434_v19 = vor.u32 %v432_v51, %v431_v41  ;;  %v404_v48 = vshll.u32 %v4165_v16, 16 }
  0x4c   : > { %v427_v12 = vor.u32 %v425_v38, %v424_v54  ;;  %v3679_v38 = vld [vmem:[%s4893_s1 + $0x88] sm:$0xff]   ;;  %v452_v51 = vrot.slane %v450_v36, 7  ;;  %v403_v36 = vrot.slane %v401_v20, 7  ;;  %v4223_v54 = vld [vmem:[%s3873_s9 + $0x38] sm:$0xff]   ;;  %v459_v41 = vrot.slane %v457_v61, 7 }
  0x4d   : > { %3293 = vmatpush3.bf16.msra.mxu0 %v3884_v22  ;;  %v445_v22 = vrot.slane %v443_v15, 7  ;;  %v4213_v15 = vsel %vm3905_vm4, 0, %v434_v19  ;;  %v518_v61 = vrot.slane %v362_v27, 1  ;;  %v4261_v27 = vsel %vm3920_vm5, %v3983_v62, 0 }
  0x4e   : > { %3021 = vmatpush3.bf16.msra.mxu1 %v3674_v39  ;;  %v4209_v59 = vsel %vm3905_vm4, 0, %v427_v12  ;;  %v441_v39 = vor.u32 %v439_v60, %v438_v37  ;;  %v455_v12 = vor.u32 %v453_v7, %v452_v51  ;;  %v3685_v60 = vld [vmem:[%s4893_s1 + $0x1c0] sm:$0xff]   ;;  %v466_v7 = vrot.slane %v464_v33, 7 }
  0x4f   : > { %3326 = vmatprep.subr.bf16.mxu1 %v3676_v30  ;;  %v448_v9 = vor.u32 %v446_v17, %v445_v22  ;;  %v4247_v37 = vsel %vm3905_vm4, 0, %v399_v50  ;;  %v462_v51 = vor.u32 %v460_v63, %v459_v41  ;;  %3142 = vmatprep.subr.bf16.mxu0 %v3685_v60  ;;  %v519_v50 = vor.u32 %v518_v61, %v359_v26  ;;  %v3682_v63 = vld [vmem:[%s4893_s1 + $0x98] sm:$0xff]  }
  0x50   : > { %915 = vmatmul.mubr.bf16.gmra.mrb[16].mxu0 %v4179_v10  ;;  %v4235_v17 = vsel %vm3905_vm4, 0, %v441_v39  ;;  %v4254_v22 = vsel %vm3905_vm4, 0, %v455_v12  ;;  %v469_v33 = vor.u32 %v467_v13, %v466_v7  ;;  %v524_v26 = vrot.slane %v383_v58, 1 }
  0x51   : > { %922 = vmatprep.mubr.bf16.mxu0 %v4143_v25  ;;  %1349 = vmatmul.mubr.bf16.vlgmr.msra.gmra.mrb[16].mxu1 %v4188_v28  ;;  %v4239_v19 = vsel %vm3905_vm4, 0, %v448_v9  ;;  %v4269_v39 = vsel %vm3905_vm4, 0, %v462_v51  ;;  %v408_v9 = vshrl.u32 %v4223_v54, 16  ;;  %v4281_v13 = vsel %vm3920_vm5, %v519_v50, 0 }
  0x52   : > { %3327 = vmatpush3.bf16.msra.mxu1 %v3676_v30  ;;  %1356 = vmatprep.mubr.bf16.mxu1 %v3888_v23  ;;  %v3681_v30 = vld [vmem:[%s4893_s1 + $0x90] sm:$0xff]   ;;  %v4277_v62 = vsel %vm3905_vm4, 0, %v469_v33  ;;  %v522_v23 = vrot.slane %v376_v14, 1  ;;  %v526_v12 = vrot.slane %v390_v34, 1  ;;  %v4906_v41 = vshrl.u32 %v3997_v3, 16 }
  0x53   : > { %3328 = vmatprep.subr.bf16.mxu1 %v3679_v38  ;;  %v4907_v7 = vshrl.u32 %v4060_v49, 16  ;;  %v528_v51 = vrot.slane %v397_v42, 1  ;;  %v411_v14 = vshll.u32 %v4223_v54, 16  ;;  %v4908_v58 = vshrl.u32 %v4123_v57, 16 }
  0x54   : > { %v523_v60 = vor.u32 %v522_v23, %v4906_v41  ;;  %v530_v33 = vrot.slane %v404_v48, 1  ;;  %v410_v50 = vrot.slane %v408_v9, 7 }
  0x55   : > { %v525_v61 = vor.u32 %v524_v26, %v4907_v7 }
  0x56   : > { %3329 = vmatpush3.bf16.msra.mxu1 %v3679_v38  ;;  %v406_v38 = vor.u32 %v404_v48, %v403_v36  ;;  %v527_v36 = vor.u32 %v526_v12, %v4908_v58  ;;  %v4305_v34 = vsel %vm3920_vm5, %v523_v60, 0  ;;  %v531_v12 = vor.u32 %v530_v33, %v401_v20  ;;  %v3691_v33 = vld [vmem:[%s4893_s1 + $0x190] sm:$0xff]  }
  0x57   : > { %3330 = vmatprep.subr.bf16.mxu1 %v3681_v30  ;;  %v4309_v42 = vsel %vm3920_vm5, %v525_v61, 0  ;;  %v413_v7 = vor.u32 %v411_v14, %v410_v50  ;;  %v532_v20 = vrot.slane %v411_v14, 1  ;;  %v3687_v61 = vld [vmem:[%s4893_s1 + $0xb0] sm:$0xff]   ;;  %v3689_v14 = vld [vmem:[%s4893_s1 + $0x188] sm:$0xff]   ;;  %v3692_v50 = vld [vmem:[%s4893_s1 + $0x1d8] sm:$0xff]  }
  0x58   : > { %923 = vmatmul.mubr.bf16.gmra.mrb[20].mxu0 %v4247_v37  ;;  %v4315_v48 = vsel %vm3905_vm4, 0, %v406_v38  ;;  %v4319_v26 = vsel %vm3920_vm5, %v527_v36, 0  ;;  %v3684_v38 = vld [vmem:[%s4893_s1 + $0xa8] sm:$0xff]   ;;  %v4333_v60 = vsel %vm3920_vm5, %v531_v12, 0  ;;  %v3690_v36 = vld [vmem:[%s4893_s1 + $0x1d0] sm:$0xff]  }
  0x59   : > { %930 = vmatprep.mubr.bf16.mxu0 %v4165_v16  ;;  %1357 = vmatmul.mubr.bf16.gmra.mrb[20].mxu1 %v3933_v40  ;;  %v3683_v40 = vld [vmem:[%s4893_s1 + $0xa0] sm:$0xff]   ;;  %v3697_v12 = vld [vmem:[%s4893_s1 + $0x1e8] sm:$0xff]  }
  0x5a   : > { %1364 = vmatprep.mubr.bf16.mxu1 %v3941_v43  ;;  %3331 = vmatpush3.bf16.msra.mxu1 %v3681_v30  ;;  %v4909_v30 = vshrl.u32 %v4143_v25, 16 }
  0x5b   : > { %3332 = vmatprep.subr.bf16.mxu1 %v3682_v63 }
  0x5c   : > { %v529_v23 = vor.u32 %v528_v51, %v4909_v30  ;;  %v4343_v51 = vsel %vm3905_vm4, 0, %v413_v7  ;;  %v3694_v30 = vld [vmem:[%s4893_s1 + $0x1e0] sm:$0xff]  }
  0x5e   : > { %v4325_v41 = vsel %vm3920_vm5, %v529_v23, 0  ;;  %3333 = vmatpush3.bf16.msra.mxu1 %v3682_v63  ;;  %v533_v63 = vor.u32 %v532_v20, %v408_v9  ;;  %v3696_v9 = vld [vmem:[%s4893_s1 + $0xb8] sm:$0xff]   ;;  %v3695_v23 = vld [vmem:[%s4893_s1 + $0x1a0] sm:$0xff]   ;;  %v3698_v20 = vld [vmem:[%s4893_s1 + $0x1a8] sm:$0xff]  }
  0x5f   : > { %3334 = vmatprep.subr.bf16.mxu1 %v3683_v40 }
  0x60   : > { %931 = vmatmul.mubr.bf16.gmra.mrb[24].mxu0 %v4315_v48  ;;  %v4347_v58 = vsel %vm3920_vm5, %v533_v63, 0  ;;  %v3699_v63 = vld [vmem:[%s4893_s1 + $0x1f0] sm:$0xff]  }
  0x61   : > { %938 = vmatprep.mubr.bf16.mxu0 %v4223_v54  ;;  %1365 = vmatmul.mubr.bf16.gmra.mrb[24].mxu1 %v3989_v0 }
  0x62   : > { %1372 = vmatprep.mubr.bf16.mxu1 %v3997_v3  ;;  %3335 = vmatpush3.bf16.msra.mxu1 %v3683_v40  ;;  %v3693_v40 = vld [vmem:[%s4893_s1 + $0x198] sm:$0xff]  }
  0x63   : > { %3336 = vmatprep.subr.bf16.mxu1 %v3684_v38 }
  0x66   : > { %3337 = vmatpush3.bf16.msra.mxu1 %v3684_v38  ;;  %v4910_v38 = vshll.u32 %v4000_v6, 16 }
  0x67   : > { %3338 = vmatprep.subr.bf16.mxu1 %v3687_v61 }
  0x68   : > { %939 = vmatmul.mubr.bf16.gmra.mrb[28].mxu0 %v4343_v51  ;;  %v516_v7 = vrot.slane %v4910_v38, 1 }
  0x69   : > { %946 = vmatprep.mubr.bf16.mxu0 %v3892_v24  ;;  %1373 = vmatmul.mubr.bf16.gmra.mrb[28].mxu1 %v4052_v45 }
  0x6a   : > { %1380 = vmatprep.mubr.bf16.mxu1 %v4060_v49  ;;  %3339 = vmatpush3.bf16.msra.mxu1 %v3687_v61  ;;  %v4911_v61 = vshrl.u32 %v4000_v6, 16 }
  0x6b   : > { %3340 = vmatprep.subr.bf16.mxu1 %v3696_v9 }
  0x6e   : > { %3341 = vmatpush3.bf16.msra.mxu1 %v3696_v9  ;;  %v517_v9 = vor.u32 %v516_v7, %v4911_v61 }
  0x6f   : > { %3374 = vmatprep.subr.bf16.mxu1 %v4359_v31 }
  0x70   : > { %947 = vmatmul.mubr.bf16.gmra.mrb[32].mxu0 %v4147_v29 }
  0x71   : > { %954 = vmatprep.mubr.bf16.mxu0 %v3910_v32  ;;  %1381 = vmatmul.mubr.bf16.gmra.mrb[32].mxu1 %v4115_v47 }
  0x72   : > { %1388 = vmatprep.mubr.bf16.mxu1 %v4123_v57 }
  0x78   : > { %955 = vmatmul.mubr.bf16.gmra.mrb[36].mxu0 %v4209_v59 }
  0x79   : > { %962 = vmatprep.mubr.bf16.mxu0 %v3952_v46  ;;  %1389 = vmatmul.mubr.bf16.gmra.mrb[36].mxu1 %v4179_v10 }
  0x7a   : > { %1396 = vmatprep.mubr.bf16.mxu1 %v4143_v25 }
  0x80   : > { %963 = vmatmul.mubr.bf16.gmra.mrb[40].mxu0 %v4213_v15 }
  0x81   : > { %970 = vmatprep.mubr.bf16.mxu0 %v3969_v55  ;;  %1397 = vmatmul.mubr.bf16.gmra.mrb[40].mxu1 %v4247_v37 }
  0x82   : > { %1404 = vmatprep.mubr.bf16.mxu1 %v4165_v16 }
  0x88   : > { %971 = vmatmul.mubr.bf16.gmra.mrb[44].mxu0 %v4235_v17 }
  0x89   : > { %978 = vmatprep.mubr.bf16.mxu0 %v4010_v11  ;;  %1405 = vmatmul.mubr.bf16.gmra.mrb[44].mxu1 %v4315_v48 }
  0x8a   : > { %1412 = vmatprep.mubr.bf16.mxu1 %v4223_v54 }
  0x90   : > { %979 = vmatmul.mubr.bf16.gmra.mrb[48].mxu0 %v4239_v19 }
  0x91   : > { %986 = vmatprep.mubr.bf16.mxu0 %v4029_v21  ;;  %1413 = vmatmul.mubr.bf16.gmra.mrb[48].mxu1 %v4343_v51 }
  0x92   : > { %1420 = vmatprep.mubr.bf16.mxu1 %v3892_v24  ;;  %v3686_v24 = vld [vmem:[%s4893_s1 + $0x180] sm:$0xff]  }
  0x98   : > { %987 = vmatmul.mubr.bf16.gmra.mrb[52].mxu0 %v4254_v22 }
  0x99   : > { %994 = vmatprep.mubr.bf16.mxu0 %v4071_v56  ;;  %1421 = vmatmul.mubr.bf16.gmra.mrb[52].mxu1 %v4147_v29 }
  0x9a   : > { %1428 = vmatprep.mubr.bf16.mxu1 %v3910_v32  ;;  %v3688_v32 = vld [vmem:[%s4893_s1 + $0x1c8] sm:$0xff]  }
  0xa0   : > { %995 = vmatmul.mubr.bf16.gmra.mrb[56].mxu0 %v4269_v39 }
  0xa1   : > { %1002 = vmatprep.mubr.bf16.mxu0 %v4090_v5  ;;  %1429 = vmatmul.mubr.bf16.gmra.mrb[56].mxu1 %v4209_v59 }
  0xa2   : > { %1436 = vmatprep.mubr.bf16.mxu1 %v3952_v46 }
  0xa8   : > { %1003 = vmatmul.mubr.bf16.gmra.mrb[60].mxu0 %v4277_v62 }
  0xa9   : > { %3294 = vmatprep.mubr.bf16.mxu0 %v4281_v13  ;;  %1437 = vmatmul.mubr.bf16.gmra.mrb[60].mxu1 %v4213_v15 }
  0xaa   : > { %1444 = vmatprep.mubr.bf16.mxu1 %v3969_v55 }
  0xb0   : > { %3295 = vmatmul.mubr.bf16.vlgmr.msra.gmra.mrb[64].mxu0 %v4261_v27 }
  0xb1   : > { %3143 = vmatpush3.bf16.msra.mxu0 %v3686_v24  ;;  %3298 = vmatprep.mubr.bf16.mxu0 %v4305_v34  ;;  %v3700_v24 = vld [vmem:[%s4893_s1 + $0x1b0] sm:$0xff]  }
  0xb2   : > { %1445 = vmatmul.mubr.bf16.gmra.mrb[64].mxu1 %v4235_v17  ;;  %3144 = vmatprep.subr.bf16.mxu0 %v3688_v32  ;;  %v3701_v32 = vld [vmem:[%s4893_s1 + $0x1f8] sm:$0xff]  }
  0xb3   : > { %1452 = vmatprep.mubr.bf16.mxu1 %v4010_v11 }
  0xb5   : > { %3145 = vmatpush3.bf16.msra.mxu0 %v3689_v14  ;;  %v4455_v14 = vsel %vm3920_vm5, %v517_v9, 0 }
  0xb6   : > { %3146 = vmatprep.subr.bf16.mxu0 %v3690_v36  ;;  %v3702_v36 = vld [vmem:[%s4893_s1 + $0x1b8] sm:$0xff]  }
  0xb8   : > { %3299 = vmatmul.mubr.bf16.gmra.mrb[68].mxu0 %v4309_v42 }
  0xb9   : > { %3147 = vmatpush3.bf16.msra.mxu0 %v3691_v33  ;;  %3302 = vmatprep.mubr.bf16.mxu0 %v4319_v26 }
  0xba   : > { %1453 = vmatmul.mubr.bf16.gmra.mrb[68].mxu1 %v4239_v19  ;;  %3148 = vmatprep.subr.bf16.mxu0 %v3692_v50 }
  0xbb   : > { %1460 = vmatprep.mubr.bf16.mxu1 %v4029_v21 }
  0xbd   : > { %3149 = vmatpush3.bf16.msra.mxu0 %v3693_v40 }
  0xbe   : > { %3150 = vmatprep.subr.bf16.mxu0 %v3694_v30 }
  0xc0   : > { %3303 = vmatmul.mubr.bf16.gmra.mrb[72].mxu0 %v4325_v41 }
  0xc1   : > { %3151 = vmatpush3.bf16.msra.mxu0 %v3695_v23  ;;  %3306 = vmatprep.mubr.bf16.mxu0 %v4333_v60 }
  0xc2   : > { %1461 = vmatmul.mubr.bf16.gmra.mrb[72].mxu1 %v4254_v22  ;;  %3152 = vmatprep.subr.bf16.mxu0 %v3697_v12 }
  0xc3   : > { %1468 = vmatprep.mubr.bf16.mxu1 %v4071_v56 }
  0xc5   : > { %3153 = vmatpush3.bf16.msra.mxu0 %v3698_v20 }
  0xc6   : > { %3154 = vmatprep.subr.bf16.mxu0 %v3699_v63 }
  0xc8   : > { %3307 = vmatmul.mubr.bf16.gmra.mrb[76].mxu0 %v4347_v58 }
  0xc9   : > { %3155 = vmatpush3.bf16.msra.mxu0 %v3700_v24  ;;  %1863 = vmatprep.mubr.bf16.mxu0 %v3941_v43  ;;  %v3705_v43 = vld [vmem:[%s4893_s1 + $0x210] sm:$0xff]  }
  0xca   : > { %1469 = vmatmul.mubr.bf16.gmra.mrb[76].mxu1 %v4269_v39  ;;  %3156 = vmatprep.subr.bf16.mxu0 %v3701_v32 }
  0xcb   : > { %3342 = vmatprep.mubr.bf16.mxu1 %v4455_v14 }
  0xcd   : > { %3157 = vmatpush3.bf16.msra.mxu0 %v3702_v36 }
  0xd0   : > { %1864 = vmatmul.mubr.bf16.vlgmr.msra.gmra.mrb[80].mxu0 %v3989_v0  ;;  %v3706_v0 = vld [vmem:[%s4893_s1 + $0x218] sm:$0xff]  }
  0xd1   : > { %1871 = vmatprep.mubr.bf16.mxu0 %v3997_v3  ;;  %v3707_v3 = vld [vmem:[%s4893_s1 + $0x220] sm:$0xff]  }
  0xd2   : > { %3343 = vmatmul.mubr.bf16.vlgmr.msra.gmra.mrb[80].mxu1 %v4281_v13 }
  0xd3   : > { %3375 = vmatpush3.bf16.msra.mxu1 %v4359_v31  ;;  %3346 = vmatprep.mubr.bf16.mxu1 %v4261_v27 }
  0xd4   : > { %3376 = vmatprep.subr.bf16.mxu1 %v3704_v35 }
  0xd7   : > { %3377 = vmatpush3.bf16.msra.mxu1 %v3704_v35 }
  0xd8   : > { %1872 = vmatmul.mubr.bf16.gmra.mrb[84].mxu0 %v4052_v45  ;;  %3378 = vmatprep.subr.bf16.mxu1 %v3705_v43  ;;  %v3708_v45 = vld [vmem:[%s4893_s1 + $0x228] sm:$0xff]  }
  0xd9   : > { %1879 = vmatprep.mubr.bf16.mxu0 %v4060_v49  ;;  %v3709_v49 = vld [vmem:[%s4893_s1 + $0x230] sm:$0xff]  }
  0xda   : > { %3347 = vmatmul.mubr.bf16.gmra.mrb[84].mxu1 %v4305_v34 }
  0xdb   : > { %3350 = vmatprep.mubr.bf16.mxu1 %v4309_v42  ;;  %3379 = vmatpush3.bf16.msra.mxu1 %v3705_v43 }
  0xdc   : > { %3380 = vmatprep.subr.bf16.mxu1 %v3706_v0 }
  0xdf   : > { %3381 = vmatpush3.bf16.msra.mxu1 %v3706_v0 }
  0xe0   : > { %1880 = vmatmul.mubr.bf16.gmra.mrb[88].mxu0 %v4115_v47  ;;  %3382 = vmatprep.subr.bf16.mxu1 %v3707_v3  ;;  %v3710_v47 = vld [vmem:[%s4893_s1 + $0x238] sm:$0xff]  }
  0xe1   : > { %1887 = vmatprep.mubr.bf16.mxu0 %v4123_v57 }
  0xe2   : > { %3351 = vmatmul.mubr.bf16.gmra.mrb[88].mxu1 %v4319_v26 }
  0xe3   : > { %3354 = vmatprep.mubr.bf16.mxu1 %v4325_v41  ;;  %3383 = vmatpush3.bf16.msra.mxu1 %v3707_v3 }
  0xe4   : > { %3384 = vmatprep.subr.bf16.mxu1 %v3708_v45 }
  0xe7   : > { %3385 = vmatpush3.bf16.msra.mxu1 %v3708_v45 }
  0xe8   : > { %1888 = vmatmul.mubr.bf16.gmra.mrb[92].mxu0 %v4179_v10  ;;  %3386 = vmatprep.subr.bf16.mxu1 %v3709_v49 }
  0xe9   : > { %1895 = vmatprep.mubr.bf16.mxu0 %v4143_v25  ;;  %v3711_v25 = vld [vmem:[%s3873_s9 + $0x40] sm:$0xff]  }
  0xea   : > { %3355 = vmatmul.mubr.bf16.gmra.mrb[92].mxu1 %v4333_v60 }
  0xeb   : > { %3358 = vmatprep.mubr.bf16.mxu1 %v4347_v58  ;;  %3387 = vmatpush3.bf16.msra.mxu1 %v3709_v49 }
  0xec   : > { %3388 = vmatprep.subr.bf16.mxu1 %v3710_v47 }
  0xef   : > { %3389 = vmatpush3.bf16.msra.mxu1 %v3710_v47 }
  0xf0   : > { %1896 = vmatmul.mubr.bf16.gmra.mrb[96].mxu0 %v4247_v37 }
  0xf1   : > { %1903 = vmatprep.mubr.bf16.mxu0 %v4165_v16 }
  0xf2   : > { %3359 = vmatmul.mubr.bf16.gmra.mrb[0].mxu1 %v3945_v44 }
  0xf3   : > { %3362 = vmatprep.mubr.bf16.mxu1 %v3964_v52 }
  0xf8   : > { %1904 = vmatmul.mubr.bf16.gmra.mrb[100].mxu0 %v4315_v48 }
  0xf9   : > { %1911 = vmatprep.mubr.bf16.mxu0 %v4223_v54  ;;  %v3712_v54 = vld [vmem:[%s3873_s9 + $0x48] sm:$0xff]  }
  0xfa   : > { %3363 = vmatmul.mubr.bf16.gmra.mrb[4].mxu1 %v4004_v8 }
  0xfb   : > { %3366 = vmatprep.mubr.bf16.mxu1 %v4023_v18 }
 0x100   : > { %1912 = vmatmul.mubr.bf16.gmra.mrb[104].mxu0 %v4343_v51 }
 0x101   : > { %1919 = vmatprep.mubr.bf16.mxu0 %v3711_v25 }
 0x102   : > { %3367 = vmatmul.mubr.bf16.gmra.mrb[8].mxu1 %v4065_v53 }
 0x103   : > { %v2886_v10 = vpop.f32.mrb[0].mxu0  ;;  %3370 = vmatprep.mubr.bf16.mxu1 %v4084_v1 }
 0x104   : > { %v2887_v57 = vpop.f32.mrb[1].mxu0 }
 0x105   : > { %v4513_v16 = vadd.f32 %v2887_v57, %v2886_v10  ;;  %v2889_v37 = vpop.f32.mrb[2].mxu0 }
 0x106   : > { %v2890_v13 = vpop.f32.mrb[3].mxu0 }
 0x107   : > { %v4515_v48 = vadd.f32 %v2890_v13, %v2889_v37 }
 0x108   : > { %1920 = vmatmul.mubr.bf16.gmra.mrb[108].mxu0 %v4147_v29 }
 0x109   : > { %1927 = vmatprep.mubr.bf16.mxu0 %v3712_v54 }
 0x10a   : > { %3371 = vmatmul.mubr.bf16.gmra.mrb[12].mxu1 %v4128_v2 }
 0x10b   : > { %v2892_v51 = vpop.f32.mrb[4].mxu0  ;;  %3390 = vmatprep.mubr.bf16.mxu1 %v4261_v27 }
 0x10c   : > { %v2893_v31 = vpop.f32.mrb[5].mxu0 }
 0x10d   : > { %v4521_v33 = vadd.f32 %v2893_v31, %v2892_v51  ;;  %v2895_v50 = vpop.f32.mrb[6].mxu0 }
 0x10e   : > { %v2896_v40 = vpop.f32.mrb[7].mxu0 }
 0x10f   : > { %v4523_v30 = vadd.f32 %v2896_v40, %v2895_v50 }
 0x110   : > { %1928 = vmatmul.mubr.bf16.gmra.mrb[112].mxu0 %v4209_v59 }
 0x111   : > { %1935 = vmatprep.mubr.bf16.mxu0 %v3952_v46 }
 0x112   : > { %3391 = vmatmul.mubr.bf16.vlgmr.msra.gmra.mrb[80].mxu1 %v4305_v34 }
 0x113   : > { %v2898_v29 = vpop.f32.mrb[8].mxu0  ;;  %3394 = vmatprep.mubr.bf16.mxu1 %v4309_v42 }
 0x114   : > { %v2899_v23 = vpop.f32.mrb[9].mxu0 }
 0x115   : > { %v4529_v12 = vadd.f32 %v2899_v23, %v2898_v29  ;;  %v2901_v27 = vpop.f32.mrb[10].mxu0 }
 0x116   : > { %v2902_v38 = vpop.f32.mrb[11].mxu0 }
 0x117   : > { %v4531_v7 = vadd.f32 %v2902_v38, %v2901_v27 }
 0x118   : > { %1936 = vmatmul.mubr.bf16.gmra.mrb[116].mxu0 %v4213_v15 }
 0x119   : > { %1943 = vmatprep.mubr.bf16.mxu0 %v3969_v55 }
 0x11a   : > { %3395 = vmatmul.mubr.bf16.gmra.mrb[84].mxu1 %v4319_v26 }
 0x11b   : > { %v2904_v59 = vpop.f32.mrb[12].mxu0  ;;  %3398 = vmatprep.mubr.bf16.mxu1 %v4325_v41 }
 0x11c   : > { %v2905_v46 = vpop.f32.mrb[13].mxu0 }
 0x11d   : > { %v4537_v34 = vadd.f32 %v2905_v46, %v2904_v59  ;;  %v2907_v42 = vpop.f32.mrb[14].mxu0 }
 0x11e   : > { %v2908_v20 = vpop.f32.mrb[15].mxu0 }
 0x11f   : > { %v4539_v63 = vadd.f32 %v2908_v20, %v2907_v42 }
 0x120   : > { %1944 = vmatmul.mubr.bf16.gmra.mrb[120].mxu0 %v4235_v17 }
 0x121   : > { %1951 = vmatprep.mubr.bf16.mxu0 %v4010_v11 }
 0x122   : > { %3399 = vmatmul.mubr.bf16.gmra.mrb[88].mxu1 %v4333_v60 }
 0x123   : > { %v2910_v15 = vpop.f32.mrb[16].mxu0  ;;  %3402 = vmatprep.mubr.bf16.mxu1 %v4347_v58 }
 0x124   : > { %v2911_v55 = vpop.f32.mrb[17].mxu0  ;;  %v3022_v61 = vpop.f32.mrb[16].mxu1 }
 0x125   : > { %v4545_v26 = vadd.f32 %v2911_v55, %v2910_v15  ;;  %v2913_v41 = vpop.f32.mrb[18].mxu0  ;;  %v3023_v24 = vpop.f32.mrb[17].mxu1 }
 0x126   : > { %v2914_v9 = vpop.f32.mrb[19].mxu0  ;;  %v4549_v36 = vadd.f32 %v3023_v24, %v3022_v61  ;;  %v3025_v35 = vpop.f32.mrb[18].mxu1 }
 0x127   : > { %v4547_v32 = vadd.f32 %v2914_v9, %v2913_v41  ;;  %v3026_v17 = vpop.f32.mrb[19].mxu1 }
 0x128   : > { %1952 = vmatmul.mubr.bf16.gmra.mrb[124].mxu0 %v4239_v19  ;;  %v4552_v11 = vadd.f32 %v3026_v17, %v3025_v35 }
 0x129   : > { %1959 = vmatprep.mubr.bf16.mxu0 %v4029_v21 }
 0x12a   : > { %3403 = vmatmul.mubr.bf16.gmra.mrb[92].mxu1 %v3945_v44 }
 0x12b   : > { %v2916_v60 = vpop.f32.mrb[20].mxu0  ;;  %3406 = vmatprep.mubr.bf16.mxu1 %v3964_v52 }
 0x12c   : > { %v2917_v58 = vpop.f32.mrb[21].mxu0  ;;  %v3028_v3 = vpop.f32.mrb[20].mxu1 }
 0x12d   : > { %v4557_v43 = vadd.f32 %v2917_v58, %v2916_v60  ;;  %v2919_v0 = vpop.f32.mrb[22].mxu0  ;;  %v3029_v49 = vpop.f32.mrb[21].mxu1 }
 0x12e   : > { %v2920_v45 = vpop.f32.mrb[23].mxu0  ;;  %v4561_v25 = vadd.f32 %v3029_v49, %v3028_v3  ;;  %v3031_v19 = vpop.f32.mrb[22].mxu1 }
 0x12f   : > { %v4559_v47 = vadd.f32 %v2920_v45, %v2919_v0  ;;  %v3032_v10 = vpop.f32.mrb[23].mxu1 }
 0x130   : > { %1960 = vmatmul.mubr.bf16.gmra.mrb[128].mxu0 %v4254_v22  ;;  %v4564_v21 = vadd.f32 %v3032_v10, %v3031_v19 }
 0x131   : > { %1967 = vmatprep.mubr.bf16.mxu0 %v4071_v56 }
 0x132   : > { %3407 = vmatmul.mubr.bf16.gmra.mrb[0].mxu1 %v4004_v8 }
 0x133   : > { %v2922_v44 = vpop.f32.mrb[24].mxu0  ;;  %3410 = vmatprep.mubr.bf16.mxu1 %v4023_v18 }
 0x134   : > { %v2923_v52 = vpop.f32.mrb[25].mxu0  ;;  %v3034_v13 = vpop.f32.mrb[24].mxu1 }
 0x135   : > { %v4569_v57 = vadd.f32 %v2923_v52, %v2922_v44  ;;  %v2925_v37 = vpop.f32.mrb[26].mxu0  ;;  %v3035_v51 = vpop.f32.mrb[25].mxu1 }
 0x136   : > { %v2926_v54 = vpop.f32.mrb[27].mxu0  ;;  %v4573_v50 = vadd.f32 %v3035_v51, %v3034_v13  ;;  %v3037_v22 = vpop.f32.mrb[26].mxu1 }
 0x137   : > { %v4571_v31 = vadd.f32 %v2926_v54, %v2925_v37  ;;  %v3038_v40 = vpop.f32.mrb[27].mxu1 }
 0x138   : > { %1968 = vmatmul.mubr.bf16.gmra.mrb[132].mxu0 %v4269_v39  ;;  %v4576_v56 = vadd.f32 %v3038_v40, %v3037_v22 }
 0x139   : > { %1975 = vmatprep.mubr.bf16.mxu0 %v4090_v5 }
 0x13a   : > { %3411 = vmatmul.mubr.bf16.gmra.mrb[4].mxu1 %v4065_v53 }
 0x13b   : > { %v2928_v8 = vpop.f32.mrb[28].mxu0  ;;  %3414 = vmatprep.mubr.bf16.mxu1 %v4084_v1 }
 0x13c   : > { %v2929_v18 = vpop.f32.mrb[29].mxu0  ;;  %v3040_v27 = vpop.f32.mrb[28].mxu1 }
 0x13d   : > { %v4581_v29 = vadd.f32 %v2929_v18, %v2928_v8  ;;  %v2931_v23 = vpop.f32.mrb[30].mxu0  ;;  %v3041_v59 = vpop.f32.mrb[29].mxu1 }
 0x13e   : > { %v2932_v38 = vpop.f32.mrb[31].mxu0  ;;  %v4585_v42 = vadd.f32 %v3041_v59, %v3040_v27  ;;  %v3043_v39 = vpop.f32.mrb[30].mxu1 }
 0x13f   : > { %v4583_v46 = vadd.f32 %v2932_v38, %v2931_v23  ;;  %v3044_v20 = vpop.f32.mrb[31].mxu1 }
 0x140   : > { %1976 = vmatmul.mubr.bf16.gmra.mrb[136].mxu0 %v4277_v62  ;;  %v4588_v5 = vadd.f32 %v3044_v20, %v3043_v39 }
 0x141   : > { %1983 = vmatprep.mubr.bf16.mxu0 %v4000_v6 }
 0x142   : > { %3415 = vmatmul.mubr.bf16.gmra.mrb[8].mxu1 %v4128_v2 }
 0x143   : > { %v2934_v53 = vpop.f32.mrb[32].mxu0  ;;  %3418 = vmatprep.mubr.bf16.mxu1 %v4151_v4 }
 0x144   : > { %v2935_v1 = vpop.f32.mrb[33].mxu0  ;;  %v3046_v41 = vpop.f32.mrb[32].mxu1 }
 0x145   : > { %v2936_v15 = vadd.f32 %v2935_v1, %v2934_v53  ;;  %v2937_v55 = vpop.f32.mrb[34].mxu0  ;;  %v3047_v9 = vpop.f32.mrb[33].mxu1 }
 0x146   : > { %v2938_v61 = vpop.f32.mrb[35].mxu0  ;;  %v4593_v35 = vadd.f32 %v3047_v9, %v3046_v41  ;;  %v3049_v17 = vpop.f32.mrb[34].mxu1 }
 0x147   : > { %v2939_v24 = vadd.f32 %v2938_v61, %v2937_v55  ;;  %v3050_v62 = vpop.f32.mrb[35].mxu1 }
 0x148   : > { %1984 = vmatmul.mubr.bf16.gmra.mrb[140].mxu0 %v4188_v28  ;;  %v4596_v60 = vadd.f32 %v3050_v62, %v3049_v17 }
 0x14a   : > { %3419 = vmatmul.mubr.bf16.gmra.mrb[12].mxu1 %v4455_v14 }
 0x14b   : > { %v2940_v6 = vpop.f32.mrb[36].mxu0 }
 0x14c   : > { %v2941_v2 = vpop.f32.mrb[37].mxu0  ;;  %v3052_v0 = vpop.f32.mrb[36].mxu1 }
 0x14d   : > { %v2942_v4 = vadd.f32 %v2941_v2, %v2940_v6  ;;  %v2943_v58 = vpop.f32.mrb[38].mxu0  ;;  %v3053_v45 = vpop.f32.mrb[37].mxu1 }
 0x14e   : > { %v2944_v3 = vpop.f32.mrb[39].mxu0  ;;  %v4599_v19 = vadd.f32 %v3053_v45, %v3052_v0  ;;  %v3055_v10 = vpop.f32.mrb[38].mxu1 }
 0x14f   : > { %v2945_v49 = vadd.f32 %v2944_v3, %v2943_v58  ;;  %v3056_v44 = vpop.f32.mrb[39].mxu1 }
 0x150   : > { %v4601_v52 = vadd.f32 %v3056_v44, %v3055_v10 }
 0x153   : > { %v2946_v37 = vpop.f32.mrb[40].mxu0 }
 0x154   : > { %v2947_v28 = vpop.f32.mrb[41].mxu0  ;;  %v3058_v51 = vpop.f32.mrb[40].mxu1 }
 0x155   : > { %v2948_v13 = vadd.f32 %v2947_v28, %v2946_v37  ;;  %v2949_v54 = vpop.f32.mrb[42].mxu0  ;;  %v3059_v22 = vpop.f32.mrb[41].mxu1 }
 0x156   : > { %v2950_v14 = vpop.f32.mrb[43].mxu0  ;;  %v4603_v8 = vadd.f32 %v3059_v22, %v3058_v51  ;;  %v3061_v18 = vpop.f32.mrb[42].mxu1 }
 0x157   : > { %v2951_v40 = vadd.f32 %v2950_v14, %v2949_v54  ;;  %v3062_v23 = vpop.f32.mrb[43].mxu1 }
 0x158   : > { %v4605_v27 = vadd.f32 %v3062_v23, %v3061_v18 }
 0x15b   : > { %v2952_v38 = vpop.f32.mrb[44].mxu0 }
 0x15c   : > { %v2953_v59 = vpop.f32.mrb[45].mxu0  ;;  %v3064_v53 = vpop.f32.mrb[44].mxu1 }
 0x15d   : > { %v4607_v39 = vadd.f32 %v2953_v59, %v2952_v38  ;;  %v2955_v20 = vpop.f32.mrb[46].mxu0  ;;  %v3065_v55 = vpop.f32.mrb[45].mxu1 }
 0x15e   : > { %v2956_v1 = vpop.f32.mrb[47].mxu0  ;;  %v4609_v61 = vadd.f32 %v3065_v55, %v3064_v53  ;;  %v3067_v9 = vpop.f32.mrb[46].mxu1 }
 0x15f   : > { %v2957_v41 = vadd.f32 %v2956_v1, %v2955_v20  ;;  %v3068_v17 = vpop.f32.mrb[47].mxu1 }
 0x160   : > { %v4611_v62 = vadd.f32 %v3068_v17, %v3067_v9 }
 0x163   : > { %v2958_v6 = vpop.f32.mrb[48].mxu0 }
 0x164   : > { %v2959_v2 = vpop.f32.mrb[49].mxu0  ;;  %v3070_v58 = vpop.f32.mrb[48].mxu1 }
 0x165   : > { %v4613_v0 = vadd.f32 %v2959_v2, %v2958_v6  ;;  %v2961_v3 = vpop.f32.mrb[50].mxu0  ;;  %v3071_v45 = vpop.f32.mrb[49].mxu1 }
 0x166   : > { %v2962_v10 = vpop.f32.mrb[51].mxu0  ;;  %v3072_v44 = vadd.f32 %v3071_v45, %v3070_v58  ;;  %v3073_v37 = vpop.f32.mrb[50].mxu1 }
 0x167   : > { %v4615_v28 = vadd.f32 %v2962_v10, %v2961_v3  ;;  %v3074_v54 = vpop.f32.mrb[51].mxu1 }
 0x168   : > { %v4617_v51 = vadd.f32 %v3072_v44, %v2936_v15  ;;  %v3075_v14 = vadd.f32 %v3074_v54, %v3073_v37 }
 0x16a   : > { %v4619_v22 = vadd.f32 %v3075_v14, %v2939_v24 }
 0x16b   : > { %v2964_v18 = vpop.f32.mrb[52].mxu0 }
 0x16c   : > { %v2965_v23 = vpop.f32.mrb[53].mxu0  ;;  %v3076_v38 = vpop.f32.mrb[52].mxu1 }
 0x16d   : > { %v4621_v59 = vadd.f32 %v2965_v23, %v2964_v18  ;;  %v2967_v20 = vpop.f32.mrb[54].mxu0  ;;  %v3077_v53 = vpop.f32.mrb[53].mxu1 }
 0x16e   : > { %v2968_v1 = vpop.f32.mrb[55].mxu0  ;;  %v3078_v55 = vadd.f32 %v3077_v53, %v3076_v38  ;;  %v3079_v9 = vpop.f32.mrb[54].mxu1 }
 0x16f   : > { %v4623_v17 = vadd.f32 %v2968_v1, %v2967_v20  ;;  %v3080_v6 = vpop.f32.mrb[55].mxu1 }
 0x170   : > { %v4625_v2 = vadd.f32 %v3078_v55, %v2942_v4  ;;  %v3081_v15 = vadd.f32 %v3080_v6, %v3079_v9 }
 0x172   : > { %v4627_v58 = vadd.f32 %v3081_v15, %v2945_v49 }
 0x173   : > { %v2970_v24 = vpop.f32.mrb[56].mxu0 }
 0x174   : > { %4912 = vst [vmem:[#allocation2_spill] sm:$0xff] %v4627_v58  ;;  %v2971_v3 = vpop.f32.mrb[57].mxu0  ;;  %v3082_v45 = vpop.f32.mrb[56].mxu1 }
 0x175   : > { %v4629_v10 = vadd.f32 %v2971_v3, %v2970_v24  ;;  %v2973_v44 = vpop.f32.mrb[58].mxu0  ;;  %v3083_v37 = vpop.f32.mrb[57].mxu1 }
 0x176   : > { %v2974_v54 = vpop.f32.mrb[59].mxu0  ;;  %v3084_v14 = vadd.f32 %v3083_v37, %v3082_v45  ;;  %v3085_v18 = vpop.f32.mrb[58].mxu1 }
 0x177   : > { %v4631_v23 = vadd.f32 %v2974_v54, %v2973_v44  ;;  %v3086_v38 = vpop.f32.mrb[59].mxu1 }
 0x178   : > { %v4633_v20 = vadd.f32 %v3084_v14, %v2948_v13  ;;  %v3087_v4 = vadd.f32 %v3086_v38, %v3085_v18 }
 0x17a   : > { %v4635_v53 = vadd.f32 %v3087_v4, %v2951_v40 }
 0x17b   : > { %v2976_v49 = vpop.f32.mrb[60].mxu0 }
 0x17c   : > { %v2977_v1 = vpop.f32.mrb[61].mxu0  ;;  %v3088_v55 = vpop.f32.mrb[60].mxu1 }
 0x17d   : > { %v4637_v9 = vadd.f32 %v2977_v1, %v2976_v49  ;;  %v2979_v6 = vpop.f32.mrb[62].mxu0  ;;  %v3089_v15 = vpop.f32.mrb[61].mxu1 }
 0x17e   : > { %v2980_v24 = vpop.f32.mrb[63].mxu0  ;;  %v3090_v3 = vadd.f32 %v3089_v15, %v3088_v55  ;;  %v3091_v58 = vpop.f32.mrb[62].mxu1 }
 0x17f   : > { %v4639_v45 = vadd.f32 %v2980_v24, %v2979_v6  ;;  %v3092_v44 = vpop.f32.mrb[63].mxu1 }
 0x180   : > { %v4642_v37 = vadd.f32 %v3090_v3, %v4607_v39  ;;  %v3093_v13 = vadd.f32 %v3092_v44, %v3091_v58 }
 0x182   : > { %v4644_v54 = vadd.f32 %v3093_v13, %v2957_v41 }
 0x183   : > { %v3296_v40 = vpop.f32.mrb[64].mxu0 }
 0x184   : > { %v1054_v14 = vadd.f32 %v3296_v40, %v4521_v33  ;;  %v1045_v18 = vpop.f32.mrb[65].mxu0 }
 0x185   : > { %v3094_v38 = vpop.f32.mrb[64].mxu1  ;;  %v1046_v4 = vadd.f32 %v4513_v16, %v1045_v18  ;;  %v3297_v49 = vpop.f32.mrb[66].mxu0 }
 0x186   : > { %v4649_v1 = vadd.f32 %v4561_v25, %v1054_v14  ;;  %v3095_v55 = vpop.f32.mrb[65].mxu1  ;;  %v1057_v6 = vadd.f32 %v3297_v49, %v4523_v30  ;;  %v1048_v15 = vpop.f32.mrb[67].mxu0 }
 0x187   : > { %v4653_v39 = vadd.f32 %v4549_v36, %v1046_v4  ;;  %v3096_v41 = vadd.f32 %v3095_v55, %v3094_v38  ;;  %v3097_v58 = vpop.f32.mrb[66].mxu1  ;;  %v1049_v24 = vadd.f32 %v4515_v48, %v1048_v15 }
 0x188   : > { %v4657_v33 = vadd.f32 %v4564_v21, %v1057_v6  ;;  %v3098_v3 = vpop.f32.mrb[67].mxu1 }
 0x189   : > { %v4660_v16 = vadd.f32 %v3096_v41, %v4613_v0  ;;  %v4663_v25 = vadd.f32 %v4552_v11, %v1049_v24  ;;  %v3099_v44 = vadd.f32 %v3098_v3, %v3097_v58 }
 0x18b   : > { %v4666_v30 = vadd.f32 %v3099_v44, %v4615_v28  ;;  %v3300_v36 = vpop.f32.mrb[68].mxu0 }
 0x18c   : > { %v1070_v13 = vadd.f32 %v3300_v36, %v4537_v34  ;;  %v1061_v40 = vpop.f32.mrb[69].mxu0 }
 0x18d   : > { %v3100_v14 = vpop.f32.mrb[68].mxu1  ;;  %v1062_v48 = vadd.f32 %v4529_v12, %v1061_v40  ;;  %v3301_v21 = vpop.f32.mrb[70].mxu0 }
 0x18e   : > { %v4671_v18 = vadd.f32 %v4585_v42, %v1070_v13  ;;  %v3101_v0 = vpop.f32.mrb[69].mxu1  ;;  %v1073_v38 = vadd.f32 %v3301_v21, %v4539_v63  ;;  %v1064_v11 = vpop.f32.mrb[71].mxu0 }
 0x18f   : > { %v4675_v4 = vadd.f32 %v4573_v50, %v1062_v48  ;;  %v3102_v28 = vadd.f32 %v3101_v0, %v3100_v14  ;;  %v3103_v49 = vpop.f32.mrb[70].mxu1  ;;  %v1065_v55 = vadd.f32 %v4531_v7, %v1064_v11 }
 0x190   : > { %v4679_v34 = vadd.f32 %v4588_v5, %v1073_v38  ;;  %v3104_v6 = vpop.f32.mrb[71].mxu1 }
 0x191   : > { %v4682_v12 = vadd.f32 %v3102_v28, %v4621_v59  ;;  %v4685_v42 = vadd.f32 %v4576_v56, %v1065_v55  ;;  %v3105_v15 = vadd.f32 %v3104_v6, %v3103_v49 }
 0x193   : > { %v4688_v63 = vadd.f32 %v3105_v15, %v4623_v17  ;;  %v3304_v50 = vpop.f32.mrb[72].mxu0 }
 0x194   : > { %v1086_v41 = vadd.f32 %v3304_v50, %v4557_v43  ;;  %v1077_v58 = vpop.f32.mrb[73].mxu0 }
 0x195   : > { %v3106_v24 = vpop.f32.mrb[72].mxu1  ;;  %v1078_v7 = vadd.f32 %v4545_v26, %v1077_v58  ;;  %v3305_v5 = vpop.f32.mrb[74].mxu0 }
 0x196   : > { %v4693_v3 = vadd.f32 %v4599_v19, %v1086_v41  ;;  %v3107_v59 = vpop.f32.mrb[73].mxu1  ;;  %v1089_v44 = vadd.f32 %v3305_v5, %v4559_v47  ;;  %v1080_v56 = vpop.f32.mrb[75].mxu0 }
 0x197   : > { %v4697_v36 = vadd.f32 %v4593_v35, %v1078_v7  ;;  %v3108_v17 = vadd.f32 %v3107_v59, %v3106_v24  ;;  %v3109_v13 = vpop.f32.mrb[74].mxu1  ;;  %v1081_v40 = vadd.f32 %v4547_v32, %v1080_v56 }
 0x198   : > { %v4701_v43 = vadd.f32 %v4601_v52, %v1089_v44  ;;  %v3110_v14 = vpop.f32.mrb[75].mxu1 }
 0x199   : > { %v4704_v26 = vadd.f32 %v3108_v17, %v4629_v10  ;;  %v1386_v19 = vadd.f32 %v4596_v60, %v1081_v40  ;;  %v3111_v48 = vadd.f32 %v3110_v14, %v3109_v13 }
 0x19b   : > { %v4708_v47 = vadd.f32 %v3111_v48, %v4631_v23  ;;  %v3308_v21 = vpop.f32.mrb[76].mxu0 }
 0x19c   : > { %v1102_v35 = vadd.f32 %v3308_v21, %v4581_v29  ;;  %v1093_v0 = vpop.f32.mrb[77].mxu0 }
 0x19d   : > { %v3112_v38 = vpop.f32.mrb[76].mxu1  ;;  %v1094_v32 = vadd.f32 %v4569_v57, %v1093_v0  ;;  %v3309_v11 = vpop.f32.mrb[78].mxu0 }
 0x19e   : > { %v4713_v52 = vadd.f32 %v4609_v61, %v1102_v35  ;;  %v3113_v28 = vpop.f32.mrb[77].mxu1  ;;  %v1105_v10 = vadd.f32 %v3309_v11, %v4583_v46  ;;  %v1096_v49 = vpop.f32.mrb[79].mxu0 }
 0x19f   : > { %v4717_v60 = vadd.f32 %v4603_v8, %v1094_v32  ;;  %v3114_v23 = vadd.f32 %v3113_v28, %v3112_v38  ;;  %v3115_v55 = vpop.f32.mrb[78].mxu1  ;;  %v1097_v6 = vadd.f32 %v4571_v31, %v1096_v49 }
 0x1a0   : > { %v4721_v29 = vadd.f32 %v4611_v62, %v1105_v10  ;;  %v3116_v15 = vpop.f32.mrb[79].mxu1 }
 0x1a1   : > { %v4724_v57 = vadd.f32 %v3114_v23, %v4637_v9  ;;  %v1402_v61 = vadd.f32 %v4605_v27, %v1097_v6  ;;  %v3117_v50 = vadd.f32 %v3116_v15, %v3115_v55 }
 0x1a3   : > { %v4728_v46 = vadd.f32 %v3117_v50, %v4639_v45  ;;  %v3158_v41 = vpop.f32.mrb[80].mxu0 }
 0x1a4   : > { %v3159_v8 = vpop.f32.mrb[81].mxu0 }
 0x1a5   : > { %v3160_v58 = vadd.f32 %v3159_v8, %v3158_v41  ;;  %v3161_v24 = vpop.f32.mrb[82].mxu0 }
 0x1a6   : > { %v3162_v7 = vpop.f32.mrb[83].mxu0 }
 0x1a7   : > { %v3163_v5 = vadd.f32 %v3162_v7, %v3161_v24  ;;  %v4731_v31 = vadd.f32 %v3160_v58, %v4653_v39 }
 0x1a9   : > { %v4734_v62 = vadd.f32 %v3163_v5, %v4663_v25 }
 0x1ab   : > { %v3164_v9 = vpop.f32.mrb[84].mxu0 }
 0x1ac   : > { %v3165_v59 = vpop.f32.mrb[85].mxu0 }
 0x1ad   : > { %v3166_v44 = vadd.f32 %v3165_v59, %v3164_v9  ;;  %v3167_v27 = vpop.f32.mrb[86].mxu0 }
 0x1ae   : > { %v3168_v56 = vpop.f32.mrb[87].mxu0 }
 0x1af   : > { %v3169_v17 = vadd.f32 %v3168_v56, %v3167_v27  ;;  %v3440_v45 = vadd.f32 %v3166_v44, %v4649_v1 }
 0x1b1   : > { %v4738_v13 = vadd.f32 %v3169_v17, %v4657_v33 }
 0x1b3   : > { %v3170_v40 = vpop.f32.mrb[88].mxu0 }
 0x1b4   : > { %v3171_v14 = vpop.f32.mrb[89].mxu0 }
 0x1b5   : > { %v3172_v48 = vadd.f32 %v3171_v14, %v3170_v40  ;;  %v3173_v21 = vpop.f32.mrb[90].mxu0 }
 0x1b6   : > { %v3174_v39 = vpop.f32.mrb[91].mxu0 }
 0x1b7   : > { %v3175_v35 = vadd.f32 %v3174_v39, %v3173_v21  ;;  %v4741_v25 = vadd.f32 %v3172_v48, %v4675_v4 }
 0x1b9   : > { %v4744_v0 = vadd.f32 %v3175_v35, %v4685_v42 }
 0x1bb   : > { %v3176_v38 = vpop.f32.mrb[92].mxu0 }
 0x1bc   : > { %v3177_v32 = vpop.f32.mrb[93].mxu0 }
 0x1bd   : > { %v3178_v11 = vadd.f32 %v3177_v32, %v3176_v38  ;;  %v3179_v28 = vpop.f32.mrb[94].mxu0 }
 0x1be   : > { %v3180_v1 = vpop.f32.mrb[95].mxu0 }
 0x1bf   : > { %v3181_v10 = vadd.f32 %v3180_v1, %v3179_v28  ;;  %v4747_v33 = vadd.f32 %v3178_v11, %v4671_v18 }
 0x1c1   : > { %v4750_v49 = vadd.f32 %v3181_v10, %v4679_v34 }
 0x1c3   : > { %v3182_v23 = vpop.f32.mrb[96].mxu0 }
 0x1c4   : > { %v3183_v55 = vpop.f32.mrb[97].mxu0 }
 0x1c5   : > { %v3184_v6 = vadd.f32 %v3183_v55, %v3182_v23  ;;  %v3185_v4 = vpop.f32.mrb[98].mxu0 }
 0x1c6   : > { %v3186_v15 = vpop.f32.mrb[99].mxu0 }
 0x1c7   : > { %v3187_v50 = vadd.f32 %v3186_v15, %v3185_v4  ;;  %v4753_v42 = vadd.f32 %v3184_v6, %v4697_v36 }
 0x1c9   : > { %v4755_v41 = vadd.f32 %v3187_v50, %v1386_v19 }
 0x1cb   : > { %v3188_v8 = vpop.f32.mrb[100].mxu0 }
 0x1cc   : > { %v3189_v58 = vpop.f32.mrb[101].mxu0 }
 0x1cd   : > { %v3190_v24 = vadd.f32 %v3189_v58, %v3188_v8  ;;  %v3191_v7 = vpop.f32.mrb[102].mxu0 }
 0x1ce   : > { %v3192_v18 = vpop.f32.mrb[103].mxu0 }
 0x1cf   : > { %v3193_v5 = vadd.f32 %v3192_v18, %v3191_v7  ;;  %v4758_v34 = vadd.f32 %v3190_v24, %v4693_v3 }
 0x1d1   : > { %v4761_v9 = vadd.f32 %v3193_v5, %v4701_v43 }
 0x1d3   : > { %v3194_v59 = vpop.f32.mrb[104].mxu0 }
 0x1d4   : > { %v3195_v44 = vpop.f32.mrb[105].mxu0 }
 0x1d5   : > { %v3196_v27 = vadd.f32 %v3195_v44, %v3194_v59  ;;  %v3197_v56 = vpop.f32.mrb[106].mxu0 }
 0x1d6   : > { %v3198_v36 = vpop.f32.mrb[107].mxu0 }
 0x1d7   : > { %v3199_v17 = vadd.f32 %v3198_v36, %v3197_v56  ;;  %v4764_v19 = vadd.f32 %v3196_v27, %v4717_v60  ;;  %v4777_v60 = vld [vmem:[%s4894_s2] ss:$0 sm:$0xff] }
 0x1d9   : > { %v4766_v40 = vadd.f32 %v3199_v17, %v1402_v61 }
 0x1db   : > { %v3200_v14 = vpop.f32.mrb[108].mxu0 }
 0x1dc   : > { %v3201_v48 = vpop.f32.mrb[109].mxu0 }
 0x1dd   : > { %v3202_v21 = vadd.f32 %v3201_v48, %v3200_v14  ;;  %v3203_v39 = vpop.f32.mrb[110].mxu0 }
 0x1de   : > { %v3204_v3 = vpop.f32.mrb[111].mxu0 }
 0x1df   : > { %v3205_v35 = vadd.f32 %v3204_v3, %v3203_v39  ;;  %v4769_v43 = vadd.f32 %v3202_v21, %v4713_v52 }
 0x1e1   : > { %v4772_v38 = vadd.f32 %v3205_v35, %v4721_v29 }
 0x1e3   : > { %v3206_v32 = vpop.f32.mrb[112].mxu0 }
 0x1e4   : > { %v3207_v11 = vpop.f32.mrb[113].mxu0 }
 0x1e5   : > { %v3392_v28 = vpop.f32.mrb[80].mxu1  ;;  %v3208_v61 = vadd.f32 %v3207_v11, %v3206_v32  ;;  %v3209_v1 = vpop.f32.mrb[114].mxu0 }
 0x1e6   : > { %v3441_v10 = vadd.f32 %v3440_v45, %v3392_v28  ;;  %v2026_v23 = vpop.f32.mrb[81].mxu1  ;;  %v3210_v55 = vpop.f32.mrb[115].mxu0 }
 0x1e7   : > { %v3445_v6 = vadd.f32 %v4731_v31, %v2026_v23  ;;  %v3393_v52 = vpop.f32.mrb[82].mxu1  ;;  %v3211_v4 = vadd.f32 %v3210_v55, %v3209_v1  ;;  %v4781_v29 = vadd.f32 %v4617_v51, %v3208_v61  ;;  %v4913_v1 = vld [vmem:[#allocation2_spill] sm:$0xff] }
 0x1e8   : > { %v2194_v15 = vadd.f32 %v3441_v10, %v4777_v60  ;;  %v3449_v50 = vadd.f32 %v4738_v13, %v3393_v52  ;;  %v2029_v8 = vpop.f32.mrb[83].mxu1 }
 0x1e9   : > { %v2192_v58 = vadd.f32 %v3445_v6, %v4777_v60  ;;  %v3453_v24 = vadd.f32 %v4734_v62, %v2029_v8  ;;  %v4788_v45 = vadd.f32 %v4619_v22, %v3211_v4 }
 0x1ea   : > { %v2195_v31 = vadd.f32 %v3449_v50, %v4777_v60  ;;  %v2226_v5 = vmax.f32 %v2194_v15, 0.0 }
 0x1eb   : > { %v2193_v7 = vadd.f32 %v3453_v24, %v4777_v60  ;;  %v3212_v18 = vpop.f32.mrb[116].mxu0  ;;  %v2224_v44 = vmax.f32 %v2192_v58, 0.0 }
 0x1ec   : > { %v2227_v51 = vmax.f32 %v2195_v31, 0.0  ;;  %v3213_v59 = vpop.f32.mrb[117].mxu0 }
 0x1ed   : > { %v2225_v62 = vmax.f32 %v2193_v7, 0.0  ;;  %v3396_v13 = vpop.f32.mrb[84].mxu1  ;;  %v3214_v22 = vadd.f32 %v3213_v59, %v3212_v18  ;;  %v3215_v27 = vpop.f32.mrb[118].mxu0 }
 0x1ee   : > { %v2783_v56 = vpack.c.bf16 %v2227_v51, %v2226_v5  ;;  %v3457_v36 = vadd.f32 %v4747_v33, %v3396_v13  ;;  %v2042_v17 = vpop.f32.mrb[85].mxu1  ;;  %v3216_v14 = vpop.f32.mrb[119].mxu0 }
 0x1ef   : > { %v2778_v48 = vpack.c.bf16 %v2225_v62, %v2224_v44  ;;  %v3461_v21 = vadd.f32 %v4741_v25, %v2042_v17  ;;  %v3397_v39 = vpop.f32.mrb[86].mxu1  ;;  %v3217_v3 = vadd.f32 %v3216_v14, %v3215_v27  ;;  %v4802_v35 = vadd.f32 %v4625_v2, %v3214_v22 }
 0x1f0   : > { %2855 = vst [vmem:[%s4797_s16 + $0x8] sm:$0xff] %v2783_v56   ;;  %v2198_v32 = vadd.f32 %v3457_v36, %v4777_v60  ;;  %v3465_v11 = vadd.f32 %v4750_v49, %v3397_v39  ;;  %v2045_v28 = vpop.f32.mrb[87].mxu1 }
 0x1f1   : > { %2779 = vst [vmem:[%s4797_s16] sm:$0xff] %v2778_v48   ;;  %v2196_v61 = vadd.f32 %v3461_v21, %v4777_v60  ;;  %v3469_v33 = vadd.f32 %v4744_v0, %v2045_v28  ;;  %v4811_v10 = vadd.f32 %v4913_v1, %v3217_v3 }
 0x1f2   : > { %v2199_v25 = vadd.f32 %v3465_v11, %v4777_v60  ;;  %v2230_v55 = vmax.f32 %v2198_v32, 0.0 }
 0x1f3   : > { %v2197_v23 = vadd.f32 %v3469_v33, %v4777_v60  ;;  %v3218_v2 = vpop.f32.mrb[120].mxu0  ;;  %v2228_v4 = vmax.f32 %v2196_v61, 0.0 }
 0x1f4   : > { %v2231_v6 = vmax.f32 %v2199_v25, 0.0  ;;  %v3219_v52 = vpop.f32.mrb[121].mxu0 }
 0x1f5   : > { %v2229_v49 = vmax.f32 %v2197_v23, 0.0  ;;  %v3400_v15 = vpop.f32.mrb[88].mxu1  ;;  %v3220_v50 = vadd.f32 %v3219_v52, %v3218_v2  ;;  %v3221_v8 = vpop.f32.mrb[122].mxu0 }
 0x1f6   : > { %v2793_v58 = vpack.c.bf16 %v2231_v6, %v2230_v55  ;;  %v3473_v0 = vadd.f32 %v4758_v34, %v3400_v15  ;;  %v2058_v24 = vpop.f32.mrb[89].mxu1  ;;  %v3222_v31 = vpop.f32.mrb[123].mxu0 }
 0x1f7   : > { %v2788_v7 = vpack.c.bf16 %v2229_v49, %v2228_v4  ;;  %v3477_v18 = vadd.f32 %v4753_v42, %v2058_v24  ;;  %v3401_v5 = vpop.f32.mrb[90].mxu1  ;;  %v3223_v51 = vadd.f32 %v3222_v31, %v3221_v8  ;;  %v4818_v59 = vadd.f32 %v4633_v20, %v3220_v50 }
 0x1f8   : > { %2857 = vst [vmem:[%s4797_s16 + $0x18] sm:$0xff] %v2793_v58   ;;  %v2202_v44 = vadd.f32 %v3473_v0, %v4777_v60  ;;  %v3481_v62 = vadd.f32 %v4761_v9, %v3401_v5  ;;  %v2061_v13 = vpop.f32.mrb[91].mxu1 }
 0x1f9   : > { %2856 = vst [vmem:[%s4797_s16 + $0x10] sm:$0xff] %v2788_v7   ;;  %v2200_v22 = vadd.f32 %v3477_v18, %v4777_v60  ;;  %v3485_v34 = vadd.f32 %v4755_v41, %v2061_v13  ;;  %v4827_v27 = vadd.f32 %v4635_v53, %v3223_v51 }
 0x1fa   : > { %v2203_v42 = vadd.f32 %v3481_v62, %v4777_v60  ;;  %v2234_v36 = vmax.f32 %v2202_v44, 0.0 }
 0x1fb   : > { %v2201_v56 = vadd.f32 %v3485_v34, %v4777_v60  ;;  %v3224_v20 = vpop.f32.mrb[124].mxu0  ;;  %v2232_v48 = vmax.f32 %v2200_v22, 0.0 }
 0x1fc   : > { %v2235_v17 = vmax.f32 %v2203_v42, 0.0  ;;  %v3225_v14 = vpop.f32.mrb[125].mxu0 }
 0x1fd   : > { %v2233_v9 = vmax.f32 %v2201_v56, 0.0  ;;  %v3404_v21 = vpop.f32.mrb[92].mxu1  ;;  %v3226_v39 = vadd.f32 %v3225_v14, %v3224_v20  ;;  %v3227_v3 = vpop.f32.mrb[126].mxu0 }
 0x1fe   : > { %v2803_v32 = vpack.c.bf16 %v2235_v17, %v2234_v36  ;;  %v3489_v41 = vadd.f32 %v4769_v43, %v3404_v21  ;;  %v2074_v53 = vpop.f32.mrb[93].mxu1  ;;  %v3228_v11 = vpop.f32.mrb[127].mxu0 }
 0x1ff   : > { %v2798_v28 = vpack.c.bf16 %v2233_v9, %v2232_v48  ;;  %v3493_v61 = vadd.f32 %v4764_v19, %v2074_v53  ;;  %v3405_v33 = vpop.f32.mrb[94].mxu1  ;;  %v3229_v1 = vadd.f32 %v3228_v11, %v3227_v3  ;;  %v3515_v25 = vadd.f32 %v4642_v37, %v3226_v39 }
 0x200   : > { %2859 = vst [vmem:[%s4797_s16 + $0x28] sm:$0xff] %v2803_v32   ;;  %v2206_v23 = vadd.f32 %v3489_v41, %v4777_v60  ;;  %v3497_v2 = vadd.f32 %v4772_v38, %v3405_v33  ;;  %v2077_v55 = vpop.f32.mrb[95].mxu1 }
 0x201   : > { %2858 = vst [vmem:[%s4797_s16 + $0x20] sm:$0xff] %v2798_v28   ;;  %v2204_v6 = vadd.f32 %v3493_v61, %v4777_v60  ;;  %v3501_v43 = vadd.f32 %v4766_v40, %v2077_v55  ;;  %v3521_v52 = vadd.f32 %v4644_v54, %v3229_v1 }
 0x202   : > { %v2207_v4 = vadd.f32 %v3497_v2, %v4777_v60  ;;  %v2238_v15 = vmax.f32 %v2206_v23, 0.0 }
 0x203   : > { %v2205_v19 = vadd.f32 %v3501_v43, %v4777_v60  ;;  %v3230_v49 = vpop.f32.mrb[128].mxu0  ;;  %v2236_v8 = vmax.f32 %v2204_v6, 0.0 }
 0x204   : > { %v2239_v37 = vmax.f32 %v2207_v4, 0.0  ;;  %v3231_v50 = vpop.f32.mrb[129].mxu0 }
 0x205   : > { %v2237_v58 = vmax.f32 %v2205_v19, 0.0  ;;  %v3408_v38 = vpop.f32.mrb[0].mxu1  ;;  %v3232_v0 = vadd.f32 %v3231_v50, %v3230_v49  ;;  %v3233_v24 = vpop.f32.mrb[130].mxu0 }
 0x206   : > { %v2813_v31 = vpack.c.bf16 %v2239_v37, %v2238_v15  ;;  %v3504_v40 = vadd.f32 %v4802_v35, %v3408_v38  ;;  %v2090_v7 = vpop.f32.mrb[1].mxu1  ;;  %v3234_v54 = vpop.f32.mrb[131].mxu0 }
 0x207   : > { %v2808_v18 = vpack.c.bf16 %v2237_v58, %v2236_v8  ;;  %v3507_v5 = vadd.f32 %v4781_v29, %v2090_v7  ;;  %v3409_v51 = vpop.f32.mrb[2].mxu1  ;;  %v3235_v44 = vadd.f32 %v3234_v54, %v3233_v24  ;;  %v3530_v62 = vadd.f32 %v4660_v16, %v3232_v0 }
 0x208   : > { %2861 = vst [vmem:[%s4797_s16 + $0x38] sm:$0xff] %v2813_v31   ;;  %v2210_v13 = vadd.f32 %v3504_v40, %v4777_v60  ;;  %v3510_v22 = vadd.f32 %v4811_v10, %v3409_v51  ;;  %v2093_v34 = vpop.f32.mrb[3].mxu1 }
 0x209   : > { %2860 = vst [vmem:[%s4797_s16 + $0x30] sm:$0xff] %v2808_v18   ;;  %v2208_v42 = vadd.f32 %v3507_v5, %v4777_v60  ;;  %v3513_v35 = vadd.f32 %v4788_v45, %v2093_v34  ;;  %v3536_v56 = vadd.f32 %v4666_v30, %v3235_v44 }
 0x20a   : > { %v2211_v20 = vadd.f32 %v3510_v22, %v4777_v60  ;;  %v2242_v17 = vmax.f32 %v2210_v13, 0.0 }
 0x20b   : > { %v2209_v29 = vadd.f32 %v3513_v35, %v4777_v60  ;;  %v3236_v36 = vpop.f32.mrb[132].mxu0  ;;  %v2240_v48 = vmax.f32 %v2208_v42, 0.0 }
 0x20c   : > { %v2243_v16 = vmax.f32 %v2211_v20, 0.0  ;;  %v3237_v14 = vpop.f32.mrb[133].mxu0 }
 0x20d   : > { %v2241_v9 = vmax.f32 %v2209_v29, 0.0  ;;  %v3412_v10 = vpop.f32.mrb[4].mxu1  ;;  %v3238_v21 = vadd.f32 %v3237_v14, %v3236_v36  ;;  %v3239_v39 = vpop.f32.mrb[134].mxu0 }
 0x20e   : > { %v2823_v3 = vpack.c.bf16 %v2243_v16, %v2242_v17  ;;  %v3516_v32 = vadd.f32 %v3515_v25, %v3412_v10  ;;  %v2106_v45 = vpop.f32.mrb[5].mxu1  ;;  %v3240_v41 = vpop.f32.mrb[135].mxu0 }
 0x20f   : > { %v2818_v30 = vpack.c.bf16 %v2241_v9, %v2240_v48  ;;  %v3519_v53 = vadd.f32 %v4818_v59, %v2106_v45  ;;  %v3413_v11 = vpop.f32.mrb[6].mxu1  ;;  %v3241_v28 = vadd.f32 %v3240_v41, %v3239_v39  ;;  %v3527_v61 = vadd.f32 %v4682_v12, %v3238_v21 }
 0x210   : > { %2863 = vst [vmem:[%s4797_s16 + $0x48] sm:$0xff] %v2823_v3   ;;  %v2214_v33 = vadd.f32 %v3516_v32, %v4777_v60  ;;  %v3522_v1 = vadd.f32 %v3521_v52, %v3413_v11  ;;  %v2109_v23 = vpop.f32.mrb[7].mxu1 }
 0x211   : > { %2862 = vst [vmem:[%s4797_s16 + $0x40] sm:$0xff] %v2818_v30   ;;  %v2212_v2 = vadd.f32 %v3519_v53, %v4777_v60  ;;  %v3525_v55 = vadd.f32 %v4827_v27, %v2109_v23  ;;  %v3533_v25 = vadd.f32 %v4688_v63, %v3241_v28 }
 0x212   : > { %v2215_v6 = vadd.f32 %v3522_v1, %v4777_v60  ;;  %v2246_v4 = vmax.f32 %v2214_v33, 0.0 }
 0x213   : > { %v2213_v59 = vadd.f32 %v3525_v55, %v4777_v60  ;;  %v3242_v43 = vpop.f32.mrb[136].mxu0  ;;  %v2244_v49 = vmax.f32 %v2212_v2, 0.0 }
 0x214   : > { %v2247_v19 = vmax.f32 %v2215_v6, 0.0  ;;  %v3243_v12 = vpop.f32.mrb[137].mxu0 }
 0x215   : > { %v2245_v15 = vmax.f32 %v2213_v59, 0.0  ;;  %v3416_v52 = vpop.f32.mrb[8].mxu1  ;;  %v3244_v37 = vadd.f32 %v3243_v12, %v3242_v43  ;;  %v3245_v50 = vpop.f32.mrb[138].mxu0 }
 0x216   : > { %v2833_v8 = vpack.c.bf16 %v2247_v19, %v2246_v4  ;;  %v3528_v58 = vadd.f32 %v3527_v61, %v3416_v52  ;;  %v2122_v27 = vpop.f32.mrb[9].mxu1  ;;  %v3246_v38 = vpop.f32.mrb[139].mxu0 }
 0x217   : > { %v2828_v63 = vpack.c.bf16 %v2245_v15, %v2244_v49  ;;  %v3531_v0 = vadd.f32 %v3530_v62, %v2122_v27  ;;  %v3417_v24 = vpop.f32.mrb[10].mxu1  ;;  %v3247_v31 = vadd.f32 %v3246_v38, %v3245_v50  ;;  %v3542_v40 = vadd.f32 %v4704_v26, %v3244_v37 }
 0x218   : > { %2865 = vst [vmem:[%s4797_s16 + $0x58] sm:$0xff] %v2833_v8   ;;  %v2218_v7 = vadd.f32 %v3528_v58, %v4777_v60  ;;  %v3534_v54 = vadd.f32 %v3533_v25, %v3417_v24  ;;  %v2125_v18 = vpop.f32.mrb[11].mxu1 }
 0x219   : > { %2864 = vst [vmem:[%s4797_s16 + $0x50] sm:$0xff] %v2828_v63   ;;  %v2216_v5 = vadd.f32 %v3531_v0, %v4777_v60  ;;  %v3537_v51 = vadd.f32 %v3536_v56, %v2125_v18  ;;  %v3548_v44 = vadd.f32 %v4708_v47, %v3247_v31 }
 0x21a   : > { %v2219_v13 = vadd.f32 %v3534_v54, %v4777_v60  ;;  %v2250_v34 = vmax.f32 %v2218_v7, 0.0 }
 0x21b   : > { %v2217_v22 = vadd.f32 %v3537_v51, %v4777_v60  ;;  %v3248_v62 = vpop.f32.mrb[140].mxu0  ;;  %v2248_v35 = vmax.f32 %v2216_v5, 0.0 }
 0x21c   : > { %v2251_v42 = vmax.f32 %v2219_v13, 0.0  ;;  %v3249_v26 = vpop.f32.mrb[141].mxu0 }
 0x21d   : > { %v2249_v20 = vmax.f32 %v2217_v22, 0.0  ;;  %v3420_v29 = vpop.f32.mrb[12].mxu1  ;;  %v3250_v36 = vadd.f32 %v3249_v26, %v3248_v62  ;;  %v3251_v17 = vpop.f32.mrb[142].mxu0 }
 0x21e   : > { %v2843_v16 = vpack.c.bf16 %v2251_v42, %v2250_v34  ;;  %v2138_v14 = vpop.f32.mrb[13].mxu1  ;;  %v3252_v56 = vpop.f32.mrb[143].mxu0 }
 0x21f   : > { %v2838_v48 = vpack.c.bf16 %v2249_v20, %v2248_v35  ;;  %v3539_v47 = vadd.f32 %v4724_v57, %v3250_v36  ;;  %v3543_v9 = vadd.f32 %v3542_v40, %v2138_v14  ;;  %v3421_v10 = vpop.f32.mrb[14].mxu1  ;;  %v3253_v21 = vadd.f32 %v3252_v56, %v3251_v17 }
 0x220   : > { %2867 = vst [vmem:[%s4797_s16 + $0x68] sm:$0xff] %v2843_v16   ;;  %v2141_v39 = vpop.f32.mrb[15].mxu1 }
 0x221   : > { %2866 = vst [vmem:[%s4797_s16 + $0x60] sm:$0xff] %v2838_v48   ;;  %v3540_v3 = vadd.f32 %v3539_v47, %v3420_v29  ;;  %v2220_v32 = vadd.f32 %v3543_v9, %v4777_v60  ;;  %v3545_v45 = vadd.f32 %v4728_v46, %v3253_v21  ;;  %v3549_v41 = vadd.f32 %v3548_v44, %v2141_v39 }
 0x223   : > { %v2222_v30 = vadd.f32 %v3540_v3, %v4777_v60  ;;  %v3546_v53 = vadd.f32 %v3545_v45, %v3421_v10  ;;  %v2221_v11 = vadd.f32 %v3549_v41, %v4777_v60  ;;  %v2252_v57 = vmax.f32 %v2220_v32, 0.0 }
 0x225   : > { %v2223_v28 = vadd.f32 %v3546_v53, %v4777_v60  ;;  %v2253_v61 = vmax.f32 %v2221_v11, 0.0  ;;  %v2254_v33 = vmax.f32 %v2222_v30, 0.0 }
 0x227   : > { %v2255_v1 = vmax.f32 %v2223_v28, 0.0  ;;  %v2848_v23 = vpack.c.bf16 %v2253_v61, %v2252_v57 }
 0x229   : > { %v2853_v2 = vpack.c.bf16 %v2255_v1, %v2254_v33  ;;  %2868 = vst [vmem:[%s4797_s16 + $0x70] sm:$0xff] %v2848_v23  }
 0x22b   : > { %2869 = vst [vmem:[%s4797_s16 + $0x78] sm:$0xff] %v2853_v2  }
 0x22c PF: > { %s13_s14 = sadd.s32 1, %s3735_s14   ;;  %s4914_s12 = smov %s3731_s13 }
 0x22d   : > { %p10_p5 = scmp.ge.s32.totalorder %s13_s14, 4   ;;  %s4915_s13 = smov %s4917_s15 }
 0x22f   :  { %12 = sbr.rel (!%p10_p5) target bundleno = 2 (0x2), region = 67 }

// kernel: bmn_forward.5
= control target key start
LH: loop header
LB: loop body
LE: loop exit
PB: predicated region body
PF: predicated region fallthrough
CT: control target
= control target key end

     0   :  { %s6295_s0 = inlined_call_operand.vmem [shape: bf16[2,16,16], index: 0, kind: input, shape index: {}]   ;;  %s6296_s1 = inlined_call_operand.hbm [shape: bf16[48,256], index: 1, kind: input, shape index: {}]   ;;  %s6297_s2 = inlined_call_operand.hbm [shape: f32[1,256], index: 2, kind: input, shape index: {}]   ;;  %s6298_s3 = inlined_call_operand.hbm [shape: bf16[768,256], index: 3, kind: input, shape index: {}]   ;;  %s6299_s4 = inlined_call_operand.hbm [shape: f32[1,256], index: 4, kind: input, shape index: {}]   ;;  %s6300_s5 = inlined_call_operand.hbm [shape: bf16[768,256], index: 5, kind: input, shape index: {}]   ;;  %s6301_s6 = inlined_call_operand.vmem [shape: f32[1,256], index: 6, kind: input, shape index: {}]   ;;  %s6302_s7 = inlined_call_operand.hbm [shape: bf16[768,256], index: 7, kind: input, shape index: {}]   ;;  %s6303_s8 = inlined_call_operand.vmem [shape: f32[1,256], index: 8, kind: input, shape index: {}]   ;;  %s6304_s9 = inlined_call_operand.hbm [shape: bf16[768,256], index: 9, kind: input, shape index: {}]   ;;  %s6305_s10 = inlined_call_operand.vmem [shape: f32[1,256], index: 10, kind: input, shape index: {}]   ;;  %s6306_s11 = inlined_call_operand.hbm [shape: bf16[2,256,128], index: 11, kind: input, shape index: {}]   ;;  %s6307_s12 = inlined_call_operand.vmem [shape: f32[1,128], index: 12, kind: input, shape index: {}]   ;;  %s6308_s13 = inlined_call_operand.vmem [shape: bf16[2,16,256], index: 13, kind: output, shape index: {0}]   ;;  %s6309_s14 = inlined_call_operand.vmem [shape: f32[2,16,128], index: 14, kind: output, shape index: {1}]  }
   0x1   :  { %6313 = sst [smem:[#allocation21_spill]] %s6297_s2 }
   0x2   :  { %6314 = sst [smem:[#allocation22_spill]] %s6299_s4 }
   0x3   :  { %6315 = sst [smem:[#allocation23_spill]] %s6309_s14 }
   0x4   :  { %20 = vsyncpa [#allocation3], 0 }
   0x5   :  { %21 = vsyncpa [#allocation5], 0 }
   0x6   :  { %22 = vsyncpa [#allocation8], 0 }
   0x7   :  { %23 = vsyncpa [#allocation11], 0 }
   0x8   :  { %24 = vsyncpa [#allocation14], 0  ;;  %s5931_s29 = smov 0  }
   0x9 LB: > { %6316 = sst [smem:[#allocation20_spill]] %s5841_s29  ;;  %s5843_s30 = smov [#allocation4]   ;;  %s5841_s29 = sphi %s5931_s29, %s30_s29  }
   0xa   : > { %s391_s15 = sshll.u32 %s5843_s30, 4  ;;  %s5937_s16 = sadd.s32 4294967295, %s5841_s29   ;;  %s5942_s15 = int_to_ptr.vmem [resolvable:$true] %s391_s15 }
   0xb   : > { %p4308_p0 = scmp.ge.s32.totalorder %s5841_s29, 1  ;;  %p365_p1 = scmp.lt.s32.totalorder %s5841_s29, 3 }
   0xc   : > { %p6311_p2 = scmp.eq.s32.totalorder %s5937_s16, 0  ;;  %s5844_s18 = smov [#allocation7]  }
   0xd   : > { %p5944_p3 = pnand %p4308_p0, %p365_p1  ;;  %s415_s19 = sshll.u32 %s5844_s18, 4  ;;  %s5950_s19 = int_to_ptr.vmem [resolvable:$true] %s415_s19 }
   0xe   : > { %s5845_s21 = smov [#allocation10]   ;;  %s5846_s23 = smov [#allocation2]  }
   0xf   : > { %s6317_s17 = scalar_select %p5944_p3, 1, 0 }
  0x10   : > { %p4903_p4 = pneg %p5944_p3  ;;  %s441_s22 = sshll.u32 %s5845_s21, 4  ;;  %s5958_s22 = int_to_ptr.vmem [resolvable:$true] %s441_s22 }
  0x11   : > { %s5960_s24 = sshll.u32 %s5846_s23, 4  ;;  %s6319_s2 = sld [smem:[#allocation21_spill]]  ;;  %s378_s24 = int_to_ptr.vmem [resolvable:$true] %s5960_s24 }
  0x12   : > { %p5954_p5 = pnand %p6311_p2, %p4903_p4 }
  0x14   : > { %p5970_p7 = pneg %p5954_p5 }
  0x17   : > { %s5591_s27 = scalar_lea.hbm %s6319_s2, 32 }
  0x18   : > { %p5592_p6 = scmp.ne.s32.totalorder %s6319_s2, %s5591_s27  ;;  %p5598_p10 = scmp.lt.u32.totalorder %s5591_s27, %s6319_s2 }
  0x1a   : > { %p5594_p8 = pnand %p5970_p7, %p5592_p6 }
  0x1c   : > { %p5595_p9 = pneg %p5594_p8 }
  0x1e   : > { %p5600_p11 = pnand %p5598_p10, %p5595_p9 }
  0x20   : > { %5603 = shalt.err (!%p5600_p11)
}
  0x21   : > { %s5604_s25 = scalar_lea.vmem %s5942_s15, 32  ;;  %p5612_p1 = scmp.lt.s32.totalorder %s5942_s15, %s5942_s15 }
  0x22   : > { %p5605_p12 = scmp.ne.s32.totalorder %s5942_s15, %s5604_s25  ;;  %p5613_p4 = scmp.lt.s32.totalorder %s5604_s25, %s5604_s25 }
  0x24   : > { %p5607_p13 = pnand %p5605_p12, %p5970_p7  ;;  %p5614_p6 = por %p5613_p4, %p5612_p1 }
  0x26   : > { %p5608_p0 = pneg %p5607_p13 }
  0x28   : > { %p5615_p8 = pnand %p5614_p6, %p5608_p0 }
  0x2a   : > { %5618 = shalt.err (!%p5615_p8)
}
  0x2b   : > { %4909 = dma.hbm_to_vmem [thread:$0]  (!%p5954_p5), %s6319_s2, 32, %s5942_s15, [#allocation5]  }
  0x2c   : > { %s6321_s4 = sld [smem:[#allocation22_spill]] }
  0x32   : > { %s5619_s21 = scalar_lea.hbm %s6321_s4, 32 }
  0x33   : > { %p5620_p9 = scmp.ne.s32.totalorder %s6321_s4, %s5619_s21  ;;  %p5626_p12 = scmp.lt.u32.totalorder %s5619_s21, %s6321_s4 }
  0x35   : > { %p5622_p10 = pnand %p5620_p9, %p5970_p7 }
  0x37   : > { %p5623_p11 = pneg %p5622_p10 }
  0x39   : > { %p5628_p13 = pnand %p5626_p12, %p5623_p11 }
  0x3b   : > { %5631 = shalt.err (!%p5628_p13)
}
  0x3c   : > { %s5632_s15 = scalar_lea.vmem %s5950_s19, 32  ;;  %p5640_p6 = scmp.lt.s32.totalorder %s5950_s19, %s5950_s19 }
  0x3d   : > { %p5633_p0 = scmp.ne.s32.totalorder %s5950_s19, %s5632_s15  ;;  %p5641_p8 = scmp.lt.s32.totalorder %s5632_s15, %s5632_s15 }
  0x3f   : > { %p5635_p1 = pnand %p5633_p0, %p5970_p7  ;;  %p5642_p9 = por %p5641_p8, %p5640_p6 }
  0x41   : > { %p5636_p4 = pneg %p5635_p1 }
  0x43   : > { %p5643_p10 = pnand %p5642_p9, %p5636_p4 }
  0x45   : > { %5646 = shalt.err (!%p5643_p10)
}
  0x46   : > { %4915 = dma.hbm_to_vmem [thread:$0]  (!%p5954_p5), %s6321_s4, 32, %s5950_s19, [#allocation8]  }
  0x47   : > { %s5647_s28 = scalar_lea.hbm %s6302_s7, 12288 }
  0x48   : > { %p5648_p11 = scmp.ne.s32.totalorder %s6302_s7, %s5647_s28  ;;  %p5654_p0 = scmp.lt.u32.totalorder %s5647_s28, %s6302_s7 }
  0x4a   : > { %p5650_p12 = pnand %p5648_p11, %p5970_p7 }
  0x4c   : > { %p5651_p13 = pneg %p5650_p12 }
  0x4e   : > { %p5656_p1 = pnand %p5654_p0, %p5651_p13 }
  0x50   : > { %5659 = shalt.err (!%p5656_p1)
}
  0x51   : > { %s5660_s19 = scalar_lea.vmem %s5958_s22, 12288  ;;  %p5668_p9 = scmp.lt.s32.totalorder %s5958_s22, %s5958_s22 }
  0x52   : > { %p5661_p4 = scmp.ne.s32.totalorder %s5958_s22, %s5660_s19  ;;  %p5669_p10 = scmp.lt.s32.totalorder %s5660_s19, %s5660_s19 }
  0x54   : > { %p5663_p6 = pnand %p5661_p4, %p5970_p7  ;;  %p5670_p11 = por %p5669_p10, %p5668_p9 }
  0x56   : > { %p5664_p8 = pneg %p5663_p6 }
  0x58   : > { %p5671_p12 = pnand %p5670_p11, %p5664_p8 }
  0x5a   : > { %5674 = shalt.err (!%p5671_p12)
}
  0x5b   : > { %s5847_s15 = smov 128   ;;  %s5848_s14 = smov 8  }
  0x5c   : > { %4921 = dma.hbm_to_vmem [thread:$0]  (!%p5954_p5), %s6302_s7, 12288, %s5958_s22, [#allocation11], %s5847_s15, %s5847_s15, %s5848_s14  }
  0x5d   : > { %s5675_s30 = scalar_lea.hbm %s6296_s1, 768 }
  0x5e   : > { %p5676_p13 = scmp.ne.s32.totalorder %s6296_s1, %s5675_s30  ;;  %p5682_p4 = scmp.lt.u32.totalorder %s5675_s30, %s6296_s1 }
  0x60   : > { %p5678_p0 = pnand %p5676_p13, %p5970_p7 }
  0x62   : > { %p5679_p1 = pneg %p5678_p0 }
  0x64   : > { %p5684_p6 = pnand %p5682_p4, %p5679_p1 }
  0x66   : > { %5687 = shalt.err (!%p5684_p6)
}
  0x67   : > { %s5688_s29 = scalar_lea.vmem %s378_s24, 768  ;;  %p5696_p11 = scmp.lt.s32.totalorder %s378_s24, %s378_s24 }
  0x68   : > { %p5689_p8 = scmp.ne.s32.totalorder %s378_s24, %s5688_s29  ;;  %p5697_p12 = scmp.lt.s32.totalorder %s5688_s29, %s5688_s29 }
  0x6a   : > { %p5691_p9 = pnand %p5689_p8, %p5970_p7  ;;  %p5698_p2 = por %p5697_p12, %p5696_p11 }
  0x6c   : > { %p5692_p10 = pneg %p5691_p9 }
  0x6e   : > { %p5699_p3 = pnand %p5698_p2, %p5692_p10 }
  0x70   : > { %5702 = shalt.err (!%p5699_p3)
}
  0x71   : > { %4906 = dma.hbm_to_vmem [thread:$0]  (!%p5954_p5), %s6296_s1, 768, %s378_s24, [#allocation3], %s5847_s15, %s5847_s15, %s5848_s14  }
  0x72   : > { %s5849_s27 = smov [#allocation6]   ;;  %s5850_s30 = smov [#allocation9]  }
  0x73   : > { %s401_s28 = sshll.u32 %s5849_s27, 4  ;;  %s425_s21 = sshll.u32 %s5850_s30, 4  ;;  %s402_s28 = int_to_ptr.vmem [resolvable:$true] %s401_s28  ;;  %s426_s21 = int_to_ptr.vmem [resolvable:$true] %s425_s21 }
  0x74   : > { %s5703_s19 = scalar_lea.hbm %s6298_s3, 12288 }
  0x75   : > { %p5704_p2 = scmp.ne.s32.totalorder %s6298_s3, %s5703_s19  ;;  %p5710_p0 = scmp.lt.u32.totalorder %s5703_s19, %s6298_s3 }
  0x77   : > { %p5706_p3 = pnand %p5704_p2, %p5970_p7 }
  0x79   : > { %p5707_p13 = pneg %p5706_p3 }
  0x7b   : > { %p5712_p1 = pnand %p5710_p0, %p5707_p13 }
  0x7d   : > { %5715 = shalt.err (!%p5712_p1)
}
  0x7e   : > { %s5716_s24 = scalar_lea.vmem %s402_s28, 12288  ;;  %p5724_p9 = scmp.lt.s32.totalorder %s402_s28, %s402_s28 }
  0x7f   : > { %p5717_p4 = scmp.ne.s32.totalorder %s402_s28, %s5716_s24  ;;  %p5725_p10 = scmp.lt.s32.totalorder %s5716_s24, %s5716_s24 }
  0x81   : > { %p5719_p6 = pnand %p5717_p4, %p5970_p7  ;;  %p5726_p11 = por %p5725_p10, %p5724_p9 }
  0x83   : > { %p5720_p8 = pneg %p5719_p6 }
  0x85   : > { %p5727_p12 = pnand %p5726_p11, %p5720_p8 }
  0x87   : > { %5730 = shalt.err (!%p5727_p12)
}
  0x88   : > { %4912 = dma.hbm_to_vmem [thread:$0]  (!%p5954_p5), %s6298_s3, 12288, %s402_s28, [#allocation5], %s5847_s15, %s5847_s15, %s5848_s14  }
  0x89   : > { %s5731_s30 = scalar_lea.hbm %s6300_s5, 12288 }
  0x8a   : > { %p5732_p2 = scmp.ne.s32.totalorder %s6300_s5, %s5731_s30  ;;  %p5738_p0 = scmp.lt.u32.totalorder %s5731_s30, %s6300_s5 }
  0x8c   : > { %p5734_p3 = pnand %p5732_p2, %p5970_p7 }
  0x8e   : > { %p5735_p13 = pneg %p5734_p3 }
  0x90   : > { %p5740_p1 = pnand %p5738_p0, %p5735_p13 }
  0x92   : > { %5743 = shalt.err (!%p5740_p1)
}
  0x93   : > { %s5744_s22 = scalar_lea.vmem %s426_s21, 12288  ;;  %p5752_p9 = scmp.lt.s32.totalorder %s426_s21, %s426_s21 }
  0x94   : > { %p5745_p4 = scmp.ne.s32.totalorder %s426_s21, %s5744_s22  ;;  %p5753_p10 = scmp.lt.s32.totalorder %s5744_s22, %s5744_s22 }
  0x96   : > { %p5747_p6 = pnand %p5745_p4, %p5970_p7  ;;  %p5754_p11 = por %p5753_p10, %p5752_p9 }
  0x98   : > { %p5748_p8 = pneg %p5747_p6 }
  0x9a   : > { %p5755_p12 = pnand %p5754_p11, %p5748_p8 }
  0x9c   : > { %5758 = shalt.err (!%p5755_p12)
}
  0x9d   : > { %4918 = dma.hbm_to_vmem [thread:$0]  (!%p5954_p5), %s6300_s5, 12288, %s426_s21, [#allocation8], %s5847_s15, %s5847_s15, %s5848_s14  }
  0x9e   : > { %s5851_s2 = smov [#allocation12]   ;;  %s5852_s26 = smov [#allocation13]  }
  0x9f   : > { %s457_s4 = sshll.u32 %s5851_s2, 4  ;;  %s473_s27 = sshll.u32 %s5852_s26, 4  ;;  %s458_s4 = int_to_ptr.vmem [resolvable:$true] %s457_s4  ;;  %s474_s27 = int_to_ptr.vmem [resolvable:$true] %s473_s27 }
  0xa0   : > { %s5759_s25 = scalar_lea.hbm %s6304_s9, 12288 }
  0xa1   : > { %p5760_p2 = scmp.ne.s32.totalorder %s6304_s9, %s5759_s25  ;;  %p5766_p0 = scmp.lt.u32.totalorder %s5759_s25, %s6304_s9 }
  0xa3   : > { %p5762_p3 = pnand %p5760_p2, %p5970_p7 }
  0xa5   : > { %p5763_p13 = pneg %p5762_p3 }
  0xa7   : > { %p5768_p1 = pnand %p5766_p0, %p5763_p13 }
  0xa9   : > { %5771 = shalt.err (!%p5768_p1)
}
  0xaa   : > { %s5772_s21 = scalar_lea.vmem %s458_s4, 12288  ;;  %p5780_p9 = scmp.lt.s32.totalorder %s458_s4, %s458_s4 }
  0xab   : > { %p5773_p4 = scmp.ne.s32.totalorder %s458_s4, %s5772_s21  ;;  %p5781_p10 = scmp.lt.s32.totalorder %s5772_s21, %s5772_s21 }
  0xad   : > { %p5775_p6 = pnand %p5773_p4, %p5970_p7  ;;  %p5782_p11 = por %p5781_p10, %p5780_p9 }
  0xaf   : > { %p5776_p8 = pneg %p5775_p6 }
  0xb1   : > { %p5783_p12 = pnand %p5782_p11, %p5776_p8 }
  0xb3   : > { %5786 = shalt.err (!%p5783_p12)
}
  0xb4   : > { %4924 = dma.hbm_to_vmem [thread:$0]  (!%p5954_p5), %s6304_s9, 12288, %s458_s4, [#allocation11], %s5847_s15, %s5847_s15, %s5848_s14  }
  0xb5   : > { %s5787_s23 = scalar_lea.hbm %s6306_s11, 4096 }
  0xb6   : > { %p5788_p2 = scmp.ne.s32.totalorder %s6306_s11, %s5787_s23  ;;  %p5794_p0 = scmp.lt.u32.totalorder %s5787_s23, %s6306_s11 }
  0xb8   : > { %p5790_p3 = pnand %p5788_p2, %p5970_p7 }
  0xba   : > { %p5791_p13 = pneg %p5790_p3 }
  0xbc   : > { %p5796_p1 = pnand %p5794_p0, %p5791_p13 }
  0xbe   : > { %5799 = shalt.err (!%p5796_p1)
}
  0xbf   : > { %s5800_s28 = scalar_lea.vmem %s474_s27, 4096  ;;  %p5808_p9 = scmp.lt.s32.totalorder %s474_s27, %s474_s27 }
  0xc0   : > { %p5801_p4 = scmp.ne.s32.totalorder %s474_s27, %s5800_s28  ;;  %p5809_p10 = scmp.lt.s32.totalorder %s5800_s28, %s5800_s28 }
  0xc2   : > { %p5803_p6 = pnand %p5801_p4, %p5970_p7  ;;  %p5810_p11 = por %p5809_p10, %p5808_p9 }
  0xc4   : > { %p5804_p8 = pneg %p5803_p6 }
  0xc6   : > { %p5811_p12 = pnand %p5810_p11, %p5804_p8 }
  0xc8   : > { %5814 = shalt.err (!%p5811_p12)
}
  0xc9   : > { %s5853_s15 = smov 64   ;;  %s5854_s14 = smov 4  }
  0xca   : > { %4927 = dma.hbm_to_vmem [thread:$0]  (!%p5954_p5), %s6306_s11, 4096, %s474_s27, [#allocation14], %s5853_s15, %s5853_s15, %s5854_s14  }
  0xcb   : > { %p6322_p2 = scmp.ne.s32.totalorder %s6317_s17, 0 }
  0xcc   : > { %p6323_p3 = scmp.eq.s32.totalorder (!%p6322_p2), %s5937_s16, 0 }
  0xcd   : > { %500 = sbr.rel (%p6322_p2) target bundleno = 1439 (0x59f), region = 72 }
  0xd4   : > { %5820 = dma.done.wait (%p6323_p3), [#allocation3], 768   ;;  %p6324_p7 = pmov %p6323_p3 }
  0xd5   : > { %p6325_p13 = pmov %p6323_p3 }
  0xd6   : > { %5822 = vsyncadd (%p6324_p7), [#allocation3], 4294966528 }
  0xd7   : > { %5824 = dma.done.wait (%p6325_p13), [#allocation5], 12320   ;;  %p6326_p0 = pmov %p6323_p3 }
  0xd9   : > { %5826 = vsyncadd (%p6326_p0), [#allocation5], 4294954976  ;;  %p6327_p1 = pmov %p6326_p0 }
  0xda   : > { %p6328_p5 = pmov %p6326_p0 }
  0xdb   : > { %5828 = dma.done.wait (%p6327_p1), [#allocation8], 12320  }
  0xdc   : > { %5830 = vsyncadd (%p6328_p5), [#allocation8], 4294954976  ;;  %p6329_p4 = pmov %p6326_p0 }
  0xdd   : > { %p6330_p6 = pmov %p6326_p0 }
  0xde   : > { %5832 = dma.done.wait (%p6329_p4), [#allocation11], 24576  }
  0xdf   : > { %5834 = vsyncadd (%p6330_p6), [#allocation11], 4294942720  ;;  %p6331_p8 = pmov %p6326_p0 }
  0xe0   : > { %p6332_p9 = pmov %p6326_p0 }
  0xe1   : > { %5836 = dma.done.wait (%p6331_p8), [#allocation14], 4096  }
  0xe2   : > { %5838 = vsyncadd (%p6332_p9), [#allocation14], 4294963200  ;;  %p579_p10 = scmp.lt.s32.totalorder %s5937_s16, 1  ;;  %v5855_v0 = vmov 0   ;;  %v4965_v1 = vld [vmem:[#allocation2 + $0x4] ss:$8 sps:$4 sm:$0xff]   ;;  %v801_v53 = vlaneseq }
  0xe3   : > { %729 = vmatprep.mubr.bf16.mxu0 %v5855_v0  ;;  %673 = vmatprep.mubr.bf16.mxu1 %v5855_v0  ;;  %v4967_v2 = vld [vmem:[#allocation2] ss:$8 sps:$4 sm:$0xff]   ;;  %v4970_v3 = vld [vmem:[#allocation2 + $0x24] ss:$8 sps:$4 sm:$0xff]   ;;  %vm618_vm0 = vsmask.f32 256 }
  0xe4   : > { %s6340_s16 = smov (!%p579_p10, %s5937_s16), 1  ;;  %697 = vmatprep.subr.bf16.mxu0 %v4965_v1  ;;  %vm617_vm1 = vcmask 1040384   ;;  %v4972_v5 = vld [vmem:[#allocation2 + $0x14] ss:$8 sps:$4 sm:$0xff]   ;;  %v4974_v6 = vld [vmem:[#allocation2 + $0x10] ss:$8 sps:$4 sm:$0xff]  }
  0xe5   : > { %s4766_s17 = sshll.u32 %s6340_s16, 3  ;;  %698 = vmatpush1.bf16.msra.mxu0 %v4967_v2  ;;  %641 = vmatprep.subr.bf16.mxu1 %v4972_v5  ;;  %v4977_v9 = vld [vmem:[#allocation6 + $0x4] ss:$8 sps:$4 sm:$0xff]   ;;  %vm6173_vm2 = vmand %vm617_vm1, %vm618_vm0  ;;  %v4975_v12 = vld [vmem:[#allocation6] ss:$8 sps:$4 sm:$0xff]   ;;  %vm638_vm3 = vcmask 130048  }
  0xe6   : > { %s583_s27 = scalar_lea.vmem %s6295_s0, %s4766_s17  ;;  %753 = vmatprep.subr.bf16.mxu0 %v4970_v3  ;;  %642 = vmatpush1.bf16.msra.mxu1 %v4974_v6  ;;  %v4980_v13 = vld [vmem:[#allocation6 + $0x14] ss:$8 sps:$4 sm:$0xff]   ;;  %v4978_v17 = vld [vmem:[#allocation6 + $0x10] ss:$8 sps:$4 sm:$0xff]   ;;  %v4983_v18 = vld [vmem:[#allocation6 + $0x24] ss:$8 sps:$4 sm:$0xff]  }
  0xe7   : > { %v4971_v4 = vld [vmem:[%s583_s27] sm:$0xff]   ;;  %1435 = vmatprep.subr.bf16.mxu1 %v4977_v9  ;;  %vm624_vm4 = vcmask 1047552   ;;  %vm625_vm5 = vsmask.f32 7424  ;;  %v4981_v20 = vld [vmem:[#allocation6 + $0x20] ss:$8 sps:$4 sm:$0xff]  }
  0xe8   : > { %v610_v7 = vshrl.u32 %v4971_v4, 16  ;;  %v613_v8 = vshll.u32 %v4971_v4, 16  ;;  %v4968_v14 = vld [vmem:[#allocation2 + $0x20] ss:$8 sps:$4 sm:$0xff]   ;;  %vm6181_vm6 = vmand %vm624_vm4, %vm625_vm5  ;;  %v4987_v27 = vld [vmem:[#allocation6 + $0x40] ss:$8 sps:$4 sm:$0xff]  }
  0xe9   : > { %4336 = vmatmul.mubr.msk.bf16.vlgmr.msra.gmra.mrb[0].mxu1 %vm638_vm3, %v4971_v4  ;;  %v4986_v21 = vld [vmem:[#allocation6 + $0x34] ss:$8 sps:$4 sm:$0xff]   ;;  %v4984_v24 = vld [vmem:[#allocation6 + $0x30] ss:$8 sps:$4 sm:$0xff]   ;;  %v4989_v25 = vld [vmem:[#allocation6 + $0x44] ss:$8 sps:$4 sm:$0xff]  }
  0xea   : > { %v612_v10 = vrot.slane %v610_v7, 7  ;;  %1436 = vmatpush1.bf16.msra.mxu1 %v4975_v12  ;;  %v621_v19 = vrot.slane %v613_v8, 1  ;;  %v4992_v28 = vld [vmem:[#allocation6 + $0x54] ss:$8 sps:$4 sm:$0xff]   ;;  %v4990_v29 = vld [vmem:[#allocation6 + $0x50] ss:$8 sps:$4 sm:$0xff]  }
  0xeb   : > { %1437 = vmatprep.subr.bf16.mxu1 %v4980_v13  ;;  %v4995_v30 = vld [vmem:[#allocation6 + $0x64] ss:$8 sps:$4 sm:$0xff]   ;;  %v4993_v31 = vld [vmem:[#allocation6 + $0x60] ss:$8 sps:$4 sm:$0xff]   ;;  %v4998_v32 = vld [vmem:[#allocation6 + $0x74] ss:$8 sps:$4 sm:$0xff]  }
  0xec   : > { %v615_v15 = vor.u32 %v613_v8, %v612_v10  ;;  %v622_v22 = vor.u32 %v621_v19, %v610_v7  ;;  %v4996_v33 = vld [vmem:[#allocation6 + $0x70] ss:$8 sps:$4 sm:$0xff]   ;;  %v5001_v34 = vld [vmem:[#allocation6 + $0x84] ss:$8 sps:$4 sm:$0xff]   ;;  %v4999_v35 = vld [vmem:[#allocation6 + $0x80] ss:$8 sps:$4 sm:$0xff]  }
  0xed   : > { %v5004_v36 = vld [vmem:[#allocation6 + $0x94] ss:$8 sps:$4 sm:$0xff]   ;;  %v5002_v37 = vld [vmem:[#allocation6 + $0x90] ss:$8 sps:$4 sm:$0xff]   ;;  %v5007_v38 = vld [vmem:[#allocation6 + $0xa4] ss:$8 sps:$4 sm:$0xff]  }
  0xee   : > { %v620_v16 = vsel %vm6173_vm2, 0, %v615_v15  ;;  %1438 = vmatpush1.bf16.msra.mxu1 %v4978_v17  ;;  %v627_v26 = vsel %vm6181_vm6, %v622_v22, 0  ;;  %v5005_v39 = vld [vmem:[#allocation6 + $0xa0] ss:$8 sps:$4 sm:$0xff]   ;;  %v5008_v40 = vld [vmem:[#allocation6 + $0xb0] ss:$8 sps:$4 sm:$0xff]  }
  0xef   : > { %4339 = vmatmul.mubr.msk.bf16.vlgmr.msra.gmra.mrb[0].mxu0 %vm638_vm3, %v620_v16  ;;  %1439 = vmatprep.subr.bf16.mxu1 %v4983_v18  ;;  %v5010_v41 = vld [vmem:[#allocation6 + $0xb4] ss:$8 sps:$4 sm:$0xff]   ;;  %v5013_v42 = vld [vmem:[#allocation6 + $0xc4] ss:$8 sps:$4 sm:$0xff]   ;;  %v5011_v43 = vld [vmem:[#allocation6 + $0xc0] ss:$8 sps:$4 sm:$0xff]  }
  0xf0   : > { %754 = vmatpush1.bf16.msra.mxu0 %v4968_v14  ;;  %785 = vmatprep.mubr.bf16.mxu0 %v5855_v0  ;;  %v5016_v44 = vld [vmem:[#allocation6 + $0xd4] ss:$8 sps:$4 sm:$0xff]   ;;  %v5014_v45 = vld [vmem:[#allocation6 + $0xd0] ss:$8 sps:$4 sm:$0xff]   ;;  %v5019_v46 = vld [vmem:[#allocation6 + $0xe4] ss:$8 sps:$4 sm:$0xff]  }
  0xf1   : > { %v5017_v47 = vld [vmem:[#allocation6 + $0xe0] ss:$8 sps:$4 sm:$0xff]   ;;  %v5020_v48 = vld [vmem:[#allocation6 + $0xf0] ss:$8 sps:$4 sm:$0xff]   ;;  %v5022_v49 = vld [vmem:[#allocation6 + $0xf4] ss:$8 sps:$4 sm:$0xff]  }
  0xf2   : > { %1440 = vmatpush1.bf16.msra.mxu1 %v4981_v20  ;;  %v5025_v50 = vld [vmem:[#allocation6 + $0x104] ss:$8 sps:$4 sm:$0xff]   ;;  %v802_v56 = vshrl.u32 %v801_v53, 7  ;;  %v603_v58 = vld [vmem:[#allocation4] sm:$0x3]  ;;  %s4767_s19 = sshll.u32 %s6340_s16, 4 }
  0xf3   : > { %1441 = vmatprep.subr.bf16.mxu1 %v4986_v21  ;;  %v5151_v53 = vld [vmem:[#allocation9 + $0x54] ss:$8 sps:$4 sm:$0xff]   ;;  %v5227_v11 = vld [vmem:[#allocation9 + $0x120] ss:$8 sps:$4 sm:$0xff]   ;;  %v5421_v23 = vld [vmem:[#allocation12 + $0x44] ss:$8 sps:$4 sm:$0xff]   ;;  %s588_s28 = scalar_lea.vmem %s6308_s13, %s4767_s19 }
  0xf4   : > { %v6188_v57 = vsub.s32 0, %v802_v56  ;;  %v6190_v59 = vsub.s32 1, %v802_v56  ;;  %v5041_v56 = vld [vmem:[#allocation6 + $0x160] ss:$8 sps:$4 sm:$0xff]   ;;  %s6337_s17 = sld [smem:[#allocation23_spill]] }
  0xf6   : > { %1442 = vmatpush1.bf16.msra.mxu1 %v4984_v24  ;;  %v804_v60 = vrot.slane %v603_v58, %v6188_v57  ;;  %v808_v62 = vrot.slane %v603_v58, %v6190_v59  ;;  %v5157_v58 = vld [vmem:[#allocation9 + $0x64] ss:$8 sps:$4 sm:$0xff]  }
  0xf7   : > { %1443 = vmatprep.subr.bf16.mxu1 %v4989_v25 }
  0xfa   : > { %1444 = vmatpush1.bf16.msra.mxu1 %v4987_v27  ;;  %s593_s20 = scalar_lea.vmem %s6337_s17, %s4767_s19 }
  0xfb   : > { %4342 = vmatmul.mubr.msk.bf16.vlgmr.msra.gmra.mrb[0].mxu0 %vm638_vm3, %v627_v26  ;;  %1445 = vmatprep.subr.bf16.mxu1 %v4992_v28 }
  0xfe   : > { %1446 = vmatpush1.bf16.msra.mxu1 %v4990_v29 }
  0xff   : > { %1447 = vmatprep.subr.bf16.mxu1 %v4995_v30  ;;  %v5023_v30 = vld [vmem:[#allocation6 + $0x100] ss:$8 sps:$4 sm:$0xff]  }
 0x102   : > { %1448 = vmatpush1.bf16.msra.mxu1 %v4993_v31 }
 0x103   : > { %1449 = vmatprep.subr.bf16.mxu1 %v4998_v32  ;;  %v5028_v32 = vld [vmem:[#allocation6 + $0x114] ss:$8 sps:$4 sm:$0xff]  }
 0x106   : > { %1450 = vmatpush1.bf16.msra.mxu1 %v4996_v33 }
 0x107   : > { %1451 = vmatprep.subr.bf16.mxu1 %v5001_v34  ;;  %v5119_v34 = vld [vmem:[#allocation9] ss:$8 sps:$4 sm:$0xff]  }
 0x10a   : > { %1452 = vmatpush1.bf16.msra.mxu1 %v4999_v35  ;;  %v5121_v35 = vld [vmem:[#allocation9 + $0x4] ss:$8 sps:$4 sm:$0xff]  }
 0x10b   : > { %1453 = vmatprep.subr.bf16.mxu1 %v5004_v36  ;;  %v5026_v36 = vld [vmem:[#allocation6 + $0x110] ss:$8 sps:$4 sm:$0xff]   ;;  %2184 = vmatprep.subr.bf16.mxu0 %v5121_v35  ;;  %v5079_v35 = vld [vmem:[#allocation6 + $0x224] ss:$8 sps:$4 sm:$0xff]  }
 0x10c   : > { %2185 = vmatpush1.bf16.msra.mxu0 %v5119_v34  ;;  %v5074_v34 = vld [vmem:[#allocation6 + $0x210] ss:$8 sps:$4 sm:$0xff]  }
 0x10e   : > { %1454 = vmatpush1.bf16.msra.mxu1 %v5002_v37  ;;  %v5127_v37 = vld [vmem:[#allocation9 + $0x14] ss:$8 sps:$4 sm:$0xff]  }
 0x10f   : > { %1455 = vmatprep.subr.bf16.mxu1 %v5007_v38  ;;  %v5031_v38 = vld [vmem:[#allocation6 + $0x124] ss:$8 sps:$4 sm:$0xff]   ;;  %2186 = vmatprep.subr.bf16.mxu0 %v5127_v37  ;;  %v5082_v37 = vld [vmem:[#allocation6 + $0x234] ss:$8 sps:$4 sm:$0xff]  }
 0x112   : > { %1456 = vmatpush1.bf16.msra.mxu1 %v5005_v39  ;;  %v5125_v39 = vld [vmem:[#allocation9 + $0x10] ss:$8 sps:$4 sm:$0xff]  }
 0x113   : > { %1457 = vmatprep.subr.bf16.mxu1 %v5010_v41  ;;  %v5133_v41 = vld [vmem:[#allocation9 + $0x24] ss:$8 sps:$4 sm:$0xff]   ;;  %2187 = vmatpush1.bf16.msra.mxu0 %v5125_v39 }
 0x114   : > { %2188 = vmatprep.subr.bf16.mxu0 %v5133_v41  ;;  %v5085_v39 = vld [vmem:[#allocation6 + $0x244] ss:$8 sps:$4 sm:$0xff]   ;;  %v5086_v41 = vld [vmem:[#allocation6 + $0x250] ss:$8 sps:$4 sm:$0xff]  }
 0x116   : > { %1458 = vmatpush1.bf16.msra.mxu1 %v5008_v40  ;;  %v5029_v40 = vld [vmem:[#allocation6 + $0x120] ss:$8 sps:$4 sm:$0xff]  }
 0x117   : > { %1459 = vmatprep.subr.bf16.mxu1 %v5013_v42  ;;  %v5034_v42 = vld [vmem:[#allocation6 + $0x134] ss:$8 sps:$4 sm:$0xff]  }
 0x11a   : > { %1460 = vmatpush1.bf16.msra.mxu1 %v5011_v43  ;;  %v5131_v43 = vld [vmem:[#allocation9 + $0x20] ss:$8 sps:$4 sm:$0xff]  }
 0x11b   : > { %1461 = vmatprep.subr.bf16.mxu1 %v5016_v44  ;;  %v5032_v44 = vld [vmem:[#allocation6 + $0x130] ss:$8 sps:$4 sm:$0xff]   ;;  %2189 = vmatpush1.bf16.msra.mxu0 %v5131_v43  ;;  %v5094_v43 = vld [vmem:[#allocation6 + $0x274] ss:$8 sps:$4 sm:$0xff]  }
 0x11e   : > { %1462 = vmatpush1.bf16.msra.mxu1 %v5014_v45  ;;  %v5139_v45 = vld [vmem:[#allocation9 + $0x34] ss:$8 sps:$4 sm:$0xff]  }
 0x11f   : > { %1463 = vmatprep.subr.bf16.mxu1 %v5019_v46  ;;  %v5037_v46 = vld [vmem:[#allocation6 + $0x144] ss:$8 sps:$4 sm:$0xff]   ;;  %2190 = vmatprep.subr.bf16.mxu0 %v5139_v45 }
 0x120   : > { %v5097_v45 = vld [vmem:[#allocation6 + $0x284] ss:$8 sps:$4 sm:$0xff]  }
 0x122   : > { %1464 = vmatpush1.bf16.msra.mxu1 %v5017_v47  ;;  %v5137_v47 = vld [vmem:[#allocation9 + $0x30] ss:$8 sps:$4 sm:$0xff]  }
 0x123   : > { %1465 = vmatprep.subr.bf16.mxu1 %v5022_v49  ;;  %v5145_v49 = vld [vmem:[#allocation9 + $0x44] ss:$8 sps:$4 sm:$0xff]   ;;  %2191 = vmatpush1.bf16.msra.mxu0 %v5137_v47  ;;  %v5100_v47 = vld [vmem:[#allocation6 + $0x294] ss:$8 sps:$4 sm:$0xff]  }
 0x124   : > { %2192 = vmatprep.subr.bf16.mxu0 %v5145_v49  ;;  %v5103_v49 = vld [vmem:[#allocation6 + $0x2a4] ss:$8 sps:$4 sm:$0xff]  }
 0x126   : > { %1466 = vmatpush1.bf16.msra.mxu1 %v5020_v48  ;;  %v5035_v48 = vld [vmem:[#allocation6 + $0x140] ss:$8 sps:$4 sm:$0xff]  }
 0x127   : > { %1478 = vmatprep.subr.bf16.mxu1 %v5025_v50  ;;  %v5040_v50 = vld [vmem:[#allocation6 + $0x154] ss:$8 sps:$4 sm:$0xff]  }
 0x1bc   : > { %v675_v51 = vpop.f32.mrb[0].mxu1 }
 0x1bd   : > { %v677_v52 = vpop.f32.mrb[1].mxu1 }
 0x1be   : > { %v679_v54 = vpop.f32.mrb[2].mxu1 }
 0x1bf   : > { %v681_v55 = vpop.f32.mrb[3].mxu1 }
 0x1ce   : > { %v787_v61 = vpop.f32.mrb[0].mxu0 }
 0x1cf   : > { %v4815_v63 = vadd.f32 %v787_v61, %v675_v51  ;;  %v789_v0 = vpop.f32.mrb[1].mxu0  ;;  %v5143_v51 = vld [vmem:[#allocation9 + $0x40] ss:$8 sps:$4 sm:$0xff]  }
 0x1d0   : > { %v4816_v1 = vadd.f32 %v789_v0, %v677_v52  ;;  %v791_v2 = vpop.f32.mrb[2].mxu0  ;;  %v5038_v52 = vld [vmem:[#allocation6 + $0x150] ss:$8 sps:$4 sm:$0xff]   ;;  %2193 = vmatpush1.bf16.msra.mxu0 %v5143_v51  ;;  %v5155_v61 = vld [vmem:[#allocation9 + $0x60] ss:$8 sps:$4 sm:$0xff]  }
 0x1d1   : > { %v811_v3 = vadd.f32 %v4815_v63, %v804_v60  ;;  %v4817_v4 = vadd.f32 %v791_v2, %v679_v54  ;;  %v793_v5 = vpop.f32.mrb[3].mxu0  ;;  %v5043_v54 = vld [vmem:[#allocation6 + $0x164] ss:$8 sps:$4 sm:$0xff]   ;;  %2194 = vmatprep.subr.bf16.mxu0 %v5151_v53  ;;  %v5163_v63 = vld [vmem:[#allocation9 + $0x74] ss:$8 sps:$4 sm:$0xff]  }
 0x1d2   : > { %v812_v6 = vadd.f32 %v4816_v1, %v808_v62  ;;  %v4818_v7 = vadd.f32 %v793_v5, %v681_v55  ;;  %v5149_v55 = vld [vmem:[#allocation9 + $0x50] ss:$8 sps:$4 sm:$0xff]   ;;  %v5049_v0 = vld [vmem:[#allocation6 + $0x184] ss:$8 sps:$4 sm:$0xff]   ;;  %v5047_v2 = vld [vmem:[#allocation6 + $0x180] ss:$8 sps:$4 sm:$0xff]  }
 0x1d3   : > { %v813_v8 = vadd.f32 %v4817_v4, %v804_v60  ;;  %v815_v10 = vmax.f32 %v811_v3, 0.0  ;;  %v5046_v60 = vld [vmem:[#allocation6 + $0x174] ss:$8 sps:$4 sm:$0xff]   ;;  %v5169_v3 = vld [vmem:[#allocation9 + $0x84] ss:$8 sps:$4 sm:$0xff]  }
 0x1d4   : > { %v814_v9 = vadd.f32 %v4818_v7, %v808_v62  ;;  %v816_v13 = vmax.f32 %v812_v6, 0.0  ;;  %2195 = vmatpush1.bf16.msra.mxu0 %v5149_v55  ;;  %v5044_v62 = vld [vmem:[#allocation6 + $0x170] ss:$8 sps:$4 sm:$0xff]   ;;  %v5052_v4 = vld [vmem:[#allocation6 + $0x194] ss:$8 sps:$4 sm:$0xff]  }
 0x1d5   : > { %v817_v12 = vmax.f32 %v813_v8, 0.0  ;;  %2196 = vmatprep.subr.bf16.mxu0 %v5157_v58  ;;  %v5161_v1 = vld [vmem:[#allocation9 + $0x70] ss:$8 sps:$4 sm:$0xff]   ;;  %v5167_v5 = vld [vmem:[#allocation9 + $0x80] ss:$8 sps:$4 sm:$0xff]  }
 0x1d6   : > { %v818_v14 = vmax.f32 %v814_v9, 0.0  ;;  %v5050_v6 = vld [vmem:[#allocation6 + $0x190] ss:$8 sps:$4 sm:$0xff]   ;;  %v5055_v8 = vld [vmem:[#allocation6 + $0x1a4] ss:$8 sps:$4 sm:$0xff]  }
 0x1d7   : > { %v6194_v15 = vpack.c.bf16 %v817_v12, %v815_v10  ;;  %v5175_v7 = vld [vmem:[#allocation9 + $0x94] ss:$8 sps:$4 sm:$0xff]   ;;  %v5173_v9 = vld [vmem:[#allocation9 + $0x90] ss:$8 sps:$4 sm:$0xff]   ;;  %v5181_v12 = vld [vmem:[#allocation9 + $0xa4] ss:$8 sps:$4 sm:$0xff]  }
 0x1d8   : > { %v820_v16 = vpack.c.bf16 %v818_v14, %v816_v13  ;;  %2197 = vmatpush1.bf16.msra.mxu0 %v5155_v61  ;;  %v5053_v10 = vld [vmem:[#allocation6 + $0x1a0] ss:$8 sps:$4 sm:$0xff]   ;;  %v5058_v13 = vld [vmem:[#allocation6 + $0x1b4] ss:$8 sps:$4 sm:$0xff]   ;;  %v5109_v53 = vld [vmem:[#allocation6 + $0x2c4] ss:$8 sps:$4 sm:$0xff]  }
 0x1d9   : > { %v919_v17 = vshrl.u32 %v6194_v15, 16  ;;  %v922_v18 = vshll.u32 %v6194_v15, 16  ;;  %2198 = vmatprep.subr.bf16.mxu0 %v5163_v63  ;;  %v5179_v14 = vld [vmem:[#allocation9 + $0xa0] ss:$8 sps:$4 sm:$0xff]   ;;  %v5106_v51 = vld [vmem:[#allocation6 + $0x2b4] ss:$8 sps:$4 sm:$0xff]  }
 0x1da   : > { %v926_v19 = vshrl.u32 %v820_v16, 16  ;;  %v929_v20 = vshll.u32 %v820_v16, 16  ;;  %v5112_v55 = vld [vmem:[#allocation6 + $0x2d4] ss:$8 sps:$4 sm:$0xff]   ;;  %v5115_v58 = vld [vmem:[#allocation6 + $0x2e4] ss:$8 sps:$4 sm:$0xff]  }
 0x1db   : > { %v921_v21 = vrot.slane %v919_v17, 7  ;;  %v936_v22 = vrot.slane %v922_v18, 1  ;;  %v5118_v61 = vld [vmem:[#allocation6 + $0x2f4] ss:$8 sps:$4 sm:$0xff]   ;;  %v5124_v63 = vld [vmem:[#allocation10 + $0x4] ss:$8 sps:$4 sm:$0xff]  }
 0x1dc   : > { %v928_v24 = vrot.slane %v926_v19, 7  ;;  %v938_v25 = vrot.slane %v929_v20, 1  ;;  %2199 = vmatpush1.bf16.msra.mxu0 %v5161_v1  ;;  %v5130_v1 = vld [vmem:[#allocation10 + $0x14] ss:$8 sps:$4 sm:$0xff]  }
 0x1dd   : > { %v924_v26 = vor.u32 %v922_v18, %v921_v21  ;;  %v6198_v27 = vor.u32 %v936_v22, %v919_v17  ;;  %2200 = vmatprep.subr.bf16.mxu0 %v5169_v3  ;;  %v5187_v17 = vld [vmem:[#allocation9 + $0xb4] ss:$8 sps:$4 sm:$0xff]   ;;  %v5061_v18 = vld [vmem:[#allocation6 + $0x1c4] ss:$8 sps:$4 sm:$0xff]   ;;  %v5128_v3 = vld [vmem:[#allocation10 + $0x10] ss:$8 sps:$4 sm:$0xff]  }
 0x1de   : > { %v931_v28 = vor.u32 %v929_v20, %v928_v24  ;;  %v6200_v29 = vor.u32 %v938_v25, %v926_v19  ;;  %v5185_v19 = vld [vmem:[#allocation9 + $0xb0] ss:$8 sps:$4 sm:$0xff]   ;;  %v5059_v20 = vld [vmem:[#allocation6 + $0x1c0] ss:$8 sps:$4 sm:$0xff]   ;;  %v5067_v24 = vld [vmem:[#allocation6 + $0x1e4] ss:$8 sps:$4 sm:$0xff]  }
 0x1df   : > { %v934_v33 = vsel %vm6173_vm2, 0, %v924_v26  ;;  %v5064_v21 = vld [vmem:[#allocation6 + $0x1d4] ss:$8 sps:$4 sm:$0xff]   ;;  %v5062_v22 = vld [vmem:[#allocation6 + $0x1d0] ss:$8 sps:$4 sm:$0xff]  }
 0x1e0   : > { %v935_v31 = vsel %vm6173_vm2, 0, %v931_v28  ;;  %2201 = vmatpush1.bf16.msra.mxu0 %v5167_v5  ;;  %v5065_v25 = vld [vmem:[#allocation6 + $0x1e0] ss:$8 sps:$4 sm:$0xff]   ;;  %v5070_v26 = vld [vmem:[#allocation6 + $0x1f4] ss:$8 sps:$4 sm:$0xff]  }
 0x1e1   : > { %1467 = vmatprep.mubr.bf16.mxu1 %v935_v31  ;;  %2202 = vmatprep.subr.bf16.mxu0 %v5175_v7  ;;  %v5068_v28 = vld [vmem:[#allocation6 + $0x1f0] ss:$8 sps:$4 sm:$0xff]   ;;  %v5071_v31 = vld [vmem:[#allocation6 + $0x200] ss:$8 sps:$4 sm:$0xff]  }
 0x1e2   : > { %1468 = vmatmul.mubr.bf16.vlgmr.msra.gmra.mrb[4].mxu1 %v934_v33  ;;  %v943_v33 = vsel %vm6181_vm6, %v6200_v29, 0  ;;  %v5091_v29 = vld [vmem:[#allocation6 + $0x264] ss:$8 sps:$4 sm:$0xff]   ;;  %v5140_v7 = vld [vmem:[#allocation10 + $0x30] ss:$8 sps:$4 sm:$0xff]  }
 0x1e3   : > { %1479 = vmatpush1.bf16.msra.mxu1 %v5023_v30  ;;  %1510 = vmatprep.mubr.bf16.mxu1 %v820_v16  ;;  %v5056_v16 = vld [vmem:[#allocation6 + $0x1b0] ss:$8 sps:$4 sm:$0xff]   ;;  %v5073_v30 = vld [vmem:[#allocation6 + $0x204] ss:$8 sps:$4 sm:$0xff]  }
 0x1e4   : > { %1480 = vmatprep.subr.bf16.mxu1 %v5028_v32  ;;  %2203 = vmatpush1.bf16.msra.mxu0 %v5173_v9  ;;  %v5076_v32 = vld [vmem:[#allocation6 + $0x214] ss:$8 sps:$4 sm:$0xff]   ;;  %v5134_v5 = vld [vmem:[#allocation10 + $0x20] ss:$8 sps:$4 sm:$0xff]  }
 0x1e5   : > { %2204 = vmatprep.subr.bf16.mxu0 %v5181_v12  ;;  %v5146_v9 = vld [vmem:[#allocation10 + $0x40] ss:$8 sps:$4 sm:$0xff]   ;;  %v5152_v12 = vld [vmem:[#allocation10 + $0x50] ss:$8 sps:$4 sm:$0xff]  }
 0x1e7   : > { %1481 = vmatpush1.bf16.msra.mxu1 %v5026_v36  ;;  %v5077_v36 = vld [vmem:[#allocation6 + $0x220] ss:$8 sps:$4 sm:$0xff]  }
 0x1e8   : > { %1482 = vmatprep.subr.bf16.mxu1 %v5031_v38  ;;  %2205 = vmatpush1.bf16.msra.mxu0 %v5179_v14  ;;  %v5080_v38 = vld [vmem:[#allocation6 + $0x230] ss:$8 sps:$4 sm:$0xff]  }
 0x1e9   : > { %2206 = vmatprep.subr.bf16.mxu0 %v5187_v17  ;;  %v5166_v14 = vld [vmem:[#allocation10 + $0x74] ss:$8 sps:$4 sm:$0xff]   ;;  %v5172_v17 = vld [vmem:[#allocation10 + $0x84] ss:$8 sps:$4 sm:$0xff]  }
 0x1eb   : > { %1483 = vmatpush1.bf16.msra.mxu1 %v5029_v40  ;;  %v5083_v40 = vld [vmem:[#allocation6 + $0x240] ss:$8 sps:$4 sm:$0xff]  }
 0x1ec   : > { %1484 = vmatprep.subr.bf16.mxu1 %v5034_v42  ;;  %2207 = vmatpush1.bf16.msra.mxu0 %v5185_v19  ;;  %v5089_v42 = vld [vmem:[#allocation6 + $0x260] ss:$8 sps:$4 sm:$0xff]  }
 0x1ed   : > { %v5178_v19 = vld [vmem:[#allocation10 + $0x94] ss:$8 sps:$4 sm:$0xff]  }
 0x1ef   : > { %1485 = vmatpush1.bf16.msra.mxu1 %v5032_v44  ;;  %v5092_v44 = vld [vmem:[#allocation6 + $0x270] ss:$8 sps:$4 sm:$0xff]  }
 0x1f0   : > { %1486 = vmatprep.subr.bf16.mxu1 %v5037_v46  ;;  %v5095_v46 = vld [vmem:[#allocation6 + $0x280] ss:$8 sps:$4 sm:$0xff]  }
 0x1f3   : > { %1487 = vmatpush1.bf16.msra.mxu1 %v5035_v48  ;;  %v5098_v48 = vld [vmem:[#allocation6 + $0x290] ss:$8 sps:$4 sm:$0xff]  }
 0x1f4   : > { %1488 = vmatprep.subr.bf16.mxu1 %v5040_v50  ;;  %v5101_v50 = vld [vmem:[#allocation6 + $0x2a0] ss:$8 sps:$4 sm:$0xff]  }
 0x1f7   : > { %1489 = vmatpush1.bf16.msra.mxu1 %v5038_v52  ;;  %v5104_v52 = vld [vmem:[#allocation6 + $0x2b0] ss:$8 sps:$4 sm:$0xff]  }
 0x1f8   : > { %1490 = vmatprep.subr.bf16.mxu1 %v5043_v54  ;;  %v5107_v54 = vld [vmem:[#allocation6 + $0x2c0] ss:$8 sps:$4 sm:$0xff]  }
 0x1fb   : > { %1491 = vmatpush1.bf16.msra.mxu1 %v5041_v56  ;;  %v5110_v56 = vld [vmem:[#allocation6 + $0x2d0] ss:$8 sps:$4 sm:$0xff]  }
 0x1fc   : > { %1492 = vmatprep.subr.bf16.mxu1 %v5046_v60  ;;  %v5113_v60 = vld [vmem:[#allocation6 + $0x2e0] ss:$8 sps:$4 sm:$0xff]  }
 0x1ff   : > { %1493 = vmatpush1.bf16.msra.mxu1 %v5044_v62  ;;  %v5116_v62 = vld [vmem:[#allocation6 + $0x2f0] ss:$8 sps:$4 sm:$0xff]  }
 0x200   : > { %1494 = vmatprep.subr.bf16.mxu1 %v5049_v0  ;;  %v5122_v0 = vld [vmem:[#allocation10] ss:$8 sps:$4 sm:$0xff]  }
 0x203   : > { %1495 = vmatpush1.bf16.msra.mxu1 %v5047_v2  ;;  %v942_v2 = vsel %vm6181_vm6, %v6198_v27, 0  ;;  %v5160_v27 = vld [vmem:[#allocation10 + $0x64] ss:$8 sps:$4 sm:$0xff]  }
 0x204   : > { %1496 = vmatprep.subr.bf16.mxu1 %v5052_v4  ;;  %v5136_v4 = vld [vmem:[#allocation10 + $0x24] ss:$8 sps:$4 sm:$0xff]  }
 0x207   : > { %1497 = vmatpush1.bf16.msra.mxu1 %v5050_v6  ;;  %v5142_v6 = vld [vmem:[#allocation10 + $0x34] ss:$8 sps:$4 sm:$0xff]  }
 0x208   : > { %1498 = vmatprep.subr.bf16.mxu1 %v5055_v8  ;;  %v5148_v8 = vld [vmem:[#allocation10 + $0x44] ss:$8 sps:$4 sm:$0xff]  }
 0x20b   : > { %1499 = vmatpush1.bf16.msra.mxu1 %v5053_v10  ;;  %v5154_v10 = vld [vmem:[#allocation10 + $0x54] ss:$8 sps:$4 sm:$0xff]  }
 0x20c   : > { %1500 = vmatprep.subr.bf16.mxu1 %v5058_v13  ;;  %v5158_v13 = vld [vmem:[#allocation10 + $0x60] ss:$8 sps:$4 sm:$0xff]  }
 0x20f   : > { %1501 = vmatpush1.bf16.msra.mxu1 %v5056_v16  ;;  %v5164_v16 = vld [vmem:[#allocation10 + $0x70] ss:$8 sps:$4 sm:$0xff]  }
 0x210   : > { %1502 = vmatprep.subr.bf16.mxu1 %v5061_v18  ;;  %v5170_v18 = vld [vmem:[#allocation10 + $0x80] ss:$8 sps:$4 sm:$0xff]  }
 0x213   : > { %1503 = vmatpush1.bf16.msra.mxu1 %v5059_v20  ;;  %v5176_v20 = vld [vmem:[#allocation10 + $0x90] ss:$8 sps:$4 sm:$0xff]  }
 0x214   : > { %1504 = vmatprep.subr.bf16.mxu1 %v5064_v21  ;;  %v5184_v21 = vld [vmem:[#allocation10 + $0xa4] ss:$8 sps:$4 sm:$0xff]  }
 0x217   : > { %1505 = vmatpush1.bf16.msra.mxu1 %v5062_v22  ;;  %v5182_v22 = vld [vmem:[#allocation10 + $0xa0] ss:$8 sps:$4 sm:$0xff]  }
 0x218   : > { %1506 = vmatprep.subr.bf16.mxu1 %v5067_v24  ;;  %v5190_v24 = vld [vmem:[#allocation10 + $0xb4] ss:$8 sps:$4 sm:$0xff]  }
 0x21b   : > { %1507 = vmatpush1.bf16.msra.mxu1 %v5065_v25  ;;  %v5188_v25 = vld [vmem:[#allocation10 + $0xb0] ss:$8 sps:$4 sm:$0xff]  }
 0x21c   : > { %1508 = vmatprep.subr.bf16.mxu1 %v5070_v26  ;;  %v5193_v26 = vld [vmem:[#allocation9 + $0xc4] ss:$8 sps:$4 sm:$0xff]  }
 0x21d   : > { %2208 = vmatprep.subr.bf16.mxu0 %v5193_v26  ;;  %v5233_v26 = vld [vmem:[#allocation9 + $0x130] ss:$8 sps:$4 sm:$0xff]  }
 0x21f   : > { %1509 = vmatpush1.bf16.msra.mxu1 %v5068_v28  ;;  %v5196_v28 = vld [vmem:[#allocation10 + $0xc4] ss:$8 sps:$4 sm:$0xff]  }
 0x220   : > { %1521 = vmatprep.subr.bf16.mxu1 %v5073_v30  ;;  %v5191_v30 = vld [vmem:[#allocation9 + $0xc0] ss:$8 sps:$4 sm:$0xff]  }
 0x221   : > { %2209 = vmatpush1.bf16.msra.mxu0 %v5191_v30  ;;  %v5241_v30 = vld [vmem:[#allocation9 + $0x144] ss:$8 sps:$4 sm:$0xff]  }
 0x222   : > { %1511 = vmatmul.mubr.bf16.vlgmr.msra.gmra.mrb[4].mxu1 %v6194_v15  ;;  %v5088_v15 = vld [vmem:[#allocation6 + $0x254] ss:$8 sps:$4 sm:$0xff]  }
 0x223   : > { %1522 = vmatpush1.bf16.msra.mxu1 %v5071_v31  ;;  %1553 = vmatprep.mubr.bf16.mxu1 %v943_v33  ;;  %v5194_v31 = vld [vmem:[#allocation10 + $0xc0] ss:$8 sps:$4 sm:$0xff]   ;;  %v5202_v33 = vld [vmem:[#allocation10 + $0xd4] ss:$8 sps:$4 sm:$0xff]  }
 0x224   : > { %1523 = vmatprep.subr.bf16.mxu1 %v5076_v32  ;;  %v5199_v32 = vld [vmem:[#allocation9 + $0xd4] ss:$8 sps:$4 sm:$0xff]  }
 0x225   : > { %2210 = vmatprep.subr.bf16.mxu0 %v5199_v32  ;;  %v5239_v32 = vld [vmem:[#allocation9 + $0x140] ss:$8 sps:$4 sm:$0xff]  }
 0x227   : > { %1524 = vmatpush1.bf16.msra.mxu1 %v5074_v34  ;;  %v5197_v34 = vld [vmem:[#allocation9 + $0xd0] ss:$8 sps:$4 sm:$0xff]  }
 0x228   : > { %1525 = vmatprep.subr.bf16.mxu1 %v5079_v35  ;;  %v5200_v35 = vld [vmem:[#allocation10 + $0xd0] ss:$8 sps:$4 sm:$0xff]   ;;  %2211 = vmatpush1.bf16.msra.mxu0 %v5197_v34  ;;  %v5247_v34 = vld [vmem:[#allocation9 + $0x154] ss:$8 sps:$4 sm:$0xff]  }
 0x22b   : > { %1526 = vmatpush1.bf16.msra.mxu1 %v5077_v36  ;;  %v5205_v36 = vld [vmem:[#allocation9 + $0xe4] ss:$8 sps:$4 sm:$0xff]  }
 0x22c   : > { %1527 = vmatprep.subr.bf16.mxu1 %v5082_v37  ;;  %v5208_v37 = vld [vmem:[#allocation10 + $0xe4] ss:$8 sps:$4 sm:$0xff]   ;;  %2212 = vmatprep.subr.bf16.mxu0 %v5205_v36  ;;  %v5245_v36 = vld [vmem:[#allocation9 + $0x150] ss:$8 sps:$4 sm:$0xff]  }
 0x22f   : > { %1528 = vmatpush1.bf16.msra.mxu1 %v5080_v38  ;;  %v5203_v38 = vld [vmem:[#allocation9 + $0xe0] ss:$8 sps:$4 sm:$0xff]  }
 0x230   : > { %1529 = vmatprep.subr.bf16.mxu1 %v5085_v39  ;;  %v5206_v39 = vld [vmem:[#allocation10 + $0xe0] ss:$8 sps:$4 sm:$0xff]   ;;  %2213 = vmatpush1.bf16.msra.mxu0 %v5203_v38  ;;  %v5253_v38 = vld [vmem:[#allocation9 + $0x164] ss:$8 sps:$4 sm:$0xff]  }
 0x233   : > { %1530 = vmatpush1.bf16.msra.mxu1 %v5083_v40  ;;  %v5211_v40 = vld [vmem:[#allocation9 + $0xf4] ss:$8 sps:$4 sm:$0xff]  }
 0x234   : > { %1531 = vmatprep.subr.bf16.mxu1 %v5088_v15  ;;  %v5214_v15 = vld [vmem:[#allocation10 + $0xf4] ss:$8 sps:$4 sm:$0xff]   ;;  %2214 = vmatprep.subr.bf16.mxu0 %v5211_v40  ;;  %v5251_v40 = vld [vmem:[#allocation9 + $0x160] ss:$8 sps:$4 sm:$0xff]  }
 0x237   : > { %1532 = vmatpush1.bf16.msra.mxu1 %v5086_v41  ;;  %v5209_v41 = vld [vmem:[#allocation9 + $0xf0] ss:$8 sps:$4 sm:$0xff]  }
 0x238   : > { %1533 = vmatprep.subr.bf16.mxu1 %v5091_v29  ;;  %v5212_v29 = vld [vmem:[#allocation10 + $0xf0] ss:$8 sps:$4 sm:$0xff]   ;;  %2215 = vmatpush1.bf16.msra.mxu0 %v5209_v41  ;;  %v5259_v41 = vld [vmem:[#allocation9 + $0x174] ss:$8 sps:$4 sm:$0xff]  }
 0x23b   : > { %1534 = vmatpush1.bf16.msra.mxu1 %v5089_v42  ;;  %v5217_v42 = vld [vmem:[#allocation9 + $0x104] ss:$8 sps:$4 sm:$0xff]  }
 0x23c   : > { %1535 = vmatprep.subr.bf16.mxu1 %v5094_v43  ;;  %v5220_v43 = vld [vmem:[#allocation10 + $0x104] ss:$8 sps:$4 sm:$0xff]   ;;  %2227 = vmatprep.subr.bf16.mxu0 %v5217_v42  ;;  %v5257_v42 = vld [vmem:[#allocation9 + $0x170] ss:$8 sps:$4 sm:$0xff]  }
 0x23f   : > { %1536 = vmatpush1.bf16.msra.mxu1 %v5092_v44  ;;  %v917_v44 = vld [vmem:[#allocation7] sm:$0x3] }
 0x240   : > { %1537 = vmatprep.subr.bf16.mxu1 %v5097_v45  ;;  %v948_v45 = vrot.slane %v917_v44, %v6188_v57 }
 0x243   : > { %1538 = vmatpush1.bf16.msra.mxu1 %v5095_v46  ;;  %v952_v46 = vrot.slane %v917_v44, %v6190_v59  ;;  %v5265_v44 = vld [vmem:[#allocation9 + $0x184] ss:$8 sps:$4 sm:$0xff]  }
 0x244   : > { %1539 = vmatprep.subr.bf16.mxu1 %v5100_v47 }
 0x247   : > { %1540 = vmatpush1.bf16.msra.mxu1 %v5098_v48 }
 0x248   : > { %1541 = vmatprep.subr.bf16.mxu1 %v5103_v49 }
 0x24b   : > { %1542 = vmatpush1.bf16.msra.mxu1 %v5101_v50 }
 0x24c   : > { %1543 = vmatprep.subr.bf16.mxu1 %v5106_v51 }
 0x24f   : > { %1544 = vmatpush1.bf16.msra.mxu1 %v5104_v52 }
 0x250   : > { %1545 = vmatprep.subr.bf16.mxu1 %v5109_v53 }
 0x253   : > { %1546 = vmatpush1.bf16.msra.mxu1 %v5107_v54 }
 0x254   : > { %1547 = vmatprep.subr.bf16.mxu1 %v5112_v55 }
 0x257   : > { %1548 = vmatpush1.bf16.msra.mxu1 %v5110_v56 }
 0x258   : > { %1549 = vmatprep.subr.bf16.mxu1 %v5115_v58 }
 0x25b   : > { %1550 = vmatpush1.bf16.msra.mxu1 %v5113_v60 }
 0x25c   : > { %1551 = vmatprep.subr.bf16.mxu1 %v5118_v61 }
 0x25f   : > { %1552 = vmatpush1.bf16.msra.mxu1 %v5116_v62 }
 0x260   : > { %2907 = vmatprep.subr.bf16.mxu1 %v5124_v63 }
 0x262   : > { %1554 = vmatmul.mubr.bf16.vlgmr.msra.gmra.mrb[4].mxu1 %v942_v2 }
 0x263   : > { %2908 = vmatpush1.bf16.msra.mxu1 %v5122_v0 }
 0x264   : > { %2909 = vmatprep.subr.bf16.mxu1 %v5130_v1 }
 0x267   : > { %2910 = vmatpush1.bf16.msra.mxu1 %v5128_v3 }
 0x268   : > { %2911 = vmatprep.subr.bf16.mxu1 %v5136_v4 }
 0x26b   : > { %2912 = vmatpush1.bf16.msra.mxu1 %v5134_v5 }
 0x26c   : > { %2913 = vmatprep.subr.bf16.mxu1 %v5142_v6 }
 0x26f   : > { %2914 = vmatpush1.bf16.msra.mxu1 %v5140_v7 }
 0x270   : > { %2915 = vmatprep.subr.bf16.mxu1 %v5148_v8 }
 0x273   : > { %2916 = vmatpush1.bf16.msra.mxu1 %v5146_v9 }
 0x274   : > { %2917 = vmatprep.subr.bf16.mxu1 %v5154_v10 }
 0x277   : > { %2918 = vmatpush1.bf16.msra.mxu1 %v5152_v12  ;;  %v5215_v12 = vld [vmem:[#allocation9 + $0x100] ss:$8 sps:$4 sm:$0xff]  }
 0x278   : > { %2919 = vmatprep.subr.bf16.mxu1 %v5160_v27  ;;  %v5218_v27 = vld [vmem:[#allocation10 + $0x100] ss:$8 sps:$4 sm:$0xff]  }
 0x27b   : > { %2920 = vmatpush1.bf16.msra.mxu1 %v5158_v13 }
 0x27c   : > { %2921 = vmatprep.subr.bf16.mxu1 %v5166_v14 }
 0x27f   : > { %2922 = vmatpush1.bf16.msra.mxu1 %v5164_v16  ;;  %v5223_v16 = vld [vmem:[#allocation9 + $0x114] ss:$8 sps:$4 sm:$0xff]  }
 0x280   : > { %2923 = vmatprep.subr.bf16.mxu1 %v5172_v17  ;;  %v5226_v17 = vld [vmem:[#allocation10 + $0x114] ss:$8 sps:$4 sm:$0xff]  }
 0x283   : > { %2924 = vmatpush1.bf16.msra.mxu1 %v5170_v18  ;;  %v5221_v18 = vld [vmem:[#allocation9 + $0x110] ss:$8 sps:$4 sm:$0xff]  }
 0x284   : > { %2925 = vmatprep.subr.bf16.mxu1 %v5178_v19  ;;  %v5224_v19 = vld [vmem:[#allocation10 + $0x110] ss:$8 sps:$4 sm:$0xff]  }
 0x287   : > { %2926 = vmatpush1.bf16.msra.mxu1 %v5176_v20  ;;  %v5229_v20 = vld [vmem:[#allocation9 + $0x124] ss:$8 sps:$4 sm:$0xff]  }
 0x288   : > { %2927 = vmatprep.subr.bf16.mxu1 %v5184_v21  ;;  %v5232_v21 = vld [vmem:[#allocation10 + $0x124] ss:$8 sps:$4 sm:$0xff]  }
 0x28b   : > { %2928 = vmatpush1.bf16.msra.mxu1 %v5182_v22  ;;  %v5230_v22 = vld [vmem:[#allocation10 + $0x120] ss:$8 sps:$4 sm:$0xff]  }
 0x28c   : > { %2929 = vmatprep.subr.bf16.mxu1 %v5190_v24  ;;  %v5235_v24 = vld [vmem:[#allocation9 + $0x134] ss:$8 sps:$4 sm:$0xff]  }
 0x28f   : > { %2930 = vmatpush1.bf16.msra.mxu1 %v5188_v25  ;;  %v5238_v25 = vld [vmem:[#allocation10 + $0x134] ss:$8 sps:$4 sm:$0xff]  }
 0x290   : > { %2931 = vmatprep.subr.bf16.mxu1 %v5196_v28  ;;  %v5236_v28 = vld [vmem:[#allocation10 + $0x130] ss:$8 sps:$4 sm:$0xff]  }
 0x293   : > { %2932 = vmatpush1.bf16.msra.mxu1 %v5194_v31  ;;  %v5244_v31 = vld [vmem:[#allocation10 + $0x144] ss:$8 sps:$4 sm:$0xff]  }
 0x294   : > { %2933 = vmatprep.subr.bf16.mxu1 %v5202_v33  ;;  %v5242_v33 = vld [vmem:[#allocation10 + $0x140] ss:$8 sps:$4 sm:$0xff]  }
 0x297   : > { %2934 = vmatpush1.bf16.msra.mxu1 %v5200_v35  ;;  %v5250_v35 = vld [vmem:[#allocation10 + $0x154] ss:$8 sps:$4 sm:$0xff]  }
 0x298   : > { %2935 = vmatprep.subr.bf16.mxu1 %v5208_v37  ;;  %v5248_v37 = vld [vmem:[#allocation10 + $0x150] ss:$8 sps:$4 sm:$0xff]  }
 0x29b   : > { %2936 = vmatpush1.bf16.msra.mxu1 %v5206_v39  ;;  %v5256_v39 = vld [vmem:[#allocation10 + $0x164] ss:$8 sps:$4 sm:$0xff]  }
 0x29c   : > { %2937 = vmatprep.subr.bf16.mxu1 %v5214_v15  ;;  %v5254_v15 = vld [vmem:[#allocation10 + $0x160] ss:$8 sps:$4 sm:$0xff]  }
 0x29f   : > { %2938 = vmatpush1.bf16.msra.mxu1 %v5212_v29  ;;  %v5262_v29 = vld [vmem:[#allocation10 + $0x174] ss:$8 sps:$4 sm:$0xff]  }
 0x2a0   : > { %2950 = vmatprep.subr.bf16.mxu1 %v5220_v43  ;;  %v5260_v43 = vld [vmem:[#allocation10 + $0x170] ss:$8 sps:$4 sm:$0xff]  }
 0x335   : > { %v1555_v47 = vpop.f32.mrb[4].mxu1 }
 0x336   : > { %v4819_v48 = vadd.f32 %v1555_v47, %v948_v45  ;;  %v1557_v49 = vpop.f32.mrb[5].mxu1  ;;  %v5266_v47 = vld [vmem:[#allocation10 + $0x180] ss:$8 sps:$4 sm:$0xff]  }
 0x337   : > { %v4820_v50 = vadd.f32 %v1557_v49, %v952_v46  ;;  %v1559_v51 = vpop.f32.mrb[6].mxu1  ;;  %v5274_v49 = vld [vmem:[#allocation10 + $0x194] ss:$8 sps:$4 sm:$0xff]  }
 0x338   : > { %v4821_v52 = vadd.f32 %v1559_v51, %v948_v45  ;;  %v1561_v53 = vpop.f32.mrb[7].mxu1  ;;  %v1564_v55 = vmax.f32 %v4819_v48, 0.0  ;;  %v5268_v45 = vld [vmem:[#allocation10 + $0x184] ss:$8 sps:$4 sm:$0xff]   ;;  %v5271_v48 = vld [vmem:[#allocation9 + $0x194] ss:$8 sps:$4 sm:$0xff]  }
 0x339   : > { %v4822_v54 = vadd.f32 %v1561_v53, %v952_v46  ;;  %v1565_v58 = vmax.f32 %v4820_v50, 0.0  ;;  %v5263_v46 = vld [vmem:[#allocation9 + $0x180] ss:$8 sps:$4 sm:$0xff]   ;;  %v5269_v50 = vld [vmem:[#allocation9 + $0x190] ss:$8 sps:$4 sm:$0xff]  }
 0x33a   : > { %v1566_v56 = vmax.f32 %v4821_v52, 0.0  ;;  %v5272_v51 = vld [vmem:[#allocation10 + $0x190] ss:$8 sps:$4 sm:$0xff]   ;;  %v5277_v52 = vld [vmem:[#allocation9 + $0x1a4] ss:$8 sps:$4 sm:$0xff]  }
 0x33b   : > { %v1567_v60 = vmax.f32 %v4822_v54, 0.0  ;;  %v5280_v53 = vld [vmem:[#allocation10 + $0x1a4] ss:$8 sps:$4 sm:$0xff]   ;;  %v5275_v54 = vld [vmem:[#allocation9 + $0x1a0] ss:$8 sps:$4 sm:$0xff]  }
 0x33c   : > { %v6215_v61 = vpack.c.bf16 %v1566_v56, %v1564_v55  ;;  %v5278_v55 = vld [vmem:[#allocation10 + $0x1a0] ss:$8 sps:$4 sm:$0xff]   ;;  %v5283_v56 = vld [vmem:[#allocation9 + $0x1b4] ss:$8 sps:$4 sm:$0xff]  }
 0x33d   : > { %v6217_v62 = vpack.c.bf16 %v1567_v60, %v1565_v58  ;;  %v5286_v58 = vld [vmem:[#allocation10 + $0x1b4] ss:$8 sps:$4 sm:$0xff]   ;;  %v5281_v60 = vld [vmem:[#allocation9 + $0x1b0] ss:$8 sps:$4 sm:$0xff]  }
 0x33e   : > { %v1668_v63 = vshrl.u32 %v6215_v61, 16  ;;  %v1671_v0 = vshll.u32 %v6215_v61, 16 }
 0x33f   : > { %v1675_v1 = vshrl.u32 %v6217_v62, 16  ;;  %v1678_v2 = vshll.u32 %v6217_v62, 16 }
 0x340   : > { %v1670_v3 = vrot.slane %v1668_v63, 7  ;;  %v1685_v4 = vrot.slane %v1671_v0, 1 }
 0x341   : > { %v1677_v5 = vrot.slane %v1675_v1, 7  ;;  %v1687_v6 = vrot.slane %v1678_v2, 1 }
 0x342   : > { %v1673_v7 = vor.u32 %v1671_v0, %v1670_v3  ;;  %v6223_v8 = vor.u32 %v1685_v4, %v1668_v63  ;;  %v5284_v63 = vld [vmem:[#allocation10 + $0x1b0] ss:$8 sps:$4 sm:$0xff]   ;;  %v5289_v0 = vld [vmem:[#allocation9 + $0x1c4] ss:$8 sps:$4 sm:$0xff]   ;;  %v5290_v3 = vld [vmem:[#allocation10 + $0x1c0] ss:$8 sps:$4 sm:$0xff]  }
 0x343   : > { %v1680_v9 = vor.u32 %v1678_v2, %v1677_v5  ;;  %v6225_v10 = vor.u32 %v1687_v6, %v1675_v1  ;;  %v5292_v1 = vld [vmem:[#allocation10 + $0x1c4] ss:$8 sps:$4 sm:$0xff]   ;;  %v5287_v2 = vld [vmem:[#allocation9 + $0x1c0] ss:$8 sps:$4 sm:$0xff]   ;;  %v5295_v4 = vld [vmem:[#allocation9 + $0x1d4] ss:$8 sps:$4 sm:$0xff]  }
 0x344   : > { %v6235_v14 = vsel %vm6173_vm2, 0, %v1673_v7  ;;  %v5298_v5 = vld [vmem:[#allocation10 + $0x1d4] ss:$8 sps:$4 sm:$0xff]   ;;  %v5293_v6 = vld [vmem:[#allocation9 + $0x1d0] ss:$8 sps:$4 sm:$0xff]  }
 0x345   : > { %v6229_v13 = vsel %vm6173_vm2, 0, %v1680_v9  ;;  %v5296_v7 = vld [vmem:[#allocation10 + $0x1d0] ss:$8 sps:$4 sm:$0xff]   ;;  %v5301_v9 = vld [vmem:[#allocation9 + $0x1e4] ss:$8 sps:$4 sm:$0xff]  }
 0x346   : > { %2216 = vmatprep.mubr.bf16.mxu0 %v6229_v13  ;;  %2939 = vmatprep.mubr.bf16.mxu1 %v6229_v13 }
 0x347   : > { %2217 = vmatmul.mubr.bf16.vlgmr.msra.gmra.mrb[4].mxu0 %v6235_v14  ;;  %2940 = vmatmul.mubr.bf16.vlgmr.msra.gmra.mrb[8].mxu1 %v6235_v14 }
 0x348   : > { %2228 = vmatpush1.bf16.msra.mxu0 %v5215_v12  ;;  %2951 = vmatpush1.bf16.msra.mxu1 %v5218_v27  ;;  %v5304_v12 = vld [vmem:[#allocation10 + $0x1e4] ss:$8 sps:$4 sm:$0xff]   ;;  %v5299_v27 = vld [vmem:[#allocation9 + $0x1e0] ss:$8 sps:$4 sm:$0xff]  }
 0x349   : > { %2259 = vmatprep.mubr.bf16.mxu0 %v6217_v62  ;;  %2982 = vmatprep.mubr.bf16.mxu1 %v6217_v62 }
 0x34a   : > { %2229 = vmatprep.subr.bf16.mxu0 %v5223_v16  ;;  %2952 = vmatprep.subr.bf16.mxu1 %v5226_v17  ;;  %v5302_v16 = vld [vmem:[#allocation10 + $0x1e0] ss:$8 sps:$4 sm:$0xff]   ;;  %v5307_v17 = vld [vmem:[#allocation9 + $0x1f4] ss:$8 sps:$4 sm:$0xff]  }
 0x34c   : > { %2230 = vmatpush1.bf16.msra.mxu0 %v5221_v18  ;;  %2953 = vmatpush1.bf16.msra.mxu1 %v5224_v19  ;;  %v5310_v18 = vld [vmem:[#allocation10 + $0x1f4] ss:$8 sps:$4 sm:$0xff]   ;;  %v5305_v19 = vld [vmem:[#allocation9 + $0x1f0] ss:$8 sps:$4 sm:$0xff]  }
 0x34d   : > { %2231 = vmatprep.subr.bf16.mxu0 %v5229_v20  ;;  %2954 = vmatprep.subr.bf16.mxu1 %v5232_v21  ;;  %v5308_v20 = vld [vmem:[#allocation10 + $0x1f0] ss:$8 sps:$4 sm:$0xff]   ;;  %v5313_v21 = vld [vmem:[#allocation9 + $0x204] ss:$8 sps:$4 sm:$0xff]  }
 0x350   : > { %2232 = vmatpush1.bf16.msra.mxu0 %v5227_v11  ;;  %2955 = vmatpush1.bf16.msra.mxu1 %v5230_v22  ;;  %v5316_v11 = vld [vmem:[#allocation10 + $0x204] ss:$8 sps:$4 sm:$0xff]   ;;  %v5311_v22 = vld [vmem:[#allocation9 + $0x200] ss:$8 sps:$4 sm:$0xff]  }
 0x351   : > { %2233 = vmatprep.subr.bf16.mxu0 %v5235_v24  ;;  %2956 = vmatprep.subr.bf16.mxu1 %v5238_v25  ;;  %v5314_v24 = vld [vmem:[#allocation10 + $0x200] ss:$8 sps:$4 sm:$0xff]   ;;  %v5319_v25 = vld [vmem:[#allocation9 + $0x214] ss:$8 sps:$4 sm:$0xff]  }
 0x354   : > { %2234 = vmatpush1.bf16.msra.mxu0 %v5233_v26  ;;  %2957 = vmatpush1.bf16.msra.mxu1 %v5236_v28  ;;  %v5322_v26 = vld [vmem:[#allocation10 + $0x214] ss:$8 sps:$4 sm:$0xff]   ;;  %v6246_v28 = vsel %vm6181_vm6, %v6225_v10, 0 }
 0x355   : > { %2235 = vmatprep.subr.bf16.mxu0 %v5241_v30  ;;  %2958 = vmatprep.subr.bf16.mxu1 %v5244_v31  ;;  %v5317_v30 = vld [vmem:[#allocation9 + $0x210] ss:$8 sps:$4 sm:$0xff]   ;;  %v5334_v10 = vld [vmem:[#allocation10 + $0x234] ss:$8 sps:$4 sm:$0xff]  }
 0x356   : > { %v5320_v31 = vld [vmem:[#allocation10 + $0x210] ss:$8 sps:$4 sm:$0xff]  }
 0x358   : > { %2236 = vmatpush1.bf16.msra.mxu0 %v5239_v32  ;;  %2959 = vmatpush1.bf16.msra.mxu1 %v5242_v33  ;;  %v5325_v32 = vld [vmem:[#allocation9 + $0x224] ss:$8 sps:$4 sm:$0xff]  }
 0x359   : > { %2237 = vmatprep.subr.bf16.mxu0 %v5247_v34  ;;  %2960 = vmatprep.subr.bf16.mxu1 %v5250_v35  ;;  %v5328_v33 = vld [vmem:[#allocation10 + $0x224] ss:$8 sps:$4 sm:$0xff]   ;;  %v5323_v34 = vld [vmem:[#allocation9 + $0x220] ss:$8 sps:$4 sm:$0xff]  }
 0x35a   : > { %v5326_v35 = vld [vmem:[#allocation10 + $0x220] ss:$8 sps:$4 sm:$0xff]  }
 0x35c   : > { %2238 = vmatpush1.bf16.msra.mxu0 %v5245_v36  ;;  %2961 = vmatpush1.bf16.msra.mxu1 %v5248_v37  ;;  %v5331_v36 = vld [vmem:[#allocation9 + $0x234] ss:$8 sps:$4 sm:$0xff]   ;;  %v5329_v37 = vld [vmem:[#allocation9 + $0x230] ss:$8 sps:$4 sm:$0xff]  }
 0x35d   : > { %2239 = vmatprep.subr.bf16.mxu0 %v5253_v38  ;;  %2962 = vmatprep.subr.bf16.mxu1 %v5256_v39  ;;  %v5332_v38 = vld [vmem:[#allocation10 + $0x230] ss:$8 sps:$4 sm:$0xff]   ;;  %v5337_v39 = vld [vmem:[#allocation9 + $0x244] ss:$8 sps:$4 sm:$0xff]  }
 0x360   : > { %2240 = vmatpush1.bf16.msra.mxu0 %v5251_v40  ;;  %2963 = vmatpush1.bf16.msra.mxu1 %v5254_v15  ;;  %v5340_v40 = vld [vmem:[#allocation10 + $0x244] ss:$8 sps:$4 sm:$0xff]   ;;  %v5335_v15 = vld [vmem:[#allocation9 + $0x240] ss:$8 sps:$4 sm:$0xff]  }
 0x361   : > { %2241 = vmatprep.subr.bf16.mxu0 %v5259_v41  ;;  %2964 = vmatprep.subr.bf16.mxu1 %v5262_v29  ;;  %v5338_v41 = vld [vmem:[#allocation10 + $0x240] ss:$8 sps:$4 sm:$0xff]   ;;  %v5343_v29 = vld [vmem:[#allocation9 + $0x254] ss:$8 sps:$4 sm:$0xff]  }
 0x364   : > { %2242 = vmatpush1.bf16.msra.mxu0 %v5257_v42  ;;  %2965 = vmatpush1.bf16.msra.mxu1 %v5260_v43  ;;  %v5346_v42 = vld [vmem:[#allocation10 + $0x254] ss:$8 sps:$4 sm:$0xff]   ;;  %v5341_v43 = vld [vmem:[#allocation9 + $0x250] ss:$8 sps:$4 sm:$0xff]  }
 0x365   : > { %2243 = vmatprep.subr.bf16.mxu0 %v5265_v44  ;;  %2966 = vmatprep.subr.bf16.mxu1 %v5268_v45  ;;  %v5344_v44 = vld [vmem:[#allocation10 + $0x250] ss:$8 sps:$4 sm:$0xff]   ;;  %v5349_v45 = vld [vmem:[#allocation9 + $0x264] ss:$8 sps:$4 sm:$0xff]  }
 0x368   : > { %2244 = vmatpush1.bf16.msra.mxu0 %v5263_v46  ;;  %2967 = vmatpush1.bf16.msra.mxu1 %v5266_v47  ;;  %v5352_v46 = vld [vmem:[#allocation10 + $0x264] ss:$8 sps:$4 sm:$0xff]   ;;  %v5347_v47 = vld [vmem:[#allocation9 + $0x260] ss:$8 sps:$4 sm:$0xff]  }
 0x369   : > { %2245 = vmatprep.subr.bf16.mxu0 %v5271_v48  ;;  %2968 = vmatprep.subr.bf16.mxu1 %v5274_v49  ;;  %v5350_v48 = vld [vmem:[#allocation10 + $0x260] ss:$8 sps:$4 sm:$0xff]   ;;  %v5355_v49 = vld [vmem:[#allocation9 + $0x274] ss:$8 sps:$4 sm:$0xff]  }
 0x36c   : > { %2246 = vmatpush1.bf16.msra.mxu0 %v5269_v50  ;;  %2969 = vmatpush1.bf16.msra.mxu1 %v5272_v51  ;;  %v5358_v50 = vld [vmem:[#allocation10 + $0x274] ss:$8 sps:$4 sm:$0xff]   ;;  %v5353_v51 = vld [vmem:[#allocation9 + $0x270] ss:$8 sps:$4 sm:$0xff]  }
 0x36d   : > { %2247 = vmatprep.subr.bf16.mxu0 %v5277_v52  ;;  %2970 = vmatprep.subr.bf16.mxu1 %v5280_v53  ;;  %v5356_v52 = vld [vmem:[#allocation10 + $0x270] ss:$8 sps:$4 sm:$0xff]   ;;  %v5361_v53 = vld [vmem:[#allocation9 + $0x284] ss:$8 sps:$4 sm:$0xff]  }
 0x370   : > { %2248 = vmatpush1.bf16.msra.mxu0 %v5275_v54  ;;  %2971 = vmatpush1.bf16.msra.mxu1 %v5278_v55  ;;  %v5364_v54 = vld [vmem:[#allocation10 + $0x284] ss:$8 sps:$4 sm:$0xff]   ;;  %v5359_v55 = vld [vmem:[#allocation9 + $0x280] ss:$8 sps:$4 sm:$0xff]  }
 0x371   : > { %2249 = vmatprep.subr.bf16.mxu0 %v5283_v56  ;;  %2972 = vmatprep.subr.bf16.mxu1 %v5286_v58  ;;  %v5362_v56 = vld [vmem:[#allocation10 + $0x280] ss:$8 sps:$4 sm:$0xff]   ;;  %v5367_v58 = vld [vmem:[#allocation9 + $0x294] ss:$8 sps:$4 sm:$0xff]  }
 0x374   : > { %2250 = vmatpush1.bf16.msra.mxu0 %v5281_v60  ;;  %2973 = vmatpush1.bf16.msra.mxu1 %v5284_v63  ;;  %v5370_v60 = vld [vmem:[#allocation10 + $0x294] ss:$8 sps:$4 sm:$0xff]   ;;  %v5365_v63 = vld [vmem:[#allocation9 + $0x290] ss:$8 sps:$4 sm:$0xff]  }
 0x375   : > { %2251 = vmatprep.subr.bf16.mxu0 %v5289_v0  ;;  %2974 = vmatprep.subr.bf16.mxu1 %v5292_v1  ;;  %v5368_v0 = vld [vmem:[#allocation10 + $0x290] ss:$8 sps:$4 sm:$0xff]   ;;  %v5373_v1 = vld [vmem:[#allocation9 + $0x2a4] ss:$8 sps:$4 sm:$0xff]  }
 0x378   : > { %2252 = vmatpush1.bf16.msra.mxu0 %v5287_v2  ;;  %2975 = vmatpush1.bf16.msra.mxu1 %v5290_v3  ;;  %v5376_v2 = vld [vmem:[#allocation10 + $0x2a4] ss:$8 sps:$4 sm:$0xff]   ;;  %v5371_v3 = vld [vmem:[#allocation9 + $0x2a0] ss:$8 sps:$4 sm:$0xff]  }
 0x379   : > { %2253 = vmatprep.subr.bf16.mxu0 %v5295_v4  ;;  %2976 = vmatprep.subr.bf16.mxu1 %v5298_v5  ;;  %v5374_v4 = vld [vmem:[#allocation10 + $0x2a0] ss:$8 sps:$4 sm:$0xff]   ;;  %v5379_v5 = vld [vmem:[#allocation9 + $0x2b4] ss:$8 sps:$4 sm:$0xff]  }
 0x37c   : > { %2254 = vmatpush1.bf16.msra.mxu0 %v5293_v6  ;;  %2977 = vmatpush1.bf16.msra.mxu1 %v5296_v7  ;;  %v5382_v6 = vld [vmem:[#allocation10 + $0x2b4] ss:$8 sps:$4 sm:$0xff]   ;;  %v5377_v7 = vld [vmem:[#allocation9 + $0x2b0] ss:$8 sps:$4 sm:$0xff]  }
 0x37d   : > { %2255 = vmatprep.subr.bf16.mxu0 %v5301_v9  ;;  %2978 = vmatprep.subr.bf16.mxu1 %v5304_v12  ;;  %v5380_v9 = vld [vmem:[#allocation10 + $0x2b0] ss:$8 sps:$4 sm:$0xff]   ;;  %v5385_v12 = vld [vmem:[#allocation9 + $0x2c4] ss:$8 sps:$4 sm:$0xff]  }
 0x380   : > { %2256 = vmatpush1.bf16.msra.mxu0 %v5299_v27  ;;  %2979 = vmatpush1.bf16.msra.mxu1 %v5302_v16  ;;  %v5388_v27 = vld [vmem:[#allocation10 + $0x2c4] ss:$8 sps:$4 sm:$0xff]   ;;  %v5383_v16 = vld [vmem:[#allocation9 + $0x2c0] ss:$8 sps:$4 sm:$0xff]  }
 0x381   : > { %2257 = vmatprep.subr.bf16.mxu0 %v5307_v17  ;;  %2980 = vmatprep.subr.bf16.mxu1 %v5310_v18  ;;  %v5386_v17 = vld [vmem:[#allocation10 + $0x2c0] ss:$8 sps:$4 sm:$0xff]   ;;  %v5391_v18 = vld [vmem:[#allocation9 + $0x2d4] ss:$8 sps:$4 sm:$0xff]  }
 0x384   : > { %2258 = vmatpush1.bf16.msra.mxu0 %v5305_v19  ;;  %2981 = vmatpush1.bf16.msra.mxu1 %v5308_v20  ;;  %v5394_v19 = vld [vmem:[#allocation10 + $0x2d4] ss:$8 sps:$4 sm:$0xff]   ;;  %v5389_v20 = vld [vmem:[#allocation9 + $0x2d0] ss:$8 sps:$4 sm:$0xff]  }
 0x385   : > { %2270 = vmatprep.subr.bf16.mxu0 %v5313_v21  ;;  %2993 = vmatprep.subr.bf16.mxu1 %v5316_v11  ;;  %v5392_v21 = vld [vmem:[#allocation10 + $0x2d0] ss:$8 sps:$4 sm:$0xff]   ;;  %v5397_v11 = vld [vmem:[#allocation9 + $0x2e4] ss:$8 sps:$4 sm:$0xff]  }
 0x387   : > { %2260 = vmatmul.mubr.bf16.vlgmr.msra.gmra.mrb[4].mxu0 %v6215_v61  ;;  %2983 = vmatmul.mubr.bf16.vlgmr.msra.gmra.mrb[8].mxu1 %v6215_v61 }
 0x388   : > { %2271 = vmatpush1.bf16.msra.mxu0 %v5311_v22  ;;  %2302 = vmatprep.mubr.bf16.mxu0 %v6246_v28  ;;  %v5400_v22 = vld [vmem:[#allocation10 + $0x2e4] ss:$8 sps:$4 sm:$0xff]  }
 0x389   : > { %2994 = vmatpush1.bf16.msra.mxu1 %v5314_v24  ;;  %3025 = vmatprep.mubr.bf16.mxu1 %v6246_v28  ;;  %v5395_v24 = vld [vmem:[#allocation9 + $0x2e0] ss:$8 sps:$4 sm:$0xff]  }
 0x38a   : > { %2272 = vmatprep.subr.bf16.mxu0 %v5319_v25  ;;  %2995 = vmatprep.subr.bf16.mxu1 %v5322_v26  ;;  %v5398_v25 = vld [vmem:[#allocation10 + $0x2e0] ss:$8 sps:$4 sm:$0xff]   ;;  %v5403_v26 = vld [vmem:[#allocation9 + $0x2f4] ss:$8 sps:$4 sm:$0xff]  }
 0x38c   : > { %2273 = vmatpush1.bf16.msra.mxu0 %v5317_v30  ;;  %v5406_v30 = vld [vmem:[#allocation10 + $0x2f4] ss:$8 sps:$4 sm:$0xff]  }
 0x38d   : > { %2996 = vmatpush1.bf16.msra.mxu1 %v5320_v31  ;;  %2274 = vmatprep.subr.bf16.mxu0 %v5325_v32  ;;  %v5401_v31 = vld [vmem:[#allocation9 + $0x2f0] ss:$8 sps:$4 sm:$0xff]  }
 0x38e   : > { %2997 = vmatprep.subr.bf16.mxu1 %v5328_v33  ;;  %v5404_v32 = vld [vmem:[#allocation10 + $0x2f0] ss:$8 sps:$4 sm:$0xff]   ;;  %v5409_v33 = vld [vmem:[#allocation12 + $0x4] ss:$8 sps:$4 sm:$0xff]  }
 0x390   : > { %2275 = vmatpush1.bf16.msra.mxu0 %v5323_v34  ;;  %v5407_v34 = vld [vmem:[#allocation12] ss:$8 sps:$4 sm:$0xff]  }
 0x391   : > { %2998 = vmatpush1.bf16.msra.mxu1 %v5326_v35  ;;  %2276 = vmatprep.subr.bf16.mxu0 %v5331_v36  ;;  %v5412_v35 = vld [vmem:[#allocation12 + $0x14] ss:$8 sps:$4 sm:$0xff]   ;;  %v6253_v36 = vsel %vm6181_vm6, %v6223_v8, 0  ;;  %v5419_v8 = vld [vmem:[#allocation12 + $0x40] ss:$8 sps:$4 sm:$0xff]  }
 0x392   : > { %2999 = vmatprep.subr.bf16.mxu1 %v5334_v10  ;;  %v5410_v10 = vld [vmem:[#allocation12 + $0x10] ss:$8 sps:$4 sm:$0xff]  }
 0x394   : > { %2277 = vmatpush1.bf16.msra.mxu0 %v5329_v37  ;;  %v5415_v37 = vld [vmem:[#allocation12 + $0x24] ss:$8 sps:$4 sm:$0xff]  }
 0x395   : > { %3000 = vmatpush1.bf16.msra.mxu1 %v5332_v38  ;;  %2278 = vmatprep.subr.bf16.mxu0 %v5337_v39  ;;  %v5413_v38 = vld [vmem:[#allocation12 + $0x20] ss:$8 sps:$4 sm:$0xff]   ;;  %v5418_v39 = vld [vmem:[#allocation12 + $0x34] ss:$8 sps:$4 sm:$0xff]  }
 0x396   : > { %3001 = vmatprep.subr.bf16.mxu1 %v5340_v40  ;;  %v5416_v40 = vld [vmem:[#allocation12 + $0x30] ss:$8 sps:$4 sm:$0xff]  }
 0x398   : > { %2279 = vmatpush1.bf16.msra.mxu0 %v5335_v15  ;;  %v5424_v15 = vld [vmem:[#allocation12 + $0x54] ss:$8 sps:$4 sm:$0xff]  }
 0x399   : > { %3002 = vmatpush1.bf16.msra.mxu1 %v5338_v41  ;;  %2280 = vmatprep.subr.bf16.mxu0 %v5343_v29  ;;  %v5422_v41 = vld [vmem:[#allocation12 + $0x50] ss:$8 sps:$4 sm:$0xff]   ;;  %v5427_v29 = vld [vmem:[#allocation12 + $0x64] ss:$8 sps:$4 sm:$0xff]  }
 0x39a   : > { %3003 = vmatprep.subr.bf16.mxu1 %v5346_v42  ;;  %v5430_v42 = vld [vmem:[#allocation12 + $0x74] ss:$8 sps:$4 sm:$0xff]  }
 0x39c   : > { %2281 = vmatpush1.bf16.msra.mxu0 %v5341_v43  ;;  %v5428_v43 = vld [vmem:[#allocation12 + $0x70] ss:$8 sps:$4 sm:$0xff]  }
 0x39d   : > { %3004 = vmatpush1.bf16.msra.mxu1 %v5344_v44  ;;  %2282 = vmatprep.subr.bf16.mxu0 %v5349_v45  ;;  %v5433_v44 = vld [vmem:[#allocation12 + $0x84] ss:$8 sps:$4 sm:$0xff]   ;;  %v5431_v45 = vld [vmem:[#allocation12 + $0x80] ss:$8 sps:$4 sm:$0xff]  }
 0x39e   : > { %3005 = vmatprep.subr.bf16.mxu1 %v5352_v46  ;;  %v5436_v46 = vld [vmem:[#allocation12 + $0x94] ss:$8 sps:$4 sm:$0xff]  }
 0x3a0   : > { %2283 = vmatpush1.bf16.msra.mxu0 %v5347_v47  ;;  %v5434_v47 = vld [vmem:[#allocation12 + $0x90] ss:$8 sps:$4 sm:$0xff]  }
 0x3a1   : > { %3006 = vmatpush1.bf16.msra.mxu1 %v5350_v48  ;;  %2284 = vmatprep.subr.bf16.mxu0 %v5355_v49  ;;  %v5439_v48 = vld [vmem:[#allocation12 + $0xa4] ss:$8 sps:$4 sm:$0xff]   ;;  %v5437_v49 = vld [vmem:[#allocation12 + $0xa0] ss:$8 sps:$4 sm:$0xff]  }
 0x3a2   : > { %3007 = vmatprep.subr.bf16.mxu1 %v5358_v50  ;;  %v5442_v50 = vld [vmem:[#allocation12 + $0xb4] ss:$8 sps:$4 sm:$0xff]  }
 0x3a4   : > { %2285 = vmatpush1.bf16.msra.mxu0 %v5353_v51  ;;  %v5440_v51 = vld [vmem:[#allocation12 + $0xb0] ss:$8 sps:$4 sm:$0xff]  }
 0x3a5   : > { %3008 = vmatpush1.bf16.msra.mxu1 %v5356_v52  ;;  %2286 = vmatprep.subr.bf16.mxu0 %v5361_v53  ;;  %v5445_v52 = vld [vmem:[#allocation12 + $0xc4] ss:$8 sps:$4 sm:$0xff]   ;;  %v5443_v53 = vld [vmem:[#allocation12 + $0xc0] ss:$8 sps:$4 sm:$0xff]  }
 0x3a6   : > { %3009 = vmatprep.subr.bf16.mxu1 %v5364_v54  ;;  %v5448_v54 = vld [vmem:[#allocation12 + $0xd4] ss:$8 sps:$4 sm:$0xff]  }
 0x3a8   : > { %2287 = vmatpush1.bf16.msra.mxu0 %v5359_v55  ;;  %v5446_v55 = vld [vmem:[#allocation12 + $0xd0] ss:$8 sps:$4 sm:$0xff]  }
 0x3a9   : > { %3010 = vmatpush1.bf16.msra.mxu1 %v5362_v56  ;;  %2288 = vmatprep.subr.bf16.mxu0 %v5367_v58  ;;  %v5451_v56 = vld [vmem:[#allocation12 + $0xe4] ss:$8 sps:$4 sm:$0xff]   ;;  %v5449_v58 = vld [vmem:[#allocation12 + $0xe0] ss:$8 sps:$4 sm:$0xff]  }
 0x3aa   : > { %3011 = vmatprep.subr.bf16.mxu1 %v5370_v60  ;;  %v5454_v60 = vld [vmem:[#allocation12 + $0xf4] ss:$8 sps:$4 sm:$0xff]  }
 0x3ac   : > { %2289 = vmatpush1.bf16.msra.mxu0 %v5365_v63  ;;  %v5452_v63 = vld [vmem:[#allocation12 + $0xf0] ss:$8 sps:$4 sm:$0xff]  }
 0x3ad   : > { %3012 = vmatpush1.bf16.msra.mxu1 %v5368_v0  ;;  %2290 = vmatprep.subr.bf16.mxu0 %v5373_v1  ;;  %v5457_v0 = vld [vmem:[#allocation12 + $0x104] ss:$8 sps:$4 sm:$0xff]   ;;  %v5455_v1 = vld [vmem:[#allocation12 + $0x100] ss:$8 sps:$4 sm:$0xff]  }
 0x3ae   : > { %3013 = vmatprep.subr.bf16.mxu1 %v5376_v2  ;;  %v5551_v2 = vld [vmem:[#allocation13 + $0xc0] sm:$0xff]  }
 0x3b0   : > { %2291 = vmatpush1.bf16.msra.mxu0 %v5371_v3  ;;  %v5552_v3 = vld [vmem:[#allocation13 + $0x80] sm:$0xff]  }
 0x3b1   : > { %3014 = vmatpush1.bf16.msra.mxu1 %v5374_v4  ;;  %2292 = vmatprep.subr.bf16.mxu0 %v5379_v5  ;;  %v5460_v4 = vld [vmem:[#allocation12 + $0x114] ss:$8 sps:$4 sm:$0xff]   ;;  %v5458_v5 = vld [vmem:[#allocation12 + $0x110] ss:$8 sps:$4 sm:$0xff]  }
 0x3b2   : > { %3015 = vmatprep.subr.bf16.mxu1 %v5382_v6  ;;  %v5555_v6 = vld [vmem:[#allocation13 + $0xc8] sm:$0xff]  }
 0x3b4   : > { %2293 = vmatpush1.bf16.msra.mxu0 %v5377_v7  ;;  %v5556_v7 = vld [vmem:[#allocation13 + $0x88] sm:$0xff]  }
 0x3b5   : > { %3016 = vmatpush1.bf16.msra.mxu1 %v5380_v9  ;;  %2294 = vmatprep.subr.bf16.mxu0 %v5385_v12  ;;  %v5463_v9 = vld [vmem:[#allocation12 + $0x124] ss:$8 sps:$4 sm:$0xff]   ;;  %v5461_v12 = vld [vmem:[#allocation12 + $0x120] ss:$8 sps:$4 sm:$0xff]  }
 0x3b6   : > { %3017 = vmatprep.subr.bf16.mxu1 %v5388_v27  ;;  %v5559_v27 = vld [vmem:[#allocation13 + $0xd0] sm:$0xff]  }
 0x3b8   : > { %2295 = vmatpush1.bf16.msra.mxu0 %v5383_v16  ;;  %v5560_v16 = vld [vmem:[#allocation13 + $0x90] sm:$0xff]  }
 0x3b9   : > { %3018 = vmatpush1.bf16.msra.mxu1 %v5386_v17  ;;  %2296 = vmatprep.subr.bf16.mxu0 %v5391_v18  ;;  %v5466_v17 = vld [vmem:[#allocation12 + $0x134] ss:$8 sps:$4 sm:$0xff]  }
 0x3ba   : > { %3019 = vmatprep.subr.bf16.mxu1 %v5394_v19  ;;  %v5563_v18 = vld [vmem:[#allocation13 + $0xd8] sm:$0xff]  }
 0x3bb   : > { %v5564_v19 = vld [vmem:[#allocation13 + $0x98] sm:$0xff]  }
 0x3bc   : > { %2297 = vmatpush1.bf16.msra.mxu0 %v5389_v20  ;;  %v5467_v20 = vld [vmem:[#allocation12 + $0x140] ss:$8 sps:$4 sm:$0xff]  }
 0x3bd   : > { %3020 = vmatpush1.bf16.msra.mxu1 %v5392_v21  ;;  %2298 = vmatprep.subr.bf16.mxu0 %v5397_v11  ;;  %v5567_v21 = vld [vmem:[#allocation13 + $0xe0] sm:$0xff]  }
 0x3be   : > { %3021 = vmatprep.subr.bf16.mxu1 %v5400_v22  ;;  %v5568_v11 = vld [vmem:[#allocation13 + $0xa0] sm:$0xff]   ;;  %v5472_v22 = vld [vmem:[#allocation12 + $0x154] ss:$8 sps:$4 sm:$0xff]  }
 0x3c0   : > { %2299 = vmatpush1.bf16.msra.mxu0 %v5395_v24  ;;  %v5470_v24 = vld [vmem:[#allocation12 + $0x150] ss:$8 sps:$4 sm:$0xff]  }
 0x3c1   : > { %3022 = vmatpush1.bf16.msra.mxu1 %v5398_v25  ;;  %2300 = vmatprep.subr.bf16.mxu0 %v5403_v26  ;;  %v5571_v25 = vld [vmem:[#allocation13 + $0xe8] sm:$0xff]  }
 0x3c2   : > { %3023 = vmatprep.subr.bf16.mxu1 %v5406_v30  ;;  %v5475_v26 = vld [vmem:[#allocation12 + $0x164] ss:$8 sps:$4 sm:$0xff]  }
 0x3c3   : > { %v5572_v30 = vld [vmem:[#allocation13 + $0xa8] sm:$0xff]  }
 0x3c4   : > { %2301 = vmatpush1.bf16.msra.mxu0 %v5401_v31  ;;  %v5473_v31 = vld [vmem:[#allocation12 + $0x160] ss:$8 sps:$4 sm:$0xff]  }
 0x3c5   : > { %3024 = vmatpush1.bf16.msra.mxu1 %v5404_v32  ;;  %3630 = vmatprep.subr.bf16.mxu0 %v5409_v33  ;;  %v5575_v32 = vld [vmem:[#allocation13 + $0xf0] sm:$0xff]  }
 0x3c6   : > { %4771 = vmatprep.subr.bf16.mxu1 %v5551_v2  ;;  %v5478_v33 = vld [vmem:[#allocation12 + $0x174] ss:$8 sps:$4 sm:$0xff]   ;;  %v5524_v2 = vld [vmem:[#allocation12 + $0x270] ss:$8 sps:$4 sm:$0xff]  }
 0x3c7   : > { %2303 = vmatmul.mubr.bf16.vlgmr.msra.gmra.mrb[4].mxu0 %v6253_v36 }
 0x3c8   : > { %3026 = vmatmul.mubr.bf16.vlgmr.msra.gmra.mrb[8].mxu1 %v6253_v36  ;;  %3631 = vmatpush1.bf16.msra.mxu0 %v5407_v34  ;;  %v5576_v34 = vld [vmem:[#allocation13 + $0xb0] sm:$0xff]  }
 0x3c9   : > { %3662 = vmatprep.mubr.bf16.mxu0 %v6229_v13  ;;  %3632 = vmatprep.subr.bf16.mxu0 %v5412_v35  ;;  %v5425_v13 = vld [vmem:[#allocation12 + $0x60] ss:$8 sps:$4 sm:$0xff]   ;;  %v5476_v35 = vld [vmem:[#allocation12 + $0x170] ss:$8 sps:$4 sm:$0xff]  }
 0x3ca   : > { %4772 = vmatpush3.bf16.msra.mxu1 %v5552_v3  ;;  %v5529_v3 = vld [vmem:[#allocation12 + $0x284] ss:$8 sps:$4 sm:$0xff]  }
 0x3cb   : > { %4773 = vmatprep.subr.bf16.mxu1 %v5555_v6  ;;  %v5530_v6 = vld [vmem:[#allocation12 + $0x290] ss:$8 sps:$4 sm:$0xff]  }
 0x3cc   : > { %3633 = vmatpush1.bf16.msra.mxu0 %v5410_v10  ;;  %v5579_v10 = vld [vmem:[#allocation13 + $0xf8] sm:$0xff]  }
 0x3cd   : > { %3634 = vmatprep.subr.bf16.mxu0 %v5415_v37  ;;  %v5481_v37 = vld [vmem:[#allocation12 + $0x184] ss:$8 sps:$4 sm:$0xff]  }
 0x3ce   : > { %4774 = vmatpush3.bf16.msra.mxu1 %v5556_v7  ;;  %v5535_v7 = vld [vmem:[#allocation12 + $0x2a4] ss:$8 sps:$4 sm:$0xff]  }
 0x3cf   : > { %4775 = vmatprep.subr.bf16.mxu1 %v5559_v27  ;;  %v5536_v27 = vld [vmem:[#allocation12 + $0x2b0] ss:$8 sps:$4 sm:$0xff]  }
 0x3d0   : > { %3635 = vmatpush1.bf16.msra.mxu0 %v5413_v38  ;;  %v5580_v38 = vld [vmem:[#allocation13 + $0xb8] sm:$0xff]  }
 0x3d1   : > { %3636 = vmatprep.subr.bf16.mxu0 %v5418_v39  ;;  %v5479_v39 = vld [vmem:[#allocation12 + $0x180] ss:$8 sps:$4 sm:$0xff]  }
 0x3d2   : > { %4776 = vmatpush3.bf16.msra.mxu1 %v5560_v16  ;;  %v5541_v16 = vld [vmem:[#allocation12 + $0x2c4] ss:$8 sps:$4 sm:$0xff]  }
 0x3d3   : > { %4777 = vmatprep.subr.bf16.mxu1 %v5563_v18  ;;  %v5542_v18 = vld [vmem:[#allocation12 + $0x2d0] ss:$8 sps:$4 sm:$0xff]  }
 0x3d4   : > { %3637 = vmatpush1.bf16.msra.mxu0 %v5416_v40  ;;  %v5484_v40 = vld [vmem:[#allocation12 + $0x194] ss:$8 sps:$4 sm:$0xff]  }
 0x3d5   : > { %3638 = vmatprep.subr.bf16.mxu0 %v5421_v23  ;;  %v5482_v23 = vld [vmem:[#allocation12 + $0x190] ss:$8 sps:$4 sm:$0xff]  }
 0x3d6   : > { %4778 = vmatpush3.bf16.msra.mxu1 %v5564_v19  ;;  %v5547_v19 = vld [vmem:[#allocation12 + $0x2e4] ss:$8 sps:$4 sm:$0xff]  }
 0x3d7   : > { %4779 = vmatprep.subr.bf16.mxu1 %v5567_v21  ;;  %v5548_v21 = vld [vmem:[#allocation12 + $0x2f0] ss:$8 sps:$4 sm:$0xff]  }
 0x3d8   : > { %3639 = vmatpush1.bf16.msra.mxu0 %v5419_v8  ;;  %v5487_v8 = vld [vmem:[#allocation12 + $0x1a4] ss:$8 sps:$4 sm:$0xff]  }
 0x3d9   : > { %3640 = vmatprep.subr.bf16.mxu0 %v5424_v15  ;;  %v5485_v15 = vld [vmem:[#allocation12 + $0x1a0] ss:$8 sps:$4 sm:$0xff]  }
 0x3da   : > { %4780 = vmatpush3.bf16.msra.mxu1 %v5568_v11  ;;  %v5553_v11 = vld [vmem:[#allocation13 + $0x40] sm:$0xff]  }
 0x3db   : > { %4781 = vmatprep.subr.bf16.mxu1 %v5571_v25  ;;  %v5558_v25 = vld [vmem:[#allocation13 + $0x8] sm:$0xff]  }
 0x3dc   : > { %3641 = vmatpush1.bf16.msra.mxu0 %v5422_v41  ;;  %v5490_v41 = vld [vmem:[#allocation12 + $0x1b4] ss:$8 sps:$4 sm:$0xff]  }
 0x3dd   : > { %3642 = vmatprep.subr.bf16.mxu0 %v5427_v29  ;;  %v5488_v29 = vld [vmem:[#allocation12 + $0x1b0] ss:$8 sps:$4 sm:$0xff]  }
 0x3de   : > { %4782 = vmatpush3.bf16.msra.mxu1 %v5572_v30  ;;  %v5562_v30 = vld [vmem:[#allocation13 + $0x10] sm:$0xff]  }
 0x3df   : > { %4783 = vmatprep.subr.bf16.mxu1 %v5575_v32  ;;  %v5566_v32 = vld [vmem:[#allocation13 + $0x18] sm:$0xff]  }
 0x3e0   : > { %3643 = vmatpush1.bf16.msra.mxu0 %v5425_v13  ;;  %v5493_v13 = vld [vmem:[#allocation12 + $0x1c4] ss:$8 sps:$4 sm:$0xff]  }
 0x3e1   : > { %3644 = vmatprep.subr.bf16.mxu0 %v5430_v42  ;;  %v5491_v42 = vld [vmem:[#allocation12 + $0x1c0] ss:$8 sps:$4 sm:$0xff]  }
 0x3e2   : > { %4784 = vmatpush3.bf16.msra.mxu1 %v5576_v34  ;;  %v5570_v34 = vld [vmem:[#allocation13 + $0x20] sm:$0xff]  }
 0x3e3   : > { %4785 = vmatprep.subr.bf16.mxu1 %v5579_v10  ;;  %v5573_v10 = vld [vmem:[#allocation13 + $0x68] sm:$0xff]  }
 0x3e4   : > { %3645 = vmatpush1.bf16.msra.mxu0 %v5428_v43  ;;  %v5496_v43 = vld [vmem:[#allocation12 + $0x1d4] ss:$8 sps:$4 sm:$0xff]  }
 0x3e5   : > { %3646 = vmatprep.subr.bf16.mxu0 %v5433_v44  ;;  %v5494_v44 = vld [vmem:[#allocation12 + $0x1d0] ss:$8 sps:$4 sm:$0xff]  }
 0x3e6   : > { %4786 = vmatpush3.bf16.msra.mxu1 %v5580_v38 }
 0x3e8   : > { %3647 = vmatpush1.bf16.msra.mxu0 %v5431_v45  ;;  %v5499_v45 = vld [vmem:[#allocation12 + $0x1e4] ss:$8 sps:$4 sm:$0xff]  }
 0x3e9   : > { %3648 = vmatprep.subr.bf16.mxu0 %v5436_v46  ;;  %v5497_v46 = vld [vmem:[#allocation12 + $0x1e0] ss:$8 sps:$4 sm:$0xff]  }
 0x3ec   : > { %3649 = vmatpush1.bf16.msra.mxu0 %v5434_v47  ;;  %v5502_v47 = vld [vmem:[#allocation12 + $0x1f4] ss:$8 sps:$4 sm:$0xff]  }
 0x3ed   : > { %3650 = vmatprep.subr.bf16.mxu0 %v5439_v48  ;;  %v5500_v48 = vld [vmem:[#allocation12 + $0x1f0] ss:$8 sps:$4 sm:$0xff]  }
 0x3f0   : > { %3651 = vmatpush1.bf16.msra.mxu0 %v5437_v49  ;;  %v5505_v49 = vld [vmem:[#allocation12 + $0x204] ss:$8 sps:$4 sm:$0xff]  }
 0x3f1   : > { %3652 = vmatprep.subr.bf16.mxu0 %v5442_v50  ;;  %v5503_v50 = vld [vmem:[#allocation12 + $0x200] ss:$8 sps:$4 sm:$0xff]  }
 0x3f4   : > { %3653 = vmatpush1.bf16.msra.mxu0 %v5440_v51  ;;  %v5508_v51 = vld [vmem:[#allocation12 + $0x214] ss:$8 sps:$4 sm:$0xff]  }
 0x3f5   : > { %3654 = vmatprep.subr.bf16.mxu0 %v5445_v52  ;;  %v5506_v52 = vld [vmem:[#allocation12 + $0x210] ss:$8 sps:$4 sm:$0xff]  }
 0x3f8   : > { %3655 = vmatpush1.bf16.msra.mxu0 %v5443_v53  ;;  %v5511_v53 = vld [vmem:[#allocation12 + $0x224] ss:$8 sps:$4 sm:$0xff]  }
 0x3f9   : > { %3656 = vmatprep.subr.bf16.mxu0 %v5448_v54  ;;  %v5509_v54 = vld [vmem:[#allocation12 + $0x220] ss:$8 sps:$4 sm:$0xff]  }
 0x3fc   : > { %3657 = vmatpush1.bf16.msra.mxu0 %v5446_v55  ;;  %v5514_v55 = vld [vmem:[#allocation12 + $0x234] ss:$8 sps:$4 sm:$0xff]  }
 0x3fd   : > { %3658 = vmatprep.subr.bf16.mxu0 %v5451_v56  ;;  %v5512_v56 = vld [vmem:[#allocation12 + $0x230] ss:$8 sps:$4 sm:$0xff]  }
 0x400   : > { %3659 = vmatpush1.bf16.msra.mxu0 %v5449_v58  ;;  %v5517_v58 = vld [vmem:[#allocation12 + $0x244] ss:$8 sps:$4 sm:$0xff]  }
 0x401   : > { %3660 = vmatprep.subr.bf16.mxu0 %v5454_v60  ;;  %v5515_v60 = vld [vmem:[#allocation12 + $0x240] ss:$8 sps:$4 sm:$0xff]  }
 0x404   : > { %3661 = vmatpush1.bf16.msra.mxu0 %v5452_v63  ;;  %v5520_v63 = vld [vmem:[#allocation12 + $0x254] ss:$8 sps:$4 sm:$0xff]  }
 0x405   : > { %3673 = vmatprep.subr.bf16.mxu0 %v5457_v0  ;;  %v5523_v0 = vld [vmem:[#allocation12 + $0x264] ss:$8 sps:$4 sm:$0xff]  }
 0x407   : > { %3663 = vmatmul.mubr.bf16.vlgmr.msra.gmra.mrb[8].mxu0 %v6235_v14  ;;  %v5464_v14 = vld [vmem:[#allocation12 + $0x130] ss:$8 sps:$4 sm:$0xff]  }
 0x408   : > { %3674 = vmatpush1.bf16.msra.mxu0 %v5455_v1  ;;  %3705 = vmatprep.mubr.bf16.mxu0 %v6217_v62  ;;  %v5469_v62 = vld [vmem:[#allocation12 + $0x144] ss:$8 sps:$4 sm:$0xff]   ;;  %v5526_v1 = vld [vmem:[#allocation12 + $0x274] ss:$8 sps:$4 sm:$0xff]  }
 0x409   : > { %3675 = vmatprep.subr.bf16.mxu0 %v5460_v4  ;;  %v5527_v4 = vld [vmem:[#allocation12 + $0x280] ss:$8 sps:$4 sm:$0xff]  }
 0x40c   : > { %3676 = vmatpush1.bf16.msra.mxu0 %v5458_v5  ;;  %v5532_v5 = vld [vmem:[#allocation12 + $0x294] ss:$8 sps:$4 sm:$0xff]  }
 0x40d   : > { %3677 = vmatprep.subr.bf16.mxu0 %v5463_v9  ;;  %v5533_v9 = vld [vmem:[#allocation12 + $0x2a0] ss:$8 sps:$4 sm:$0xff]  }
 0x410   : > { %3678 = vmatpush1.bf16.msra.mxu0 %v5461_v12  ;;  %v5538_v12 = vld [vmem:[#allocation12 + $0x2b4] ss:$8 sps:$4 sm:$0xff]  }
 0x411   : > { %3679 = vmatprep.subr.bf16.mxu0 %v5466_v17  ;;  %v5539_v17 = vld [vmem:[#allocation12 + $0x2c0] ss:$8 sps:$4 sm:$0xff]  }
 0x414   : > { %3680 = vmatpush1.bf16.msra.mxu0 %v5464_v14  ;;  %v5544_v14 = vld [vmem:[#allocation12 + $0x2d4] ss:$8 sps:$4 sm:$0xff]  }
 0x415   : > { %3681 = vmatprep.subr.bf16.mxu0 %v5469_v62  ;;  %v5545_v62 = vld [vmem:[#allocation12 + $0x2e0] ss:$8 sps:$4 sm:$0xff]  }
 0x418   : > { %3682 = vmatpush1.bf16.msra.mxu0 %v5467_v20  ;;  %v5550_v20 = vld [vmem:[#allocation12 + $0x2f4] ss:$8 sps:$4 sm:$0xff]  }
 0x419   : > { %3683 = vmatprep.subr.bf16.mxu0 %v5472_v22  ;;  %v5554_v22 = vld [vmem:[#allocation13] sm:$0xff]  }
 0x41c   : > { %3684 = vmatpush1.bf16.msra.mxu0 %v5470_v24  ;;  %v5557_v24 = vld [vmem:[#allocation13 + $0x48] sm:$0xff]  }
 0x41d   : > { %3685 = vmatprep.subr.bf16.mxu0 %v5475_v26  ;;  %v5561_v26 = vld [vmem:[#allocation13 + $0x50] sm:$0xff]  }
 0x420   : > { %3686 = vmatpush1.bf16.msra.mxu0 %v5473_v31  ;;  %v5565_v31 = vld [vmem:[#allocation13 + $0x58] sm:$0xff]  }
 0x421   : > { %3687 = vmatprep.subr.bf16.mxu0 %v5478_v33  ;;  %v5569_v33 = vld [vmem:[#allocation13 + $0x60] sm:$0xff]  }
 0x424   : > { %3688 = vmatpush1.bf16.msra.mxu0 %v5476_v35  ;;  %v1666_v35 = vld [vmem:[%s6301_s6] sm:$0x3] }
 0x425   : > { %3689 = vmatprep.subr.bf16.mxu0 %v5481_v37  ;;  %v1697_v37 = vrot.slane %v1666_v35, %v6188_v57 }
 0x428   : > { %3690 = vmatpush1.bf16.msra.mxu0 %v5479_v39  ;;  %v1701_v39 = vrot.slane %v1666_v35, %v6190_v59 }
 0x429   : > { %3691 = vmatprep.subr.bf16.mxu0 %v5484_v40  ;;  %v5574_v40 = vld [vmem:[#allocation13 + $0x28] sm:$0xff]  }
 0x42c   : > { %3692 = vmatpush1.bf16.msra.mxu0 %v5482_v23 }
 0x42d   : > { %3693 = vmatprep.subr.bf16.mxu0 %v5487_v8  ;;  %v5577_v8 = vld [vmem:[#allocation13 + $0x70] sm:$0xff]  }
 0x430   : > { %3694 = vmatpush1.bf16.msra.mxu0 %v5485_v15 }
 0x431   : > { %3695 = vmatprep.subr.bf16.mxu0 %v5490_v41 }
 0x434   : > { %3696 = vmatpush1.bf16.msra.mxu0 %v5488_v29 }
 0x435   : > { %3697 = vmatprep.subr.bf16.mxu0 %v5493_v13 }
 0x438   : > { %3698 = vmatpush1.bf16.msra.mxu0 %v5491_v42 }
 0x439   : > { %3699 = vmatprep.subr.bf16.mxu0 %v5496_v43 }
 0x43c   : > { %3700 = vmatpush1.bf16.msra.mxu0 %v5494_v44 }
 0x43d   : > { %3701 = vmatprep.subr.bf16.mxu0 %v5499_v45 }
 0x440   : > { %3702 = vmatpush1.bf16.msra.mxu0 %v5497_v46  ;;  %v5578_v46 = vld [vmem:[#allocation13 + $0x30] sm:$0xff]  }
 0x441   : > { %3703 = vmatprep.subr.bf16.mxu0 %v5502_v47 }
 0x444   : > { %3704 = vmatpush1.bf16.msra.mxu0 %v5500_v48 }
 0x445   : > { %3716 = vmatprep.subr.bf16.mxu0 %v5505_v49 }
 0x447   : > { %3706 = vmatmul.mubr.bf16.vlgmr.msra.gmra.mrb[8].mxu0 %v6215_v61  ;;  %v5518_v61 = vld [vmem:[#allocation12 + $0x250] ss:$8 sps:$4 sm:$0xff]  }
 0x448   : > { %3717 = vmatpush1.bf16.msra.mxu0 %v5503_v50  ;;  %3748 = vmatprep.mubr.bf16.mxu0 %v6246_v28  ;;  %v5521_v28 = vld [vmem:[#allocation12 + $0x260] ss:$8 sps:$4 sm:$0xff]  }
 0x449   : > { %3718 = vmatprep.subr.bf16.mxu0 %v5508_v51  ;;  %v5581_v51 = vld [vmem:[#allocation13 + $0x78] sm:$0xff]  }
 0x44c   : > { %3719 = vmatpush1.bf16.msra.mxu0 %v5506_v52 }
 0x44d   : > { %3720 = vmatprep.subr.bf16.mxu0 %v5511_v53 }
 0x450   : > { %3721 = vmatpush1.bf16.msra.mxu0 %v5509_v54 }
 0x451   : > { %3722 = vmatprep.subr.bf16.mxu0 %v5514_v55 }
 0x454   : > { %3723 = vmatpush1.bf16.msra.mxu0 %v5512_v56 }
 0x455   : > { %3724 = vmatprep.subr.bf16.mxu0 %v5517_v58 }
 0x458   : > { %3725 = vmatpush1.bf16.msra.mxu0 %v5515_v60 }
 0x459   : > { %3726 = vmatprep.subr.bf16.mxu0 %v5520_v63 }
 0x45c   : > { %3727 = vmatpush1.bf16.msra.mxu0 %v5518_v61 }
 0x45d   : > { %3728 = vmatprep.subr.bf16.mxu0 %v5523_v0 }
 0x460   : > { %3729 = vmatpush1.bf16.msra.mxu0 %v5521_v28  ;;  %v5582_v28 = vld [vmem:[#allocation13 + $0x38] sm:$0xff]  }
 0x461   : > { %3730 = vmatprep.subr.bf16.mxu0 %v5526_v1 }
 0x464   : > { %3731 = vmatpush1.bf16.msra.mxu0 %v5524_v2 }
 0x465   : > { %3732 = vmatprep.subr.bf16.mxu0 %v5529_v3 }
 0x468   : > { %3733 = vmatpush1.bf16.msra.mxu0 %v5527_v4 }
 0x469   : > { %3734 = vmatprep.subr.bf16.mxu0 %v5532_v5 }
 0x46c   : > { %3735 = vmatpush1.bf16.msra.mxu0 %v5530_v6 }
 0x46d   : > { %3736 = vmatprep.subr.bf16.mxu0 %v5535_v7  ;;  %v3138_v7 = vld [vmem:[%s6305_s10] sm:$0x3] }
 0x470   : > { %3737 = vmatpush1.bf16.msra.mxu0 %v5533_v9  ;;  %v3143_v9 = vrot.slane %v3138_v7, %v6188_v57 }
 0x471   : > { %3738 = vmatprep.subr.bf16.mxu0 %v5538_v12  ;;  %v3147_v12 = vrot.slane %v3138_v7, %v6190_v59 }
 0x474   : > { %3739 = vmatpush1.bf16.msra.mxu0 %v5536_v27 }
 0x475   : > { %3740 = vmatprep.subr.bf16.mxu0 %v5541_v16 }
 0x478   : > { %3741 = vmatpush1.bf16.msra.mxu0 %v5539_v17 }
 0x479   : > { %3742 = vmatprep.subr.bf16.mxu0 %v5544_v14 }
 0x47c   : > { %3743 = vmatpush1.bf16.msra.mxu0 %v5542_v18 }
 0x47d   : > { %3744 = vmatprep.subr.bf16.mxu0 %v5547_v19 }
 0x480   : > { %3745 = vmatpush1.bf16.msra.mxu0 %v5545_v62 }
 0x481   : > { %3746 = vmatprep.subr.bf16.mxu0 %v5550_v20 }
 0x484   : > { %3747 = vmatpush1.bf16.msra.mxu0 %v5548_v21 }
 0x485   : > { %4793 = vmatprep.subr.bf16.mxu0 %v5553_v11 }
 0x487   : > { %3749 = vmatmul.mubr.bf16.vlgmr.msra.gmra.mrb[8].mxu0 %v6253_v36  ;;  %v2415_v36 = vld [vmem:[%s6303_s8] sm:$0x3] }
 0x488   : > { %4794 = vmatpush3.bf16.msra.mxu0 %v5554_v22  ;;  %v2420_v38 = vrot.slane %v2415_v36, %v6188_v57  ;;  %v2424_v23 = vrot.slane %v2415_v36, %v6190_v59 }
 0x489   : > { %4795 = vmatprep.subr.bf16.mxu0 %v5557_v24 }
 0x48c   : > { %4796 = vmatpush3.bf16.msra.mxu0 %v5558_v25 }
 0x48d   : > { %4797 = vmatprep.subr.bf16.mxu0 %v5561_v26 }
 0x490   : > { %4798 = vmatpush3.bf16.msra.mxu0 %v5562_v30 }
 0x491   : > { %4799 = vmatprep.subr.bf16.mxu0 %v5565_v31 }
 0x494   : > { %4800 = vmatpush3.bf16.msra.mxu0 %v5566_v32 }
 0x495   : > { %4801 = vmatprep.subr.bf16.mxu0 %v5569_v33 }
 0x498   : > { %4802 = vmatpush3.bf16.msra.mxu0 %v5570_v34 }
 0x499   : > { %4803 = vmatprep.subr.bf16.mxu0 %v5573_v10 }
 0x49a   : > { %v2304_v15 = vpop.f32.mrb[4].mxu0 }
 0x49b   : > { %v4823_v41 = vadd.f32 %v2304_v15, %v1697_v37  ;;  %v3027_v29 = vpop.f32.mrb[8].mxu1  ;;  %v2306_v13 = vpop.f32.mrb[5].mxu0 }
 0x49c   : > { %v4827_v42 = vadd.f32 %v3027_v29, %v2420_v38  ;;  %v4824_v43 = vadd.f32 %v2306_v13, %v1701_v39  ;;  %v3029_v44 = vpop.f32.mrb[9].mxu1  ;;  %v2308_v45 = vpop.f32.mrb[6].mxu0  ;;  %4804 = vmatpush3.bf16.msra.mxu0 %v5574_v40 }
 0x49d   : > { %v4828_v47 = vadd.f32 %v3029_v44, %v2424_v23  ;;  %v4825_v48 = vadd.f32 %v2308_v45, %v1697_v37  ;;  %v3031_v49 = vpop.f32.mrb[10].mxu1  ;;  %v2310_v50 = vpop.f32.mrb[7].mxu0  ;;  %4805 = vmatprep.subr.bf16.mxu0 %v5577_v8  ;;  %v2313_v55 = vmax.f32 %v4823_v41, 0.0  ;;  %v4761_v37 = vld [vmem:[%s6307_s12] ss:$0 sm:$0xff] }
 0x49e   : > { %v4829_v52 = vadd.f32 %v3031_v49, %v2420_v38  ;;  %v4826_v53 = vadd.f32 %v2310_v50, %v1701_v39  ;;  %v3033_v54 = vpop.f32.mrb[11].mxu1  ;;  %v3036_v60 = vmax.f32 %v4827_v42, 0.0  ;;  %v2314_v63 = vmax.f32 %v4824_v43, 0.0 }
 0x49f   : > { %v2315_v56 = vmax.f32 %v4825_v48, 0.0  ;;  %v4830_v58 = vadd.f32 %v3033_v54, %v2424_v23  ;;  %v3037_v1 = vmax.f32 %v4828_v47, 0.0 }
 0x4a0   : > { %v3038_v61 = vmax.f32 %v4829_v52, 0.0  ;;  %v2316_v0 = vmax.f32 %v4826_v53, 0.0  ;;  %4806 = vmatpush3.bf16.msra.mxu0 %v5578_v46 }
 0x4a1   : > { %v2317_v2 = vpack.c.bf16 %v2315_v56, %v2313_v55  ;;  %v3039_v3 = vmax.f32 %v4830_v58, 0.0  ;;  %4807 = vmatprep.subr.bf16.mxu0 %v5581_v51 }
 0x4a2   : > { %v3040_v4 = vpack.c.bf16 %v3038_v61, %v3036_v60  ;;  %v2318_v5 = vpack.c.bf16 %v2316_v0, %v2314_v63 }
 0x4a3   : > { %v3041_v6 = vpack.c.bf16 %v3039_v3, %v3037_v1 }
 0x4a4   : > { %4808 = vmatpush3.bf16.msra.mxu0 %v5582_v28  ;;  %4107 = vmatprep.mubr.bf16.mxu0 %v2318_v5 }
 0x4a5   : > { %3970 = vmatprep.mubr.bf16.mxu1 %v3041_v6 }
 0x4a6   : > { %3971 = vmatmul.mubr.bf16.vlgmr.msra.gmra.mrb[12].mxu1 %v3040_v4 }
 0x4a7   : > { %4108 = vmatmul.mubr.bf16.vlgmr.msra.gmra.mrb[12].mxu0 %v2317_v2 }
 0x55a   : > { %v3750_v27 = vpop.f32.mrb[8].mxu0 }
 0x55b   : > { %v4831_v16 = vadd.f32 %v3750_v27, %v3143_v9  ;;  %v3752_v17 = vpop.f32.mrb[9].mxu0 }
 0x55c   : > { %v4832_v14 = vadd.f32 %v3752_v17, %v3147_v12  ;;  %v3754_v18 = vpop.f32.mrb[10].mxu0 }
 0x55d   : > { %v3759_v19 = vmax.f32 %v4831_v16, 0.0  ;;  %v4833_v62 = vadd.f32 %v3754_v18, %v3143_v9  ;;  %v3756_v20 = vpop.f32.mrb[11].mxu0 }
 0x55e   : > { %v3760_v21 = vmax.f32 %v4832_v14, 0.0  ;;  %v4834_v11 = vadd.f32 %v3756_v20, %v3147_v12 }
 0x55f   : > { %v3761_v22 = vmax.f32 %v4833_v62, 0.0 }
 0x560   : > { %v4769_v57 = vpack.c.bf16 %v3760_v21, %v3759_v19  ;;  %v3762_v24 = vmax.f32 %v4834_v11, 0.0 }
 0x562   : > { %3775 = vst [vmem:[%s588_s28] sm:$0xff] %v4769_v57  ;;  %v4770_v59 = vpack.c.bf16 %v3762_v24, %v3761_v22 }
 0x564   : > { %3776 = vst [vmem:[%s588_s28 + $0x8] sm:$0xff] %v4770_v59 }
 0x579   : > { %v4787_v25 = vpop.f32.mrb[12].mxu1 }
 0x57a   : > { %v4788_v26 = vpop.f32.mrb[13].mxu1  ;;  %v4809_v30 = vpop.f32.mrb[12].mxu0 }
 0x57b   : > { %v4789_v31 = vadd.f32 %v4788_v26, %v4787_v25  ;;  %v4790_v32 = vpop.f32.mrb[14].mxu1  ;;  %v4810_v33 = vpop.f32.mrb[13].mxu0 }
 0x57c   : > { %v4791_v34 = vpop.f32.mrb[15].mxu1  ;;  %v4811_v35 = vadd.f32 %v4810_v33, %v4809_v30  ;;  %v4812_v36 = vpop.f32.mrb[14].mxu0 }
 0x57d   : > { %v4792_v10 = vadd.f32 %v4791_v34, %v4790_v32  ;;  %v4813_v38 = vpop.f32.mrb[15].mxu0 }
 0x57e   : > { %v4110_v39 = vadd.f32 %v4811_v35, %v4789_v31  ;;  %v4814_v40 = vadd.f32 %v4813_v38, %v4812_v36 }
 0x580   : > { %v4123_v23 = vadd.f32 %v4761_v37, %v4110_v39  ;;  %v4113_v8 = vadd.f32 %v4814_v40, %v4792_v10 }
 0x582   : > { %v4762_v15 = vmul.f32 -1.442695, %v4123_v23  ;;  %v4124_v41 = vadd.f32 %v4761_v37, %v4113_v8 }
 0x584   : > { %5583 = vpow2.f32 %v4762_v15  ;;  %v4763_v29 = vmul.f32 -1.442695, %v4124_v41 }
 0x586   : > { %5585 = vpow2.f32 %v4763_v29 }
 0x58e   : > { %v5584_v13 = vpop.eup %5583 }
 0x58f   : > { %v4131_v42 = vadd.f32 1.0, %v5584_v13 }
 0x590   : > { %v5586_v43 = vpop.eup %5585 }
 0x591   : > { %5587 = vrcp.f32 %v4131_v42  ;;  %v4132_v44 = vadd.f32 1.0, %v5586_v43 }
 0x593   : > { %5589 = vrcp.f32 %v4132_v44 }
 0x59b   : > { %v5588_v45 = vpop.eup %5587 }
 0x59c   : > { %4137 = vst [vmem:[%s593_s20] sm:$0xff] %v5588_v45 }
 0x59d   : > { %v5590_v46 = vpop.eup %5589 }
 0x59e   : > { %4138 = vst [vmem:[%s593_s20 + $0x8] sm:$0xff] %v5590_v46 }
 0x59f PF: > { %s6338_s18 = sld [smem:[#allocation20_spill]] }
 0x5a5   : > { %s30_s29 = sadd.s32 1, %s6338_s18  }
 0x5a6   : > { %p27_p11 = scmp.ge.s32.totalorder %s30_s29, 4  }
 0x5a8   :  { %29 = sbr.rel (!%p27_p11) target bundleno = 9 (0x9), region = 148 }
 0x5af   :  { %4176 = vsyncpa [#allocation3], 1 }
 0x5b0   :  { %4178 = vsyncpa [#allocation3 + $0x1], 1 }
 0x5b1   :  { %4179 = vsyncpa [#allocation5], 1 }
 0x5b2   :  { %4180 = vsyncpa [#allocation8], 1 }
 0x5b3   :  { %4181 = vsyncpa [#allocation11], 1 }
 0x5b4   :  { %4182 = vsyncpa [#allocation14], 1 }

// kernel: bmn_forward.9
= control target key start
LH: loop header
LB: loop body
LE: loop exit
PB: predicated region body
PF: predicated region fallthrough
CT: control target
= control target key end

     0   :  { %s4206_s18 = smov 0   ;;  %s4208_s19 = smov 0   ;;  %s5354_s0 = inlined_call_operand.vmem [shape: bf16[2,16,16,128], index: 0, kind: input, shape index: {}]   ;;  %s5355_s1 = inlined_call_operand.vmem [shape: bf16[3,384,128], index: 1, kind: input, shape index: {}]   ;;  %s5356_s2 = inlined_call_operand.vmem [shape: f32[1,128], index: 2, kind: input, shape index: {}]   ;;  %s5357_s3 = inlined_call_operand.vmem [shape: bf16[128,128], index: 3, kind: input, shape index: {}]   ;;  %s5358_s4 = inlined_call_operand.vmem [shape: f32[1,128], index: 4, kind: input, shape index: {}]   ;;  %s5359_s5 = inlined_call_operand.vmem [shape: f32[2,16,16,128], index: 5, kind: output, shape index: {}]  }
   0x1   :  { %s4210_s20 = smov 0  }
   0x2 LB: > { %s27_s21 = sadd.s32 1, %s4169_s19  ;;  %p2879_p0 = scmp.ge.s32.totalorder %s4173_s20, 1  ;;  %s4173_s20 = sphi %s4210_s20, %s15_s20   ;;  %s4169_s19 = sphi %s4208_s19, %s5383_s19   ;;  %s4165_s18 = sphi %s4206_s18, %s5382_s18  }
   0x3   : > { %p29_p1 = scmp.ge.s32.totalorder %s27_s21, 2  ;;  %p201_p2 = scmp.lt.s32.totalorder %s4173_s20, 3 }
   0x5   : > { %s5385_s21 = smov (%p29_p1, %s27_s21), 0  ;;  %p202_p3 = pnand %p2879_p0, %p201_p2 }
   0x6   : > { %v3927_v0 = vld [vmem:[%s5355_s1 + $0x100] sm:$0xff] (!%p202_p3)   ;;  %v3930_v3 = vld [vmem:[%s5355_s1 + $0x108] sm:$0xff] (!%p202_p3)   ;;  %v3933_v6 = vld [vmem:[%s5355_s1 + $0x110] sm:$0xff] (!%p202_p3)   ;;  %p234_p4 = scmp.lt.s32.totalorder (!%p202_p3), %s4165_s18, 1  ;;  %vm624_vm0 = vcmask (!%p202_p3), 1047552   ;;  %vm549_vm1 = vcmask (!%p202_p3), 1040384  }
   0x7   : > { %205 = sbr.rel (%p202_p3) target bundleno = 823 (0x337), region = 40  ;;  %v3928_v1 = vld [vmem:[%s5355_s1 + $0x140] sm:$0xff] (!%p202_p3)   ;;  %3118 = vmatprep.subr.bf16.mxu0 (!%p202_p3), %v3927_v0  ;;  %v3931_v4 = vld [vmem:[%s5355_s1 + $0x148] sm:$0xff] (!%p202_p3)   ;;  %v3934_v7 = vld [vmem:[%s5355_s1 + $0x150] sm:$0xff] (!%p202_p3)   ;;  %vm625_vm2 = vsmask.f32 (!%p202_p3), 7424 }
   0x8   : > { %v3929_v2 = vld [vmem:[%s5355_s1 + $0xc0] sm:$0xff] (!%p202_p3)   ;;  %3550 = vmatprep.subr.bf16.mxu1 (!%p202_p3), %v3928_v1  ;;  %v3932_v5 = vld [vmem:[%s5355_s1 + $0xc8] sm:$0xff] (!%p202_p3)   ;;  %v3935_v8 = vld [vmem:[%s5355_s1 + $0xd0] sm:$0xff] (!%p202_p3)   ;;  %vm550_vm3 = vsmask.f32 (!%p202_p3), 256 }
   0x9   : > { %3119 = vmatpush3.bf16.msra.mxu0 (!%p202_p3), %v3929_v2  ;;  %3551 = vmatpush3.bf16.msra.mxu1 (!%p202_p3), %v3928_v1  ;;  %v3936_v9 = vld [vmem:[%s5355_s1 + $0x118] sm:$0xff] (!%p202_p3)   ;;  %v3939_v12 = vld [vmem:[%s5355_s1 + $0x120] sm:$0xff] (!%p202_p3)   ;;  %v3942_v15 = vld [vmem:[%s5355_s1 + $0x128] sm:$0xff] (!%p202_p3)  }
   0xa   : > { %3120 = vmatprep.subr.bf16.mxu0 (!%p202_p3), %v3930_v3  ;;  %3552 = vmatprep.subr.bf16.mxu1 (!%p202_p3), %v3931_v4  ;;  %v3937_v10 = vld [vmem:[%s5355_s1 + $0x158] sm:$0xff] (!%p202_p3)   ;;  %v3940_v13 = vld [vmem:[%s5355_s1 + $0x160] sm:$0xff] (!%p202_p3)   ;;  %v3943_v16 = vld [vmem:[%s5355_s1 + $0x168] sm:$0xff] (!%p202_p3)  }
   0xb   : > { %v3938_v11 = vld [vmem:[%s5355_s1 + $0xd8] sm:$0xff] (!%p202_p3)   ;;  %v3941_v14 = vld [vmem:[%s5355_s1 + $0xe0] sm:$0xff] (!%p202_p3)   ;;  %v3944_v17 = vld [vmem:[%s5355_s1 + $0xe8] sm:$0xff] (!%p202_p3)  }
   0xc   : > { %v3945_v18 = vld [vmem:[%s5355_s1 + $0x130] sm:$0xff] (!%p202_p3)   ;;  %v3948_v21 = vld [vmem:[%s5355_s1 + $0x138] sm:$0xff] (!%p202_p3)   ;;  %vm4314_vm4 = vmand (!%p202_p3), %vm624_vm0, %vm625_vm2 }
   0xd   : > { %3121 = vmatpush3.bf16.msra.mxu0 (!%p202_p3), %v3932_v5  ;;  %3553 = vmatpush3.bf16.msra.mxu1 (!%p202_p3), %v3931_v4  ;;  %v3946_v19 = vld [vmem:[%s5355_s1 + $0x170] sm:$0xff] (!%p202_p3)   ;;  %v3949_v22 = vld [vmem:[%s5355_s1 + $0x178] sm:$0xff] (!%p202_p3)   ;;  %vm4322_vm5 = vmand (!%p202_p3), %vm549_vm1, %vm550_vm3 }
   0xe   : > { %3122 = vmatprep.subr.bf16.mxu0 %v3933_v6  ;;  %3554 = vmatprep.subr.bf16.mxu1 %v3934_v7  ;;  %s5387_s18 = smov (!%p234_p4, %s4165_s18), 1  ;;  %v3947_v20 = vld [vmem:[%s5355_s1 + $0xf0] sm:$0xff]   ;;  %v3950_v28 = vld [vmem:[%s5355_s1 + $0xf8] sm:$0xff]   ;;  %v3953_v34 = vld [vmem:[%s5355_s1 + $0x40] sm:$0xff]  }
   0xf   : > { %s3116_s10 = sshll.u32 %s5387_s18, 7  ;;  %v3954_v44 = vld [vmem:[%s5355_s1] sm:$0xff]   ;;  %v3957_v50 = vld [vmem:[%s5355_s1 + $0x48] sm:$0xff]   ;;  %v3961_v63 = vld [vmem:[%s5355_s1 + $0x50] sm:$0xff]   ;;  %s3117_s24 = sshll.u32 %s5387_s18, 8 }
  0x10   : > { %s4294_s23 = scalar_lea.vmem %s5354_s0, %s3116_s10  ;;  %v3958_v55 = vld [vmem:[%s5355_s1 + $0x8] sm:$0xff]   ;;  %v3962_v4 = vld [vmem:[%s5355_s1 + $0x10] sm:$0xff]   ;;  %s5292_s27 = scalar_lea.vmem %s5359_s5, %s3117_s24 }
  0x11   : > { %3123 = vmatpush3.bf16.msra.mxu0 %v3935_v8  ;;  %3555 = vmatpush3.bf16.msra.mxu1 %v3934_v7  ;;  %v4306_v23 = vld [vmem:[%s4294_s23] sm:$0xff]   ;;  %v4312_v26 = vld [vmem:[%s4294_s23 + $0x8] sm:$0xff]   ;;  %v4332_v38 = vld [vmem:[%s4294_s23 + $0x10] sm:$0xff]  }
  0x12   : > { %3124 = vmatprep.subr.bf16.mxu0 %v3936_v9  ;;  %3556 = vmatprep.subr.bf16.mxu1 %v3937_v10  ;;  %v413_v24 = vshrl.u32 %v4306_v23, 16  ;;  %v416_v25 = vshll.u32 %v4306_v23, 16  ;;  %v420_v32 = vshrl.u32 %v4312_v26, 16  ;;  %v423_v33 = vshll.u32 %v4312_v26, 16  ;;  %v4335_v40 = vld [vmem:[%s4294_s23 + $0x18] sm:$0xff]   ;;  %v4361_v52 = vld [vmem:[%s4294_s23 + $0x20] sm:$0xff]  }
  0x13   : > { %936 = vmatprep.mubr.bf16.mxu0 %v4306_v23  ;;  %v427_v45 = vshrl.u32 %v4332_v38, 16  ;;  %v430_v46 = vshll.u32 %v4332_v38, 16  ;;  %v434_v48 = vshrl.u32 %v4335_v40, 16  ;;  %v437_v49 = vshll.u32 %v4335_v40, 16  ;;  %v4378_v61 = vld [vmem:[%s4294_s23 + $0x28] sm:$0xff]   ;;  %v4398_v5 = vld [vmem:[%s4294_s23 + $0x30] sm:$0xff]  }
  0x14   : > { %v572_v29 = vrot.slane %v416_v25, 1  ;;  %v415_v30 = vrot.slane %v413_v24, 7  ;;  %v574_v37 = vrot.slane %v423_v33, 1  ;;  %v422_v39 = vrot.slane %v420_v32, 7  ;;  %v4405_v8 = vld [vmem:[%s4294_s23 + $0x38] sm:$0xff]   ;;  %v4009_v27 = vld [vmem:[%s5355_s1 + $0x210] sm:$0xff]  }
  0x15   : > { %3125 = vmatpush3.bf16.msra.mxu0 %v3938_v11  ;;  %3557 = vmatpush3.bf16.msra.mxu1 %v3937_v10  ;;  %v576_v53 = vrot.slane %v430_v46, 1  ;;  %v578_v54 = vrot.slane %v437_v49, 1  ;;  %v441_v56 = vshrl.u32 %v4361_v52, 16  ;;  %v444_v57 = vshll.u32 %v4361_v52, 16 }
  0x16   : > { %3126 = vmatprep.subr.bf16.mxu0 %v3939_v12  ;;  %3558 = vmatprep.subr.bf16.mxu1 %v3940_v13  ;;  %v573_v35 = vor.u32 %v572_v29, %v413_v24  ;;  %v418_v36 = vor.u32 %v416_v25, %v415_v30  ;;  %v575_v43 = vor.u32 %v574_v37, %v420_v32  ;;  %v429_v2 = vrot.slane %v427_v45, 7  ;;  %v3969_v25 = vld [vmem:[%s5355_s1 + $0x60] sm:$0xff]   ;;  %v4451_v32 = vld [vmem:[%s4294_s23 + $0x48] sm:$0xff]  }
  0x17   : > { %v425_v47 = vor.u32 %v423_v33, %v422_v39  ;;  %v577_v58 = vor.u32 %v576_v53, %v427_v45  ;;  %v579_v60 = vor.u32 %v578_v54, %v434_v48  ;;  %v580_v62 = vrot.slane %v444_v57, 1  ;;  %v3974_v54 = vld [vmem:[%s5355_s1 + $0x28] sm:$0xff]  }
  0x18   : > { %v4339_v41 = vsel %vm4314_vm4, %v573_v35, 0  ;;  %v4343_v42 = vsel %vm4322_vm5, 0, %v418_v36  ;;  %v4358_v51 = vsel %vm4314_vm4, %v575_v43, 0  ;;  %v448_v3 = vshrl.u32 %v4378_v61, 16  ;;  %v3970_v36 = vld [vmem:[%s5355_s1 + $0x20] sm:$0xff]   ;;  %v4468_v43 = vld [vmem:[%s4294_s23 + $0x50] sm:$0xff]  }
  0x19   : > { %3127 = vmatpush3.bf16.msra.mxu0 %v3941_v14  ;;  %3559 = vmatpush3.bf16.msra.mxu1 %v3940_v13  ;;  %v4375_v59 = vsel %vm4322_vm5, 0, %v425_v47  ;;  %v4387_v0 = vsel %vm4314_vm4, %v577_v58, 0  ;;  %v4391_v1 = vsel %vm4314_vm4, %v579_v60, 0  ;;  %v581_v6 = vor.u32 %v580_v62, %v441_v56 }
  0x1a   : > { %3128 = vmatprep.subr.bf16.mxu0 %v3942_v15  ;;  %3560 = vmatprep.subr.bf16.mxu1 %v3943_v16  ;;  %v451_v7 = vshll.u32 %v4378_v61, 16  ;;  %v455_v9 = vshrl.u32 %v4398_v5, 16  ;;  %v458_v10 = vshll.u32 %v4398_v5, 16  ;;  %v432_v13 = vor.u32 %v430_v46, %v429_v2  ;;  %v4510_v2 = vld [vmem:[%s4294_s23 + $0x60] sm:$0xff]  }
  0x1b   : > { %3566 = vmatprep.mubr.bf16.mxu1 %v4339_v41  ;;  %v4411_v11 = vsel %vm4314_vm4, %v581_v6, 0  ;;  %v465_v15 = vshll.u32 %v4405_v8, 16  ;;  %v5367_v45 = vshll.u32 %v4468_v43, 16  ;;  %v443_v47 = vrot.slane %v441_v56, 7  ;;  %v4498_v56 = vld [vmem:[%s4294_s23 + $0x58] sm:$0xff]  }
  0x1c   : > { %v582_v12 = vrot.slane %v451_v7, 1  ;;  %v584_v14 = vrot.slane %v458_v10, 1  ;;  %v476_v53 = vshrl.u32 %v4451_v32, 16  ;;  %v5368_v58 = vshrl.u32 %v4468_v43, 16 }
  0x1d   : > { %3129 = vmatpush3.bf16.msra.mxu0 %v3944_v17  ;;  %3561 = vmatpush3.bf16.msra.mxu1 %v3943_v16  ;;  %v3965_v16 = vld [vmem:[%s5355_s1 + $0x58] sm:$0xff]   ;;  %v586_v24 = vrot.slane %v465_v15, 1  ;;  %v592_v60 = vrot.slane %v5367_v45, 1 }
  0x1e   : > { %3130 = vmatprep.subr.bf16.mxu0 %v3945_v18  ;;  %3562 = vmatprep.subr.bf16.mxu1 %v3946_v19  ;;  %v583_v17 = vor.u32 %v582_v12, %v448_v3  ;;  %v585_v18 = vor.u32 %v584_v14, %v455_v9  ;;  %v5365_v12 = vshll.u32 %v4498_v56, 16  ;;  %v4528_v14 = vld [vmem:[%s4294_s23 + $0x68] sm:$0xff]   ;;  %v3993_v45 = vld [vmem:[%s5355_s1 + $0x198] sm:$0xff]  }
  0x20   : > { %v4447_v29 = vsel %vm4314_vm4, %v583_v17, 0  ;;  %v4455_v33 = vsel %vm4314_vm4, %v585_v18, 0  ;;  %v5361_v17 = vshll.u32 %v4510_v2, 16  ;;  %v450_v18 = vrot.slane %v448_v3, 7  ;;  %v3982_v3 = vld [vmem:[%s5355_s1 + $0x38] sm:$0xff]  }
  0x21   : > { %3131 = vmatpush3.bf16.msra.mxu0 %v3947_v20  ;;  %3563 = vmatpush3.bf16.msra.mxu1 %v3946_v19  ;;  %v436_v19 = vrot.slane %v434_v48, 7  ;;  %v462_v20 = vshrl.u32 %v4405_v8, 16  ;;  %v3973_v48 = vld [vmem:[%s5355_s1 + $0x68] sm:$0xff]  }
  0x22   : > { %3132 = vmatprep.subr.bf16.mxu0 %v3948_v21  ;;  %3564 = vmatprep.subr.bf16.mxu1 %v3949_v22  ;;  %v3966_v21 = vld [vmem:[%s5355_s1 + $0x18] sm:$0xff]  }
  0x23   : > { %v439_v37 = vor.u32 %v437_v49, %v436_v19  ;;  %v587_v39 = vor.u32 %v586_v24, %v462_v20  ;;  %v5366_v19 = vshrl.u32 %v4498_v56, 16 }
  0x25   : > { %3133 = vmatpush3.bf16.msra.mxu0 %v3950_v28  ;;  %3565 = vmatpush3.bf16.msra.mxu1 %v3949_v22  ;;  %v4434_v22 = vld [vmem:[%s4294_s23 + $0x40] sm:$0xff]   ;;  %v4443_v28 = vsel %vm4322_vm5, 0, %v432_v13  ;;  %v4485_v49 = vsel %vm4322_vm5, 0, %v439_v37  ;;  %v593_v13 = vor.u32 %v592_v60, %v5368_v58 }
  0x26   : > { %3254 = vmatprep.subr.bf16.mxu1 %v3953_v34  ;;  %v472_v30 = vshll.u32 %v4434_v22, 16  ;;  %v469_v34 = vshrl.u32 %v4434_v22, 16 }
  0x27   : > { %v4554_v37 = vsel %vm4314_vm4, %v593_v13, 0 }
  0x28   : > { %937 = vmatmul.mubr.bf16.vlgmr.msra.gmra.mrb[0].mxu0 %v4343_v42  ;;  %3567 = vmatmul.mubr.bf16.vlgmr.msra.gmra.mrb[0].mxu1 %v4358_v51  ;;  %v588_v35 = vrot.slane %v472_v30, 1 }
  0x29   : > { %3255 = vmatpush3.bf16.msra.mxu1 %v3954_v44  ;;  %944 = vmatprep.mubr.bf16.mxu0 %v4312_v26  ;;  %v479_v44 = vshll.u32 %v4451_v32, 16 }
  0x2a   : > { %3256 = vmatprep.subr.bf16.mxu1 %v3957_v50  ;;  %3570 = vmatprep.mubr.bf16.mxu1 %v4387_v0  ;;  %v589_v46 = vor.u32 %v588_v35, %v469_v34  ;;  %v4489_v50 = vsel %vm4314_vm4, %v587_v39, 0  ;;  %v594_v35 = vrot.slane %v5365_v12, 1  ;;  %v5362_v39 = vshrl.u32 %v4510_v2, 16 }
  0x2c   : > { %v4505_v62 = vsel %vm4314_vm4, %v589_v46, 0  ;;  %v5360_v46 = vshll.u32 %v4528_v14, 16 }
  0x2d   : > { %3257 = vmatpush3.bf16.msra.mxu1 %v3958_v55  ;;  %v590_v55 = vrot.slane %v479_v44, 1 }
  0x2e   : > { %3258 = vmatprep.subr.bf16.mxu1 %v3961_v63  ;;  %v446_v63 = vor.u32 %v444_v57, %v443_v47  ;;  %v3978_v57 = vld [vmem:[%s5355_s1 + $0x30] sm:$0xff]  }
  0x2f   : > { %v591_v6 = vor.u32 %v590_v55, %v476_v53  ;;  %v4559_v47 = vld [vmem:[%s4294_s23 + $0x70] sm:$0xff]   ;;  %v3984_v55 = vld [vmem:[%s5355_s1 + $0x180] sm:$0xff]  }
  0x30   : > { %945 = vmatmul.mubr.bf16.gmra.mrb[4].mxu0 %v4375_v59  ;;  %3571 = vmatmul.mubr.bf16.gmra.mrb[4].mxu1 %v4391_v1  ;;  %v514_v13 = vshll.u32 %v4559_v47, 16 }
  0x31   : > { %952 = vmatprep.mubr.bf16.mxu0 %v4332_v38  ;;  %3574 = vmatprep.mubr.bf16.mxu1 %v4411_v11 }
  0x32   : > { %3259 = vmatpush3.bf16.msra.mxu1 %v3962_v4  ;;  %v3977_v4 = vld [vmem:[%s5355_s1 + $0x70] sm:$0xff]  }
  0x33   : > { %3260 = vmatprep.subr.bf16.mxu1 %v3965_v16  ;;  %v4532_v16 = vsel %vm4322_vm5, 0, %v446_v63  ;;  %v453_v63 = vor.u32 %v451_v7, %v450_v18  ;;  %v4588_v7 = vld [vmem:[%s5355_s1 + $0x80] sm:$0xff]  }
  0x36   : > { %3261 = vmatpush3.bf16.msra.mxu1 %v3966_v21  ;;  %v4175_v21 = vmov 0  }
  0x37   : > { %3262 = vmatprep.subr.bf16.mxu1 %v3969_v25  ;;  %v4538_v24 = vcombine.low %v4175_v21, %v4175_v21  ;;  %v4542_v25 = vsel %vm4314_vm4, %v591_v6, 0  ;;  %v457_v6 = vrot.slane %v455_v9, 7  ;;  %v4583_v21 = vld [vmem:[%s4294_s23 + $0x78] sm:$0xff]   ;;  %v598_v9 = vrot.slane %v5360_v46, 1 }
  0x38   : > { %953 = vmatmul.mubr.bf16.gmra.mrb[8].mxu0 %v4443_v28  ;;  %3575 = vmatmul.mubr.bf16.gmra.mrb[8].mxu1 %v4447_v29  ;;  %v600_v46 = vrot.slane %v514_v13, 1 }
  0x39   : > { %960 = vmatprep.mubr.bf16.mxu0 %v4335_v40  ;;  %3578 = vmatprep.mubr.bf16.mxu1 %v4455_v33  ;;  %v5363_v60 = vshrl.u32 %v4538_v24, 16  ;;  %v5381_v31 = vshrl.u32 %v4538_v24, 16 }
  0x3a   : > { %3263 = vmatpush3.bf16.msra.mxu1 %v3970_v36  ;;  %v3981_v36 = vld [vmem:[%s5355_s1 + $0x78] sm:$0xff]  }
  0x3b   : > { %3264 = vmatprep.subr.bf16.mxu1 %v3973_v48  ;;  %v596_v48 = vrot.slane %v5361_v17, 1 }
  0x3d   : > { %v597_v18 = vor.u32 %v596_v48, %v5362_v39 }
  0x3e   : > { %3265 = vmatpush3.bf16.msra.mxu1 %v3974_v54  ;;  %v3983_v54 = vld [vmem:[%s5355_s1 + $0x1c0] sm:$0xff]  }
  0x3f   : > { %3266 = vmatprep.subr.bf16.mxu1 %v3977_v4  ;;  %v595_v4 = vor.u32 %v594_v35, %v5366_v19  ;;  %3390 = vmatprep.subr.bf16.mxu0 %v3983_v54  ;;  %v3986_v35 = vld [vmem:[%s5355_s1 + $0x1c8] sm:$0xff]   ;;  %v460_v54 = vor.u32 %v458_v10, %v457_v6  ;;  %v4614_v17 = vsel %vm4314_vm4, %v597_v18, 0  ;;  %v3989_v10 = vld [vmem:[%s5355_s1 + $0x1d0] sm:$0xff]   ;;  %v521_v6 = vshll.u32 %v4583_v21, 16 }
  0x40   : > { %961 = vmatmul.mubr.bf16.gmra.mrb[12].mxu0 %v4485_v49  ;;  %3579 = vmatmul.mubr.bf16.gmra.mrb[12].mxu1 %v4489_v50  ;;  %v3990_v18 = vld [vmem:[%s5355_s1 + $0x190] sm:$0xff]  }
  0x41   : > { %968 = vmatprep.mubr.bf16.mxu0 %v4361_v52  ;;  %3582 = vmatprep.mubr.bf16.mxu1 %v4505_v62  ;;  %v4607_v48 = vsel %vm4314_vm4, %v595_v4, 0  ;;  %v409_v4 = vshll.u32 %v4538_v24, 16  ;;  %v602_v19 = vrot.slane %v521_v6, 1 }
  0x42   : > { %3267 = vmatpush3.bf16.msra.mxu1 %v3978_v57  ;;  %v5364_v57 = vshrl.u32 %v4528_v14, 16  ;;  %3391 = vmatpush3.bf16.msra.mxu0 %v3984_v55  ;;  %v511_v55 = vshrl.u32 %v4559_v47, 16 }
  0x43   : > { %3268 = vmatprep.subr.bf16.mxu1 %v3981_v36  ;;  %v3987_v36 = vld [vmem:[%s5355_s1 + $0x188] sm:$0xff]   ;;  %3392 = vmatprep.subr.bf16.mxu0 %v3986_v35  ;;  %v3992_v35 = vld [vmem:[%s5355_s1 + $0x1d8] sm:$0xff]  }
  0x44   : > { %v599_v39 = vor.u32 %v598_v9, %v5364_v57  ;;  %v4632_v9 = vsel %vm4322_vm5, 0, %v460_v54  ;;  %v513_v57 = vrot.slane %v511_v55, 7  ;;  %v518_v54 = vshrl.u32 %v4583_v21, 16 }
  0x46   : > { %3269 = vmatpush3.bf16.msra.mxu1 %v3982_v3  ;;  %v4603_v3 = vsel %vm4322_vm5, 0, %v453_v63  ;;  %v408_v63 = vrot.slane %v5363_v60, 7  ;;  %3393 = vmatpush3.bf16.msra.mxu0 %v3987_v36  ;;  %v601_v36 = vor.u32 %v600_v46, %v511_v55  ;;  %v464_v60 = vrot.slane %v462_v20, 7 }
  0x47   : > { %3598 = vmatprep.subr.bf16.mxu1 %v4588_v7  ;;  %v4643_v12 = vsel %vm4314_vm4, %v599_v39, 0  ;;  %3394 = vmatprep.subr.bf16.mxu0 %v3989_v10  ;;  %v516_v58 = vor.u32 %v514_v13, %v513_v57  ;;  %v3995_v39 = vld [vmem:[%s5355_s1 + $0x1e0] sm:$0xff]   ;;  %v520_v55 = vrot.slane %v518_v54, 7  ;;  %v3997_v13 = vld [vmem:[%s5355_s1 + $0x1e8] sm:$0xff]  }
  0x48   : > { %969 = vmatmul.mubr.bf16.gmra.mrb[16].mxu0 %v4532_v16  ;;  %3583 = vmatmul.mubr.bf16.gmra.mrb[16].mxu1 %v4542_v25  ;;  %v4651_v46 = vsel %vm4314_vm4, %v601_v36, 0  ;;  %v3996_v10 = vld [vmem:[%s5355_s1 + $0x1a0] sm:$0xff]   ;;  %v467_v57 = vor.u32 %v465_v15, %v464_v60 }
  0x49   : > { %976 = vmatprep.mubr.bf16.mxu0 %v4378_v61  ;;  %3586 = vmatprep.mubr.bf16.mxu1 %v4554_v37  ;;  %v4655_v20 = vsel %vm4322_vm5, 0, %v516_v58  ;;  %v471_v58 = vrot.slane %v469_v34, 7  ;;  %v3998_v34 = vld [vmem:[%s5355_s1 + $0x1a8] sm:$0xff]  }
  0x4a   : > { %3395 = vmatpush3.bf16.msra.mxu0 %v3990_v18  ;;  %v523_v18 = vor.u32 %v521_v6, %v520_v55  ;;  %v4685_v60 = vsel %vm4322_vm5, 0, %v467_v57  ;;  %v3999_v6 = vld [vmem:[%s5355_s1 + $0x1f0] sm:$0xff]   ;;  %v4002_v55 = vld [vmem:[%s5355_s1 + $0x1b8] sm:$0xff]   ;;  %v3988_v57 = vld [vmem:[%s5355_s1 + $0x88] sm:$0xff]  }
  0x4b   : > { %3396 = vmatprep.subr.bf16.mxu0 %v3992_v35  ;;  %v411_v35 = vor.u32 %v409_v4, %v408_v63 }
  0x4c   : > { %v4678_v15 = vsel %vm4322_vm5, 0, %v523_v18  ;;  %v5373_v18 = vshrl.u32 %v4468_v43, 16 }
  0x4d   : > { %v4698_v36 = vsel %vm4322_vm5, 0, %v411_v35  ;;  %v4003_v35 = vld [vmem:[%s5355_s1 + $0xa0] sm:$0xff]  }
  0x4e   : > { %3397 = vmatpush3.bf16.msra.mxu0 %v3993_v45  ;;  %v603_v45 = vor.u32 %v602_v19, %v518_v54  ;;  %v474_v19 = vor.u32 %v472_v30, %v471_v58  ;;  %v4000_v54 = vld [vmem:[%s5355_s1 + $0x1b0] sm:$0xff]  }
  0x4f   : > { %3398 = vmatprep.subr.bf16.mxu0 %v3995_v39  ;;  %v4001_v39 = vld [vmem:[%s5355_s1 + $0x1f8] sm:$0xff]  }
  0x50   : > { %977 = vmatmul.mubr.bf16.gmra.mrb[20].mxu0 %v4603_v3  ;;  %3587 = vmatmul.mubr.bf16.gmra.mrb[20].mxu1 %v4607_v48  ;;  %v4691_v63 = vsel %vm4314_vm4, %v603_v45, 0  ;;  %v4707_v30 = vsel %vm4322_vm5, 0, %v474_v19  ;;  %v485_v45 = vrot.slane %v5373_v18, 7  ;;  %v5375_v19 = vshrl.u32 %v4498_v56, 16 }
  0x51   : > { %984 = vmatprep.mubr.bf16.mxu0 %v4398_v5  ;;  %3590 = vmatprep.mubr.bf16.mxu1 %v4614_v17  ;;  %v5378_v18 = vshll.u32 %v4510_v2, 16 }
  0x52   : > { %3399 = vmatpush3.bf16.msra.mxu0 %v3996_v10  ;;  %v478_v10 = vrot.slane %v476_v53, 7  ;;  %v3991_v53 = vld [vmem:[%s5355_s1 + $0x90] sm:$0xff]  }
  0x53   : > { %3400 = vmatprep.subr.bf16.mxu0 %v3997_v13 }
  0x54   : > { %v481_v58 = vor.u32 %v479_v44, %v478_v10  ;;  %v3994_v44 = vld [vmem:[%s5355_s1 + $0x98] sm:$0xff]  }
  0x56   : > { %3401 = vmatpush3.bf16.msra.mxu0 %v3998_v34  ;;  %v4734_v13 = vsel %vm4322_vm5, 0, %v481_v58 }
  0x57   : > { %3402 = vmatprep.subr.bf16.mxu0 %v3999_v6  ;;  %v4004_v6 = vld [vmem:[%s5355_s1 + $0xa8] sm:$0xff]  }
  0x58   : > { %985 = vmatmul.mubr.bf16.gmra.mrb[24].mxu0 %v4632_v9  ;;  %3591 = vmatmul.mubr.bf16.gmra.mrb[24].mxu1 %v4643_v12 }
  0x59   : > { %992 = vmatprep.mubr.bf16.mxu0 %v4405_v8  ;;  %3594 = vmatprep.mubr.bf16.mxu1 %v4651_v46 }
  0x5a   : > { %3403 = vmatpush3.bf16.msra.mxu0 %v4000_v54  ;;  %v5376_v54 = vshll.u32 %v4498_v56, 16 }
  0x5b   : > { %3404 = vmatprep.subr.bf16.mxu0 %v4001_v39 }
  0x5e   : > { %3405 = vmatpush3.bf16.msra.mxu0 %v4002_v55  ;;  %v4005_v55 = vld [vmem:[%s5355_s1 + $0xb0] sm:$0xff]  }
  0x60   : > { %993 = vmatmul.mubr.bf16.gmra.mrb[28].mxu0 %v4685_v60  ;;  %3595 = vmatmul.mubr.bf16.gmra.mrb[28].mxu1 %v4691_v63 }
  0x61   : > { %1000 = vmatprep.mubr.bf16.mxu0 %v4434_v22  ;;  %1402 = vmatprep.mubr.bf16.mxu1 %v4538_v24 }
  0x68   : > { %1001 = vmatmul.mubr.bf16.gmra.mrb[32].mxu0 %v4707_v30  ;;  %1403 = vmatmul.mubr.bf16.vlgmr.msra.gmra.mrb[32].mxu1 %v4698_v36 }
  0x69   : > { %3599 = vmatpush3.bf16.msra.mxu1 %v4588_v7  ;;  %1008 = vmatprep.mubr.bf16.mxu0 %v4451_v32 }
  0x6a   : > { %1410 = vmatprep.mubr.bf16.mxu1 %v4306_v23  ;;  %3600 = vmatprep.subr.bf16.mxu1 %v3988_v57  ;;  %v5374_v23 = vshll.u32 %v4468_v43, 16 }
  0x6c   : > { %v488_v7 = vor.u32 %v5374_v23, %v485_v45 }
  0x6d   : > { %3601 = vmatpush3.bf16.msra.mxu1 %v3988_v57  ;;  %v5377_v57 = vshrl.u32 %v4510_v2, 16 }
  0x6e   : > { %3602 = vmatprep.subr.bf16.mxu1 %v3991_v53  ;;  %v4752_v34 = vsel %vm4322_vm5, 0, %v488_v7  ;;  %v5379_v7 = vshrl.u32 %v4528_v14, 16 }
  0x6f   : > { %v499_v58 = vrot.slane %v5377_v57, 7 }
  0x70   : > { %1009 = vmatmul.mubr.bf16.gmra.mrb[36].mxu0 %v4734_v13  ;;  %1411 = vmatmul.mubr.bf16.gmra.mrb[36].mxu1 %v4343_v42  ;;  %v492_v42 = vrot.slane %v5375_v19, 7  ;;  %v5380_v19 = vshll.u32 %v4528_v14, 16 }
  0x71   : > { %1016 = vmatprep.mubr.bf16.mxu0 %v4468_v43  ;;  %1418 = vmatprep.mubr.bf16.mxu1 %v4312_v26  ;;  %v502_v45 = vor.u32 %v5378_v18, %v499_v58 }
  0x72   : > { %3603 = vmatpush3.bf16.msra.mxu1 %v3991_v53  ;;  %v495_v39 = vor.u32 %v5376_v54, %v492_v42  ;;  %v4006_v53 = vld [vmem:[%s5355_s1 + $0xb8] sm:$0xff]  }
  0x73   : > { %3604 = vmatprep.subr.bf16.mxu1 %v3994_v44  ;;  %v4788_v23 = vsel %vm4322_vm5, 0, %v502_v45 }
  0x74   : > { %v4770_v10 = vsel %vm4322_vm5, 0, %v495_v39 }
  0x76   : > { %3605 = vmatpush3.bf16.msra.mxu1 %v3994_v44  ;;  %v4007_v44 = vld [vmem:[%s5355_s1 + $0x200] sm:$0xff]  }
  0x77   : > { %3606 = vmatprep.subr.bf16.mxu1 %v4003_v35 }
  0x78   : > { %1017 = vmatmul.mubr.bf16.gmra.mrb[40].mxu0 %v4752_v34  ;;  %1419 = vmatmul.mubr.bf16.gmra.mrb[40].mxu1 %v4375_v59 }
  0x79   : > { %1024 = vmatprep.mubr.bf16.mxu0 %v4498_v56  ;;  %1426 = vmatprep.mubr.bf16.mxu1 %v4332_v38 }
  0x7a   : > { %3607 = vmatpush3.bf16.msra.mxu1 %v4003_v35  ;;  %v506_v35 = vrot.slane %v5379_v7, 7 }
  0x7b   : > { %3608 = vmatprep.subr.bf16.mxu1 %v4004_v6 }
  0x7c   : > { %v509_v42 = vor.u32 %v5380_v19, %v506_v35 }
  0x7e   : > { %3609 = vmatpush3.bf16.msra.mxu1 %v4004_v6  ;;  %v4800_v6 = vsel %vm4322_vm5, 0, %v509_v42 }
  0x7f   : > { %3610 = vmatprep.subr.bf16.mxu1 %v4005_v55 }
  0x80   : > { %1025 = vmatmul.mubr.bf16.gmra.mrb[44].mxu0 %v4770_v10  ;;  %1427 = vmatmul.mubr.bf16.gmra.mrb[44].mxu1 %v4443_v28 }
  0x81   : > { %1032 = vmatprep.mubr.bf16.mxu0 %v4510_v2  ;;  %1434 = vmatprep.mubr.bf16.mxu1 %v4335_v40 }
  0x82   : > { %3611 = vmatpush3.bf16.msra.mxu1 %v4005_v55 }
  0x83   : > { %3612 = vmatprep.subr.bf16.mxu1 %v4006_v53 }
  0x86   : > { %3613 = vmatpush3.bf16.msra.mxu1 %v4006_v53 }
  0x87   : > { %3646 = vmatprep.subr.bf16.mxu1 %v4007_v44 }
  0x88   : > { %1033 = vmatmul.mubr.bf16.gmra.mrb[48].mxu0 %v4788_v23  ;;  %1435 = vmatmul.mubr.bf16.gmra.mrb[48].mxu1 %v4485_v49 }
  0x89   : > { %1040 = vmatprep.mubr.bf16.mxu0 %v4528_v14  ;;  %1442 = vmatprep.mubr.bf16.mxu1 %v4361_v52 }
  0x90   : > { %1041 = vmatmul.mubr.bf16.gmra.mrb[52].mxu0 %v4800_v6  ;;  %1443 = vmatmul.mubr.bf16.gmra.mrb[52].mxu1 %v4532_v16 }
  0x91   : > { %1048 = vmatprep.mubr.bf16.mxu0 %v4559_v47  ;;  %1450 = vmatprep.mubr.bf16.mxu1 %v4378_v61 }
  0x98   : > { %1049 = vmatmul.mubr.bf16.gmra.mrb[56].mxu0 %v4655_v20  ;;  %1451 = vmatmul.mubr.bf16.gmra.mrb[56].mxu1 %v4603_v3 }
  0x99   : > { %1056 = vmatprep.mubr.bf16.mxu0 %v4583_v21  ;;  %1458 = vmatprep.mubr.bf16.mxu1 %v4398_v5 }
  0xa0   : > { %1057 = vmatmul.mubr.bf16.gmra.mrb[60].mxu0 %v4678_v15  ;;  %1459 = vmatmul.mubr.bf16.gmra.mrb[60].mxu1 %v4632_v9 }
  0xa1   : > { %1466 = vmatprep.mubr.bf16.mxu1 %v4405_v8  ;;  %1917 = vmatprep.mubr.bf16.mxu0 %v4312_v26  ;;  %v570_v26 = vrot.slane %v409_v4, 1 }
  0xa8   : > { %1467 = vmatmul.mubr.bf16.gmra.mrb[64].mxu1 %v4685_v60  ;;  %1918 = vmatmul.mubr.bf16.vlgmr.msra.gmra.mrb[64].mxu0 %v4375_v59  ;;  %v4010_v59 = vld [vmem:[%s5355_s1 + $0x218] sm:$0xff]  }
  0xa9   : > { %1474 = vmatprep.mubr.bf16.mxu1 %v4434_v22  ;;  %1925 = vmatprep.mubr.bf16.mxu0 %v4332_v38  ;;  %v571_v38 = vor.u32 %v570_v26, %v5381_v31  ;;  %v4017_v31 = vld [vmem:[%s5357_s3 + $0x10] sm:$0xff]  }
  0xb0   : > { %1475 = vmatmul.mubr.bf16.gmra.mrb[68].mxu1 %v4707_v30  ;;  %1926 = vmatmul.mubr.bf16.gmra.mrb[68].mxu0 %v4443_v28 }
  0xb1   : > { %1482 = vmatprep.mubr.bf16.mxu1 %v4451_v32  ;;  %1933 = vmatprep.mubr.bf16.mxu0 %v4335_v40  ;;  %v4848_v40 = vsel %vm4314_vm4, %v571_v38, 0 }
  0xb8   : > { %1483 = vmatmul.mubr.bf16.gmra.mrb[72].mxu1 %v4734_v13  ;;  %1934 = vmatmul.mubr.bf16.gmra.mrb[72].mxu0 %v4485_v49  ;;  %v4014_v49 = vld [vmem:[%s5355_s1 + $0x238] sm:$0xff]  }
  0xb9   : > { %1490 = vmatprep.mubr.bf16.mxu1 %v4468_v43  ;;  %1941 = vmatprep.mubr.bf16.mxu0 %v4361_v52  ;;  %v4008_v52 = vld [vmem:[%s5355_s1 + $0x208] sm:$0xff]  }
  0xc0   : > { %1491 = vmatmul.mubr.bf16.gmra.mrb[76].mxu1 %v4752_v34  ;;  %1942 = vmatmul.mubr.bf16.gmra.mrb[76].mxu0 %v4532_v16 }
  0xc1   : > { %1498 = vmatprep.mubr.bf16.mxu1 %v4498_v56  ;;  %1949 = vmatprep.mubr.bf16.mxu0 %v4378_v61  ;;  %v4012_v61 = vld [vmem:[%s5355_s1 + $0x228] sm:$0xff]  }
  0xc8   : > { %1499 = vmatmul.mubr.bf16.gmra.mrb[80].mxu1 %v4770_v10  ;;  %1950 = vmatmul.mubr.bf16.gmra.mrb[80].mxu0 %v4603_v3 }
  0xc9   : > { %1506 = vmatprep.mubr.bf16.mxu1 %v4510_v2  ;;  %1957 = vmatprep.mubr.bf16.mxu0 %v4398_v5  ;;  %v4013_v5 = vld [vmem:[%s5355_s1 + $0x230] sm:$0xff]  }
  0xd0   : > { %1507 = vmatmul.mubr.bf16.gmra.mrb[84].mxu1 %v4788_v23  ;;  %1958 = vmatmul.mubr.bf16.gmra.mrb[84].mxu0 %v4632_v9 }
  0xd1   : > { %1514 = vmatprep.mubr.bf16.mxu1 %v4528_v14  ;;  %1965 = vmatprep.mubr.bf16.mxu0 %v4405_v8 }
  0xd8   : > { %1515 = vmatmul.mubr.bf16.gmra.mrb[88].mxu1 %v4800_v6  ;;  %1966 = vmatmul.mubr.bf16.gmra.mrb[88].mxu0 %v4685_v60 }
  0xd9   : > { %1522 = vmatprep.mubr.bf16.mxu1 %v4559_v47  ;;  %1973 = vmatprep.mubr.bf16.mxu0 %v4434_v22 }
  0xe0   : > { %1523 = vmatmul.mubr.bf16.gmra.mrb[92].mxu1 %v4655_v20  ;;  %1974 = vmatmul.mubr.bf16.gmra.mrb[92].mxu0 %v4707_v30 }
  0xe1   : > { %3614 = vmatprep.mubr.bf16.mxu1 %v4848_v40  ;;  %1981 = vmatprep.mubr.bf16.mxu0 %v4451_v32 }
  0xe8   : > { %3615 = vmatmul.mubr.bf16.vlgmr.msra.gmra.mrb[0].mxu1 %v4339_v41  ;;  %1982 = vmatmul.mubr.bf16.gmra.mrb[96].mxu0 %v4734_v13  ;;  %v4011_v41 = vld [vmem:[%s5355_s1 + $0x220] sm:$0xff]  }
  0xe9   : > { %3647 = vmatpush3.bf16.msra.mxu1 %v4007_v44  ;;  %3618 = vmatprep.mubr.bf16.mxu1 %v4358_v51 }
  0xea   : > { %1989 = vmatprep.mubr.bf16.mxu0 %v4468_v43  ;;  %3648 = vmatprep.subr.bf16.mxu1 %v4008_v52 }
  0xed   : > { %3649 = vmatpush3.bf16.msra.mxu1 %v4008_v52 }
  0xee   : > { %3650 = vmatprep.subr.bf16.mxu1 %v4009_v27 }
  0xf0   : > { %3619 = vmatmul.mubr.bf16.gmra.mrb[4].mxu1 %v4387_v0  ;;  %1990 = vmatmul.mubr.bf16.gmra.mrb[100].mxu0 %v4752_v34 }
  0xf1   : > { %3622 = vmatprep.mubr.bf16.mxu1 %v4391_v1  ;;  %1997 = vmatprep.mubr.bf16.mxu0 %v4498_v56 }
  0xf2   : > { %3651 = vmatpush3.bf16.msra.mxu1 %v4009_v27 }
  0xf3   : > { %3652 = vmatprep.subr.bf16.mxu1 %v4010_v59 }
  0xf6   : > { %3653 = vmatpush3.bf16.msra.mxu1 %v4010_v59 }
  0xf7   : > { %3654 = vmatprep.subr.bf16.mxu1 %v4011_v41 }
  0xf8   : > { %3623 = vmatmul.mubr.bf16.gmra.mrb[8].mxu1 %v4411_v11  ;;  %1998 = vmatmul.mubr.bf16.gmra.mrb[104].mxu0 %v4770_v10 }
  0xf9   : > { %3626 = vmatprep.mubr.bf16.mxu1 %v4447_v29  ;;  %2005 = vmatprep.mubr.bf16.mxu0 %v4510_v2 }
  0xfa   : > { %3655 = vmatpush3.bf16.msra.mxu1 %v4011_v41 }
  0xfb   : > { %3656 = vmatprep.subr.bf16.mxu1 %v4012_v61  ;;  %v3134_v8 = vpop.f32.mrb[0].mxu0 }
  0xfc   : > { %v3135_v22 = vpop.f32.mrb[1].mxu0 }
  0xfd   : > { %v4884_v28 = vadd.f32 %v3135_v22, %v3134_v8  ;;  %v3137_v32 = vpop.f32.mrb[2].mxu0  ;;  %v4018_v22 = vld [vmem:[%s5357_s3 + $0x18] sm:$0xff]  }
  0xfe   : > { %3657 = vmatpush3.bf16.msra.mxu1 %v4012_v61  ;;  %v3138_v43 = vpop.f32.mrb[3].mxu0 }
  0xff   : > { %3658 = vmatprep.subr.bf16.mxu1 %v4013_v5  ;;  %v4889_v56 = vadd.f32 %v3138_v43, %v3137_v32 }
 0x100   : > { %3627 = vmatmul.mubr.bf16.gmra.mrb[12].mxu1 %v4455_v33  ;;  %2006 = vmatmul.mubr.bf16.gmra.mrb[108].mxu0 %v4788_v23 }
 0x101   : > { %3630 = vmatprep.mubr.bf16.mxu1 %v4489_v50  ;;  %2013 = vmatprep.mubr.bf16.mxu0 %v4528_v14  ;;  %v4015_v14 = vld [vmem:[%s5357_s3] sm:$0xff]  }
 0x102   : > { %3659 = vmatpush3.bf16.msra.mxu1 %v4013_v5  ;;  %3694 = vmatprep.subr.bf16.mxu0 %v4015_v14 }
 0x103   : > { %3660 = vmatprep.subr.bf16.mxu1 %v4014_v49  ;;  %v3140_v2 = vpop.f32.mrb[4].mxu0  ;;  %3695 = vmatpush3.bf16.msra.mxu0 %v4015_v14 }
 0x104   : > { %v3141_v16 = vpop.f32.mrb[5].mxu0 }
 0x105   : > { %v4895_v3 = vadd.f32 %v3141_v16, %v3140_v2  ;;  %v3143_v4 = vpop.f32.mrb[6].mxu0 }
 0x106   : > { %3661 = vmatpush3.bf16.msra.mxu1 %v4014_v49  ;;  %v3144_v9 = vpop.f32.mrb[7].mxu0 }
 0x107   : > { %v4897_v60 = vadd.f32 %v3144_v9, %v3143_v4 }
 0x108   : > { %3631 = vmatmul.mubr.bf16.gmra.mrb[16].mxu1 %v4505_v62  ;;  %2014 = vmatmul.mubr.bf16.gmra.mrb[112].mxu0 %v4800_v6 }
 0x109   : > { %3634 = vmatprep.mubr.bf16.mxu1 %v4542_v25  ;;  %2021 = vmatprep.mubr.bf16.mxu0 %v4559_v47 }
 0x10b   : > { %v3146_v30 = vpop.f32.mrb[8].mxu0 }
 0x10c   : > { %v3147_v13 = vpop.f32.mrb[9].mxu0 }
 0x10d   : > { %v4906_v34 = vadd.f32 %v3147_v13, %v3146_v30  ;;  %v3149_v54 = vpop.f32.mrb[10].mxu0 }
 0x10e   : > { %v3150_v39 = vpop.f32.mrb[11].mxu0 }
 0x10f   : > { %v4908_v55 = vadd.f32 %v3150_v39, %v3149_v54 }
 0x110   : > { %3635 = vmatmul.mubr.bf16.gmra.mrb[20].mxu1 %v4554_v37  ;;  %2022 = vmatmul.mubr.bf16.gmra.mrb[116].mxu0 %v4655_v20 }
 0x111   : > { %3638 = vmatprep.mubr.bf16.mxu1 %v4607_v48  ;;  %2029 = vmatprep.mubr.bf16.mxu0 %v4583_v21  ;;  %v4016_v21 = vld [vmem:[%s5357_s3 + $0x8] sm:$0xff]  }
 0x112   : > { %3696 = vmatprep.subr.bf16.mxu0 %v4016_v21 }
 0x113   : > { %v3152_v47 = vpop.f32.mrb[12].mxu0  ;;  %3697 = vmatpush3.bf16.msra.mxu0 %v4016_v21 }
 0x114   : > { %v3153_v10 = vpop.f32.mrb[13].mxu0  ;;  %3698 = vmatprep.subr.bf16.mxu0 %v4017_v31 }
 0x115   : > { %v4914_v57 = vadd.f32 %v3153_v10, %v3152_v47  ;;  %v3155_v58 = vpop.f32.mrb[14].mxu0 }
 0x116   : > { %v3156_v53 = vpop.f32.mrb[15].mxu0 }
 0x117   : > { %v4916_v18 = vadd.f32 %v3156_v53, %v3155_v58  ;;  %3699 = vmatpush3.bf16.msra.mxu0 %v4017_v31 }
 0x118   : > { %3639 = vmatmul.mubr.bf16.gmra.mrb[24].mxu1 %v4614_v17  ;;  %2030 = vmatmul.mubr.bf16.gmra.mrb[120].mxu0 %v4678_v15 }
 0x119   : > { %3642 = vmatprep.mubr.bf16.mxu1 %v4643_v12  ;;  %2037 = vmatprep.mubr.bf16.mxu0 %v4538_v24 }
 0x11a   : > { %3700 = vmatprep.subr.bf16.mxu0 %v4018_v22 }
 0x11b   : > { %v3158_v20 = vpop.f32.mrb[16].mxu0  ;;  %3701 = vmatpush3.bf16.msra.mxu0 %v4018_v22 }
 0x11c   : > { %v3159_v45 = vpop.f32.mrb[17].mxu0 }
 0x11d   : > { %v4925_v44 = vadd.f32 %v3159_v45, %v3158_v20  ;;  %v3161_v23 = vpop.f32.mrb[18].mxu0 }
 0x11e   : > { %v3162_v7 = vpop.f32.mrb[19].mxu0 }
 0x11f   : > { %v4927_v35 = vadd.f32 %v3162_v7, %v3161_v23 }
 0x120   : > { %3643 = vmatmul.mubr.bf16.gmra.mrb[28].mxu1 %v4651_v46  ;;  %2038 = vmatmul.mubr.bf16.gmra.mrb[124].mxu0 %v4698_v36 }
 0x121   : > { %3662 = vmatprep.mubr.bf16.mxu1 %v4358_v51 }
 0x123   : > { %v3164_v24 = vpop.f32.mrb[20].mxu0 }
 0x124   : > { %v3165_v15 = vpop.f32.mrb[21].mxu0 }
 0x125   : > { %v4932_v19 = vadd.f32 %v3165_v15, %v3164_v24  ;;  %v3167_v42 = vpop.f32.mrb[22].mxu0 }
 0x126   : > { %v3168_v6 = vpop.f32.mrb[23].mxu0 }
 0x127   : > { %v4934_v26 = vadd.f32 %v3168_v6, %v3167_v42 }
 0x128   : > { %3663 = vmatmul.mubr.bf16.vlgmr.msra.gmra.mrb[0].mxu1 %v4387_v0 }
 0x129   : > { %3666 = vmatprep.mubr.bf16.mxu1 %v4391_v1 }
 0x12b   : > { %v3170_v38 = vpop.f32.mrb[24].mxu0 }
 0x12c   : > { %v3171_v36 = vpop.f32.mrb[25].mxu0 }
 0x12d   : > { %v4941_v51 = vadd.f32 %v3171_v36, %v3170_v38  ;;  %v3173_v52 = vpop.f32.mrb[26].mxu0 }
 0x12e   : > { %v3174_v27 = vpop.f32.mrb[27].mxu0 }
 0x12f   : > { %v4943_v59 = vadd.f32 %v3174_v27, %v3173_v52 }
 0x130   : > { %3667 = vmatmul.mubr.bf16.gmra.mrb[4].mxu1 %v4411_v11 }
 0x131   : > { %3670 = vmatprep.mubr.bf16.mxu1 %v4447_v29 }
 0x133   : > { %v3176_v0 = vpop.f32.mrb[28].mxu0 }
 0x134   : > { %v3177_v1 = vpop.f32.mrb[29].mxu0 }
 0x135   : > { %v4947_v41 = vadd.f32 %v3177_v1, %v3176_v0  ;;  %v3179_v61 = vpop.f32.mrb[30].mxu0 }
 0x136   : > { %v3180_v5 = vpop.f32.mrb[31].mxu0 }
 0x137   : > { %v4949_v8 = vadd.f32 %v3180_v5, %v3179_v61 }
 0x138   : > { %3671 = vmatmul.mubr.bf16.gmra.mrb[8].mxu1 %v4455_v33 }
 0x139   : > { %3674 = vmatprep.mubr.bf16.mxu1 %v4489_v50 }
 0x13b   : > { %v3270_v32 = vpop.f32.mrb[32].mxu1  ;;  %v3182_v11 = vpop.f32.mrb[32].mxu0 }
 0x13c   : > { %v3271_v29 = vpop.f32.mrb[33].mxu1  ;;  %v3183_v43 = vpop.f32.mrb[33].mxu0 }
 0x13d   : > { %v3272_v49 = vadd.f32 %v3271_v29, %v3270_v32  ;;  %v3273_v2 = vpop.f32.mrb[34].mxu1  ;;  %v4956_v16 = vadd.f32 %v3183_v43, %v3182_v11  ;;  %v3185_v4 = vpop.f32.mrb[34].mxu0 }
 0x13e   : > { %v3274_v9 = vpop.f32.mrb[35].mxu1  ;;  %v3186_v14 = vpop.f32.mrb[35].mxu0 }
 0x13f   : > { %v4959_v33 = vadd.f32 %v3272_v49, %v4884_v28  ;;  %v3275_v50 = vadd.f32 %v3274_v9, %v3273_v2  ;;  %v4961_v30 = vadd.f32 %v3186_v14, %v3185_v4 }
 0x140   : > { %3675 = vmatmul.mubr.bf16.gmra.mrb[12].mxu1 %v4505_v62 }
 0x141   : > { %v4965_v13 = vadd.f32 %v3275_v50, %v4889_v56  ;;  %3678 = vmatprep.mubr.bf16.mxu1 %v4542_v25  ;;  %v4019_v25 = vld [vmem:[%s5357_s3 + $0x20] sm:$0xff]  }
 0x142   : > { %3702 = vmatprep.subr.bf16.mxu0 %v4019_v25 }
 0x143   : > { %v3276_v54 = vpop.f32.mrb[36].mxu1  ;;  %v3188_v39 = vpop.f32.mrb[36].mxu0  ;;  %3703 = vmatpush3.bf16.msra.mxu0 %v4019_v25 }
 0x144   : > { %v3277_v47 = vpop.f32.mrb[37].mxu1  ;;  %v3189_v10 = vpop.f32.mrb[37].mxu0 }
 0x145   : > { %v3278_v58 = vadd.f32 %v3277_v47, %v3276_v54  ;;  %v3279_v53 = vpop.f32.mrb[38].mxu1  ;;  %v4968_v21 = vadd.f32 %v3189_v10, %v3188_v39  ;;  %v3191_v28 = vpop.f32.mrb[38].mxu0 }
 0x146   : > { %v3280_v20 = vpop.f32.mrb[39].mxu1  ;;  %v3192_v45 = vpop.f32.mrb[39].mxu0 }
 0x147   : > { %v4971_v23 = vadd.f32 %v3278_v58, %v4895_v3  ;;  %v3281_v62 = vadd.f32 %v3280_v20, %v3279_v53  ;;  %v4973_v7 = vadd.f32 %v3192_v45, %v3191_v28 }
 0x148   : > { %3679 = vmatmul.mubr.bf16.gmra.mrb[16].mxu1 %v4554_v37 }
 0x149   : > { %v4980_v56 = vadd.f32 %v3281_v62, %v4897_v60  ;;  %3682 = vmatprep.mubr.bf16.mxu1 %v4607_v48 }
 0x14b   : > { %v3282_v24 = vpop.f32.mrb[40].mxu1  ;;  %v3194_v15 = vpop.f32.mrb[40].mxu0 }
 0x14c   : > { %v3283_v3 = vpop.f32.mrb[41].mxu1  ;;  %v3195_v42 = vpop.f32.mrb[41].mxu0 }
 0x14d   : > { %v3284_v6 = vadd.f32 %v3283_v3, %v3282_v24  ;;  %v3285_v31 = vpop.f32.mrb[42].mxu1  ;;  %v4983_v38 = vadd.f32 %v3195_v42, %v3194_v15  ;;  %v3197_v36 = vpop.f32.mrb[42].mxu0 }
 0x14e   : > { %v3286_v52 = vpop.f32.mrb[43].mxu1  ;;  %v3198_v27 = vpop.f32.mrb[43].mxu0 }
 0x14f   : > { %v4986_v37 = vadd.f32 %v3284_v6, %v4906_v34  ;;  %v3287_v60 = vadd.f32 %v3286_v52, %v3285_v31  ;;  %v4988_v0 = vadd.f32 %v3198_v27, %v3197_v36 }
 0x150   : > { %3683 = vmatmul.mubr.bf16.gmra.mrb[20].mxu1 %v4614_v17 }
 0x151   : > { %v4992_v48 = vadd.f32 %v3287_v60, %v4908_v55  ;;  %3686 = vmatprep.mubr.bf16.mxu1 %v4643_v12  ;;  %v4020_v12 = vld [vmem:[%s5357_s3 + $0x28] sm:$0xff]  }
 0x152   : > { %3704 = vmatprep.subr.bf16.mxu0 %v4020_v12 }
 0x153   : > { %v3288_v1 = vpop.f32.mrb[44].mxu1  ;;  %v3200_v61 = vpop.f32.mrb[44].mxu0  ;;  %3705 = vmatpush3.bf16.msra.mxu0 %v4020_v12 }
 0x154   : > { %v3289_v5 = vpop.f32.mrb[45].mxu1  ;;  %v3201_v22 = vpop.f32.mrb[45].mxu0 }
 0x155   : > { %v3290_v32 = vadd.f32 %v3289_v5, %v3288_v1  ;;  %v3291_v11 = vpop.f32.mrb[46].mxu1  ;;  %v4995_v29 = vadd.f32 %v3201_v22, %v3200_v61  ;;  %v3203_v34 = vpop.f32.mrb[46].mxu0 }
 0x156   : > { %v3292_v43 = vpop.f32.mrb[47].mxu1  ;;  %v3204_v49 = vpop.f32.mrb[47].mxu0 }
 0x157   : > { %v4998_v2 = vadd.f32 %v3290_v32, %v4914_v57  ;;  %v3293_v17 = vadd.f32 %v3292_v43, %v3291_v11  ;;  %v5000_v4 = vadd.f32 %v3204_v49, %v3203_v34 }
 0x158   : > { %3687 = vmatmul.mubr.bf16.gmra.mrb[24].mxu1 %v4651_v46 }
 0x159   : > { %v5007_v55 = vadd.f32 %v3293_v17, %v4916_v18  ;;  %3690 = vmatprep.mubr.bf16.mxu1 %v4691_v63 }
 0x15b   : > { %v3294_v9 = vpop.f32.mrb[48].mxu1  ;;  %v3206_v14 = vpop.f32.mrb[48].mxu0 }
 0x15c   : > { %v3295_v57 = vpop.f32.mrb[49].mxu1  ;;  %v3207_v50 = vpop.f32.mrb[49].mxu0 }
 0x15d   : > { %v3296_v54 = vadd.f32 %v3295_v57, %v3294_v9  ;;  %v3297_v39 = vpop.f32.mrb[50].mxu1  ;;  %v5010_v47 = vadd.f32 %v3207_v50, %v3206_v14  ;;  %v3209_v10 = vpop.f32.mrb[50].mxu0 }
 0x15e   : > { %v3298_v58 = vpop.f32.mrb[51].mxu1  ;;  %v3210_v53 = vpop.f32.mrb[51].mxu0 }
 0x15f   : > { %v5013_v46 = vadd.f32 %v3296_v54, %v4925_v44  ;;  %v3299_v18 = vadd.f32 %v3298_v58, %v3297_v39  ;;  %v5015_v28 = vadd.f32 %v3210_v53, %v3209_v10 }
 0x160   : > { %3691 = vmatmul.mubr.bf16.gmra.mrb[28].mxu1 %v4848_v40  ;;  %v4021_v40 = vld [vmem:[%s5357_s3 + $0x30] sm:$0xff]  }
 0x161   : > { %v5019_v63 = vadd.f32 %v3299_v18, %v4927_v35  ;;  %3706 = vmatprep.subr.bf16.mxu0 %v4021_v40 }
 0x162   : > { %3707 = vmatpush3.bf16.msra.mxu0 %v4021_v40 }
 0x163   : > { %v3300_v20 = vpop.f32.mrb[52].mxu1  ;;  %v3212_v45 = vpop.f32.mrb[52].mxu0 }
 0x164   : > { %v3301_v62 = vpop.f32.mrb[53].mxu1  ;;  %v3213_v25 = vpop.f32.mrb[53].mxu0 }
 0x165   : > { %v3302_v24 = vadd.f32 %v3301_v62, %v3300_v20  ;;  %v3303_v15 = vpop.f32.mrb[54].mxu1  ;;  %v5021_v3 = vadd.f32 %v3213_v25, %v3212_v45  ;;  %v3215_v42 = vpop.f32.mrb[54].mxu0 }
 0x166   : > { %v3304_v6 = vpop.f32.mrb[55].mxu1  ;;  %v3216_v44 = vpop.f32.mrb[55].mxu0 }
 0x167   : > { %v5024_v31 = vadd.f32 %v3302_v24, %v4932_v19  ;;  %v3305_v36 = vadd.f32 %v3304_v6, %v3303_v15  ;;  %v5026_v52 = vadd.f32 %v3216_v44, %v3215_v42 }
 0x169   : > { %v5032_v35 = vadd.f32 %v3305_v36, %v4934_v26 }
 0x16b   : > { %v3306_v27 = vpop.f32.mrb[56].mxu1  ;;  %v3218_v60 = vpop.f32.mrb[56].mxu0 }
 0x16c   : > { %v3307_v1 = vpop.f32.mrb[57].mxu1  ;;  %v3219_v61 = vpop.f32.mrb[57].mxu0 }
 0x16d   : > { %v3308_v5 = vadd.f32 %v3307_v1, %v3306_v27  ;;  %v3309_v22 = vpop.f32.mrb[58].mxu1  ;;  %v5034_v19 = vadd.f32 %v3219_v61, %v3218_v60  ;;  %v3221_v32 = vpop.f32.mrb[58].mxu0 }
 0x16e   : > { %v3310_v11 = vpop.f32.mrb[59].mxu1  ;;  %v3222_v34 = vpop.f32.mrb[59].mxu0 }
 0x16f   : > { %v5037_v43 = vadd.f32 %v3308_v5, %v4941_v51  ;;  %v3311_v49 = vadd.f32 %v3310_v11, %v3309_v22  ;;  %v5039_v17 = vadd.f32 %v3222_v34, %v3221_v32 }
 0x171   : > { %v5042_v26 = vadd.f32 %v3311_v49, %v4943_v59  ;;  %v4022_v59 = vld [vmem:[%s5357_s3 + $0x38] sm:$0xff]  }
 0x172   : > { %3708 = vmatprep.subr.bf16.mxu0 %v4022_v59 }
 0x173   : > { %v3312_v12 = vpop.f32.mrb[60].mxu1  ;;  %v3224_v9 = vpop.f32.mrb[60].mxu0  ;;  %3709 = vmatpush3.bf16.msra.mxu0 %v4022_v59 }
 0x174   : > { %v3313_v14 = vpop.f32.mrb[61].mxu1  ;;  %v3225_v57 = vpop.f32.mrb[61].mxu0 }
 0x175   : > { %v3314_v50 = vadd.f32 %v3313_v14, %v3312_v12  ;;  %v3315_v54 = vpop.f32.mrb[62].mxu1  ;;  %v5044_v39 = vadd.f32 %v3225_v57, %v3224_v9  ;;  %v3227_v10 = vpop.f32.mrb[62].mxu0 }
 0x176   : > { %v3316_v58 = vpop.f32.mrb[63].mxu1  ;;  %v3228_v53 = vpop.f32.mrb[63].mxu0 }
 0x177   : > { %v5047_v51 = vadd.f32 %v3314_v50, %v4947_v41  ;;  %v3317_v18 = vadd.f32 %v3316_v58, %v3315_v54  ;;  %v5049_v20 = vadd.f32 %v3228_v53, %v3227_v10 }
 0x179   : > { %v5055_v45 = vadd.f32 %v3317_v18, %v4949_v8 }
 0x17b   : > { %v3318_v62 = vpop.f32.mrb[64].mxu1  ;;  %v3406_v25 = vpop.f32.mrb[64].mxu0 }
 0x17c   : > { %v3319_v24 = vpop.f32.mrb[65].mxu1  ;;  %v3407_v15 = vpop.f32.mrb[65].mxu0 }
 0x17d   : > { %v3320_v42 = vadd.f32 %v3319_v24, %v3318_v62  ;;  %v3408_v6 = vadd.f32 %v3407_v15, %v3406_v25  ;;  %v3321_v41 = vpop.f32.mrb[66].mxu1  ;;  %v3409_v44 = vpop.f32.mrb[66].mxu0 }
 0x17e   : > { %v3322_v36 = vpop.f32.mrb[67].mxu1  ;;  %v3410_v40 = vpop.f32.mrb[67].mxu0 }
 0x17f   : > { %v5058_v27 = vadd.f32 %v3320_v42, %v4956_v16  ;;  %v3323_v60 = vadd.f32 %v3322_v36, %v3321_v41  ;;  %v3411_v1 = vadd.f32 %v3410_v40, %v3409_v44  ;;  %v5061_v8 = vadd.f32 %v4959_v33, %v3408_v6 }
 0x181   : > { %v5064_v61 = vadd.f32 %v3323_v60, %v4961_v30  ;;  %v5067_v5 = vadd.f32 %v4965_v13, %v3411_v1 }
 0x183   : > { %v3324_v22 = vpop.f32.mrb[68].mxu1  ;;  %v3412_v32 = vpop.f32.mrb[68].mxu0 }
 0x184   : > { %v3325_v11 = vpop.f32.mrb[69].mxu1  ;;  %v3413_v34 = vpop.f32.mrb[69].mxu0 }
 0x185   : > { %v3326_v49 = vadd.f32 %v3325_v11, %v3324_v22  ;;  %v3414_v12 = vadd.f32 %v3413_v34, %v3412_v32  ;;  %v3327_v9 = vpop.f32.mrb[70].mxu1  ;;  %v3415_v16 = vpop.f32.mrb[70].mxu0 }
 0x186   : > { %v3328_v14 = vpop.f32.mrb[71].mxu1  ;;  %v3416_v57 = vpop.f32.mrb[71].mxu0 }
 0x187   : > { %v5070_v50 = vadd.f32 %v3326_v49, %v4968_v21  ;;  %v3329_v33 = vadd.f32 %v3328_v14, %v3327_v9  ;;  %v3417_v54 = vadd.f32 %v3416_v57, %v3415_v16  ;;  %v5073_v30 = vadd.f32 %v4971_v23, %v3414_v12 }
 0x189   : > { %v5076_v13 = vadd.f32 %v3329_v33, %v4973_v7  ;;  %v5079_v10 = vadd.f32 %v4980_v56, %v3417_v54 }
 0x18b   : > { %v3330_v58 = vpop.f32.mrb[72].mxu1  ;;  %v3418_v53 = vpop.f32.mrb[72].mxu0 }
 0x18c   : > { %v3331_v18 = vpop.f32.mrb[73].mxu1  ;;  %v3419_v59 = vpop.f32.mrb[73].mxu0 }
 0x18d   : > { %v3332_v62 = vadd.f32 %v3331_v18, %v3330_v58  ;;  %v3420_v25 = vadd.f32 %v3419_v59, %v3418_v53  ;;  %v3333_v24 = vpop.f32.mrb[74].mxu1  ;;  %v3421_v21 = vpop.f32.mrb[74].mxu0 }
 0x18e   : > { %v3334_v15 = vpop.f32.mrb[75].mxu1  ;;  %v3422_v42 = vpop.f32.mrb[75].mxu0 }
 0x18f   : > { %v5082_v6 = vadd.f32 %v3332_v62, %v4983_v38  ;;  %v3335_v23 = vadd.f32 %v3334_v15, %v3333_v24  ;;  %v3423_v41 = vadd.f32 %v3422_v42, %v3421_v21  ;;  %v5085_v7 = vadd.f32 %v4986_v37, %v3420_v25 }
 0x191   : > { %v5088_v56 = vadd.f32 %v3335_v23, %v4988_v0  ;;  %v5091_v44 = vadd.f32 %v4992_v48, %v3423_v41 }
 0x193   : > { %v3336_v36 = vpop.f32.mrb[76].mxu1  ;;  %v3424_v40 = vpop.f32.mrb[76].mxu0 }
 0x194   : > { %v3337_v60 = vpop.f32.mrb[77].mxu1  ;;  %v3425_v1 = vpop.f32.mrb[77].mxu0 }
 0x195   : > { %v3338_v22 = vadd.f32 %v3337_v60, %v3336_v36  ;;  %v3426_v32 = vadd.f32 %v3425_v1, %v3424_v40  ;;  %v3339_v11 = vpop.f32.mrb[78].mxu1  ;;  %v3427_v38 = vpop.f32.mrb[78].mxu0 }
 0x196   : > { %v3340_v34 = vpop.f32.mrb[79].mxu1  ;;  %v3428_v49 = vpop.f32.mrb[79].mxu0 }
 0x197   : > { %v5094_v12 = vadd.f32 %v3338_v22, %v4995_v29  ;;  %v3341_v37 = vadd.f32 %v3340_v34, %v3339_v11  ;;  %v3429_v9 = vadd.f32 %v3428_v49, %v3427_v38  ;;  %v5097_v0 = vadd.f32 %v4998_v2, %v3426_v32 }
 0x199   : > { %v5100_v48 = vadd.f32 %v3341_v37, %v5000_v4  ;;  %v5103_v16 = vadd.f32 %v5007_v55, %v3429_v9 }
 0x19b   : > { %v3342_v14 = vpop.f32.mrb[80].mxu1  ;;  %v3430_v57 = vpop.f32.mrb[80].mxu0 }
 0x19c   : > { %v3343_v33 = vpop.f32.mrb[81].mxu1  ;;  %v3431_v54 = vpop.f32.mrb[81].mxu0 }
 0x19d   : > { %v3344_v58 = vadd.f32 %v3343_v33, %v3342_v14  ;;  %v3432_v53 = vadd.f32 %v3431_v54, %v3430_v57  ;;  %v3345_v18 = vpop.f32.mrb[82].mxu1  ;;  %v3433_v29 = vpop.f32.mrb[82].mxu0 }
 0x19e   : > { %v3346_v59 = vpop.f32.mrb[83].mxu1  ;;  %v3434_v62 = vpop.f32.mrb[83].mxu0 }
 0x19f   : > { %v5106_v25 = vadd.f32 %v3344_v58, %v5010_v47  ;;  %v3347_v2 = vadd.f32 %v3346_v59, %v3345_v18  ;;  %v3435_v24 = vadd.f32 %v3434_v62, %v3433_v29  ;;  %v5109_v4 = vadd.f32 %v5013_v46, %v3432_v53 }
 0x1a1   : > { %v5112_v55 = vadd.f32 %v3347_v2, %v5015_v28  ;;  %v5115_v21 = vadd.f32 %v5019_v63, %v3435_v24 }
 0x1a3   : > { %v3348_v15 = vpop.f32.mrb[84].mxu1  ;;  %v3436_v42 = vpop.f32.mrb[84].mxu0 }
 0x1a4   : > { %v3349_v23 = vpop.f32.mrb[85].mxu1  ;;  %v3437_v41 = vpop.f32.mrb[85].mxu0 }
 0x1a5   : > { %v3350_v36 = vadd.f32 %v3349_v23, %v3348_v15  ;;  %v3438_v40 = vadd.f32 %v3437_v41, %v3436_v42  ;;  %v3351_v60 = vpop.f32.mrb[86].mxu1  ;;  %v3439_v47 = vpop.f32.mrb[86].mxu0 }
 0x1a6   : > { %v3352_v1 = vpop.f32.mrb[87].mxu1  ;;  %v3440_v22 = vpop.f32.mrb[87].mxu0 }
 0x1a7   : > { %v5118_v32 = vadd.f32 %v3350_v36, %v5021_v3  ;;  %v3353_v46 = vadd.f32 %v3352_v1, %v3351_v60  ;;  %v3441_v11 = vadd.f32 %v3440_v22, %v3439_v47  ;;  %v5121_v28 = vadd.f32 %v5024_v31, %v3438_v40 }
 0x1a9   : > { %v5124_v63 = vadd.f32 %v3353_v46, %v5026_v52  ;;  %v5127_v38 = vadd.f32 %v5032_v35, %v3441_v11 }
 0x1ab   : > { %v3354_v34 = vpop.f32.mrb[88].mxu1  ;;  %v3442_v49 = vpop.f32.mrb[88].mxu0 }
 0x1ac   : > { %v3355_v37 = vpop.f32.mrb[89].mxu1  ;;  %v3443_v9 = vpop.f32.mrb[89].mxu0 }
 0x1ad   : > { %v3356_v14 = vadd.f32 %v3355_v37, %v3354_v34  ;;  %v3444_v57 = vadd.f32 %v3443_v9, %v3442_v49  ;;  %v3357_v33 = vpop.f32.mrb[90].mxu1  ;;  %v3445_v3 = vpop.f32.mrb[90].mxu0 }
 0x1ae   : > { %v3358_v54 = vpop.f32.mrb[91].mxu1  ;;  %v3446_v58 = vpop.f32.mrb[91].mxu0 }
 0x1af   : > { %v5130_v53 = vadd.f32 %v3356_v14, %v5034_v19  ;;  %v3359_v31 = vadd.f32 %v3358_v54, %v3357_v33  ;;  %v3447_v18 = vadd.f32 %v3446_v58, %v3445_v3  ;;  %v5133_v52 = vadd.f32 %v5037_v43, %v3444_v57 }
 0x1b1   : > { %v5136_v35 = vadd.f32 %v3359_v31, %v5039_v17  ;;  %v5139_v29 = vadd.f32 %v5042_v26, %v3447_v18 }
 0x1b3   : > { %v3360_v59 = vpop.f32.mrb[92].mxu1  ;;  %v3448_v62 = vpop.f32.mrb[92].mxu0 }
 0x1b4   : > { %v3361_v2 = vpop.f32.mrb[93].mxu1  ;;  %v3449_v24 = vpop.f32.mrb[93].mxu0 }
 0x1b5   : > { %v3362_v15 = vadd.f32 %v3361_v2, %v3360_v59  ;;  %v3450_v42 = vadd.f32 %v3449_v24, %v3448_v62  ;;  %v3363_v23 = vpop.f32.mrb[94].mxu1  ;;  %v3451_v19 = vpop.f32.mrb[94].mxu0 }
 0x1b6   : > { %v3364_v41 = vpop.f32.mrb[95].mxu1  ;;  %v3452_v36 = vpop.f32.mrb[95].mxu0 }
 0x1b7   : > { %v5142_v40 = vadd.f32 %v3362_v15, %v5044_v39  ;;  %v3365_v43 = vadd.f32 %v3364_v41, %v3363_v23  ;;  %v3453_v60 = vadd.f32 %v3452_v36, %v3451_v19  ;;  %v5145_v17 = vadd.f32 %v5047_v51, %v3450_v42 }
 0x1b9   : > { %v5148_v26 = vadd.f32 %v3365_v43, %v5049_v20  ;;  %v5151_v47 = vadd.f32 %v5055_v45, %v3453_v60 }
 0x1bb   : > { %v3454_v1 = vpop.f32.mrb[96].mxu0 }
 0x1bc   : > { %v3455_v22 = vpop.f32.mrb[97].mxu0 }
 0x1bd   : > { %v3456_v46 = vadd.f32 %v3455_v22, %v3454_v1  ;;  %v3457_v11 = vpop.f32.mrb[98].mxu0 }
 0x1be   : > { %v3458_v34 = vpop.f32.mrb[99].mxu0 }
 0x1bf   : > { %v3459_v49 = vadd.f32 %v3458_v34, %v3457_v11  ;;  %v5154_v39 = vadd.f32 %v5058_v27, %v3456_v46 }
 0x1c1   : > { %v5157_v37 = vadd.f32 %v5064_v61, %v3459_v49 }
 0x1c3   : > { %v3460_v51 = vpop.f32.mrb[100].mxu0 }
 0x1c4   : > { %v3461_v9 = vpop.f32.mrb[101].mxu0 }
 0x1c5   : > { %v3462_v14 = vadd.f32 %v3461_v9, %v3460_v51  ;;  %v3463_v20 = vpop.f32.mrb[102].mxu0 }
 0x1c6   : > { %v3464_v57 = vpop.f32.mrb[103].mxu0 }
 0x1c7   : > { %v3465_v33 = vadd.f32 %v3464_v57, %v3463_v20  ;;  %v5160_v45 = vadd.f32 %v5070_v50, %v3462_v14 }
 0x1c9   : > { %v5163_v3 = vadd.f32 %v5076_v13, %v3465_v33 }
 0x1cb   : > { %v3466_v54 = vpop.f32.mrb[104].mxu0 }
 0x1cc   : > { %v3467_v58 = vpop.f32.mrb[105].mxu0 }
 0x1cd   : > { %v3468_v31 = vadd.f32 %v3467_v58, %v3466_v54  ;;  %v3469_v27 = vpop.f32.mrb[106].mxu0 }
 0x1ce   : > { %v3470_v18 = vpop.f32.mrb[107].mxu0 }
 0x1cf   : > { %v3471_v59 = vadd.f32 %v3470_v18, %v3469_v27  ;;  %v5166_v61 = vadd.f32 %v5082_v6, %v3468_v31 }
 0x1d1   : > { %v5169_v62 = vadd.f32 %v5088_v56, %v3471_v59 }
 0x1d3   : > { %v3472_v2 = vpop.f32.mrb[108].mxu0 }
 0x1d4   : > { %v3473_v24 = vpop.f32.mrb[109].mxu0 }
 0x1d5   : > { %v3474_v15 = vadd.f32 %v3473_v24, %v3472_v2  ;;  %v3475_v50 = vpop.f32.mrb[110].mxu0 }
 0x1d6   : > { %v3476_v42 = vpop.f32.mrb[111].mxu0 }
 0x1d7   : > { %v3477_v23 = vadd.f32 %v3476_v42, %v3475_v50  ;;  %v5172_v13 = vadd.f32 %v5094_v12, %v3474_v15 }
 0x1d9   : > { %v5175_v19 = vadd.f32 %v5100_v48, %v3477_v23 }
 0x1db   : > { %v3478_v41 = vpop.f32.mrb[112].mxu0 }
 0x1dc   : > { %v3479_v36 = vpop.f32.mrb[113].mxu0 }
 0x1dd   : > { %v3480_v43 = vadd.f32 %v3479_v36, %v3478_v41  ;;  %v3481_v6 = vpop.f32.mrb[114].mxu0 }
 0x1de   : > { %v3482_v60 = vpop.f32.mrb[115].mxu0 }
 0x1df   : > { %v3483_v1 = vadd.f32 %v3482_v60, %v3481_v6  ;;  %v5178_v56 = vadd.f32 %v5106_v25, %v3480_v43 }
 0x1e1   : > { %v5181_v22 = vadd.f32 %v5112_v55, %v3483_v1 }
 0x1e3   : > { %v3484_v46 = vpop.f32.mrb[116].mxu0 }
 0x1e4   : > { %v3485_v11 = vpop.f32.mrb[117].mxu0 }
 0x1e5   : > { %v3486_v34 = vadd.f32 %v3485_v11, %v3484_v46  ;;  %v3487_v12 = vpop.f32.mrb[118].mxu0 }
 0x1e6   : > { %v3488_v49 = vpop.f32.mrb[119].mxu0 }
 0x1e7   : > { %v3489_v51 = vadd.f32 %v3488_v49, %v3487_v12  ;;  %v5184_v48 = vadd.f32 %v5118_v32, %v3486_v34 }
 0x1e9   : > { %v5187_v9 = vadd.f32 %v5124_v63, %v3489_v51 }
 0x1eb   : > { %v3490_v14 = vpop.f32.mrb[120].mxu0 }
 0x1ec   : > { %v3491_v20 = vpop.f32.mrb[121].mxu0 }
 0x1ed   : > { %v3492_v57 = vadd.f32 %v3491_v20, %v3490_v14  ;;  %v3493_v25 = vpop.f32.mrb[122].mxu0 }
 0x1ee   : > { %v3494_v33 = vpop.f32.mrb[123].mxu0 }
 0x1ef   : > { %v3495_v54 = vadd.f32 %v3494_v33, %v3493_v25  ;;  %v5190_v55 = vadd.f32 %v5130_v53, %v3492_v57  ;;  %v5204_v53 = vld [vmem:[%s5356_s2] ss:$0 sm:$0xff] }
 0x1f1   : > { %v5193_v58 = vadd.f32 %v5136_v35, %v3495_v54 }
 0x1f3   : > { %v3496_v31 = vpop.f32.mrb[124].mxu0 }
 0x1f4   : > { %v3497_v27 = vpop.f32.mrb[125].mxu0 }
 0x1f5   : > { %v3498_v18 = vadd.f32 %v3497_v27, %v3496_v31  ;;  %v3499_v32 = vpop.f32.mrb[126].mxu0 }
 0x1f6   : > { %v3500_v59 = vpop.f32.mrb[127].mxu0 }
 0x1f7   : > { %v3501_v2 = vadd.f32 %v3500_v59, %v3499_v32  ;;  %v5196_v63 = vadd.f32 %v5142_v40, %v3498_v18 }
 0x1f9   : > { %v5199_v24 = vadd.f32 %v5148_v26, %v3501_v2 }
 0x1fb   : > { %v3664_v15 = vpop.f32.mrb[0].mxu1 }
 0x1fc   : > { %v3744_v35 = vadd.f32 %v5073_v30, %v3664_v15  ;;  %v2080_v50 = vpop.f32.mrb[1].mxu1 }
 0x1fd   : > { %v3747_v42 = vadd.f32 %v5061_v8, %v2080_v50  ;;  %v3665_v23 = vpop.f32.mrb[2].mxu1 }
 0x1fe   : > { %v2248_v41 = vadd.f32 %v3744_v35, %v5204_v53  ;;  %v3750_v40 = vadd.f32 %v5079_v10, %v3665_v23  ;;  %v2083_v36 = vpop.f32.mrb[3].mxu1 }
 0x1ff   : > { %v2246_v26 = vadd.f32 %v3747_v42, %v5204_v53  ;;  %v3753_v43 = vadd.f32 %v5067_v5, %v2083_v36 }
 0x200   : > { %v2249_v6 = vadd.f32 %v3750_v40, %v5204_v53  ;;  %v2280_v1 = vmax.f32 %v2248_v41, 0.0 }
 0x201   : > { %v2247_v60 = vadd.f32 %v3753_v43, %v5204_v53  ;;  %v2278_v30 = vmax.f32 %v2246_v26, 0.0 }
 0x202   : > { %v2281_v46 = vmax.f32 %v2249_v6, 0.0 }
 0x203   : > { %v2279_v11 = vmax.f32 %v2247_v60, 0.0  ;;  %v3668_v34 = vpop.f32.mrb[4].mxu1 }
 0x204   : > { %v2311_v8 = vpack.c.bf16 %v2281_v46, %v2280_v1  ;;  %v3756_v12 = vadd.f32 %v5097_v0, %v3668_v34  ;;  %v2096_v49 = vpop.f32.mrb[5].mxu1 }
 0x205   : > { %v3759_v10 = vadd.f32 %v5085_v7, %v2096_v49  ;;  %v3669_v51 = vpop.f32.mrb[6].mxu1  ;;  %v2310_v14 = vpack.c.bf16 %v2279_v11, %v2278_v30 }
 0x206   : > { %v2252_v20 = vadd.f32 %v3756_v12, %v5204_v53  ;;  %v3762_v5 = vadd.f32 %v5103_v16, %v3669_v51  ;;  %v2099_v57 = vpop.f32.mrb[7].mxu1 }
 0x207   : > { %v2250_v25 = vadd.f32 %v3759_v10, %v5204_v53  ;;  %v3765_v33 = vadd.f32 %v5091_v44, %v2099_v57  ;;  %3710 = vmatprep.mubr.bf16.mxu0 %v2310_v14 }
 0x208   : > { %v2253_v54 = vadd.f32 %v3762_v5, %v5204_v53  ;;  %3711 = vmatmul.mubr.bf16.vlgmr.msra.gmra.mrb[128].mxu0 %v2311_v8  ;;  %v2284_v31 = vmax.f32 %v2252_v20, 0.0 }
 0x209   : > { %v2251_v0 = vadd.f32 %v3765_v33, %v5204_v53  ;;  %v2282_v7 = vmax.f32 %v2250_v25, 0.0 }
 0x20a   : > { %v2285_v27 = vmax.f32 %v2253_v54, 0.0 }
 0x20b   : > { %v2283_v18 = vmax.f32 %v2251_v0, 0.0  ;;  %v3672_v32 = vpop.f32.mrb[8].mxu1 }
 0x20c   : > { %v3768_v59 = vadd.f32 %v5121_v28, %v3672_v32  ;;  %v2112_v2 = vpop.f32.mrb[9].mxu1  ;;  %v2313_v16 = vpack.c.bf16 %v2285_v27, %v2284_v31 }
 0x20d   : > { %v3771_v15 = vadd.f32 %v5109_v4, %v2112_v2  ;;  %v3673_v35 = vpop.f32.mrb[10].mxu1  ;;  %v2312_v50 = vpack.c.bf16 %v2283_v18, %v2282_v7 }
 0x20e   : > { %v2256_v44 = vadd.f32 %v3768_v59, %v5204_v53  ;;  %v3774_v42 = vadd.f32 %v5127_v38, %v3673_v35  ;;  %v2115_v23 = vpop.f32.mrb[11].mxu1 }
 0x20f   : > { %v2254_v41 = vadd.f32 %v3771_v15, %v5204_v53  ;;  %v3777_v40 = vadd.f32 %v5115_v21, %v2115_v23  ;;  %3714 = vmatprep.mubr.bf16.mxu0 %v2312_v50 }
 0x210   : > { %v2257_v36 = vadd.f32 %v3774_v42, %v5204_v53  ;;  %3715 = vmatmul.mubr.bf16.gmra.mrb[132].mxu0 %v2313_v16  ;;  %v2288_v26 = vmax.f32 %v2256_v44, 0.0 }
 0x211   : > { %v2255_v28 = vadd.f32 %v3777_v40, %v5204_v53  ;;  %v2286_v4 = vmax.f32 %v2254_v41, 0.0 }
 0x212   : > { %v2289_v43 = vmax.f32 %v2257_v36, 0.0 }
 0x213   : > { %v2287_v6 = vmax.f32 %v2255_v28, 0.0  ;;  %v3676_v60 = vpop.f32.mrb[12].mxu1 }
 0x214   : > { %v3780_v1 = vadd.f32 %v5145_v17, %v3676_v60  ;;  %v2128_v46 = vpop.f32.mrb[13].mxu1  ;;  %v2315_v38 = vpack.c.bf16 %v2289_v43, %v2288_v26 }
 0x215   : > { %v3783_v30 = vadd.f32 %v5133_v52, %v2128_v46  ;;  %v3677_v11 = vpop.f32.mrb[14].mxu1  ;;  %v2314_v34 = vpack.c.bf16 %v2287_v6, %v2286_v4 }
 0x216   : > { %v2260_v21 = vadd.f32 %v3780_v1, %v5204_v53  ;;  %v3786_v8 = vadd.f32 %v5151_v47, %v3677_v11  ;;  %v2131_v12 = vpop.f32.mrb[15].mxu1 }
 0x217   : > { %v2258_v49 = vadd.f32 %v3783_v30, %v5204_v53  ;;  %v3789_v10 = vadd.f32 %v5139_v29, %v2131_v12  ;;  %3718 = vmatprep.mubr.bf16.mxu0 %v2314_v34 }
 0x218   : > { %v2261_v51 = vadd.f32 %v3786_v8, %v5204_v53  ;;  %3719 = vmatmul.mubr.bf16.gmra.mrb[136].mxu0 %v2315_v38  ;;  %v2292_v14 = vmax.f32 %v2260_v21, 0.0 }
 0x219   : > { %v2259_v17 = vadd.f32 %v3789_v10, %v5204_v53  ;;  %v2290_v52 = vmax.f32 %v2258_v49, 0.0 }
 0x21a   : > { %v2293_v20 = vmax.f32 %v2261_v51, 0.0 }
 0x21b   : > { %v2291_v5 = vmax.f32 %v2259_v17, 0.0  ;;  %v3680_v57 = vpop.f32.mrb[16].mxu1 }
 0x21c   : > { %v3792_v25 = vadd.f32 %v5160_v45, %v3680_v57  ;;  %v2144_v33 = vpop.f32.mrb[17].mxu1  ;;  %v2317_v47 = vpack.c.bf16 %v2293_v20, %v2292_v14 }
 0x21d   : > { %v3795_v54 = vadd.f32 %v5154_v39, %v2144_v33  ;;  %v3681_v0 = vpop.f32.mrb[18].mxu1  ;;  %v2316_v31 = vpack.c.bf16 %v2291_v5, %v2290_v52 }
 0x21e   : > { %v2264_v29 = vadd.f32 %v3792_v25, %v5204_v53  ;;  %v3798_v27 = vadd.f32 %v5163_v3, %v3681_v0  ;;  %v2147_v7 = vpop.f32.mrb[19].mxu1 }
 0x21f   : > { %v2262_v18 = vadd.f32 %v3795_v54, %v5204_v53  ;;  %v3801_v32 = vadd.f32 %v5157_v37, %v2147_v7  ;;  %3722 = vmatprep.mubr.bf16.mxu0 %v2316_v31 }
 0x220   : > { %v2265_v59 = vadd.f32 %v3798_v27, %v5204_v53  ;;  %3723 = vmatmul.mubr.bf16.gmra.mrb[140].mxu0 %v2317_v47  ;;  %v2296_v2 = vmax.f32 %v2264_v29, 0.0 }
 0x221   : > { %v2263_v45 = vadd.f32 %v3801_v32, %v5204_v53  ;;  %v2294_v39 = vmax.f32 %v2262_v18, 0.0 }
 0x222   : > { %v2297_v16 = vmax.f32 %v2265_v59, 0.0 }
 0x223   : > { %v2295_v15 = vmax.f32 %v2263_v45, 0.0  ;;  %v3684_v35 = vpop.f32.mrb[20].mxu1 }
 0x224   : > { %v3804_v50 = vadd.f32 %v5172_v13, %v3684_v35  ;;  %v2160_v44 = vpop.f32.mrb[21].mxu1  ;;  %v2319_v3 = vpack.c.bf16 %v2297_v16, %v2296_v2 }
 0x225   : > { %v3807_v42 = vadd.f32 %v5166_v61, %v2160_v44  ;;  %v3685_v23 = vpop.f32.mrb[22].mxu1  ;;  %v2318_v41 = vpack.c.bf16 %v2295_v15, %v2294_v39 }
 0x226   : > { %v2268_v37 = vadd.f32 %v3804_v50, %v5204_v53  ;;  %v3810_v40 = vadd.f32 %v5175_v19, %v3685_v23  ;;  %v2163_v36 = vpop.f32.mrb[23].mxu1 }
 0x227   : > { %v2266_v28 = vadd.f32 %v3807_v42, %v5204_v53  ;;  %v3813_v26 = vadd.f32 %v5169_v62, %v2163_v36  ;;  %3726 = vmatprep.mubr.bf16.mxu0 %v2318_v41 }
 0x228   : > { %v2269_v43 = vadd.f32 %v3810_v40, %v5204_v53  ;;  %3727 = vmatmul.mubr.bf16.gmra.mrb[144].mxu0 %v2319_v3  ;;  %v2300_v4 = vmax.f32 %v2268_v37, 0.0 }
 0x229   : > { %v2267_v13 = vadd.f32 %v3813_v26, %v5204_v53  ;;  %v2298_v61 = vmax.f32 %v2266_v28, 0.0 }
 0x22a   : > { %v2301_v6 = vmax.f32 %v2269_v43, 0.0 }
 0x22b   : > { %v2299_v60 = vmax.f32 %v2267_v13, 0.0  ;;  %v3688_v1 = vpop.f32.mrb[24].mxu1 }
 0x22c   : > { %v3816_v46 = vadd.f32 %v5184_v48, %v3688_v1  ;;  %v2176_v38 = vpop.f32.mrb[25].mxu1  ;;  %v2321_v19 = vpack.c.bf16 %v2301_v6, %v2300_v4 }
 0x22d   : > { %v3819_v30 = vadd.f32 %v5178_v56, %v2176_v38  ;;  %v3689_v11 = vpop.f32.mrb[26].mxu1  ;;  %v2320_v34 = vpack.c.bf16 %v2299_v60, %v2298_v61 }
 0x22e   : > { %v2272_v62 = vadd.f32 %v3816_v46, %v5204_v53  ;;  %v3822_v21 = vadd.f32 %v5187_v9, %v3689_v11  ;;  %v2179_v8 = vpop.f32.mrb[27].mxu1 }
 0x22f   : > { %v2270_v12 = vadd.f32 %v3819_v30, %v5204_v53  ;;  %v3825_v49 = vadd.f32 %v5181_v22, %v2179_v8  ;;  %3730 = vmatprep.mubr.bf16.mxu0 %v2320_v34 }
 0x230   : > { %v2273_v10 = vadd.f32 %v3822_v21, %v5204_v53  ;;  %3731 = vmatmul.mubr.bf16.gmra.mrb[148].mxu0 %v2321_v19  ;;  %v2304_v51 = vmax.f32 %v2272_v62, 0.0 }
 0x231   : > { %v2271_v48 = vadd.f32 %v3825_v49, %v5204_v53  ;;  %v2302_v56 = vmax.f32 %v2270_v12, 0.0 }
 0x232   : > { %v2305_v17 = vmax.f32 %v2273_v10, 0.0 }
 0x233   : > { %v2303_v14 = vmax.f32 %v2271_v48, 0.0  ;;  %v3692_v20 = vpop.f32.mrb[28].mxu1 }
 0x234   : > { %v3828_v52 = vadd.f32 %v5196_v63, %v3692_v20  ;;  %v2192_v5 = vpop.f32.mrb[29].mxu1  ;;  %v2323_v9 = vpack.c.bf16 %v2305_v17, %v2304_v51 }
 0x235   : > { %v3831_v57 = vadd.f32 %v5190_v55, %v2192_v5  ;;  %v3693_v25 = vpop.f32.mrb[30].mxu1  ;;  %v2322_v33 = vpack.c.bf16 %v2303_v14, %v2302_v56 }
 0x236   : > { %v2276_v22 = vadd.f32 %v3828_v52, %v5204_v53  ;;  %v3834_v47 = vadd.f32 %v5199_v24, %v3693_v25  ;;  %v2195_v54 = vpop.f32.mrb[31].mxu1  ;;  %v5273_v24 = vld [vmem:[%s5358_s4] ss:$0 sm:$0xff] }
 0x237   : > { %v2274_v0 = vadd.f32 %v3831_v57, %v5204_v53  ;;  %v3837_v31 = vadd.f32 %v5193_v58, %v2195_v54  ;;  %3734 = vmatprep.mubr.bf16.mxu0 %v2322_v33 }
 0x238   : > { %v2277_v29 = vadd.f32 %v3834_v47, %v5204_v53  ;;  %3735 = vmatmul.mubr.bf16.gmra.mrb[152].mxu0 %v2323_v9  ;;  %v2308_v27 = vmax.f32 %v2276_v22, 0.0 }
 0x239   : > { %v2275_v63 = vadd.f32 %v3837_v31, %v5204_v53  ;;  %v2306_v55 = vmax.f32 %v2274_v0, 0.0 }
 0x23a   : > { %v2309_v7 = vmax.f32 %v2277_v29, 0.0 }
 0x23b   : > { %v2307_v18 = vmax.f32 %v2275_v63, 0.0 }
 0x23c   : > { %v2325_v32 = vpack.c.bf16 %v2309_v7, %v2308_v27 }
 0x23d   : > { %v2324_v59 = vpack.c.bf16 %v2307_v18, %v2306_v55 }
 0x23f   : > { %3738 = vmatprep.mubr.bf16.mxu0 %v2324_v59 }
 0x240   : > { %3739 = vmatmul.mubr.bf16.gmra.mrb[156].mxu0 %v2325_v32 }
 0x2db   : > { %v3712_v58 = vpop.f32.mrb[128].mxu0 }
 0x2dc   : > { %v2440_v45 = vadd.f32 %v3712_v58, %v5273_v24  ;;  %v2431_v2 = vpop.f32.mrb[129].mxu0 }
 0x2dd   : > { %v2432_v16 = vadd.f32 %v5273_v24, %v2431_v2  ;;  %v3713_v53 = vpop.f32.mrb[130].mxu0 }
 0x2de   : > { %v3084_v39 = vmul.f32 -1.442695, %v2440_v45  ;;  %v2443_v15 = vadd.f32 %v3713_v53, %v5273_v24  ;;  %v2434_v35 = vpop.f32.mrb[131].mxu0 }
 0x2df   : > { %v3082_v50 = vmul.f32 -1.442695, %v2432_v16  ;;  %v2435_v44 = vadd.f32 %v5273_v24, %v2434_v35 }
 0x2e0   : > { %4023 = vpow2.f32 %v3084_v39  ;;  %v3085_v3 = vmul.f32 -1.442695, %v2443_v15 }
 0x2e1   : > { %4025 = vpow2.f32 %v3082_v50  ;;  %v3083_v42 = vmul.f32 -1.442695, %v2435_v44 }
 0x2e2   : > { %4027 = vpow2.f32 %v3085_v3 }
 0x2e3   : > { %4029 = vpow2.f32 %v3083_v42  ;;  %v3716_v23 = vpop.f32.mrb[132].mxu0 }
 0x2e4   : > { %v2456_v41 = vadd.f32 %v3716_v23, %v5273_v24  ;;  %v2447_v37 = vpop.f32.mrb[133].mxu0 }
 0x2e5   : > { %v2448_v40 = vadd.f32 %v5273_v24, %v2447_v37  ;;  %v3717_v36 = vpop.f32.mrb[134].mxu0 }
 0x2e6   : > { %v3088_v28 = vmul.f32 -1.442695, %v2456_v41  ;;  %v2459_v26 = vadd.f32 %v3717_v36, %v5273_v24  ;;  %v2450_v43 = vpop.f32.mrb[135].mxu0 }
 0x2e7   : > { %v3086_v13 = vmul.f32 -1.442695, %v2448_v40  ;;  %v2451_v4 = vadd.f32 %v5273_v24, %v2450_v43 }
 0x2e8   : > { %4031 = vpow2.f32 %v3088_v28  ;;  %v3089_v6 = vmul.f32 -1.442695, %v2459_v26 }
 0x2e9   : > { %4033 = vpow2.f32 %v3086_v13  ;;  %v3087_v61 = vmul.f32 -1.442695, %v2451_v4 }
 0x2ea   : > { %v4024_v60 = vpop.eup %4023  ;;  %4035 = vpow2.f32 %v3089_v6 }
 0x2eb   : > { %v4026_v1 = vpop.eup %4025  ;;  %v2656_v46 = vadd.f32 1.0, %v4024_v60  ;;  %4037 = vpow2.f32 %v3087_v61  ;;  %v3720_v38 = vpop.f32.mrb[136].mxu0 }
 0x2ec   : > { %v4028_v19 = vpop.eup %4027  ;;  %v2654_v30 = vadd.f32 1.0, %v4026_v1  ;;  %v2472_v11 = vadd.f32 %v3720_v38, %v5273_v24  ;;  %v2463_v34 = vpop.f32.mrb[137].mxu0 }
 0x2ed   : > { %v4030_v62 = vpop.eup %4029  ;;  %4039 = vrcp.f32 %v2656_v46  ;;  %v2657_v21 = vadd.f32 1.0, %v4028_v19  ;;  %v2464_v8 = vadd.f32 %v5273_v24, %v2463_v34  ;;  %v3721_v12 = vpop.f32.mrb[138].mxu0 }
 0x2ee   : > { %4041 = vrcp.f32 %v2654_v30  ;;  %v2655_v49 = vadd.f32 1.0, %v4030_v62  ;;  %v3092_v10 = vmul.f32 -1.442695, %v2472_v11  ;;  %v2475_v48 = vadd.f32 %v3721_v12, %v5273_v24  ;;  %v2466_v51 = vpop.f32.mrb[139].mxu0 }
 0x2ef   : > { %4043 = vrcp.f32 %v2657_v21  ;;  %v3090_v17 = vmul.f32 -1.442695, %v2464_v8  ;;  %v2467_v56 = vadd.f32 %v5273_v24, %v2466_v51 }
 0x2f0   : > { %4045 = vrcp.f32 %v2655_v49  ;;  %v3093_v14 = vmul.f32 -1.442695, %v2475_v48 }
 0x2f1   : > { %4047 = vpow2.f32 %v3092_v10  ;;  %v3091_v20 = vmul.f32 -1.442695, %v2467_v56 }
 0x2f2   : > { %v4032_v52 = vpop.eup %4031  ;;  %4049 = vpow2.f32 %v3090_v17 }
 0x2f3   : > { %v4034_v5 = vpop.eup %4033  ;;  %v2660_v9 = vadd.f32 1.0, %v4032_v52  ;;  %4051 = vpow2.f32 %v3093_v14  ;;  %v3724_v57 = vpop.f32.mrb[140].mxu0 }
 0x2f4   : > { %v4036_v25 = vpop.eup %4035  ;;  %v2658_v33 = vadd.f32 1.0, %v4034_v5  ;;  %4053 = vpow2.f32 %v3091_v20  ;;  %v2488_v22 = vadd.f32 %v3724_v57, %v5273_v24  ;;  %v2479_v47 = vpop.f32.mrb[141].mxu0 }
 0x2f5   : > { %v4038_v54 = vpop.eup %4037  ;;  %4055 = vrcp.f32 %v2660_v9  ;;  %v2661_v0 = vadd.f32 1.0, %v4036_v25  ;;  %v2480_v31 = vadd.f32 %v5273_v24, %v2479_v47  ;;  %v3725_v29 = vpop.f32.mrb[142].mxu0 }
 0x2f6   : > { %4057 = vrcp.f32 %v2658_v33  ;;  %v2659_v63 = vadd.f32 1.0, %v4038_v54  ;;  %v3096_v27 = vmul.f32 -1.442695, %v2488_v22  ;;  %v2491_v7 = vadd.f32 %v3725_v29, %v5273_v24  ;;  %v2482_v55 = vpop.f32.mrb[143].mxu0 }
 0x2f7   : > { %v4040_v18 = vpop.eup %4039  ;;  %4059 = vrcp.f32 %v2661_v0  ;;  %v3094_v32 = vmul.f32 -1.442695, %v2480_v31  ;;  %v2483_v59 = vadd.f32 %v5273_v24, %v2482_v55 }
 0x2f8   : > { %v4042_v58 = vpop.eup %4041  ;;  %2752 = vst [vmem:[%s5292_s27 + $0x10] sm:$0xff] %v4040_v18  ;;  %4061 = vrcp.f32 %v2659_v63  ;;  %v3097_v45 = vmul.f32 -1.442695, %v2491_v7 }
 0x2f9   : > { %v4044_v2 = vpop.eup %4043  ;;  %2750 = vst [vmem:[%s5292_s27] sm:$0xff] %v4042_v58  ;;  %4063 = vpow2.f32 %v3096_v27  ;;  %v3095_v16 = vmul.f32 -1.442695, %v2483_v59 }
 0x2fa   : > { %v4046_v53 = vpop.eup %4045  ;;  %2753 = vst [vmem:[%s5292_s27 + $0x18] sm:$0xff] %v4044_v2  ;;  %4065 = vpow2.f32 %v3094_v32 }
 0x2fb   : > { %v4048_v39 = vpop.eup %4047  ;;  %2751 = vst [vmem:[%s5292_s27 + $0x8] sm:$0xff] %v4046_v53  ;;  %4067 = vpow2.f32 %v3097_v45  ;;  %v3728_v15 = vpop.f32.mrb[144].mxu0 }
 0x2fc   : > { %v4050_v35 = vpop.eup %4049  ;;  %v2664_v50 = vadd.f32 1.0, %v4048_v39  ;;  %4069 = vpow2.f32 %v3095_v16  ;;  %v2504_v44 = vadd.f32 %v3728_v15, %v5273_v24  ;;  %v2495_v3 = vpop.f32.mrb[145].mxu0 }
 0x2fd   : > { %v4052_v42 = vpop.eup %4051  ;;  %v2662_v23 = vadd.f32 1.0, %v4050_v35  ;;  %v2496_v41 = vadd.f32 %v5273_v24, %v2495_v3  ;;  %v3729_v37 = vpop.f32.mrb[146].mxu0 }
 0x2fe   : > { %v4054_v40 = vpop.eup %4053  ;;  %4071 = vrcp.f32 %v2664_v50  ;;  %v2665_v36 = vadd.f32 1.0, %v4052_v42  ;;  %v3100_v28 = vmul.f32 -1.442695, %v2504_v44  ;;  %v2507_v26 = vadd.f32 %v3729_v37, %v5273_v24  ;;  %v2498_v43 = vpop.f32.mrb[147].mxu0 }
 0x2ff   : > { %v4056_v13 = vpop.eup %4055  ;;  %4073 = vrcp.f32 %v2662_v23  ;;  %v2663_v4 = vadd.f32 1.0, %v4054_v40  ;;  %v3098_v6 = vmul.f32 -1.442695, %v2496_v41  ;;  %v2499_v61 = vadd.f32 %v5273_v24, %v2498_v43 }
 0x300   : > { %v4058_v60 = vpop.eup %4057  ;;  %2756 = vst [vmem:[%s5292_s27 + $0x30] sm:$0xff] %v4056_v13  ;;  %4075 = vrcp.f32 %v2665_v36  ;;  %v3101_v1 = vmul.f32 -1.442695, %v2507_v26 }
 0x301   : > { %v4060_v46 = vpop.eup %4059  ;;  %2754 = vst [vmem:[%s5292_s27 + $0x20] sm:$0xff] %v4058_v60  ;;  %4077 = vrcp.f32 %v2663_v4  ;;  %v3099_v38 = vmul.f32 -1.442695, %v2499_v61 }
 0x302   : > { %v4062_v19 = vpop.eup %4061  ;;  %2757 = vst [vmem:[%s5292_s27 + $0x38] sm:$0xff] %v4060_v46  ;;  %4079 = vpow2.f32 %v3100_v28 }
 0x303   : > { %v4064_v30 = vpop.eup %4063  ;;  %2755 = vst [vmem:[%s5292_s27 + $0x28] sm:$0xff] %v4062_v19  ;;  %4081 = vpow2.f32 %v3098_v6  ;;  %v3732_v11 = vpop.f32.mrb[148].mxu0 }
 0x304   : > { %v4066_v34 = vpop.eup %4065  ;;  %v2668_v62 = vadd.f32 1.0, %v4064_v30  ;;  %4083 = vpow2.f32 %v3101_v1  ;;  %v2520_v21 = vadd.f32 %v3732_v11, %v5273_v24  ;;  %v2511_v8 = vpop.f32.mrb[149].mxu0 }
 0x305   : > { %v4068_v12 = vpop.eup %4067  ;;  %v2666_v49 = vadd.f32 1.0, %v4066_v34  ;;  %4085 = vpow2.f32 %v3099_v38  ;;  %v2512_v10 = vadd.f32 %v5273_v24, %v2511_v8  ;;  %v3733_v48 = vpop.f32.mrb[150].mxu0 }
 0x306   : > { %v4070_v51 = vpop.eup %4069  ;;  %4087 = vrcp.f32 %v2668_v62  ;;  %v2669_v17 = vadd.f32 1.0, %v4068_v12  ;;  %v3104_v56 = vmul.f32 -1.442695, %v2520_v21  ;;  %v2523_v14 = vadd.f32 %v3733_v48, %v5273_v24  ;;  %v2514_v20 = vpop.f32.mrb[151].mxu0 }
 0x307   : > { %4089 = vrcp.f32 %v2666_v49  ;;  %v2667_v52 = vadd.f32 1.0, %v4070_v51  ;;  %v3102_v5 = vmul.f32 -1.442695, %v2512_v10  ;;  %v2515_v9 = vadd.f32 %v5273_v24, %v2514_v20 }
 0x308   : > { %v4072_v57 = vpop.eup %4071  ;;  %4091 = vrcp.f32 %v2669_v17  ;;  %v3105_v25 = vmul.f32 -1.442695, %v2523_v14 }
 0x309   : > { %v4074_v33 = vpop.eup %4073  ;;  %2760 = vst [vmem:[%s5292_s27 + $0x50] sm:$0xff] %v4072_v57  ;;  %4093 = vrcp.f32 %v2667_v52  ;;  %v3103_v22 = vmul.f32 -1.442695, %v2515_v9 }
 0x30a   : > { %v4076_v47 = vpop.eup %4075  ;;  %2758 = vst [vmem:[%s5292_s27 + $0x40] sm:$0xff] %v4074_v33  ;;  %4095 = vpow2.f32 %v3104_v56 }
 0x30b   : > { %v4078_v54 = vpop.eup %4077  ;;  %2761 = vst [vmem:[%s5292_s27 + $0x58] sm:$0xff] %v4076_v47  ;;  %4097 = vpow2.f32 %v3102_v5  ;;  %v3736_v0 = vpop.f32.mrb[152].mxu0 }
 0x30c   : > { %v4080_v31 = vpop.eup %4079  ;;  %2759 = vst [vmem:[%s5292_s27 + $0x48] sm:$0xff] %v4078_v54  ;;  %4099 = vpow2.f32 %v3105_v25  ;;  %v2536_v29 = vadd.f32 %v3736_v0, %v5273_v24  ;;  %v2527_v63 = vpop.f32.mrb[153].mxu0 }
 0x30d   : > { %v4082_v27 = vpop.eup %4081  ;;  %v2672_v7 = vadd.f32 1.0, %v4080_v31  ;;  %4101 = vpow2.f32 %v3103_v22  ;;  %v2528_v55 = vadd.f32 %v5273_v24, %v2527_v63  ;;  %v3737_v18 = vpop.f32.mrb[154].mxu0 }
 0x30e   : > { %v4084_v32 = vpop.eup %4083  ;;  %v2670_v59 = vadd.f32 1.0, %v4082_v27  ;;  %v2539_v58 = vadd.f32 %v3737_v18, %v5273_v24  ;;  %v2530_v45 = vpop.f32.mrb[155].mxu0  ;;  %v3108_v53 = vmul.f32 -1.442695, %v2536_v29 }
 0x30f   : > { %v4086_v2 = vpop.eup %4085  ;;  %4103 = vrcp.f32 %v2672_v7  ;;  %v2673_v16 = vadd.f32 1.0, %v4084_v32  ;;  %v2531_v39 = vadd.f32 %v5273_v24, %v2530_v45  ;;  %v3106_v50 = vmul.f32 -1.442695, %v2528_v55 }
 0x310   : > { %v4088_v15 = vpop.eup %4087  ;;  %4105 = vrcp.f32 %v2670_v59  ;;  %v2671_v35 = vadd.f32 1.0, %v4086_v2  ;;  %v3109_v3 = vmul.f32 -1.442695, %v2539_v58 }
 0x311   : > { %v4090_v44 = vpop.eup %4089  ;;  %2764 = vst [vmem:[%s5292_s27 + $0x70] sm:$0xff] %v4088_v15  ;;  %4107 = vrcp.f32 %v2673_v16  ;;  %v3107_v23 = vmul.f32 -1.442695, %v2531_v39 }
 0x312   : > { %v4092_v42 = vpop.eup %4091  ;;  %2762 = vst [vmem:[%s5292_s27 + $0x60] sm:$0xff] %v4090_v44  ;;  %4109 = vrcp.f32 %v2671_v35 }
 0x313   : > { %v4094_v41 = vpop.eup %4093  ;;  %2765 = vst [vmem:[%s5292_s27 + $0x78] sm:$0xff] %v4092_v42  ;;  %4111 = vpow2.f32 %v3108_v53  ;;  %v3740_v37 = vpop.f32.mrb[156].mxu0 }
 0x314   : > { %v4096_v40 = vpop.eup %4095  ;;  %2763 = vst [vmem:[%s5292_s27 + $0x68] sm:$0xff] %v4094_v41  ;;  %4113 = vpow2.f32 %v3106_v50  ;;  %v2552_v36 = vadd.f32 %v3740_v37, %v5273_v24  ;;  %v2543_v28 = vpop.f32.mrb[157].mxu0 }
 0x315   : > { %v4098_v26 = vpop.eup %4097  ;;  %v2676_v43 = vadd.f32 1.0, %v4096_v40  ;;  %4115 = vpow2.f32 %v3109_v3  ;;  %v2544_v13 = vadd.f32 %v5273_v24, %v2543_v28  ;;  %v3741_v4 = vpop.f32.mrb[158].mxu0 }
 0x316   : > { %v4100_v6 = vpop.eup %4099  ;;  %v2674_v61 = vadd.f32 1.0, %v4098_v26  ;;  %4117 = vpow2.f32 %v3107_v23  ;;  %v2555_v60 = vadd.f32 %v3741_v4, %v5273_v24  ;;  %v2546_v1 = vpop.f32.mrb[159].mxu0  ;;  %v3112_v19 = vmul.f32 -1.442695, %v2552_v36 }
 0x317   : > { %v4102_v46 = vpop.eup %4101  ;;  %4119 = vrcp.f32 %v2676_v43  ;;  %v2677_v38 = vadd.f32 1.0, %v4100_v6  ;;  %v2547_v30 = vadd.f32 %v5273_v24, %v2546_v1  ;;  %v3110_v34 = vmul.f32 -1.442695, %v2544_v13 }
 0x318   : > { %4121 = vrcp.f32 %v2674_v61  ;;  %v2675_v11 = vadd.f32 1.0, %v4102_v46  ;;  %v3113_v21 = vmul.f32 -1.442695, %v2555_v60 }
 0x319   : > { %v4104_v62 = vpop.eup %4103  ;;  %4123 = vrcp.f32 %v2677_v38  ;;  %v3111_v12 = vmul.f32 -1.442695, %v2547_v30 }
 0x31a   : > { %v4106_v8 = vpop.eup %4105  ;;  %2768 = vst [vmem:[%s5292_s27 + $0x90] sm:$0xff] %v4104_v62  ;;  %4125 = vrcp.f32 %v2675_v11 }
 0x31b   : > { %v4108_v49 = vpop.eup %4107  ;;  %2766 = vst [vmem:[%s5292_s27 + $0x80] sm:$0xff] %v4106_v8  ;;  %4127 = vpow2.f32 %v3112_v19 }
 0x31c   : > { %v4110_v10 = vpop.eup %4109  ;;  %2769 = vst [vmem:[%s5292_s27 + $0x98] sm:$0xff] %v4108_v49  ;;  %4129 = vpow2.f32 %v3110_v34 }
 0x31d   : > { %v4112_v48 = vpop.eup %4111  ;;  %2767 = vst [vmem:[%s5292_s27 + $0x88] sm:$0xff] %v4110_v10  ;;  %4131 = vpow2.f32 %v3113_v21 }
 0x31e   : > { %v4114_v24 = vpop.eup %4113  ;;  %v2680_v51 = vadd.f32 1.0, %v4112_v48  ;;  %4133 = vpow2.f32 %v3111_v12 }
 0x31f   : > { %v4116_v17 = vpop.eup %4115  ;;  %v2678_v56 = vadd.f32 1.0, %v4114_v24 }
 0x320   : > { %v4118_v14 = vpop.eup %4117  ;;  %4135 = vrcp.f32 %v2680_v51  ;;  %v2681_v20 = vadd.f32 1.0, %v4116_v17 }
 0x321   : > { %v4120_v52 = vpop.eup %4119  ;;  %4137 = vrcp.f32 %v2678_v56  ;;  %v2679_v5 = vadd.f32 1.0, %v4118_v14 }
 0x322   : > { %v4122_v9 = vpop.eup %4121  ;;  %2772 = vst [vmem:[%s5292_s27 + $0xb0] sm:$0xff] %v4120_v52  ;;  %4139 = vrcp.f32 %v2681_v20 }
 0x323   : > { %v4124_v57 = vpop.eup %4123  ;;  %2770 = vst [vmem:[%s5292_s27 + $0xa0] sm:$0xff] %v4122_v9  ;;  %4141 = vrcp.f32 %v2679_v5 }
 0x324   : > { %v4126_v25 = vpop.eup %4125  ;;  %2773 = vst [vmem:[%s5292_s27 + $0xb8] sm:$0xff] %v4124_v57 }
 0x325   : > { %v4128_v33 = vpop.eup %4127  ;;  %2771 = vst [vmem:[%s5292_s27 + $0xa8] sm:$0xff] %v4126_v25 }
 0x326   : > { %v4130_v22 = vpop.eup %4129  ;;  %v2684_v47 = vadd.f32 1.0, %v4128_v33 }
 0x327   : > { %v4132_v54 = vpop.eup %4131  ;;  %v2682_v0 = vadd.f32 1.0, %v4130_v22 }
 0x328   : > { %v4134_v31 = vpop.eup %4133  ;;  %4143 = vrcp.f32 %v2684_v47  ;;  %v2685_v29 = vadd.f32 1.0, %v4132_v54 }
 0x329   : > { %4145 = vrcp.f32 %v2682_v0  ;;  %v2683_v63 = vadd.f32 1.0, %v4134_v31 }
 0x32a   : > { %v4136_v27 = vpop.eup %4135  ;;  %4147 = vrcp.f32 %v2685_v29 }
 0x32b   : > { %v4138_v7 = vpop.eup %4137  ;;  %2776 = vst [vmem:[%s5292_s27 + $0xd0] sm:$0xff] %v4136_v27  ;;  %4149 = vrcp.f32 %v2683_v63 }
 0x32c   : > { %v4140_v55 = vpop.eup %4139  ;;  %2774 = vst [vmem:[%s5292_s27 + $0xc0] sm:$0xff] %v4138_v7 }
 0x32d   : > { %v4142_v18 = vpop.eup %4141  ;;  %2777 = vst [vmem:[%s5292_s27 + $0xd8] sm:$0xff] %v4140_v55 }
 0x32e   : > { %2775 = vst [vmem:[%s5292_s27 + $0xc8] sm:$0xff] %v4142_v18 }
 0x332   : > { %v4144_v32 = vpop.eup %4143 }
 0x333   : > { %v4146_v59 = vpop.eup %4145  ;;  %2780 = vst [vmem:[%s5292_s27 + $0xf0] sm:$0xff] %v4144_v32 }
 0x334   : > { %v4148_v58 = vpop.eup %4147  ;;  %2778 = vst [vmem:[%s5292_s27 + $0xe0] sm:$0xff] %v4146_v59 }
 0x335   : > { %v4150_v45 = vpop.eup %4149  ;;  %2781 = vst [vmem:[%s5292_s27 + $0xf8] sm:$0xff] %v4148_v58 }
 0x336   : > { %2779 = vst [vmem:[%s5292_s27 + $0xe8] sm:$0xff] %v4150_v45 }
 0x337 PF: > { %s15_s20 = sadd.s32 1, %s4173_s20   ;;  %s5382_s18 = smov %s4169_s19 }
 0x338   : > { %p12_p5 = scmp.ge.s32.totalorder %s15_s20, 4   ;;  %s5383_s19 = smov %s5385_s21 }
 0x33a   :  { %14 = sbr.rel (!%p12_p5) target bundleno = 2 (0x2), region = 75 }

</bundles_post_ra>
